<compile_context>
chip_gen: v7x
topology: tpu7x:2x2x1
jax: 0.10.0
libtpu: 0.0.40
codegen_flags: <defaults>
</compile_context>

<pallas_src>
import math
import numpy as np
import jax
import jax.numpy as jnp
from jax import lax
from jax.experimental import pallas as pl
from jax.experimental.pallas import tpu as pltpu

# ---------------- scaled-down DAC hyper-parameters ----------------
ENC_DIM = 4
STRIDES = (2, 4)
DILATIONS = (1, 3, 9)
LATENT_DIM = ENC_DIM * (2 ** len(STRIDES))     # 16
N_CODEBOOKS = 9
CODEBOOK_SIZE = 32
CODEBOOK_DIM = 8
HOP_LENGTH = int(np.prod(STRIDES))             # 8
SAMPLE_RATE = 44100

VMEM_LIMIT = 32 * 1024 * 1024                  # safe on v5e/v6e (128 MiB) and v7x (64 MiB)
MAX_TILE_N = 4096                              # lane tile upper bound (review: 2048-8192)


def _round_up(n, m):
    return ((n + m - 1) // m) * m


def _choose_tile(n):
    """Lane tile: multiple of 128, <= MAX_TILE_N, split into >=2 grid steps when possible
    (keeps both v7x TensorCores busy via the 'parallel' grid axis)."""
    npad = _round_up(max(n, 1), 128)
    if npad > MAX_TILE_N:
        return MAX_TILE_N
    if npad >= 256:
        return _round_up((npad + 1) // 2, 128)
    return npad


def _snake_cols(alpha, c_pad=None):
    """(C,) alpha -> ((Cp,1) alpha, (Cp,1) 1/(alpha+eps)); channel padding uses 1.0."""
    a = alpha.astype(jnp.float32)
    if c_pad is not None and c_pad != a.shape[0]:
        a = jnp.pad(a, (0, c_pad - a.shape[0]), constant_values=1.0)
    a = a.reshape(-1, 1)
    return a, 1.0 / (a + 1e-9)


# ---------------- Pallas kernel: stride-1 "same" conv, per-batch, in-kernel taps ----------------
def _make_tap_conv_kernel(K, cin_is_one):
    def kernel(x_ref, w_ref, b_ref, o_ref):
        x = x_ref[0]                                      # (Cin, Tp)
        Cout, T = o_ref.shape[1], o_ref.shape[2]
        acc = jnp.zeros((Cout, T), jnp.float32)
        for k in range(K):                                # K shifted taps (in-kernel im2col)
            xk = x[:, k:k + T]
            wk = w_ref[k]                                 # (Cout, Cin)
            if cin_is_one:
                acc = acc + wk * xk                       # (Cout,1)*(1,T) broadcast (VPU)
            else:
                acc = acc + jnp.dot(wk, xk, preferred_element_type=jnp.float32)
        o_ref[0] = acc + b_ref[...]
    return kernel


def tap_conv(x, p, padding):
    """Stride-1 / dilation-1 conv.  x:(B,Cin,T) -> (B,Cout,T_out); grid over batch."""
    B, Cin, T = x.shape
    Cout, _, K = p["w"].shape
    xp = jnp.pad(x.astype(jnp.float32), ((0, 0), (0, 0), (padding, padding)))
    Tp = T + 2 * padding
    T_out = Tp - (K - 1)
    w = jnp.transpose(p["w"], (2, 0, 1)).astype(jnp.float32)      # (K, Cout, Cin)
    b = p["b"].reshape(Cout, 1).astype(jnp.float32)
    return pl.pallas_call(
        _make_tap_conv_kernel(K, Cin == 1),
        out_shape=jax.ShapeDtypeStruct((B, Cout, T_out), jnp.float32),
        grid=(B,),
        in_specs=[
            pl.BlockSpec((1, Cin, Tp), lambda b_: (b_, 0, 0)),
            pl.BlockSpec((K, Cout, Cin), lambda b_: (0, 0, 0)),
            pl.BlockSpec((Cout, 1), lambda b_: (0, 0)),
        ],
        out_specs=pl.BlockSpec((1, Cout, T_out), lambda b_: (b_, 0, 0)),
        compiler_params=pltpu.CompilerParams(
            dimension_semantics=("parallel",), vmem_limit_bytes=VMEM_LIMIT),
    )(xp, w, b)


# ---------------- Pallas kernel: fully fused ResidualUnit (Snake/conv7/Snake/conv1/skip) ----------------
def _make_resunit_kernel(K, dil, post_snake):
    halo = ((K - 1) * dil) // 2

    def kernel(x_ref, w1_ref, b1_ref, a1_ref, ia1_ref,
               w2_ref, b2_ref, a2_ref, ia2_ref, *rest):
        xs_ref = rest[-1]                                 # VMEM scratch (C, Tp)
        o_ref = rest[-2]
        C, T = o_ref.shape[1], o_ref.shape[2]
        x = x_ref[0]                                      # (C, Tp) raw (un-snaked) haloed input
        a1, ia1 = a1_ref[...], ia1_ref[...]
        s1 = jnp.sin(a1 * x)
        xs_ref[...] = x + ia1 * s1 * s1                   # Snake1 ONCE on the un-expanded input
        acc = jnp.zeros((C, T), jnp.float32)
        for k in range(K):                                # dilated conv: K window loads from VMEM
            acc = acc + jnp.dot(w1_ref[k], xs_ref[:, k * dil:k * dil + T],
                                preferred_element_type=jnp.float32)
        y = acc + b1_ref[...]
        s2 = jnp.sin(a2_ref[...] * y)                     # Snake2 fused
        ys = y + ia2_ref[...] * s2 * s2
        y2 = jnp.dot(w2_ref[...], ys, preferred_element_type=jnp.float32) + b2_ref[...]
        out = x[:, halo:halo + T] + y2                    # skip-add fused
        if post_snake:                                    # next (block-level) Snake fused as epilogue
            pa, pia = rest[0][...], rest[1][...]
            s3 = jnp.sin(pa * out)
            out = out + pia * s3 * s3
        o_ref[0] = out

    return kernel


def residual_unit(x, ru, dil, post_alpha=None):
    """Fused DAC ResidualUnit on x:(B,C,T); optional trailing Snake(post_alpha) epilogue."""
    B, C, T = x.shape
    K = ru["conv1"]["w"].shape[2]
    halo = ((K - 1) * dil) // 2
    Cp = _round_up(C, 8)                                  # pad channels to 8 (aligned MXU/sublane)
    xp = jnp.pad(x.astype(jnp.float32), ((0, 0), (0, Cp - C), (halo, halo)))
    Tp = T + 2 * halo

    w1 = jnp.transpose(ru["conv1"]["w"], (2, 0, 1)).astype(jnp.float32)   # (K, C, C)
    w1 = jnp.pad(w1, ((0, 0), (0, Cp - C), (0, Cp - C)))
    b1 = jnp.pad(ru["conv1"]["b"].astype(jnp.float32), (0, Cp - C)).reshape(Cp, 1)
    a1, ia1 = _snake_cols(ru["alpha1"], Cp)
    w2 = jnp.pad(ru["conv2"]["w"].reshape(C, C).astype(jnp.float32),
                 ((0, Cp - C), (0, Cp - C)))
    b2 = jnp.pad(ru["conv2"]["b"].astype(jnp.float32), (0, Cp - C)).reshape(Cp, 1)
    a2, ia2 = _snake_cols(ru["alpha2"], Cp)

    args = [xp, w1, b1, a1, ia1, w2, b2, a2, ia2]
    in_specs = [
        pl.BlockSpec((1, Cp, Tp), lambda b_: (b_, 0, 0)),
        pl.BlockSpec((K, Cp, Cp), lambda b_: (0, 0, 0)),
        pl.BlockSpec((Cp, 1), lambda b_: (0, 0)),
        pl.BlockSpec((Cp, 1), lambda b_: (0, 0)),
        pl.BlockSpec((Cp, 1), lambda b_: (0, 0)),
        pl.BlockSpec((Cp, Cp), lambda b_: (0, 0)),
        pl.BlockSpec((Cp, 1), lambda b_: (0, 0)),
        pl.BlockSpec((Cp, 1), lambda b_: (0, 0)),
        pl.BlockSpec((Cp, 1), lambda b_: (0, 0)),
    ]
    post = post_alpha is not None
    if post:
        pa, pia = _snake_cols(post_alpha, Cp)
        args += [pa, pia]
        in_specs += [pl.BlockSpec((Cp, 1), lambda b_: (0, 0))] * 2

    out = pl.pallas_call(
        _make_resunit_kernel(K, dil, post),
        out_shape=jax.ShapeDtypeStruct((B, Cp, T), jnp.float32),
        grid=(B,),
        in_specs=in_specs,
        out_specs=pl.BlockSpec((1, Cp, T), lambda b_: (b_, 0, 0)),
        scratch_shapes=[pltpu.VMEM((Cp, Tp), jnp.float32)],
        compiler_params=pltpu.CompilerParams(
            dimension_semantics=("parallel",), vmem_limit_bytes=VMEM_LIMIT),
    )(*args)
    # TODO(synk): time-axis tiling (halo DMA) would be needed for very long per-batch
    # sequences; per-batch full-T blocks are sized for this scaled-down model.
    return out[:, :C, :]


# ---------------- Pallas kernel: strided down-conv as matmul (+ optional Snake epilogue) ----------------
def _make_matmul_conv_kernel(post_snake):
    def kernel(w_ref, b_ref, p_ref, *rest):
        o_ref = rest[-1]
        acc = jnp.dot(w_ref[...], p_ref[...], preferred_element_type=jnp.float32) + b_ref[...]
        if post_snake:
            a, ia = rest[0][...], rest[1][...]
            s = jnp.sin(a * acc)
            acc = acc + ia * s * s
        o_ref[...] = acc
    return kernel


def strided_conv(x, p, stride, padding, post_alpha=None):
    """Strided conv (k = 2*stride) on x:(B,Cin,T) -> (B,Cout,T_out).  im2col (2x inflation only)
    is built in the wrapper; the *following* Snake (if any) is fused as an epilogue."""
    B, Cin, T = x.shape
    Cout, _, K = p["w"].shape
    xp = jnp.pad(x.astype(jnp.float32), ((0, 0), (0, 0), (padding, padding)))
    Tp = T + 2 * padding
    T_out = (Tp - K) // stride + 1

    taps = [xp[:, :, k: k + (T_out - 1) * stride + 1: stride] for k in range(K)]  # (B,Cin,T_out)
    patches = jnp.stack(taps, axis=2)                                             # (B,Cin,K,T_out)
    patches = jnp.transpose(patches, (1, 2, 0, 3)).reshape(Cin * K, B * T_out)
    wmat = p["w"].reshape(Cout, Cin * K).astype(jnp.float32)

    CK = Cin * K
    CKp = _round_up(CK, 8)
    if CKp != CK:
        patches = jnp.pad(patches, ((0, CKp - CK), (0, 0)))
        wmat = jnp.pad(wmat, ((0, 0), (0, CKp - CK)))
    N = B * T_out
    tile_n = _choose_tile(N)
    Np = _round_up(N, tile_n)
    patches = jnp.pad(patches, ((0, 0), (0, Np - N)))

    args = [wmat, p["b"].reshape(Cout, 1).astype(jnp.float32), patches]
    in_specs = [
        pl.BlockSpec((Cout, CKp), lambda i: (0, 0)),
        pl.BlockSpec((Cout, 1), lambda i: (0, 0)),
        pl.BlockSpec((CKp, tile_n), lambda i: (0, i)),
    ]
    post = post_alpha is not None
    if post:
        pa, pia = _snake_cols(post_alpha)
        args += [pa, pia]
        in_specs += [pl.BlockSpec((Cout, 1), lambda i: (0, 0))] * 2

    out = pl.pallas_call(
        _make_matmul_conv_kernel(post),
        out_shape=jax.ShapeDtypeStruct((Cout, Np), jnp.float32),
        grid=(Np // tile_n,),
        in_specs=in_specs,
        out_specs=pl.BlockSpec((Cout, tile_n), lambda i: (0, i)),
        compiler_params=pltpu.CompilerParams(
            dimension_semantics=("parallel",), vmem_limit_bytes=VMEM_LIMIT),
    )(*args)
    out = out[:, :N].reshape(Cout, B, T_out)
    return jnp.transpose(out, (1, 0, 2))


# ---------------- Pallas kernel: fused 9-codebook residual vector quantizer ----------------
def _make_rvq_kernel(n_q, cb_dim, cb_size, latent_dim):
    def kernel(z_ref, win_ref, bin_ref, wout_ref, bout_ref, cb_ref, cbn_ref,
               codes_ref, lat_ref, zq_ref):
        res = z_ref[...]                                  # (latent_dim, tile_n)
        N = res.shape[1]
        win, bin_ = win_ref[...], bin_ref[...]
        wout, bout = wout_ref[...], bout_ref[...]
        cb, cbn = cb_ref[...], cbn_ref[...]
        zq = jnp.zeros_like(res)
        codes = jnp.zeros((n_q, N), jnp.int32)
        iota_v = lax.broadcasted_iota(jnp.int32, (cb_size, N), 0)
        iota_q = lax.broadcasted_iota(jnp.int32, (n_q, N), 0)
        for q in range(n_q):                              # 9 codebooks, statically unrolled
            wq = win[q * cb_dim:(q + 1) * cb_dim, :]
            bq = bin_[q * cb_dim:(q + 1) * cb_dim, :]
            z_e_i = jnp.dot(wq, res, preferred_element_type=jnp.float32) + bq      # (cb_dim, N)
            # encoding L2-norm dropped (argmax-invariant positive column scale);
            # codebook rows arrive pre-normalized from the wrapper.
            cbq_n = cbn[q * cb_size:(q + 1) * cb_size, :]                           # (V, cb_dim)
            sim = jnp.dot(cbq_n, z_e_i, preferred_element_type=jnp.float32)         # (V, N)
            m = jnp.max(sim, axis=0, keepdims=True)
            idx = jnp.min(jnp.where(sim >= m, iota_v, jnp.int32(2 ** 30)),
                          axis=0, keepdims=True)                                    # first-max
            codes = jnp.where(iota_q == q, idx, codes)                              # vreg accumulate
            onehot = (iota_v == idx).astype(jnp.float32)                            # (V, N)
            cbq = cb[q * cb_size:(q + 1) * cb_size, :]
            zq_raw = lax.dot_general(cbq, onehot, (((0,), (0,)), ((), ())),
                                     preferred_element_type=jnp.float32)            # (cb_dim, N)
            woq = wout[q * latent_dim:(q + 1) * latent_dim, :]
            boq = bout[q * latent_dim:(q + 1) * latent_dim, :]
            z_q_i = jnp.dot(woq, zq_raw, preferred_element_type=jnp.float32) + boq
            zq = zq + z_q_i
            res = res - z_q_i
            lat_ref[q * cb_dim:(q + 1) * cb_dim, :] = z_e_i                          # 8-row aligned
        codes_ref[...] = codes                                                       # single store
        zq_ref[...] = zq
    return kernel


def pallas_rvq(z_e_flat, quantizers):
    """z_e_flat:(LATENT_DIM, N) -> codes:(n_q,N) int32, latents:(n_q*cb_dim,N), z_q:(LATENT_DIM,N)."""
    D, N = z_e_flat.shape
    n_q = len(quantizers)
    win = jnp.concatenate([q["in_proj"]["w"].reshape(CODEBOOK_DIM, LATENT_DIM) for q in quantizers], 0)
    bin_ = jnp.concatenate([q["in_proj"]["b"].reshape(CODEBOOK_DIM, 1) for q in quantizers], 0)
    wout = jnp.concatenate([q["out_proj"]["w"].reshape(LATENT_DIM, CODEBOOK_DIM) for q in quantizers], 0)
    bout = jnp.concatenate([q["out_proj"]["b"].reshape(LATENT_DIM, 1) for q in quantizers], 0)
    cb = jnp.concatenate([q["codebook"] for q in quantizers], 0).astype(jnp.float32)
    cbn = cb * lax.rsqrt(jnp.sum(cb * cb, axis=1, keepdims=True) + 1e-12)  # hoisted out of kernel

    tile_n = _choose_tile(N)
    Np = _round_up(N, tile_n)
    z_p = jnp.pad(z_e_flat.astype(jnp.float32), ((0, 0), (0, Np - N)))

    codes, lat, zq = pl.pallas_call(
        _make_rvq_kernel(n_q, CODEBOOK_DIM, CODEBOOK_SIZE, LATENT_DIM),
        out_shape=(
            jax.ShapeDtypeStruct((n_q, Np), jnp.int32),
            jax.ShapeDtypeStruct((n_q * CODEBOOK_DIM, Np), jnp.float32),
            jax.ShapeDtypeStruct((LATENT_DIM, Np), jnp.float32),
        ),
        grid=(Np // tile_n,),
        in_specs=[
            pl.BlockSpec((LATENT_DIM, tile_n), lambda i: (0, i)),
            pl.BlockSpec(win.shape, lambda i: (0, 0)),
            pl.BlockSpec(bin_.shape, lambda i: (0, 0)),
            pl.BlockSpec(wout.shape, lambda i: (0, 0)),
            pl.BlockSpec(bout.shape, lambda i: (0, 0)),
            pl.BlockSpec(cb.shape, lambda i: (0, 0)),
            pl.BlockSpec(cbn.shape, lambda i: (0, 0)),
        ],
        out_specs=(
            pl.BlockSpec((n_q, tile_n), lambda i: (0, i)),
            pl.BlockSpec((n_q * CODEBOOK_DIM, tile_n), lambda i: (0, i)),
            pl.BlockSpec((LATENT_DIM, tile_n), lambda i: (0, i)),
        ),
        compiler_params=pltpu.CompilerParams(
            dimension_semantics=("parallel",), vmem_limit_bytes=VMEM_LIMIT),
    )(z_p, win, bin_, wout, bout, cb, cbn)
    return codes[:, :N], lat[:, :N], zq[:, :N]


# ---------------- deterministic parameter init ----------------
def _init_conv(key, cout, cin, k):
    kw, kb = jax.random.split(key)
    scale = 1.0 / math.sqrt(cin * k)
    return {
        "w": jax.random.normal(kw, (cout, cin, k), jnp.float32) * scale,
        "b": jax.random.normal(kb, (cout,), jnp.float32) * 0.01,
    }


def init_params(key):
    keys = iter(jax.random.split(key, 256))
    params = {}
    params["conv0"] = _init_conv(next(keys), ENC_DIM, 1, 7)
    blocks = []
    d = ENC_DIM
    for stride in STRIDES:
        res_units = []
        for _dil in DILATIONS:
            res_units.append({
                "alpha1": jnp.ones((d,), jnp.float32),
                "conv1": _init_conv(next(keys), d, d, 7),
                "alpha2": jnp.ones((d,), jnp.float32),
                "conv2": _init_conv(next(keys), d, d, 1),
            })
        blocks.append({
            "res_units": res_units,
            "alpha": jnp.ones((d,), jnp.float32),
            "down": _init_conv(next(keys), 2 * d, d, 2 * stride),
        })
        d *= 2
    params["blocks"] = blocks
    params["final_alpha"] = jnp.ones((d,), jnp.float32)
    params["final_conv"] = _init_conv(next(keys), LATENT_DIM, d, 3)
    quantizers = []
    for _ in range(N_CODEBOOKS):
        quantizers.append({
            "in_proj": _init_conv(next(keys), CODEBOOK_DIM, LATENT_DIM, 1),
            "out_proj": _init_conv(next(keys), LATENT_DIM, CODEBOOK_DIM, 1),
            "codebook": jax.random.normal(next(keys), (CODEBOOK_SIZE, CODEBOOK_DIM), jnp.float32),
        })
    params["quantizers"] = quantizers
    return params


# ---------------- DACEncoder.forward ----------------
def dac_encoder_forward(params, wav, sample_rate=SAMPLE_RATE, n_codebooks=N_CODEBOOKS):
    assert sample_rate == SAMPLE_RATE
    if wav.ndim == 2:                      # wav.dim() == 2 -> unsqueeze(0)
        wav = wav[None]
    B, _, T = wav.shape
    # model.preprocess: right-pad audio to a multiple of hop_length
    right_pad = (-T) % HOP_LENGTH
    wav = jnp.pad(wav, ((0, 0), (0, 0), (0, right_pad))).astype(jnp.float32)

    # ---- encoder: activations kept as (B, C, T); every Snake is fused into a kernel ----
    x = tap_conv(wav, params["conv0"], padding=3)
    n_blocks = len(STRIDES)
    for bi, (bp, stride) in enumerate(zip(params["blocks"], STRIDES)):
        for ri, (ru, dil) in enumerate(zip(bp["res_units"], DILATIONS)):
            post = bp["alpha"] if ri == len(DILATIONS) - 1 else None   # block Snake fused here
            x = residual_unit(x, ru, dil, post_alpha=post)
        post = params["final_alpha"] if bi == n_blocks - 1 else None   # final Snake fused here
        x = strided_conv(x, bp["down"], stride=stride,
                         padding=math.ceil(stride / 2), post_alpha=post)
    z_e = tap_conv(x, params["final_conv"], padding=1)                 # (B, LATENT_DIM, T_out)
    Bq, _, Tq = z_e.shape

    # ---- residual vector quantization: one fused kernel over all 9 codebooks ----
    z_flat = jnp.transpose(z_e, (1, 0, 2)).reshape(LATENT_DIM, Bq * Tq)
    codes_f, lat_f, zq_f = pallas_rvq(z_flat, params["quantizers"])

    codes = jnp.transpose(codes_f.reshape(N_CODEBOOKS, Bq, Tq), (1, 0, 2))
    codes = codes.astype(jnp.int32)[:, :n_codebooks, :]
    embeddings = jnp.transpose(lat_f.reshape(N_CODEBOOKS * CODEBOOK_DIM, Bq, Tq), (1, 2, 0))
    quantized = jnp.transpose(zq_f.reshape(LATENT_DIM, Bq, Tq), (1, 2, 0))

    return {
        "codes": codes,                        # (B, n_codebooks, T_out) int32
        "embeddings": embeddings,              # (B, T_out, N_CODEBOOKS*CODEBOOK_DIM)
        "quantized_embeddings": quantized,     # (B, T_out, LATENT_DIM)
    }
    # TODO(synk): pretrained DAC weight loading / weight-norm reparametrization is not
    # reproducible in-script; effective weights are deterministically initialized instead.


if __name__ == "__main__":
    params = init_params(jax.random.PRNGKey(42))
    # analogous to dummy_test's torch.rand(2, 1, L), at a small length
    wav = jax.random.uniform(jax.random.PRNGKey(0), (2, 1, 60), jnp.float32)

    fwd = jax.jit(dac_encoder_forward)
    out = fwd(params, wav)
    out = jax.block_until_ready(out)

    T_out = math.ceil(60 / HOP_LENGTH)                    # 8
    assert out["codes"].shape == (2, N_CODEBOOKS, T_out)
    assert out["codes"].dtype == jnp.int32
    assert out["embeddings"].shape == (2, T_out, N_CODEBOOKS * CODEBOOK_DIM)
    assert out["quantized_embeddings"].shape == (2, T_out, LATENT_DIM)
    assert bool(jnp.all(jnp.isfinite(out["embeddings"])))
    assert bool(jnp.all(jnp.isfinite(out["quantized_embeddings"])))
    assert bool(jnp.all((out["codes"] >= 0) & (out["codes"] < CODEBOOK_SIZE)))
    print("KERNEL_OK")
</pallas_src>

<mosaic_0001>
module attributes {stable_mosaic.version = 11 : i64} {
  func.func @kernel(%arg0: i32, %arg1: memref<1x1x70xf32, #tpu.memory_space<vmem>>, %arg2: memref<7x4x1xf32, #tpu.memory_space<vmem>>, %arg3: memref<4x1xf32, #tpu.memory_space<vmem>>, %arg4: memref<1x4x64xf32, #tpu.memory_space<vmem>>) attributes {dimension_semantics = [#tpu.dimension_semantics<parallel>], iteration_bounds = array<i64: 2>, scalar_prefetch = 0 : i64, scratch_operands = 0 : i64, tpu.core_type = #tpu.core_type<tc>, window_params = [{transform_indices = @transform_0, window_bounds = array<i64: 1, 1, 70>}, {pipeline_mode = #tpu.pipeline_mode<synchronous>, transform_indices = @transform_1, window_bounds = array<i64: 7, 4, 1>}, {pipeline_mode = #tpu.pipeline_mode<synchronous>, transform_indices = @transform_2, window_bounds = array<i64: 4, 1>}, {transform_indices = @transform_3, window_bounds = array<i64: 1, 4, 64>}]} {
    %c0 = arith.constant 0 : index
    %c0_0 = arith.constant 0 : index
    %c0_1 = arith.constant 0 : index
    %0 = vector.load %arg1[%c0, %c0_0, %c0_1] : memref<1x1x70xf32, #tpu.memory_space<vmem>>, vector<1x1x70xf32>
    %1 = vector.shape_cast %0 : vector<1x1x70xf32> to vector<1x70xf32>
    %cst = arith.constant 0.000000e+00 : f32
    %2 = vector.broadcast %cst : f32 to vector<4x64xf32>
    %3 = vector.extract_strided_slice %1 {offsets = [0, 0], sizes = [1, 64], strides = [1, 1]} : vector<1x70xf32> to vector<1x64xf32>
    %c0_2 = arith.constant 0 : index
    %c0_3 = arith.constant 0 : index
    %c0_4 = arith.constant 0 : index
    %4 = vector.load %arg2[%c0_2, %c0_3, %c0_4] : memref<7x4x1xf32, #tpu.memory_space<vmem>>, vector<1x4x1xf32>
    %5 = vector.shape_cast %4 : vector<1x4x1xf32> to vector<4x1xf32>
    %6 = vector.broadcast %5 : vector<4x1xf32> to vector<4x64xf32>
    %7 = vector.broadcast %3 : vector<1x64xf32> to vector<4x64xf32>
    %8 = arith.mulf %6, %7 : vector<4x64xf32>
    %9 = arith.addf %2, %8 : vector<4x64xf32>
    %10 = vector.extract_strided_slice %1 {offsets = [0, 1], sizes = [1, 64], strides = [1, 1]} : vector<1x70xf32> to vector<1x64xf32>
    %c1 = arith.constant 1 : index
    %c0_5 = arith.constant 0 : index
    %c0_6 = arith.constant 0 : index
    %11 = vector.load %arg2[%c1, %c0_5, %c0_6] : memref<7x4x1xf32, #tpu.memory_space<vmem>>, vector<1x4x1xf32>
    %12 = vector.shape_cast %11 : vector<1x4x1xf32> to vector<4x1xf32>
    %13 = vector.broadcast %12 : vector<4x1xf32> to vector<4x64xf32>
    %14 = vector.broadcast %10 : vector<1x64xf32> to vector<4x64xf32>
    %15 = arith.mulf %13, %14 : vector<4x64xf32>
    %16 = arith.addf %9, %15 : vector<4x64xf32>
    %17 = vector.extract_strided_slice %1 {offsets = [0, 2], sizes = [1, 64], strides = [1, 1]} : vector<1x70xf32> to vector<1x64xf32>
    %c2 = arith.constant 2 : index
    %c0_7 = arith.constant 0 : index
    %c0_8 = arith.constant 0 : index
    %18 = vector.load %arg2[%c2, %c0_7, %c0_8] : memref<7x4x1xf32, #tpu.memory_space<vmem>>, vector<1x4x1xf32>
    %19 = vector.shape_cast %18 : vector<1x4x1xf32> to vector<4x1xf32>
    %20 = vector.broadcast %19 : vector<4x1xf32> to vector<4x64xf32>
    %21 = vector.broadcast %17 : vector<1x64xf32> to vector<4x64xf32>
    %22 = arith.mulf %20, %21 : vector<4x64xf32>
    %23 = arith.addf %16, %22 : vector<4x64xf32>
    %24 = vector.extract_strided_slice %1 {offsets = [0, 3], sizes = [1, 64], strides = [1, 1]} : vector<1x70xf32> to vector<1x64xf32>
    %c3 = arith.constant 3 : index
    %c0_9 = arith.constant 0 : index
    %c0_10 = arith.constant 0 : index
    %25 = vector.load %arg2[%c3, %c0_9, %c0_10] : memref<7x4x1xf32, #tpu.memory_space<vmem>>, vector<1x4x1xf32>
    %26 = vector.shape_cast %25 : vector<1x4x1xf32> to vector<4x1xf32>
    %27 = vector.broadcast %26 : vector<4x1xf32> to vector<4x64xf32>
    %28 = vector.broadcast %24 : vector<1x64xf32> to vector<4x64xf32>
    %29 = arith.mulf %27, %28 : vector<4x64xf32>
    %30 = arith.addf %23, %29 : vector<4x64xf32>
    %31 = vector.extract_strided_slice %1 {offsets = [0, 4], sizes = [1, 64], strides = [1, 1]} : vector<1x70xf32> to vector<1x64xf32>
    %c4 = arith.constant 4 : index
    %c0_11 = arith.constant 0 : index
    %c0_12 = arith.constant 0 : index
    %32 = vector.load %arg2[%c4, %c0_11, %c0_12] : memref<7x4x1xf32, #tpu.memory_space<vmem>>, vector<1x4x1xf32>
    %33 = vector.shape_cast %32 : vector<1x4x1xf32> to vector<4x1xf32>
    %34 = vector.broadcast %33 : vector<4x1xf32> to vector<4x64xf32>
    %35 = vector.broadcast %31 : vector<1x64xf32> to vector<4x64xf32>
    %36 = arith.mulf %34, %35 : vector<4x64xf32>
    %37 = arith.addf %30, %36 : vector<4x64xf32>
    %38 = vector.extract_strided_slice %1 {offsets = [0, 5], sizes = [1, 64], strides = [1, 1]} : vector<1x70xf32> to vector<1x64xf32>
    %c5 = arith.constant 5 : index
    %c0_13 = arith.constant 0 : index
    %c0_14 = arith.constant 0 : index
    %39 = vector.load %arg2[%c5, %c0_13, %c0_14] : memref<7x4x1xf32, #tpu.memory_space<vmem>>, vector<1x4x1xf32>
    %40 = vector.shape_cast %39 : vector<1x4x1xf32> to vector<4x1xf32>
    %41 = vector.broadcast %40 : vector<4x1xf32> to vector<4x64xf32>
    %42 = vector.broadcast %38 : vector<1x64xf32> to vector<4x64xf32>
    %43 = arith.mulf %41, %42 : vector<4x64xf32>
    %44 = arith.addf %37, %43 : vector<4x64xf32>
    %45 = vector.extract_strided_slice %1 {offsets = [0, 6], sizes = [1, 64], strides = [1, 1]} : vector<1x70xf32> to vector<1x64xf32>
    %c6 = arith.constant 6 : index
    %c0_15 = arith.constant 0 : index
    %c0_16 = arith.constant 0 : index
    %46 = vector.load %arg2[%c6, %c0_15, %c0_16] : memref<7x4x1xf32, #tpu.memory_space<vmem>>, vector<1x4x1xf32>
    %47 = vector.shape_cast %46 : vector<1x4x1xf32> to vector<4x1xf32>
    %48 = vector.broadcast %47 : vector<4x1xf32> to vector<4x64xf32>
    %49 = vector.broadcast %45 : vector<1x64xf32> to vector<4x64xf32>
    %50 = arith.mulf %48, %49 : vector<4x64xf32>
    %51 = arith.addf %44, %50 : vector<4x64xf32>
    %c0_17 = arith.constant 0 : index
    %c0_18 = arith.constant 0 : index
    %52 = vector.load %arg3[%c0_17, %c0_18] : memref<4x1xf32, #tpu.memory_space<vmem>>, vector<4x1xf32>
    %53 = vector.broadcast %52 : vector<4x1xf32> to vector<4x64xf32>
    %54 = arith.addf %51, %53 : vector<4x64xf32>
    %c0_19 = arith.constant 0 : index
    %c0_20 = arith.constant 0 : index
    %c0_21 = arith.constant 0 : index
    %55 = vector.load %arg4[%c0_19, %c0_20, %c0_21] : memref<1x4x64xf32, #tpu.memory_space<vmem>>, vector<1x4x64xf32>
    %56 = vector.shape_cast %55 : vector<1x4x64xf32> to vector<4x64xf32>
    %57 = vector.shape_cast %54 : vector<4x64xf32> to vector<1x4x64xf32>
    tpu.vector_store %arg4[%c0_19, %c0_20, %c0_21], %57 {strides = array<i32>} : memref<1x4x64xf32, #tpu.memory_space<vmem>>, vector<1x4x64xf32>,
    return
  }
  func.func @transform_0(%arg0: i32) -> (i32, i32, i32) {
    %c0_i32 = arith.constant 0 : i32
    %c0_i32_0 = arith.constant 0 : i32
    %c0_i32_1 = arith.constant 0 : i32
    return %arg0, %c0_i32, %c0_i32_0 : i32, i32, i32
  }
  func.func @transform_1(%arg0: i32) -> (i32, i32, i32) {
    %c0_i32 = arith.constant 0 : i32
    %c0_i32_0 = arith.constant 0 : i32
    %c0_i32_1 = arith.constant 0 : i32
    %c0_i32_2 = arith.constant 0 : i32
    return %c0_i32, %c0_i32_0, %c0_i32_1 : i32, i32, i32
  }
  func.func @transform_2(%arg0: i32) -> (i32, i32) {
    %c0_i32 = arith.constant 0 : i32
    %c0_i32_0 = arith.constant 0 : i32
    %c0_i32_1 = arith.constant 0 : i32
    return %c0_i32, %c0_i32_0 : i32, i32
  }
  func.func @transform_3(%arg0: i32) -> (i32, i32, i32) {
    %c0_i32 = arith.constant 0 : i32
    %c0_i32_0 = arith.constant 0 : i32
    %c0_i32_1 = arith.constant 0 : i32
    return %arg0, %c0_i32, %c0_i32_0 : i32, i32, i32
  }
}

module attributes {stable_mosaic.version = 11 : i64} {
  func.func @kernel(%arg0: i32, %arg1: memref<1x8x70xf32, #tpu.memory_space<vmem>>, %arg2: memref<7x8x8xf32, #tpu.memory_space<vmem>>, %arg3: memref<8x1xf32, #tpu.memory_space<vmem>>, %arg4: memref<8x1xf32, #tpu.memory_space<vmem>>, %arg5: memref<8x1xf32, #tpu.memory_space<vmem>>, %arg6: memref<8x8xf32, #tpu.memory_space<vmem>>, %arg7: memref<8x1xf32, #tpu.memory_space<vmem>>, %arg8: memref<8x1xf32, #tpu.memory_space<vmem>>, %arg9: memref<8x1xf32, #tpu.memory_space<vmem>>, %arg10: memref<1x8x64xf32, #tpu.memory_space<vmem>>, %arg11: memref<8x70xf32, #tpu.memory_space<vmem>>) attributes {dimension_semantics = [#tpu.dimension_semantics<parallel>], iteration_bounds = array<i64: 2>, scalar_prefetch = 0 : i64, scratch_operands = 1 : i64, tpu.core_type = #tpu.core_type<tc>, window_params = [{transform_indices = @transform_0, window_bounds = array<i64: 1, 8, 70>}, {pipeline_mode = #tpu.pipeline_mode<synchronous>, transform_indices = @transform_1, window_bounds = array<i64: 7, 8, 8>}, {pipeline_mode = #tpu.pipeline_mode<synchronous>, transform_indices = @transform_2, window_bounds = array<i64: 8, 1>}, {pipeline_mode = #tpu.pipeline_mode<synchronous>, transform_indices = @transform_3, window_bounds = array<i64: 8, 1>}, {pipeline_mode = #tpu.pipeline_mode<synchronous>, transform_indices = @transform_4, window_bounds = array<i64: 8, 1>}, {pipeline_mode = #tpu.pipeline_mode<synchronous>, transform_indices = @transform_5, window_bounds = array<i64: 8, 8>}, {pipeline_mode = #tpu.pipeline_mode<synchronous>, transform_indices = @transform_6, window_bounds = array<i64: 8, 1>}, {pipeline_mode = #tpu.pipeline_mode<synchronous>, transform_indices = @transform_7, window_bounds = array<i64: 8, 1>}, {pipeline_mode = #tpu.pipeline_mode<synchronous>, transform_indices = @transform_8, window_bounds = array<i64: 8, 1>}, {transform_indices = @transform_9, window_bounds = array<i64: 1, 8, 64>}]} {
    %c0 = arith.constant 0 : index
    %c0_0 = arith.constant 0 : index
    %c0_1 = arith.constant 0 : index
    %0 = vector.load %arg1[%c0, %c0_0, %c0_1] : memref<1x8x70xf32, #tpu.memory_space<vmem>>, vector<1x8x70xf32>
    %1 = vector.shape_cast %0 : vector<1x8x70xf32> to vector<8x70xf32>
    %c0_2 = arith.constant 0 : index
    %c0_3 = arith.constant 0 : index
    %2 = vector.load %arg4[%c0_2, %c0_3] : memref<8x1xf32, #tpu.memory_space<vmem>>, vector<8x1xf32>
    %c0_4 = arith.constant 0 : index
    %c0_5 = arith.constant 0 : index
    %3 = vector.load %arg5[%c0_4, %c0_5] : memref<8x1xf32, #tpu.memory_space<vmem>>, vector<8x1xf32>
    %4 = vector.broadcast %2 : vector<8x1xf32> to vector<8x70xf32>
    %5 = arith.mulf %4, %1 : vector<8x70xf32>
    %6 = math.sin %5 : vector<8x70xf32>
    %7 = vector.broadcast %3 : vector<8x1xf32> to vector<8x70xf32>
    %8 = arith.mulf %7, %6 : vector<8x70xf32>
    %9 = arith.mulf %8, %6 : vector<8x70xf32>
    %10 = arith.addf %1, %9 : vector<8x70xf32>
    %c0_6 = arith.constant 0 : index
    %c0_7 = arith.constant 0 : index
    %11 = vector.load %arg11[%c0_6, %c0_7] : memref<8x70xf32, #tpu.memory_space<vmem>>, vector<8x70xf32>
    tpu.vector_store %arg11[%c0_6, %c0_7], %10 {strides = array<i32>} : memref<8x70xf32, #tpu.memory_space<vmem>>, vector<8x70xf32>,
    %cst = arith.constant 0.000000e+00 : f32
    %12 = vector.broadcast %cst : f32 to vector<8x64xf32>
    %c0_8 = arith.constant 0 : index
    %c0_9 = arith.constant 0 : index
    %c0_10 = arith.constant 0 : index
    %13 = vector.load %arg2[%c0_8, %c0_9, %c0_10] : memref<7x8x8xf32, #tpu.memory_space<vmem>>, vector<1x8x8xf32>
    %14 = vector.shape_cast %13 : vector<1x8x8xf32> to vector<8x8xf32>
    %c0_11 = arith.constant 0 : index
    %c0_12 = arith.constant 0 : index
    %15 = vector.load %arg11[%c0_11, %c0_12] : memref<8x70xf32, #tpu.memory_space<vmem>>, vector<8x64xf32>
    %cst_13 = arith.constant dense<0.000000e+00> : vector<8x64xf32>
    %16 = tpu.matmul %14, %15, %cst_13 {dimension_numbers = #tpu.dot_dimension_numbers<[1], [0], [0], [1], [0, 0, 1, 1], [], []>} : vector<8x8xf32>, vector<8x64xf32>, vector<8x64xf32> -> vector<8x64xf32>
    %17 = arith.addf %12, %16 : vector<8x64xf32>
    %c1 = arith.constant 1 : index
    %c0_14 = arith.constant 0 : index
    %c0_15 = arith.constant 0 : index
    %18 = vector.load %arg2[%c1, %c0_14, %c0_15] : memref<7x8x8xf32, #tpu.memory_space<vmem>>, vector<1x8x8xf32>
    %19 = vector.shape_cast %18 : vector<1x8x8xf32> to vector<8x8xf32>
    %c0_16 = arith.constant 0 : index
    %c1_17 = arith.constant 1 : index
    %20 = vector.load %arg11[%c0_16, %c1_17] : memref<8x70xf32, #tpu.memory_space<vmem>>, vector<8x64xf32>
    %cst_18 = arith.constant dense<0.000000e+00> : vector<8x64xf32>
    %21 = tpu.matmul %19, %20, %cst_18 {dimension_numbers = #tpu.dot_dimension_numbers<[1], [0], [0], [1], [0, 0, 1, 1], [], []>} : vector<8x8xf32>, vector<8x64xf32>, vector<8x64xf32> -> vector<8x64xf32>
    %22 = arith.addf %17, %21 : vector<8x64xf32>
    %c2 = arith.constant 2 : index
    %c0_19 = arith.constant 0 : index
    %c0_20 = arith.constant 0 : index
    %23 = vector.load %arg2[%c2, %c0_19, %c0_20] : memref<7x8x8xf32, #tpu.memory_space<vmem>>, vector<1x8x8xf32>
    %24 = vector.shape_cast %23 : vector<1x8x8xf32> to vector<8x8xf32>
    %c0_21 = arith.constant 0 : index
    %c2_22 = arith.constant 2 : index
    %25 = vector.load %arg11[%c0_21, %c2_22] : memref<8x70xf32, #tpu.memory_space<vmem>>, vector<8x64xf32>
    %cst_23 = arith.constant dense<0.000000e+00> : vector<8x64xf32>
    %26 = tpu.matmul %24, %25, %cst_23 {dimension_numbers = #tpu.dot_dimension_numbers<[1], [0], [0], [1], [0, 0, 1, 1], [], []>} : vector<8x8xf32>, vector<8x64xf32>, vector<8x64xf32> -> vector<8x64xf32>
    %27 = arith.addf %22, %26 : vector<8x64xf32>
    %c3 = arith.constant 3 : index
    %c0_24 = arith.constant 0 : index
    %c0_25 = arith.constant 0 : index
    %28 = vector.load %arg2[%c3, %c0_24, %c0_25] : memref<7x8x8xf32, #tpu.memory_space<vmem>>, vector<1x8x8xf32>
    %29 = vector.shape_cast %28 : vector<1x8x8xf32> to vector<8x8xf32>
    %c0_26 = arith.constant 0 : index
    %c3_27 = arith.constant 3 : index
    %30 = vector.load %arg11[%c0_26, %c3_27] : memref<8x70xf32, #tpu.memory_space<vmem>>, vector<8x64xf32>
    %cst_28 = arith.constant dense<0.000000e+00> : vector<8x64xf32>
    %31 = tpu.matmul %29, %30, %cst_28 {dimension_numbers = #tpu.dot_dimension_numbers<[1], [0], [0], [1], [0, 0, 1, 1], [], []>} : vector<8x8xf32>, vector<8x64xf32>, vector<8x64xf32> -> vector<8x64xf32>
    %32 = arith.addf %27, %31 : vector<8x64xf32>
    %c4 = arith.constant 4 : index
    %c0_29 = arith.constant 0 : index
    %c0_30 = arith.constant 0 : index
    %33 = vector.load %arg2[%c4, %c0_29, %c0_30] : memref<7x8x8xf32, #tpu.memory_space<vmem>>, vector<1x8x8xf32>
    %34 = vector.shape_cast %33 : vector<1x8x8xf32> to vector<8x8xf32>
    %c0_31 = arith.constant 0 : index
    %c4_32 = arith.constant 4 : index
    %35 = vector.load %arg11[%c0_31, %c4_32] : memref<8x70xf32, #tpu.memory_space<vmem>>, vector<8x64xf32>
    %cst_33 = arith.constant dense<0.000000e+00> : vector<8x64xf32>
    %36 = tpu.matmul %34, %35, %cst_33 {dimension_numbers = #tpu.dot_dimension_numbers<[1], [0], [0], [1], [0, 0, 1, 1], [], []>} : vector<8x8xf32>, vector<8x64xf32>, vector<8x64xf32> -> vector<8x64xf32>
    %37 = arith.addf %32, %36 : vector<8x64xf32>
    %c5 = arith.constant 5 : index
    %c0_34 = arith.constant 0 : index
    %c0_35 = arith.constant 0 : index
    %38 = vector.load %arg2[%c5, %c0_34, %c0_35] : memref<7x8x8xf32, #tpu.memory_space<vmem>>, vector<1x8x8xf32>
    %39 = vector.shape_cast %38 : vector<1x8x8xf32> to vector<8x8xf32>
    %c0_36 = arith.constant 0 : index
    %c5_37 = arith.constant 5 : index
    %40 = vector.load %arg11[%c0_36, %c5_37] : memref<8x70xf32, #tpu.memory_space<vmem>>, vector<8x64xf32>
    %cst_38 = arith.constant dense<0.000000e+00> : vector<8x64xf32>
    %41 = tpu.matmul %39, %40, %cst_38 {dimension_numbers = #tpu.dot_dimension_numbers<[1], [0], [0], [1], [0, 0, 1, 1], [], []>} : vector<8x8xf32>, vector<8x64xf32>, vector<8x64xf32> -> vector<8x64xf32>
    %42 = arith.addf %37, %41 : vector<8x64xf32>
    %c6 = arith.constant 6 : index
    %c0_39 = arith.constant 0 : index
    %c0_40 = arith.constant 0 : index
    %43 = vector.load %arg2[%c6, %c0_39, %c0_40] : memref<7x8x8xf32, #tpu.memory_space<vmem>>, vector<1x8x8xf32>
    %44 = vector.shape_cast %43 : vector<1x8x8xf32> to vector<8x8xf32>
    %c0_41 = arith.constant 0 : index
    %c6_42 = arith.constant 6 : index
    %45 = vector.load %arg11[%c0_41, %c6_42] : memref<8x70xf32, #tpu.memory_space<vmem>>, vector<8x64xf32>
    %cst_43 = arith.constant dense<0.000000e+00> : vector<8x64xf32>
    %46 = tpu.matmul %44, %45, %cst_43 {dimension_numbers = #tpu.dot_dimension_numbers<[1], [0], [0], [1], [0, 0, 1, 1], [], []>} : vector<8x8xf32>, vector<8x64xf32>, vector<8x64xf32> -> vector<8x64xf32>
    %47 = arith.addf %42, %46 : vector<8x64xf32>
    %c0_44 = arith.constant 0 : index
    %c0_45 = arith.constant 0 : index
    %48 = vector.load %arg3[%c0_44, %c0_45] : memref<8x1xf32, #tpu.memory_space<vmem>>, vector<8x1xf32>
    %49 = vector.broadcast %48 : vector<8x1xf32> to vector<8x64xf32>
    %50 = arith.addf %47, %49 : vector<8x64xf32>
    %c0_46 = arith.constant 0 : index
    %c0_47 = arith.constant 0 : index
    %51 = vector.load %arg8[%c0_46, %c0_47] : memref<8x1xf32, #tpu.memory_space<vmem>>, vector<8x1xf32>
    %52 = vector.broadcast %51 : vector<8x1xf32> to vector<8x64xf32>
    %53 = arith.mulf %52, %50 : vector<8x64xf32>
    %54 = math.sin %53 : vector<8x64xf32>
    %c0_48 = arith.constant 0 : index
    %c0_49 = arith.constant 0 : index
    %55 = vector.load %arg9[%c0_48, %c0_49] : memref<8x1xf32, #tpu.memory_space<vmem>>, vector<8x1xf32>
    %56 = vector.broadcast %55 : vector<8x1xf32> to vector<8x64xf32>
    %57 = arith.mulf %56, %54 : vector<8x64xf32>
    %58 = arith.mulf %57, %54 : vector<8x64xf32>
    %59 = arith.addf %50, %58 : vector<8x64xf32>
    %c0_50 = arith.constant 0 : index
    %c0_51 = arith.constant 0 : index
    %60 = vector.load %arg6[%c0_50, %c0_51] : memref<8x8xf32, #tpu.memory_space<vmem>>, vector<8x8xf32>
    %cst_52 = arith.constant dense<0.000000e+00> : vector<8x64xf32>
    %61 = tpu.matmul %60, %59, %cst_52 {dimension_numbers = #tpu.dot_dimension_numbers<[1], [0], [0], [1], [0, 0, 1, 1], [], []>} : vector<8x8xf32>, vector<8x64xf32>, vector<8x64xf32> -> vector<8x64xf32>
    %c0_53 = arith.constant 0 : index
    %c0_54 = arith.constant 0 : index
    %62 = vector.load %arg7[%c0_53, %c0_54] : memref<8x1xf32, #tpu.memory_space<vmem>>, vector<8x1xf32>
    %63 = vector.broadcast %62 : vector<8x1xf32> to vector<8x64xf32>
    %64 = arith.addf %61, %63 : vector<8x64xf32>
    %65 = vector.extract_strided_slice %1 {offsets = [0, 3], sizes = [8, 64], strides = [1, 1]} : vector<8x70xf32> to vector<8x64xf32>
    %66 = arith.addf %65, %64 : vector<8x64xf32>
    %c0_55 = arith.constant 0 : index
    %c0_56 = arith.constant 0 : index
    %c0_57 = arith.constant 0 : index
    %67 = vector.load %arg10[%c0_55, %c0_56, %c0_57] : memref<1x8x64xf32, #tpu.memory_space<vmem>>, vector<1x8x64xf32>
    %68 = vector.shape_cast %67 : vector<1x8x64xf32> to vector<8x64xf32>
    %69 = vector.shape_cast %66 : vector<8x64xf32> to vector<1x8x64xf32>
    tpu.vector_store %arg10[%c0_55, %c0_56, %c0_57], %69 {strides = array<i32>} : memref<1x8x64xf32, #tpu.memory_space<vmem>>, vector<1x8x64xf32>,
    return
  }
  func.func @transform_0(%arg0: i32) -> (i32, i32, i32) {
    %c0_i32 = arith.constant 0 : i32
    %c0_i32_0 = arith.constant 0 : i32
    %c0_i32_1 = arith.constant 0 : i32
    return %arg0, %c0_i32, %c0_i32_0 : i32, i32, i32
  }
  func.func @transform_1(%arg0: i32) -> (i32, i32, i32) {
    %c0_i32 = arith.constant 0 : i32
    %c0_i32_0 = arith.constant 0 : i32
    %c0_i32_1 = arith.constant 0 : i32
    %c0_i32_2 = arith.constant 0 : i32
    return %c0_i32, %c0_i32_0, %c0_i32_1 : i32, i32, i32
  }
  func.func @transform_2(%arg0: i32) -> (i32, i32) {
    %c0_i32 = arith.constant 0 : i32
    %c0_i32_0 = arith.constant 0 : i32
    %c0_i32_1 = arith.constant 0 : i32
    return %c0_i32, %c0_i32_0 : i32, i32
  }
  func.func @transform_3(%arg0: i32) -> (i32, i32) {
    %c0_i32 = arith.constant 0 : i32
    %c0_i32_0 = arith.constant 0 : i32
    %c0_i32_1 = arith.constant 0 : i32
    return %c0_i32, %c0_i32_0 : i32, i32
  }
  func.func @transform_4(%arg0: i32) -> (i32, i32) {
    %c0_i32 = arith.constant 0 : i32
    %c0_i32_0 = arith.constant 0 : i32
    %c0_i32_1 = arith.constant 0 : i32
    return %c0_i32, %c0_i32_0 : i32, i32
  }
  func.func @transform_5(%arg0: i32) -> (i32, i32) {
    %c0_i32 = arith.constant 0 : i32
    %c0_i32_0 = arith.constant 0 : i32
    %c0_i32_1 = arith.constant 0 : i32
    return %c0_i32, %c0_i32_0 : i32, i32
  }
  func.func @transform_6(%arg0: i32) -> (i32, i32) {
    %c0_i32 = arith.constant 0 : i32
    %c0_i32_0 = arith.constant 0 : i32
    %c0_i32_1 = arith.constant 0 : i32
    return %c0_i32, %c0_i32_0 : i32, i32
  }
  func.func @transform_7(%arg0: i32) -> (i32, i32) {
    %c0_i32 = arith.constant 0 : i32
    %c0_i32_0 = arith.constant 0 : i32
    %c0_i32_1 = arith.constant 0 : i32
    return %c0_i32, %c0_i32_0 : i32, i32
  }
  func.func @transform_8(%arg0: i32) -> (i32, i32) {
    %c0_i32 = arith.constant 0 : i32
    %c0_i32_0 = arith.constant 0 : i32
    %c0_i32_1 = arith.constant 0 : i32
    return %c0_i32, %c0_i32_0 : i32, i32
  }
  func.func @transform_9(%arg0: i32) -> (i32, i32, i32) {
    %c0_i32 = arith.constant 0 : i32
    %c0_i32_0 = arith.constant 0 : i32
    %c0_i32_1 = arith.constant 0 : i32
    return %arg0, %c0_i32, %c0_i32_0 : i32, i32, i32
  }
}

module attributes {stable_mosaic.version = 11 : i64} {
  func.func @kernel(%arg0: i32, %arg1: memref<1x8x82xf32, #tpu.memory_space<vmem>>, %arg2: memref<7x8x8xf32, #tpu.memory_space<vmem>>, %arg3: memref<8x1xf32, #tpu.memory_space<vmem>>, %arg4: memref<8x1xf32, #tpu.memory_space<vmem>>, %arg5: memref<8x1xf32, #tpu.memory_space<vmem>>, %arg6: memref<8x8xf32, #tpu.memory_space<vmem>>, %arg7: memref<8x1xf32, #tpu.memory_space<vmem>>, %arg8: memref<8x1xf32, #tpu.memory_space<vmem>>, %arg9: memref<8x1xf32, #tpu.memory_space<vmem>>, %arg10: memref<1x8x64xf32, #tpu.memory_space<vmem>>, %arg11: memref<8x82xf32, #tpu.memory_space<vmem>>) attributes {dimension_semantics = [#tpu.dimension_semantics<parallel>], iteration_bounds = array<i64: 2>, scalar_prefetch = 0 : i64, scratch_operands = 1 : i64, tpu.core_type = #tpu.core_type<tc>, window_params = [{transform_indices = @transform_0, window_bounds = array<i64: 1, 8, 82>}, {pipeline_mode = #tpu.pipeline_mode<synchronous>, transform_indices = @transform_1, window_bounds = array<i64: 7, 8, 8>}, {pipeline_mode = #tpu.pipeline_mode<synchronous>, transform_indices = @transform_2, window_bounds = array<i64: 8, 1>}, {pipeline_mode = #tpu.pipeline_mode<synchronous>, transform_indices = @transform_3, window_bounds = array<i64: 8, 1>}, {pipeline_mode = #tpu.pipeline_mode<synchronous>, transform_indices = @transform_4, window_bounds = array<i64: 8, 1>}, {pipeline_mode = #tpu.pipeline_mode<synchronous>, transform_indices = @transform_5, window_bounds = array<i64: 8, 8>}, {pipeline_mode = #tpu.pipeline_mode<synchronous>, transform_indices = @transform_6, window_bounds = array<i64: 8, 1>}, {pipeline_mode = #tpu.pipeline_mode<synchronous>, transform_indices = @transform_7, window_bounds = array<i64: 8, 1>}, {pipeline_mode = #tpu.pipeline_mode<synchronous>, transform_indices = @transform_8, window_bounds = array<i64: 8, 1>}, {transform_indices = @transform_9, window_bounds = array<i64: 1, 8, 64>}]} {
    %c0 = arith.constant 0 : index
    %c0_0 = arith.constant 0 : index
    %c0_1 = arith.constant 0 : index
    %0 = vector.load %arg1[%c0, %c0_0, %c0_1] : memref<1x8x82xf32, #tpu.memory_space<vmem>>, vector<1x8x82xf32>
    %1 = vector.shape_cast %0 : vector<1x8x82xf32> to vector<8x82xf32>
    %c0_2 = arith.constant 0 : index
    %c0_3 = arith.constant 0 : index
    %2 = vector.load %arg4[%c0_2, %c0_3] : memref<8x1xf32, #tpu.memory_space<vmem>>, vector<8x1xf32>
    %c0_4 = arith.constant 0 : index
    %c0_5 = arith.constant 0 : index
    %3 = vector.load %arg5[%c0_4, %c0_5] : memref<8x1xf32, #tpu.memory_space<vmem>>, vector<8x1xf32>
    %4 = vector.broadcast %2 : vector<8x1xf32> to vector<8x82xf32>
    %5 = arith.mulf %4, %1 : vector<8x82xf32>
    %6 = math.sin %5 : vector<8x82xf32>
    %7 = vector.broadcast %3 : vector<8x1xf32> to vector<8x82xf32>
    %8 = arith.mulf %7, %6 : vector<8x82xf32>
    %9 = arith.mulf %8, %6 : vector<8x82xf32>
    %10 = arith.addf %1, %9 : vector<8x82xf32>
    %c0_6 = arith.constant 0 : index
    %c0_7 = arith.constant 0 : index
    %11 = vector.load %arg11[%c0_6, %c0_7] : memref<8x82xf32, #tpu.memory_space<vmem>>, vector<8x82xf32>
    tpu.vector_store %arg11[%c0_6, %c0_7], %10 {strides = array<i32>} : memref<8x82xf32, #tpu.memory_space<vmem>>, vector<8x82xf32>,
    %cst = arith.constant 0.000000e+00 : f32
    %12 = vector.broadcast %cst : f32 to vector<8x64xf32>
    %c0_8 = arith.constant 0 : index
    %c0_9 = arith.constant 0 : index
    %c0_10 = arith.constant 0 : index
    %13 = vector.load %arg2[%c0_8, %c0_9, %c0_10] : memref<7x8x8xf32, #tpu.memory_space<vmem>>, vector<1x8x8xf32>
    %14 = vector.shape_cast %13 : vector<1x8x8xf32> to vector<8x8xf32>
    %c0_11 = arith.constant 0 : index
    %c0_12 = arith.constant 0 : index
    %15 = vector.load %arg11[%c0_11, %c0_12] : memref<8x82xf32, #tpu.memory_space<vmem>>, vector<8x64xf32>
    %cst_13 = arith.constant dense<0.000000e+00> : vector<8x64xf32>
    %16 = tpu.matmul %14, %15, %cst_13 {dimension_numbers = #tpu.dot_dimension_numbers<[1], [0], [0], [1], [0, 0, 1, 1], [], []>} : vector<8x8xf32>, vector<8x64xf32>, vector<8x64xf32> -> vector<8x64xf32>
    %17 = arith.addf %12, %16 : vector<8x64xf32>
    %c1 = arith.constant 1 : index
    %c0_14 = arith.constant 0 : index
    %c0_15 = arith.constant 0 : index
    %18 = vector.load %arg2[%c1, %c0_14, %c0_15] : memref<7x8x8xf32, #tpu.memory_space<vmem>>, vector<1x8x8xf32>
    %19 = vector.shape_cast %18 : vector<1x8x8xf32> to vector<8x8xf32>
    %c0_16 = arith.constant 0 : index
    %c3 = arith.constant 3 : index
    %20 = vector.load %arg11[%c0_16, %c3] : memref<8x82xf32, #tpu.memory_space<vmem>>, vector<8x64xf32>
    %cst_17 = arith.constant dense<0.000000e+00> : vector<8x64xf32>
    %21 = tpu.matmul %19, %20, %cst_17 {dimension_numbers = #tpu.dot_dimension_numbers<[1], [0], [0], [1], [0, 0, 1, 1], [], []>} : vector<8x8xf32>, vector<8x64xf32>, vector<8x64xf32> -> vector<8x64xf32>
    %22 = arith.addf %17, %21 : vector<8x64xf32>
    %c2 = arith.constant 2 : index
    %c0_18 = arith.constant 0 : index
    %c0_19 = arith.constant 0 : index
    %23 = vector.load %arg2[%c2, %c0_18, %c0_19] : memref<7x8x8xf32, #tpu.memory_space<vmem>>, vector<1x8x8xf32>
    %24 = vector.shape_cast %23 : vector<1x8x8xf32> to vector<8x8xf32>
    %c0_20 = arith.constant 0 : index
    %c6 = arith.constant 6 : index
    %25 = vector.load %arg11[%c0_20, %c6] : memref<8x82xf32, #tpu.memory_space<vmem>>, vector<8x64xf32>
    %cst_21 = arith.constant dense<0.000000e+00> : vector<8x64xf32>
    %26 = tpu.matmul %24, %25, %cst_21 {dimension_numbers = #tpu.dot_dimension_numbers<[1], [0], [0], [1], [0, 0, 1, 1], [], []>} : vector<8x8xf32>, vector<8x64xf32>, vector<8x64xf32> -> vector<8x64xf32>
    %27 = arith.addf %22, %26 : vector<8x64xf32>
    %c3_22 = arith.constant 3 : index
    %c0_23 = arith.constant 0 : index
    %c0_24 = arith.constant 0 : index
    %28 = vector.load %arg2[%c3_22, %c0_23, %c0_24] : memref<7x8x8xf32, #tpu.memory_space<vmem>>, vector<1x8x8xf32>
    %29 = vector.shape_cast %28 : vector<1x8x8xf32> to vector<8x8xf32>
    %c0_25 = arith.constant 0 : index
    %c9 = arith.constant 9 : index
    %30 = vector.load %arg11[%c0_25, %c9] : memref<8x82xf32, #tpu.memory_space<vmem>>, vector<8x64xf32>
    %cst_26 = arith.constant dense<0.000000e+00> : vector<8x64xf32>
    %31 = tpu.matmul %29, %30, %cst_26 {dimension_numbers = #tpu.dot_dimension_numbers<[1], [0], [0], [1], [0, 0, 1, 1], [], []>} : vector<8x8xf32>, vector<8x64xf32>, vector<8x64xf32> -> vector<8x64xf32>
    %32 = arith.addf %27, %31 : vector<8x64xf32>
    %c4 = arith.constant 4 : index
    %c0_27 = arith.constant 0 : index
    %c0_28 = arith.constant 0 : index
    %33 = vector.load %arg2[%c4, %c0_27, %c0_28] : memref<7x8x8xf32, #tpu.memory_space<vmem>>, vector<1x8x8xf32>
    %34 = vector.shape_cast %33 : vector<1x8x8xf32> to vector<8x8xf32>
    %c0_29 = arith.constant 0 : index
    %c12 = arith.constant 12 : index
    %35 = vector.load %arg11[%c0_29, %c12] : memref<8x82xf32, #tpu.memory_space<vmem>>, vector<8x64xf32>
    %cst_30 = arith.constant dense<0.000000e+00> : vector<8x64xf32>
    %36 = tpu.matmul %34, %35, %cst_30 {dimension_numbers = #tpu.dot_dimension_numbers<[1], [0], [0], [1], [0, 0, 1, 1], [], []>} : vector<8x8xf32>, vector<8x64xf32>, vector<8x64xf32> -> vector<8x64xf32>
    %37 = arith.addf %32, %36 : vector<8x64xf32>
    %c5 = arith.constant 5 : index
    %c0_31 = arith.constant 0 : index
    %c0_32 = arith.constant 0 : index
    %38 = vector.load %arg2[%c5, %c0_31, %c0_32] : memref<7x8x8xf32, #tpu.memory_space<vmem>>, vector<1x8x8xf32>
    %39 = vector.shape_cast %38 : vector<1x8x8xf32> to vector<8x8xf32>
    %c0_33 = arith.constant 0 : index
    %c15 = arith.constant 15 : index
    %40 = vector.load %arg11[%c0_33, %c15] : memref<8x82xf32, #tpu.memory_space<vmem>>, vector<8x64xf32>
    %cst_34 = arith.constant dense<0.000000e+00> : vector<8x64xf32>
    %41 = tpu.matmul %39, %40, %cst_34 {dimension_numbers = #tpu.dot_dimension_numbers<[1], [0], [0], [1], [0, 0, 1, 1], [], []>} : vector<8x8xf32>, vector<8x64xf32>, vector<8x64xf32> -> vector<8x64xf32>
    %42 = arith.addf %37, %41 : vector<8x64xf32>
    %c6_35 = arith.constant 6 : index
    %c0_36 = arith.constant 0 : index
    %c0_37 = arith.constant 0 : index
    %43 = vector.load %arg2[%c6_35, %c0_36, %c0_37] : memref<7x8x8xf32, #tpu.memory_space<vmem>>, vector<1x8x8xf32>
    %44 = vector.shape_cast %43 : vector<1x8x8xf32> to vector<8x8xf32>
    %c0_38 = arith.constant 0 : index
    %c18 = arith.constant 18 : index
    %45 = vector.load %arg11[%c0_38, %c18] : memref<8x82xf32, #tpu.memory_space<vmem>>, vector<8x64xf32>
    %cst_39 = arith.constant dense<0.000000e+00> : vector<8x64xf32>
    %46 = tpu.matmul %44, %45, %cst_39 {dimension_numbers = #tpu.dot_dimension_numbers<[1], [0], [0], [1], [0, 0, 1, 1], [], []>} : vector<8x8xf32>, vector<8x64xf32>, vector<8x64xf32> -> vector<8x64xf32>
    %47 = arith.addf %42, %46 : vector<8x64xf32>
    %c0_40 = arith.constant 0 : index
    %c0_41 = arith.constant 0 : index
    %48 = vector.load %arg3[%c0_40, %c0_41] : memref<8x1xf32, #tpu.memory_space<vmem>>, vector<8x1xf32>
    %49 = vector.broadcast %48 : vector<8x1xf32> to vector<8x64xf32>
    %50 = arith.addf %47, %49 : vector<8x64xf32>
    %c0_42 = arith.constant 0 : index
    %c0_43 = arith.constant 0 : index
    %51 = vector.load %arg8[%c0_42, %c0_43] : memref<8x1xf32, #tpu.memory_space<vmem>>, vector<8x1xf32>
    %52 = vector.broadcast %51 : vector<8x1xf32> to vector<8x64xf32>
    %53 = arith.mulf %52, %50 : vector<8x64xf32>
    %54 = math.sin %53 : vector<8x64xf32>
    %c0_44 = arith.constant 0 : index
    %c0_45 = arith.constant 0 : index
    %55 = vector.load %arg9[%c0_44, %c0_45] : memref<8x1xf32, #tpu.memory_space<vmem>>, vector<8x1xf32>
    %56 = vector.broadcast %55 : vector<8x1xf32> to vector<8x64xf32>
    %57 = arith.mulf %56, %54 : vector<8x64xf32>
    %58 = arith.mulf %57, %54 : vector<8x64xf32>
    %59 = arith.addf %50, %58 : vector<8x64xf32>
    %c0_46 = arith.constant 0 : index
    %c0_47 = arith.constant 0 : index
    %60 = vector.load %arg6[%c0_46, %c0_47] : memref<8x8xf32, #tpu.memory_space<vmem>>, vector<8x8xf32>
    %cst_48 = arith.constant dense<0.000000e+00> : vector<8x64xf32>
    %61 = tpu.matmul %60, %59, %cst_48 {dimension_numbers = #tpu.dot_dimension_numbers<[1], [0], [0], [1], [0, 0, 1, 1], [], []>} : vector<8x8xf32>, vector<8x64xf32>, vector<8x64xf32> -> vector<8x64xf32>
    %c0_49 = arith.constant 0 : index
    %c0_50 = arith.constant 0 : index
    %62 = vector.load %arg7[%c0_49, %c0_50] : memref<8x1xf32, #tpu.memory_space<vmem>>, vector<8x1xf32>
    %63 = vector.broadcast %62 : vector<8x1xf32> to vector<8x64xf32>
    %64 = arith.addf %61, %63 : vector<8x64xf32>
    %65 = vector.extract_strided_slice %1 {offsets = [0, 9], sizes = [8, 64], strides = [1, 1]} : vector<8x82xf32> to vector<8x64xf32>
    %66 = arith.addf %65, %64 : vector<8x64xf32>
    %c0_51 = arith.constant 0 : index
    %c0_52 = arith.constant 0 : index
    %c0_53 = arith.constant 0 : index
    %67 = vector.load %arg10[%c0_51, %c0_52, %c0_53] : memref<1x8x64xf32, #tpu.memory_space<vmem>>, vector<1x8x64xf32>
    %68 = vector.shape_cast %67 : vector<1x8x64xf32> to vector<8x64xf32>
    %69 = vector.shape_cast %66 : vector<8x64xf32> to vector<1x8x64xf32>
    tpu.vector_store %arg10[%c0_51, %c0_52, %c0_53], %69 {strides = array<i32>} : memref<1x8x64xf32, #tpu.memory_space<vmem>>, vector<1x8x64xf32>,
    return
  }
  func.func @transform_0(%arg0: i32) -> (i32, i32, i32) {
    %c0_i32 = arith.constant 0 : i32
    %c0_i32_0 = arith.constant 0 : i32
    %c0_i32_1 = arith.constant 0 : i32
    return %arg0, %c0_i32, %c0_i32_0 : i32, i32, i32
  }
  func.func @transform_1(%arg0: i32) -> (i32, i32, i32) {
    %c0_i32 = arith.constant 0 : i32
    %c0_i32_0 = arith.constant 0 : i32
    %c0_i32_1 = arith.constant 0 : i32
    %c0_i32_2 = arith.constant 0 : i32
    return %c0_i32, %c0_i32_0, %c0_i32_1 : i32, i32, i32
  }
  func.func @transform_2(%arg0: i32) -> (i32, i32) {
    %c0_i32 = arith.constant 0 : i32
    %c0_i32_0 = arith.constant 0 : i32
    %c0_i32_1 = arith.constant 0 : i32
    return %c0_i32, %c0_i32_0 : i32, i32
  }
  func.func @transform_3(%arg0: i32) -> (i32, i32) {
    %c0_i32 = arith.constant 0 : i32
    %c0_i32_0 = arith.constant 0 : i32
    %c0_i32_1 = arith.constant 0 : i32
    return %c0_i32, %c0_i32_0 : i32, i32
  }
  func.func @transform_4(%arg0: i32) -> (i32, i32) {
    %c0_i32 = arith.constant 0 : i32
    %c0_i32_0 = arith.constant 0 : i32
    %c0_i32_1 = arith.constant 0 : i32
    return %c0_i32, %c0_i32_0 : i32, i32
  }
  func.func @transform_5(%arg0: i32) -> (i32, i32) {
    %c0_i32 = arith.constant 0 : i32
    %c0_i32_0 = arith.constant 0 : i32
    %c0_i32_1 = arith.constant 0 : i32
    return %c0_i32, %c0_i32_0 : i32, i32
  }
  func.func @transform_6(%arg0: i32) -> (i32, i32) {
    %c0_i32 = arith.constant 0 : i32
    %c0_i32_0 = arith.constant 0 : i32
    %c0_i32_1 = arith.constant 0 : i32
    return %c0_i32, %c0_i32_0 : i32, i32
  }
  func.func @transform_7(%arg0: i32) -> (i32, i32) {
    %c0_i32 = arith.constant 0 : i32
    %c0_i32_0 = arith.constant 0 : i32
    %c0_i32_1 = arith.constant 0 : i32
    return %c0_i32, %c0_i32_0 : i32, i32
  }
  func.func @transform_8(%arg0: i32) -> (i32, i32) {
    %c0_i32 = arith.constant 0 : i32
    %c0_i32_0 = arith.constant 0 : i32
    %c0_i32_1 = arith.constant 0 : i32
    return %c0_i32, %c0_i32_0 : i32, i32
  }
  func.func @transform_9(%arg0: i32) -> (i32, i32, i32) {
    %c0_i32 = arith.constant 0 : i32
    %c0_i32_0 = arith.constant 0 : i32
    %c0_i32_1 = arith.constant 0 : i32
    return %arg0, %c0_i32, %c0_i32_0 : i32, i32, i32
  }
}

module attributes {stable_mosaic.version = 11 : i64} {
  func.func @kernel(%arg0: i32, %arg1: memref<1x8x118xf32, #tpu.memory_space<vmem>>, %arg2: memref<7x8x8xf32, #tpu.memory_space<vmem>>, %arg3: memref<8x1xf32, #tpu.memory_space<vmem>>, %arg4: memref<8x1xf32, #tpu.memory_space<vmem>>, %arg5: memref<8x1xf32, #tpu.memory_space<vmem>>, %arg6: memref<8x8xf32, #tpu.memory_space<vmem>>, %arg7: memref<8x1xf32, #tpu.memory_space<vmem>>, %arg8: memref<8x1xf32, #tpu.memory_space<vmem>>, %arg9: memref<8x1xf32, #tpu.memory_space<vmem>>, %arg10: memref<8x1xf32, #tpu.memory_space<vmem>>, %arg11: memref<8x1xf32, #tpu.memory_space<vmem>>, %arg12: memref<1x8x64xf32, #tpu.memory_space<vmem>>, %arg13: memref<8x118xf32, #tpu.memory_space<vmem>>) attributes {dimension_semantics = [#tpu.dimension_semantics<parallel>], iteration_bounds = array<i64: 2>, scalar_prefetch = 0 : i64, scratch_operands = 1 : i64, tpu.core_type = #tpu.core_type<tc>, window_params = [{transform_indices = @transform_0, window_bounds = array<i64: 1, 8, 118>}, {pipeline_mode = #tpu.pipeline_mode<synchronous>, transform_indices = @transform_1, window_bounds = array<i64: 7, 8, 8>}, {pipeline_mode = #tpu.pipeline_mode<synchronous>, transform_indices = @transform_2, window_bounds = array<i64: 8, 1>}, {pipeline_mode = #tpu.pipeline_mode<synchronous>, transform_indices = @transform_3, window_bounds = array<i64: 8, 1>}, {pipeline_mode = #tpu.pipeline_mode<synchronous>, transform_indices = @transform_4, window_bounds = array<i64: 8, 1>}, {pipeline_mode = #tpu.pipeline_mode<synchronous>, transform_indices = @transform_5, window_bounds = array<i64: 8, 8>}, {pipeline_mode = #tpu.pipeline_mode<synchronous>, transform_indices = @transform_6, window_bounds = array<i64: 8, 1>}, {pipeline_mode = #tpu.pipeline_mode<synchronous>, transform_indices = @transform_7, window_bounds = array<i64: 8, 1>}, {pipeline_mode = #tpu.pipeline_mode<synchronous>, transform_indices = @transform_8, window_bounds = array<i64: 8, 1>}, {pipeline_mode = #tpu.pipeline_mode<synchronous>, transform_indices = @transform_9, window_bounds = array<i64: 8, 1>}, {pipeline_mode = #tpu.pipeline_mode<synchronous>, transform_indices = @transform_10, window_bounds = array<i64: 8, 1>}, {transform_indices = @transform_11, window_bounds = array<i64: 1, 8, 64>}]} {
    %c0 = arith.constant 0 : index
    %c0_0 = arith.constant 0 : index
    %c0_1 = arith.constant 0 : index
    %0 = vector.load %arg1[%c0, %c0_0, %c0_1] : memref<1x8x118xf32, #tpu.memory_space<vmem>>, vector<1x8x118xf32>
    %1 = vector.shape_cast %0 : vector<1x8x118xf32> to vector<8x118xf32>
    %c0_2 = arith.constant 0 : index
    %c0_3 = arith.constant 0 : index
    %2 = vector.load %arg4[%c0_2, %c0_3] : memref<8x1xf32, #tpu.memory_space<vmem>>, vector<8x1xf32>
    %c0_4 = arith.constant 0 : index
    %c0_5 = arith.constant 0 : index
    %3 = vector.load %arg5[%c0_4, %c0_5] : memref<8x1xf32, #tpu.memory_space<vmem>>, vector<8x1xf32>
    %4 = vector.broadcast %2 : vector<8x1xf32> to vector<8x118xf32>
    %5 = arith.mulf %4, %1 : vector<8x118xf32>
    %6 = math.sin %5 : vector<8x118xf32>
    %7 = vector.broadcast %3 : vector<8x1xf32> to vector<8x118xf32>
    %8 = arith.mulf %7, %6 : vector<8x118xf32>
    %9 = arith.mulf %8, %6 : vector<8x118xf32>
    %10 = arith.addf %1, %9 : vector<8x118xf32>
    %c0_6 = arith.constant 0 : index
    %c0_7 = arith.constant 0 : index
    %11 = vector.load %arg13[%c0_6, %c0_7] : memref<8x118xf32, #tpu.memory_space<vmem>>, vector<8x118xf32>
    tpu.vector_store %arg13[%c0_6, %c0_7], %10 {strides = array<i32>} : memref<8x118xf32, #tpu.memory_space<vmem>>, vector<8x118xf32>,
    %cst = arith.constant 0.000000e+00 : f32
    %12 = vector.broadcast %cst : f32 to vector<8x64xf32>
    %c0_8 = arith.constant 0 : index
    %c0_9 = arith.constant 0 : index
    %c0_10 = arith.constant 0 : index
    %13 = vector.load %arg2[%c0_8, %c0_9, %c0_10] : memref<7x8x8xf32, #tpu.memory_space<vmem>>, vector<1x8x8xf32>
    %14 = vector.shape_cast %13 : vector<1x8x8xf32> to vector<8x8xf32>
    %c0_11 = arith.constant 0 : index
    %c0_12 = arith.constant 0 : index
    %15 = vector.load %arg13[%c0_11, %c0_12] : memref<8x118xf32, #tpu.memory_space<vmem>>, vector<8x64xf32>
    %cst_13 = arith.constant dense<0.000000e+00> : vector<8x64xf32>
    %16 = tpu.matmul %14, %15, %cst_13 {dimension_numbers = #tpu.dot_dimension_numbers<[1], [0], [0], [1], [0, 0, 1, 1], [], []>} : vector<8x8xf32>, vector<8x64xf32>, vector<8x64xf32> -> vector<8x64xf32>
    %17 = arith.addf %12, %16 : vector<8x64xf32>
    %c1 = arith.constant 1 : index
    %c0_14 = arith.constant 0 : index
    %c0_15 = arith.constant 0 : index
    %18 = vector.load %arg2[%c1, %c0_14, %c0_15] : memref<7x8x8xf32, #tpu.memory_space<vmem>>, vector<1x8x8xf32>
    %19 = vector.shape_cast %18 : vector<1x8x8xf32> to vector<8x8xf32>
    %c0_16 = arith.constant 0 : index
    %c9 = arith.constant 9 : index
    %20 = vector.load %arg13[%c0_16, %c9] : memref<8x118xf32, #tpu.memory_space<vmem>>, vector<8x64xf32>
    %cst_17 = arith.constant dense<0.000000e+00> : vector<8x64xf32>
    %21 = tpu.matmul %19, %20, %cst_17 {dimension_numbers = #tpu.dot_dimension_numbers<[1], [0], [0], [1], [0, 0, 1, 1], [], []>} : vector<8x8xf32>, vector<8x64xf32>, vector<8x64xf32> -> vector<8x64xf32>
    %22 = arith.addf %17, %21 : vector<8x64xf32>
    %c2 = arith.constant 2 : index
    %c0_18 = arith.constant 0 : index
    %c0_19 = arith.constant 0 : index
    %23 = vector.load %arg2[%c2, %c0_18, %c0_19] : memref<7x8x8xf32, #tpu.memory_space<vmem>>, vector<1x8x8xf32>
    %24 = vector.shape_cast %23 : vector<1x8x8xf32> to vector<8x8xf32>
    %c0_20 = arith.constant 0 : index
    %c18 = arith.constant 18 : index
    %25 = vector.load %arg13[%c0_20, %c18] : memref<8x118xf32, #tpu.memory_space<vmem>>, vector<8x64xf32>
    %cst_21 = arith.constant dense<0.000000e+00> : vector<8x64xf32>
    %26 = tpu.matmul %24, %25, %cst_21 {dimension_numbers = #tpu.dot_dimension_numbers<[1], [0], [0], [1], [0, 0, 1, 1], [], []>} : vector<8x8xf32>, vector<8x64xf32>, vector<8x64xf32> -> vector<8x64xf32>
    %27 = arith.addf %22, %26 : vector<8x64xf32>
    %c3 = arith.constant 3 : index
    %c0_22 = arith.constant 0 : index
    %c0_23 = arith.constant 0 : index
    %28 = vector.load %arg2[%c3, %c0_22, %c0_23] : memref<7x8x8xf32, #tpu.memory_space<vmem>>, vector<1x8x8xf32>
    %29 = vector.shape_cast %28 : vector<1x8x8xf32> to vector<8x8xf32>
    %c0_24 = arith.constant 0 : index
    %c27 = arith.constant 27 : index
    %30 = vector.load %arg13[%c0_24, %c27] : memref<8x118xf32, #tpu.memory_space<vmem>>, vector<8x64xf32>
    %cst_25 = arith.constant dense<0.000000e+00> : vector<8x64xf32>
    %31 = tpu.matmul %29, %30, %cst_25 {dimension_numbers = #tpu.dot_dimension_numbers<[1], [0], [0], [1], [0, 0, 1, 1], [], []>} : vector<8x8xf32>, vector<8x64xf32>, vector<8x64xf32> -> vector<8x64xf32>
    %32 = arith.addf %27, %31 : vector<8x64xf32>
    %c4 = arith.constant 4 : index
    %c0_26 = arith.constant 0 : index
    %c0_27 = arith.constant 0 : index
    %33 = vector.load %arg2[%c4, %c0_26, %c0_27] : memref<7x8x8xf32, #tpu.memory_space<vmem>>, vector<1x8x8xf32>
    %34 = vector.shape_cast %33 : vector<1x8x8xf32> to vector<8x8xf32>
    %c0_28 = arith.constant 0 : index
    %c36 = arith.constant 36 : index
    %35 = vector.load %arg13[%c0_28, %c36] : memref<8x118xf32, #tpu.memory_space<vmem>>, vector<8x64xf32>
    %cst_29 = arith.constant dense<0.000000e+00> : vector<8x64xf32>
    %36 = tpu.matmul %34, %35, %cst_29 {dimension_numbers = #tpu.dot_dimension_numbers<[1], [0], [0], [1], [0, 0, 1, 1], [], []>} : vector<8x8xf32>, vector<8x64xf32>, vector<8x64xf32> -> vector<8x64xf32>
    %37 = arith.addf %32, %36 : vector<8x64xf32>
    %c5 = arith.constant 5 : index
    %c0_30 = arith.constant 0 : index
    %c0_31 = arith.constant 0 : index
    %38 = vector.load %arg2[%c5, %c0_30, %c0_31] : memref<7x8x8xf32, #tpu.memory_space<vmem>>, vector<1x8x8xf32>
    %39 = vector.shape_cast %38 : vector<1x8x8xf32> to vector<8x8xf32>
    %c0_32 = arith.constant 0 : index
    %c45 = arith.constant 45 : index
    %40 = vector.load %arg13[%c0_32, %c45] : memref<8x118xf32, #tpu.memory_space<vmem>>, vector<8x64xf32>
    %cst_33 = arith.constant dense<0.000000e+00> : vector<8x64xf32>
    %41 = tpu.matmul %39, %40, %cst_33 {dimension_numbers = #tpu.dot_dimension_numbers<[1], [0], [0], [1], [0, 0, 1, 1], [], []>} : vector<8x8xf32>, vector<8x64xf32>, vector<8x64xf32> -> vector<8x64xf32>
    %42 = arith.addf %37, %41 : vector<8x64xf32>
    %c6 = arith.constant 6 : index
    %c0_34 = arith.constant 0 : index
    %c0_35 = arith.constant 0 : index
    %43 = vector.load %arg2[%c6, %c0_34, %c0_35] : memref<7x8x8xf32, #tpu.memory_space<vmem>>, vector<1x8x8xf32>
    %44 = vector.shape_cast %43 : vector<1x8x8xf32> to vector<8x8xf32>
    %c0_36 = arith.constant 0 : index
    %c54 = arith.constant 54 : index
    %45 = vector.load %arg13[%c0_36, %c54] : memref<8x118xf32, #tpu.memory_space<vmem>>, vector<8x64xf32>
    %cst_37 = arith.constant dense<0.000000e+00> : vector<8x64xf32>
    %46 = tpu.matmul %44, %45, %cst_37 {dimension_numbers = #tpu.dot_dimension_numbers<[1], [0], [0], [1], [0, 0, 1, 1], [], []>} : vector<8x8xf32>, vector<8x64xf32>, vector<8x64xf32> -> vector<8x64xf32>
    %47 = arith.addf %42, %46 : vector<8x64xf32>
    %c0_38 = arith.constant 0 : index
    %c0_39 = arith.constant 0 : index
    %48 = vector.load %arg3[%c0_38, %c0_39] : memref<8x1xf32, #tpu.memory_space<vmem>>, vector<8x1xf32>
    %49 = vector.broadcast %48 : vector<8x1xf32> to vector<8x64xf32>
    %50 = arith.addf %47, %49 : vector<8x64xf32>
    %c0_40 = arith.constant 0 : index
    %c0_41 = arith.constant 0 : index
    %51 = vector.load %arg8[%c0_40, %c0_41] : memref<8x1xf32, #tpu.memory_space<vmem>>, vector<8x1xf32>
    %52 = vector.broadcast %51 : vector<8x1xf32> to vector<8x64xf32>
    %53 = arith.mulf %52, %50 : vector<8x64xf32>
    %54 = math.sin %53 : vector<8x64xf32>
    %c0_42 = arith.constant 0 : index
    %c0_43 = arith.constant 0 : index
    %55 = vector.load %arg9[%c0_42, %c0_43] : memref<8x1xf32, #tpu.memory_space<vmem>>, vector<8x1xf32>
    %56 = vector.broadcast %55 : vector<8x1xf32> to vector<8x64xf32>
    %57 = arith.mulf %56, %54 : vector<8x64xf32>
    %58 = arith.mulf %57, %54 : vector<8x64xf32>
    %59 = arith.addf %50, %58 : vector<8x64xf32>
    %c0_44 = arith.constant 0 : index
    %c0_45 = arith.constant 0 : index
    %60 = vector.load %arg6[%c0_44, %c0_45] : memref<8x8xf32, #tpu.memory_space<vmem>>, vector<8x8xf32>
    %cst_46 = arith.constant dense<0.000000e+00> : vector<8x64xf32>
    %61 = tpu.matmul %60, %59, %cst_46 {dimension_numbers = #tpu.dot_dimension_numbers<[1], [0], [0], [1], [0, 0, 1, 1], [], []>} : vector<8x8xf32>, vector<8x64xf32>, vector<8x64xf32> -> vector<8x64xf32>
    %c0_47 = arith.constant 0 : index
    %c0_48 = arith.constant 0 : index
    %62 = vector.load %arg7[%c0_47, %c0_48] : memref<8x1xf32, #tpu.memory_space<vmem>>, vector<8x1xf32>
    %63 = vector.broadcast %62 : vector<8x1xf32> to vector<8x64xf32>
    %64 = arith.addf %61, %63 : vector<8x64xf32>
    %65 = vector.extract_strided_slice %1 {offsets = [0, 27], sizes = [8, 64], strides = [1, 1]} : vector<8x118xf32> to vector<8x64xf32>
    %66 = arith.addf %65, %64 : vector<8x64xf32>
    %c0_49 = arith.constant 0 : index
    %c0_50 = arith.constant 0 : index
    %67 = vector.load %arg10[%c0_49, %c0_50] : memref<8x1xf32, #tpu.memory_space<vmem>>, vector<8x1xf32>
    %c0_51 = arith.constant 0 : index
    %c0_52 = arith.constant 0 : index
    %68 = vector.load %arg11[%c0_51, %c0_52] : memref<8x1xf32, #tpu.memory_space<vmem>>, vector<8x1xf32>
    %69 = vector.broadcast %67 : vector<8x1xf32> to vector<8x64xf32>
    %70 = arith.mulf %69, %66 : vector<8x64xf32>
    %71 = math.sin %70 : vector<8x64xf32>
    %72 = vector.broadcast %68 : vector<8x1xf32> to vector<8x64xf32>
    %73 = arith.mulf %72, %71 : vector<8x64xf32>
    %74 = arith.mulf %73, %71 : vector<8x64xf32>
    %75 = arith.addf %66, %74 : vector<8x64xf32>
    %c0_53 = arith.constant 0 : index
    %c0_54 = arith.constant 0 : index
    %c0_55 = arith.constant 0 : index
    %76 = vector.load %arg12[%c0_53, %c0_54, %c0_55] : memref<1x8x64xf32, #tpu.memory_space<vmem>>, vector<1x8x64xf32>
    %77 = vector.shape_cast %76 : vector<1x8x64xf32> to vector<8x64xf32>
    %78 = vector.shape_cast %75 : vector<8x64xf32> to vector<1x8x64xf32>
    tpu.vector_store %arg12[%c0_53, %c0_54, %c0_55], %78 {strides = array<i32>} : memref<1x8x64xf32, #tpu.memory_space<vmem>>, vector<1x8x64xf32>,
    return
  }
  func.func @transform_0(%arg0: i32) -> (i32, i32, i32) {
    %c0_i32 = arith.constant 0 : i32
    %c0_i32_0 = arith.constant 0 : i32
    %c0_i32_1 = arith.constant 0 : i32
    return %arg0, %c0_i32, %c0_i32_0 : i32, i32, i32
  }
  func.func @transform_1(%arg0: i32) -> (i32, i32, i32) {
    %c0_i32 = arith.constant 0 : i32
    %c0_i32_0 = arith.constant 0 : i32
    %c0_i32_1 = arith.constant 0 : i32
    %c0_i32_2 = arith.constant 0 : i32
    return %c0_i32, %c0_i32_0, %c0_i32_1 : i32, i32, i32
  }
  func.func @transform_2(%arg0: i32) -> (i32, i32) {
    %c0_i32 = arith.constant 0 : i32
    %c0_i32_0 = arith.constant 0 : i32
    %c0_i32_1 = arith.constant 0 : i32
    return %c0_i32, %c0_i32_0 : i32, i32
  }
  func.func @transform_3(%arg0: i32) -> (i32, i32) {
    %c0_i32 = arith.constant 0 : i32
    %c0_i32_0 = arith.constant 0 : i32
    %c0_i32_1 = arith.constant 0 : i32
    return %c0_i32, %c0_i32_0 : i32, i32
  }
  func.func @transform_4(%arg0: i32) -> (i32, i32) {
    %c0_i32 = arith.constant 0 : i32
    %c0_i32_0 = arith.constant 0 : i32
    %c0_i32_1 = arith.constant 0 : i32
    return %c0_i32, %c0_i32_0 : i32, i32
  }
  func.func @transform_5(%arg0: i32) -> (i32, i32) {
    %c0_i32 = arith.constant 0 : i32
    %c0_i32_0 = arith.constant 0 : i32
    %c0_i32_1 = arith.constant 0 : i32
    return %c0_i32, %c0_i32_0 : i32, i32
  }
  func.func @transform_6(%arg0: i32) -> (i32, i32) {
    %c0_i32 = arith.constant 0 : i32
    %c0_i32_0 = arith.constant 0 : i32
    %c0_i32_1 = arith.constant 0 : i32
    return %c0_i32, %c0_i32_0 : i32, i32
  }
  func.func @transform_7(%arg0: i32) -> (i32, i32) {
    %c0_i32 = arith.constant 0 : i32
    %c0_i32_0 = arith.constant 0 : i32
    %c0_i32_1 = arith.constant 0 : i32
    return %c0_i32, %c0_i32_0 : i32, i32
  }
  func.func @transform_8(%arg0: i32) -> (i32, i32) {
    %c0_i32 = arith.constant 0 : i32
    %c0_i32_0 = arith.constant 0 : i32
    %c0_i32_1 = arith.constant 0 : i32
    return %c0_i32, %c0_i32_0 : i32, i32
  }
  func.func @transform_9(%arg0: i32) -> (i32, i32) {
    %c0_i32 = arith.constant 0 : i32
    %c0_i32_0 = arith.constant 0 : i32
    %c0_i32_1 = arith.constant 0 : i32
    return %c0_i32, %c0_i32_0 : i32, i32
  }
  func.func @transform_10(%arg0: i32) -> (i32, i32) {
    %c0_i32 = arith.constant 0 : i32
    %c0_i32_0 = arith.constant 0 : i32
    %c0_i32_1 = arith.constant 0 : i32
    return %c0_i32, %c0_i32_0 : i32, i32
  }
  func.func @transform_11(%arg0: i32) -> (i32, i32, i32) {
    %c0_i32 = arith.constant 0 : i32
    %c0_i32_0 = arith.constant 0 : i32
    %c0_i32_1 = arith.constant 0 : i32
    return %arg0, %c0_i32, %c0_i32_0 : i32, i32, i32
  }
}

module attributes {stable_mosaic.version = 11 : i64} {
  func.func @kernel(%arg0: i32, %arg1: memref<8x16xf32, #tpu.memory_space<vmem>>, %arg2: memref<8x1xf32, #tpu.memory_space<vmem>>, %arg3: memref<16x128xf32, #tpu.memory_space<vmem>>, %arg4: memref<8x128xf32, #tpu.memory_space<vmem>>) attributes {dimension_semantics = [#tpu.dimension_semantics<parallel>], iteration_bounds = array<i64: 1>, scalar_prefetch = 0 : i64, scratch_operands = 0 : i64, tpu.core_type = #tpu.core_type<tc>, window_params = [{pipeline_mode = #tpu.pipeline_mode<synchronous>, transform_indices = @transform_0, window_bounds = array<i64: 8, 16>}, {pipeline_mode = #tpu.pipeline_mode<synchronous>, transform_indices = @transform_1, window_bounds = array<i64: 8, 1>}, {transform_indices = @transform_2, window_bounds = array<i64: 16, 128>}, {transform_indices = @transform_3, window_bounds = array<i64: 8, 128>}]} {
    %c0 = arith.constant 0 : index
    %c0_0 = arith.constant 0 : index
    %0 = vector.load %arg1[%c0, %c0_0] : memref<8x16xf32, #tpu.memory_space<vmem>>, vector<8x16xf32>
    %c0_1 = arith.constant 0 : index
    %c0_2 = arith.constant 0 : index
    %1 = vector.load %arg3[%c0_1, %c0_2] : memref<16x128xf32, #tpu.memory_space<vmem>>, vector<16x128xf32>
    %cst = arith.constant dense<0.000000e+00> : vector<8x128xf32>
    %2 = tpu.matmul %0, %1, %cst {dimension_numbers = #tpu.dot_dimension_numbers<[1], [0], [0], [1], [0, 0, 1, 1], [], []>} : vector<8x16xf32>, vector<16x128xf32>, vector<8x128xf32> -> vector<8x128xf32>
    %c0_3 = arith.constant 0 : index
    %c0_4 = arith.constant 0 : index
    %3 = vector.load %arg2[%c0_3, %c0_4] : memref<8x1xf32, #tpu.memory_space<vmem>>, vector<8x1xf32>
    %4 = vector.broadcast %3 : vector<8x1xf32> to vector<8x128xf32>
    %5 = arith.addf %2, %4 : vector<8x128xf32>
    %c0_5 = arith.constant 0 : index
    %c0_6 = arith.constant 0 : index
    %6 = vector.load %arg4[%c0_5, %c0_6] : memref<8x128xf32, #tpu.memory_space<vmem>>, vector<8x128xf32>
    tpu.vector_store %arg4[%c0_5, %c0_6], %5 {strides = array<i32>} : memref<8x128xf32, #tpu.memory_space<vmem>>, vector<8x128xf32>,
    return
  }
  func.func @transform_0(%arg0: i32) -> (i32, i32) {
    %c0_i32 = arith.constant 0 : i32
    %c0_i32_0 = arith.constant 0 : i32
    %c0_i32_1 = arith.constant 0 : i32
    return %c0_i32, %c0_i32_0 : i32, i32
  }
  func.func @transform_1(%arg0: i32) -> (i32, i32) {
    %c0_i32 = arith.constant 0 : i32
    %c0_i32_0 = arith.constant 0 : i32
    %c0_i32_1 = arith.constant 0 : i32
    return %c0_i32, %c0_i32_0 : i32, i32
  }
  func.func @transform_2(%arg0: i32) -> (i32, i32) {
    %c0_i32 = arith.constant 0 : i32
    %c0_i32_0 = arith.constant 0 : i32
    return %c0_i32, %arg0 : i32, i32
  }
  func.func @transform_3(%arg0: i32) -> (i32, i32) {
    %c0_i32 = arith.constant 0 : i32
    %c0_i32_0 = arith.constant 0 : i32
    return %c0_i32, %arg0 : i32, i32
  }
}

module attributes {stable_mosaic.version = 11 : i64} {
  func.func @kernel(%arg0: i32, %arg1: memref<1x8x38xf32, #tpu.memory_space<vmem>>, %arg2: memref<7x8x8xf32, #tpu.memory_space<vmem>>, %arg3: memref<8x1xf32, #tpu.memory_space<vmem>>, %arg4: memref<8x1xf32, #tpu.memory_space<vmem>>, %arg5: memref<8x1xf32, #tpu.memory_space<vmem>>, %arg6: memref<8x8xf32, #tpu.memory_space<vmem>>, %arg7: memref<8x1xf32, #tpu.memory_space<vmem>>, %arg8: memref<8x1xf32, #tpu.memory_space<vmem>>, %arg9: memref<8x1xf32, #tpu.memory_space<vmem>>, %arg10: memref<1x8x32xf32, #tpu.memory_space<vmem>>, %arg11: memref<8x38xf32, #tpu.memory_space<vmem>>) attributes {dimension_semantics = [#tpu.dimension_semantics<parallel>], iteration_bounds = array<i64: 2>, scalar_prefetch = 0 : i64, scratch_operands = 1 : i64, tpu.core_type = #tpu.core_type<tc>, window_params = [{transform_indices = @transform_0, window_bounds = array<i64: 1, 8, 38>}, {pipeline_mode = #tpu.pipeline_mode<synchronous>, transform_indices = @transform_1, window_bounds = array<i64: 7, 8, 8>}, {pipeline_mode = #tpu.pipeline_mode<synchronous>, transform_indices = @transform_2, window_bounds = array<i64: 8, 1>}, {pipeline_mode = #tpu.pipeline_mode<synchronous>, transform_indices = @transform_3, window_bounds = array<i64: 8, 1>}, {pipeline_mode = #tpu.pipeline_mode<synchronous>, transform_indices = @transform_4, window_bounds = array<i64: 8, 1>}, {pipeline_mode = #tpu.pipeline_mode<synchronous>, transform_indices = @transform_5, window_bounds = array<i64: 8, 8>}, {pipeline_mode = #tpu.pipeline_mode<synchronous>, transform_indices = @transform_6, window_bounds = array<i64: 8, 1>}, {pipeline_mode = #tpu.pipeline_mode<synchronous>, transform_indices = @transform_7, window_bounds = array<i64: 8, 1>}, {pipeline_mode = #tpu.pipeline_mode<synchronous>, transform_indices = @transform_8, window_bounds = array<i64: 8, 1>}, {transform_indices = @transform_9, window_bounds = array<i64: 1, 8, 32>}]} {
    %c0 = arith.constant 0 : index
    %c0_0 = arith.constant 0 : index
    %c0_1 = arith.constant 0 : index
    %0 = vector.load %arg1[%c0, %c0_0, %c0_1] : memref<1x8x38xf32, #tpu.memory_space<vmem>>, vector<1x8x38xf32>
    %1 = vector.shape_cast %0 : vector<1x8x38xf32> to vector<8x38xf32>
    %c0_2 = arith.constant 0 : index
    %c0_3 = arith.constant 0 : index
    %2 = vector.load %arg4[%c0_2, %c0_3] : memref<8x1xf32, #tpu.memory_space<vmem>>, vector<8x1xf32>
    %c0_4 = arith.constant 0 : index
    %c0_5 = arith.constant 0 : index
    %3 = vector.load %arg5[%c0_4, %c0_5] : memref<8x1xf32, #tpu.memory_space<vmem>>, vector<8x1xf32>
    %4 = vector.broadcast %2 : vector<8x1xf32> to vector<8x38xf32>
    %5 = arith.mulf %4, %1 : vector<8x38xf32>
    %6 = math.sin %5 : vector<8x38xf32>
    %7 = vector.broadcast %3 : vector<8x1xf32> to vector<8x38xf32>
    %8 = arith.mulf %7, %6 : vector<8x38xf32>
    %9 = arith.mulf %8, %6 : vector<8x38xf32>
    %10 = arith.addf %1, %9 : vector<8x38xf32>
    %c0_6 = arith.constant 0 : index
    %c0_7 = arith.constant 0 : index
    %11 = vector.load %arg11[%c0_6, %c0_7] : memref<8x38xf32, #tpu.memory_space<vmem>>, vector<8x38xf32>
    tpu.vector_store %arg11[%c0_6, %c0_7], %10 {strides = array<i32>} : memref<8x38xf32, #tpu.memory_space<vmem>>, vector<8x38xf32>,
    %cst = arith.constant 0.000000e+00 : f32
    %12 = vector.broadcast %cst : f32 to vector<8x32xf32>
    %c0_8 = arith.constant 0 : index
    %c0_9 = arith.constant 0 : index
    %c0_10 = arith.constant 0 : index
    %13 = vector.load %arg2[%c0_8, %c0_9, %c0_10] : memref<7x8x8xf32, #tpu.memory_space<vmem>>, vector<1x8x8xf32>
    %14 = vector.shape_cast %13 : vector<1x8x8xf32> to vector<8x8xf32>
    %c0_11 = arith.constant 0 : index
    %c0_12 = arith.constant 0 : index
    %15 = vector.load %arg11[%c0_11, %c0_12] : memref<8x38xf32, #tpu.memory_space<vmem>>, vector<8x32xf32>
    %cst_13 = arith.constant dense<0.000000e+00> : vector<8x32xf32>
    %16 = tpu.matmul %14, %15, %cst_13 {dimension_numbers = #tpu.dot_dimension_numbers<[1], [0], [0], [1], [0, 0, 1, 1], [], []>} : vector<8x8xf32>, vector<8x32xf32>, vector<8x32xf32> -> vector<8x32xf32>
    %17 = arith.addf %12, %16 : vector<8x32xf32>
    %c1 = arith.constant 1 : index
    %c0_14 = arith.constant 0 : index
    %c0_15 = arith.constant 0 : index
    %18 = vector.load %arg2[%c1, %c0_14, %c0_15] : memref<7x8x8xf32, #tpu.memory_space<vmem>>, vector<1x8x8xf32>
    %19 = vector.shape_cast %18 : vector<1x8x8xf32> to vector<8x8xf32>
    %c0_16 = arith.constant 0 : index
    %c1_17 = arith.constant 1 : index
    %20 = vector.load %arg11[%c0_16, %c1_17] : memref<8x38xf32, #tpu.memory_space<vmem>>, vector<8x32xf32>
    %cst_18 = arith.constant dense<0.000000e+00> : vector<8x32xf32>
    %21 = tpu.matmul %19, %20, %cst_18 {dimension_numbers = #tpu.dot_dimension_numbers<[1], [0], [0], [1], [0, 0, 1, 1], [], []>} : vector<8x8xf32>, vector<8x32xf32>, vector<8x32xf32> -> vector<8x32xf32>
    %22 = arith.addf %17, %21 : vector<8x32xf32>
    %c2 = arith.constant 2 : index
    %c0_19 = arith.constant 0 : index
    %c0_20 = arith.constant 0 : index
    %23 = vector.load %arg2[%c2, %c0_19, %c0_20] : memref<7x8x8xf32, #tpu.memory_space<vmem>>, vector<1x8x8xf32>
    %24 = vector.shape_cast %23 : vector<1x8x8xf32> to vector<8x8xf32>
    %c0_21 = arith.constant 0 : index
    %c2_22 = arith.constant 2 : index
    %25 = vector.load %arg11[%c0_21, %c2_22] : memref<8x38xf32, #tpu.memory_space<vmem>>, vector<8x32xf32>
    %cst_23 = arith.constant dense<0.000000e+00> : vector<8x32xf32>
    %26 = tpu.matmul %24, %25, %cst_23 {dimension_numbers = #tpu.dot_dimension_numbers<[1], [0], [0], [1], [0, 0, 1, 1], [], []>} : vector<8x8xf32>, vector<8x32xf32>, vector<8x32xf32> -> vector<8x32xf32>
    %27 = arith.addf %22, %26 : vector<8x32xf32>
    %c3 = arith.constant 3 : index
    %c0_24 = arith.constant 0 : index
    %c0_25 = arith.constant 0 : index
    %28 = vector.load %arg2[%c3, %c0_24, %c0_25] : memref<7x8x8xf32, #tpu.memory_space<vmem>>, vector<1x8x8xf32>
    %29 = vector.shape_cast %28 : vector<1x8x8xf32> to vector<8x8xf32>
    %c0_26 = arith.constant 0 : index
    %c3_27 = arith.constant 3 : index
    %30 = vector.load %arg11[%c0_26, %c3_27] : memref<8x38xf32, #tpu.memory_space<vmem>>, vector<8x32xf32>
    %cst_28 = arith.constant dense<0.000000e+00> : vector<8x32xf32>
    %31 = tpu.matmul %29, %30, %cst_28 {dimension_numbers = #tpu.dot_dimension_numbers<[1], [0], [0], [1], [0, 0, 1, 1], [], []>} : vector<8x8xf32>, vector<8x32xf32>, vector<8x32xf32> -> vector<8x32xf32>
    %32 = arith.addf %27, %31 : vector<8x32xf32>
    %c4 = arith.constant 4 : index
    %c0_29 = arith.constant 0 : index
    %c0_30 = arith.constant 0 : index
    %33 = vector.load %arg2[%c4, %c0_29, %c0_30] : memref<7x8x8xf32, #tpu.memory_space<vmem>>, vector<1x8x8xf32>
    %34 = vector.shape_cast %33 : vector<1x8x8xf32> to vector<8x8xf32>
    %c0_31 = arith.constant 0 : index
    %c4_32 = arith.constant 4 : index
    %35 = vector.load %arg11[%c0_31, %c4_32] : memref<8x38xf32, #tpu.memory_space<vmem>>, vector<8x32xf32>
    %cst_33 = arith.constant dense<0.000000e+00> : vector<8x32xf32>
    %36 = tpu.matmul %34, %35, %cst_33 {dimension_numbers = #tpu.dot_dimension_numbers<[1], [0], [0], [1], [0, 0, 1, 1], [], []>} : vector<8x8xf32>, vector<8x32xf32>, vector<8x32xf32> -> vector<8x32xf32>
    %37 = arith.addf %32, %36 : vector<8x32xf32>
    %c5 = arith.constant 5 : index
    %c0_34 = arith.constant 0 : index
    %c0_35 = arith.constant 0 : index
    %38 = vector.load %arg2[%c5, %c0_34, %c0_35] : memref<7x8x8xf32, #tpu.memory_space<vmem>>, vector<1x8x8xf32>
    %39 = vector.shape_cast %38 : vector<1x8x8xf32> to vector<8x8xf32>
    %c0_36 = arith.constant 0 : index
    %c5_37 = arith.constant 5 : index
    %40 = vector.load %arg11[%c0_36, %c5_37] : memref<8x38xf32, #tpu.memory_space<vmem>>, vector<8x32xf32>
    %cst_38 = arith.constant dense<0.000000e+00> : vector<8x32xf32>
    %41 = tpu.matmul %39, %40, %cst_38 {dimension_numbers = #tpu.dot_dimension_numbers<[1], [0], [0], [1], [0, 0, 1, 1], [], []>} : vector<8x8xf32>, vector<8x32xf32>, vector<8x32xf32> -> vector<8x32xf32>
    %42 = arith.addf %37, %41 : vector<8x32xf32>
    %c6 = arith.constant 6 : index
    %c0_39 = arith.constant 0 : index
    %c0_40 = arith.constant 0 : index
    %43 = vector.load %arg2[%c6, %c0_39, %c0_40] : memref<7x8x8xf32, #tpu.memory_space<vmem>>, vector<1x8x8xf32>
    %44 = vector.shape_cast %43 : vector<1x8x8xf32> to vector<8x8xf32>
    %c0_41 = arith.constant 0 : index
    %c6_42 = arith.constant 6 : index
    %45 = vector.load %arg11[%c0_41, %c6_42] : memref<8x38xf32, #tpu.memory_space<vmem>>, vector<8x32xf32>
    %cst_43 = arith.constant dense<0.000000e+00> : vector<8x32xf32>
    %46 = tpu.matmul %44, %45, %cst_43 {dimension_numbers = #tpu.dot_dimension_numbers<[1], [0], [0], [1], [0, 0, 1, 1], [], []>} : vector<8x8xf32>, vector<8x32xf32>, vector<8x32xf32> -> vector<8x32xf32>
    %47 = arith.addf %42, %46 : vector<8x32xf32>
    %c0_44 = arith.constant 0 : index
    %c0_45 = arith.constant 0 : index
    %48 = vector.load %arg3[%c0_44, %c0_45] : memref<8x1xf32, #tpu.memory_space<vmem>>, vector<8x1xf32>
    %49 = vector.broadcast %48 : vector<8x1xf32> to vector<8x32xf32>
    %50 = arith.addf %47, %49 : vector<8x32xf32>
    %c0_46 = arith.constant 0 : index
    %c0_47 = arith.constant 0 : index
    %51 = vector.load %arg8[%c0_46, %c0_47] : memref<8x1xf32, #tpu.memory_space<vmem>>, vector<8x1xf32>
    %52 = vector.broadcast %51 : vector<8x1xf32> to vector<8x32xf32>
    %53 = arith.mulf %52, %50 : vector<8x32xf32>
    %54 = math.sin %53 : vector<8x32xf32>
    %c0_48 = arith.constant 0 : index
    %c0_49 = arith.constant 0 : index
    %55 = vector.load %arg9[%c0_48, %c0_49] : memref<8x1xf32, #tpu.memory_space<vmem>>, vector<8x1xf32>
    %56 = vector.broadcast %55 : vector<8x1xf32> to vector<8x32xf32>
    %57 = arith.mulf %56, %54 : vector<8x32xf32>
    %58 = arith.mulf %57, %54 : vector<8x32xf32>
    %59 = arith.addf %50, %58 : vector<8x32xf32>
    %c0_50 = arith.constant 0 : index
    %c0_51 = arith.constant 0 : index
    %60 = vector.load %arg6[%c0_50, %c0_51] : memref<8x8xf32, #tpu.memory_space<vmem>>, vector<8x8xf32>
    %cst_52 = arith.constant dense<0.000000e+00> : vector<8x32xf32>
    %61 = tpu.matmul %60, %59, %cst_52 {dimension_numbers = #tpu.dot_dimension_numbers<[1], [0], [0], [1], [0, 0, 1, 1], [], []>} : vector<8x8xf32>, vector<8x32xf32>, vector<8x32xf32> -> vector<8x32xf32>
    %c0_53 = arith.constant 0 : index
    %c0_54 = arith.constant 0 : index
    %62 = vector.load %arg7[%c0_53, %c0_54] : memref<8x1xf32, #tpu.memory_space<vmem>>, vector<8x1xf32>
    %63 = vector.broadcast %62 : vector<8x1xf32> to vector<8x32xf32>
    %64 = arith.addf %61, %63 : vector<8x32xf32>
    %65 = vector.extract_strided_slice %1 {offsets = [0, 3], sizes = [8, 32], strides = [1, 1]} : vector<8x38xf32> to vector<8x32xf32>
    %66 = arith.addf %65, %64 : vector<8x32xf32>
    %c0_55 = arith.constant 0 : index
    %c0_56 = arith.constant 0 : index
    %c0_57 = arith.constant 0 : index
    %67 = vector.load %arg10[%c0_55, %c0_56, %c0_57] : memref<1x8x32xf32, #tpu.memory_space<vmem>>, vector<1x8x32xf32>
    %68 = vector.shape_cast %67 : vector<1x8x32xf32> to vector<8x32xf32>
    %69 = vector.shape_cast %66 : vector<8x32xf32> to vector<1x8x32xf32>
    tpu.vector_store %arg10[%c0_55, %c0_56, %c0_57], %69 {strides = array<i32>} : memref<1x8x32xf32, #tpu.memory_space<vmem>>, vector<1x8x32xf32>,
    return
  }
  func.func @transform_0(%arg0: i32) -> (i32, i32, i32) {
    %c0_i32 = arith.constant 0 : i32
    %c0_i32_0 = arith.constant 0 : i32
    %c0_i32_1 = arith.constant 0 : i32
    return %arg0, %c0_i32, %c0_i32_0 : i32, i32, i32
  }
  func.func @transform_1(%arg0: i32) -> (i32, i32, i32) {
    %c0_i32 = arith.constant 0 : i32
    %c0_i32_0 = arith.constant 0 : i32
    %c0_i32_1 = arith.constant 0 : i32
    %c0_i32_2 = arith.constant 0 : i32
    return %c0_i32, %c0_i32_0, %c0_i32_1 : i32, i32, i32
  }
  func.func @transform_2(%arg0: i32) -> (i32, i32) {
    %c0_i32 = arith.constant 0 : i32
    %c0_i32_0 = arith.constant 0 : i32
    %c0_i32_1 = arith.constant 0 : i32
    return %c0_i32, %c0_i32_0 : i32, i32
  }
  func.func @transform_3(%arg0: i32) -> (i32, i32) {
    %c0_i32 = arith.constant 0 : i32
    %c0_i32_0 = arith.constant 0 : i32
    %c0_i32_1 = arith.constant 0 : i32
    return %c0_i32, %c0_i32_0 : i32, i32
  }
  func.func @transform_4(%arg0: i32) -> (i32, i32) {
    %c0_i32 = arith.constant 0 : i32
    %c0_i32_0 = arith.constant 0 : i32
    %c0_i32_1 = arith.constant 0 : i32
    return %c0_i32, %c0_i32_0 : i32, i32
  }
  func.func @transform_5(%arg0: i32) -> (i32, i32) {
    %c0_i32 = arith.constant 0 : i32
    %c0_i32_0 = arith.constant 0 : i32
    %c0_i32_1 = arith.constant 0 : i32
    return %c0_i32, %c0_i32_0 : i32, i32
  }
  func.func @transform_6(%arg0: i32) -> (i32, i32) {
    %c0_i32 = arith.constant 0 : i32
    %c0_i32_0 = arith.constant 0 : i32
    %c0_i32_1 = arith.constant 0 : i32
    return %c0_i32, %c0_i32_0 : i32, i32
  }
  func.func @transform_7(%arg0: i32) -> (i32, i32) {
    %c0_i32 = arith.constant 0 : i32
    %c0_i32_0 = arith.constant 0 : i32
    %c0_i32_1 = arith.constant 0 : i32
    return %c0_i32, %c0_i32_0 : i32, i32
  }
  func.func @transform_8(%arg0: i32) -> (i32, i32) {
    %c0_i32 = arith.constant 0 : i32
    %c0_i32_0 = arith.constant 0 : i32
    %c0_i32_1 = arith.constant 0 : i32
    return %c0_i32, %c0_i32_0 : i32, i32
  }
  func.func @transform_9(%arg0: i32) -> (i32, i32, i32) {
    %c0_i32 = arith.constant 0 : i32
    %c0_i32_0 = arith.constant 0 : i32
    %c0_i32_1 = arith.constant 0 : i32
    return %arg0, %c0_i32, %c0_i32_0 : i32, i32, i32
  }
}

module attributes {stable_mosaic.version = 11 : i64} {
  func.func @kernel(%arg0: i32, %arg1: memref<1x8x50xf32, #tpu.memory_space<vmem>>, %arg2: memref<7x8x8xf32, #tpu.memory_space<vmem>>, %arg3: memref<8x1xf32, #tpu.memory_space<vmem>>, %arg4: memref<8x1xf32, #tpu.memory_space<vmem>>, %arg5: memref<8x1xf32, #tpu.memory_space<vmem>>, %arg6: memref<8x8xf32, #tpu.memory_space<vmem>>, %arg7: memref<8x1xf32, #tpu.memory_space<vmem>>, %arg8: memref<8x1xf32, #tpu.memory_space<vmem>>, %arg9: memref<8x1xf32, #tpu.memory_space<vmem>>, %arg10: memref<1x8x32xf32, #tpu.memory_space<vmem>>, %arg11: memref<8x50xf32, #tpu.memory_space<vmem>>) attributes {dimension_semantics = [#tpu.dimension_semantics<parallel>], iteration_bounds = array<i64: 2>, scalar_prefetch = 0 : i64, scratch_operands = 1 : i64, tpu.core_type = #tpu.core_type<tc>, window_params = [{transform_indices = @transform_0, window_bounds = array<i64: 1, 8, 50>}, {pipeline_mode = #tpu.pipeline_mode<synchronous>, transform_indices = @transform_1, window_bounds = array<i64: 7, 8, 8>}, {pipeline_mode = #tpu.pipeline_mode<synchronous>, transform_indices = @transform_2, window_bounds = array<i64: 8, 1>}, {pipeline_mode = #tpu.pipeline_mode<synchronous>, transform_indices = @transform_3, window_bounds = array<i64: 8, 1>}, {pipeline_mode = #tpu.pipeline_mode<synchronous>, transform_indices = @transform_4, window_bounds = array<i64: 8, 1>}, {pipeline_mode = #tpu.pipeline_mode<synchronous>, transform_indices = @transform_5, window_bounds = array<i64: 8, 8>}, {pipeline_mode = #tpu.pipeline_mode<synchronous>, transform_indices = @transform_6, window_bounds = array<i64: 8, 1>}, {pipeline_mode = #tpu.pipeline_mode<synchronous>, transform_indices = @transform_7, window_bounds = array<i64: 8, 1>}, {pipeline_mode = #tpu.pipeline_mode<synchronous>, transform_indices = @transform_8, window_bounds = array<i64: 8, 1>}, {transform_indices = @transform_9, window_bounds = array<i64: 1, 8, 32>}]} {
    %c0 = arith.constant 0 : index
    %c0_0 = arith.constant 0 : index
    %c0_1 = arith.constant 0 : index
    %0 = vector.load %arg1[%c0, %c0_0, %c0_1] : memref<1x8x50xf32, #tpu.memory_space<vmem>>, vector<1x8x50xf32>
    %1 = vector.shape_cast %0 : vector<1x8x50xf32> to vector<8x50xf32>
    %c0_2 = arith.constant 0 : index
    %c0_3 = arith.constant 0 : index
    %2 = vector.load %arg4[%c0_2, %c0_3] : memref<8x1xf32, #tpu.memory_space<vmem>>, vector<8x1xf32>
    %c0_4 = arith.constant 0 : index
    %c0_5 = arith.constant 0 : index
    %3 = vector.load %arg5[%c0_4, %c0_5] : memref<8x1xf32, #tpu.memory_space<vmem>>, vector<8x1xf32>
    %4 = vector.broadcast %2 : vector<8x1xf32> to vector<8x50xf32>
    %5 = arith.mulf %4, %1 : vector<8x50xf32>
    %6 = math.sin %5 : vector<8x50xf32>
    %7 = vector.broadcast %3 : vector<8x1xf32> to vector<8x50xf32>
    %8 = arith.mulf %7, %6 : vector<8x50xf32>
    %9 = arith.mulf %8, %6 : vector<8x50xf32>
    %10 = arith.addf %1, %9 : vector<8x50xf32>
    %c0_6 = arith.constant 0 : index
    %c0_7 = arith.constant 0 : index
    %11 = vector.load %arg11[%c0_6, %c0_7] : memref<8x50xf32, #tpu.memory_space<vmem>>, vector<8x50xf32>
    tpu.vector_store %arg11[%c0_6, %c0_7], %10 {strides = array<i32>} : memref<8x50xf32, #tpu.memory_space<vmem>>, vector<8x50xf32>,
    %cst = arith.constant 0.000000e+00 : f32
    %12 = vector.broadcast %cst : f32 to vector<8x32xf32>
    %c0_8 = arith.constant 0 : index
    %c0_9 = arith.constant 0 : index
    %c0_10 = arith.constant 0 : index
    %13 = vector.load %arg2[%c0_8, %c0_9, %c0_10] : memref<7x8x8xf32, #tpu.memory_space<vmem>>, vector<1x8x8xf32>
    %14 = vector.shape_cast %13 : vector<1x8x8xf32> to vector<8x8xf32>
    %c0_11 = arith.constant 0 : index
    %c0_12 = arith.constant 0 : index
    %15 = vector.load %arg11[%c0_11, %c0_12] : memref<8x50xf32, #tpu.memory_space<vmem>>, vector<8x32xf32>
    %cst_13 = arith.constant dense<0.000000e+00> : vector<8x32xf32>
    %16 = tpu.matmul %14, %15, %cst_13 {dimension_numbers = #tpu.dot_dimension_numbers<[1], [0], [0], [1], [0, 0, 1, 1], [], []>} : vector<8x8xf32>, vector<8x32xf32>, vector<8x32xf32> -> vector<8x32xf32>
    %17 = arith.addf %12, %16 : vector<8x32xf32>
    %c1 = arith.constant 1 : index
    %c0_14 = arith.constant 0 : index
    %c0_15 = arith.constant 0 : index
    %18 = vector.load %arg2[%c1, %c0_14, %c0_15] : memref<7x8x8xf32, #tpu.memory_space<vmem>>, vector<1x8x8xf32>
    %19 = vector.shape_cast %18 : vector<1x8x8xf32> to vector<8x8xf32>
    %c0_16 = arith.constant 0 : index
    %c3 = arith.constant 3 : index
    %20 = vector.load %arg11[%c0_16, %c3] : memref<8x50xf32, #tpu.memory_space<vmem>>, vector<8x32xf32>
    %cst_17 = arith.constant dense<0.000000e+00> : vector<8x32xf32>
    %21 = tpu.matmul %19, %20, %cst_17 {dimension_numbers = #tpu.dot_dimension_numbers<[1], [0], [0], [1], [0, 0, 1, 1], [], []>} : vector<8x8xf32>, vector<8x32xf32>, vector<8x32xf32> -> vector<8x32xf32>
    %22 = arith.addf %17, %21 : vector<8x32xf32>
    %c2 = arith.constant 2 : index
    %c0_18 = arith.constant 0 : index
    %c0_19 = arith.constant 0 : index
    %23 = vector.load %arg2[%c2, %c0_18, %c0_19] : memref<7x8x8xf32, #tpu.memory_space<vmem>>, vector<1x8x8xf32>
    %24 = vector.shape_cast %23 : vector<1x8x8xf32> to vector<8x8xf32>
    %c0_20 = arith.constant 0 : index
    %c6 = arith.constant 6 : index
    %25 = vector.load %arg11[%c0_20, %c6] : memref<8x50xf32, #tpu.memory_space<vmem>>, vector<8x32xf32>
    %cst_21 = arith.constant dense<0.000000e+00> : vector<8x32xf32>
    %26 = tpu.matmul %24, %25, %cst_21 {dimension_numbers = #tpu.dot_dimension_numbers<[1], [0], [0], [1], [0, 0, 1, 1], [], []>} : vector<8x8xf32>, vector<8x32xf32>, vector<8x32xf32> -> vector<8x32xf32>
    %27 = arith.addf %22, %26 : vector<8x32xf32>
    %c3_22 = arith.constant 3 : index
    %c0_23 = arith.constant 0 : index
    %c0_24 = arith.constant 0 : index
    %28 = vector.load %arg2[%c3_22, %c0_23, %c0_24] : memref<7x8x8xf32, #tpu.memory_space<vmem>>, vector<1x8x8xf32>
    %29 = vector.shape_cast %28 : vector<1x8x8xf32> to vector<8x8xf32>
    %c0_25 = arith.constant 0 : index
    %c9 = arith.constant 9 : index
    %30 = vector.load %arg11[%c0_25, %c9] : memref<8x50xf32, #tpu.memory_space<vmem>>, vector<8x32xf32>
    %cst_26 = arith.constant dense<0.000000e+00> : vector<8x32xf32>
    %31 = tpu.matmul %29, %30, %cst_26 {dimension_numbers = #tpu.dot_dimension_numbers<[1], [0], [0], [1], [0, 0, 1, 1], [], []>} : vector<8x8xf32>, vector<8x32xf32>, vector<8x32xf32> -> vector<8x32xf32>
    %32 = arith.addf %27, %31 : vector<8x32xf32>
    %c4 = arith.constant 4 : index
    %c0_27 = arith.constant 0 : index
    %c0_28 = arith.constant 0 : index
    %33 = vector.load %arg2[%c4, %c0_27, %c0_28] : memref<7x8x8xf32, #tpu.memory_space<vmem>>, vector<1x8x8xf32>
    %34 = vector.shape_cast %33 : vector<1x8x8xf32> to vector<8x8xf32>
    %c0_29 = arith.constant 0 : index
    %c12 = arith.constant 12 : index
    %35 = vector.load %arg11[%c0_29, %c12] : memref<8x50xf32, #tpu.memory_space<vmem>>, vector<8x32xf32>
    %cst_30 = arith.constant dense<0.000000e+00> : vector<8x32xf32>
    %36 = tpu.matmul %34, %35, %cst_30 {dimension_numbers = #tpu.dot_dimension_numbers<[1], [0], [0], [1], [0, 0, 1, 1], [], []>} : vector<8x8xf32>, vector<8x32xf32>, vector<8x32xf32> -> vector<8x32xf32>
    %37 = arith.addf %32, %36 : vector<8x32xf32>
    %c5 = arith.constant 5 : index
    %c0_31 = arith.constant 0 : index
    %c0_32 = arith.constant 0 : index
    %38 = vector.load %arg2[%c5, %c0_31, %c0_32] : memref<7x8x8xf32, #tpu.memory_space<vmem>>, vector<1x8x8xf32>
    %39 = vector.shape_cast %38 : vector<1x8x8xf32> to vector<8x8xf32>
    %c0_33 = arith.constant 0 : index
    %c15 = arith.constant 15 : index
    %40 = vector.load %arg11[%c0_33, %c15] : memref<8x50xf32, #tpu.memory_space<vmem>>, vector<8x32xf32>
    %cst_34 = arith.constant dense<0.000000e+00> : vector<8x32xf32>
    %41 = tpu.matmul %39, %40, %cst_34 {dimension_numbers = #tpu.dot_dimension_numbers<[1], [0], [0], [1], [0, 0, 1, 1], [], []>} : vector<8x8xf32>, vector<8x32xf32>, vector<8x32xf32> -> vector<8x32xf32>
    %42 = arith.addf %37, %41 : vector<8x32xf32>
    %c6_35 = arith.constant 6 : index
    %c0_36 = arith.constant 0 : index
    %c0_37 = arith.constant 0 : index
    %43 = vector.load %arg2[%c6_35, %c0_36, %c0_37] : memref<7x8x8xf32, #tpu.memory_space<vmem>>, vector<1x8x8xf32>
    %44 = vector.shape_cast %43 : vector<1x8x8xf32> to vector<8x8xf32>
    %c0_38 = arith.constant 0 : index
    %c18 = arith.constant 18 : index
    %45 = vector.load %arg11[%c0_38, %c18] : memref<8x50xf32, #tpu.memory_space<vmem>>, vector<8x32xf32>
    %cst_39 = arith.constant dense<0.000000e+00> : vector<8x32xf32>
    %46 = tpu.matmul %44, %45, %cst_39 {dimension_numbers = #tpu.dot_dimension_numbers<[1], [0], [0], [1], [0, 0, 1, 1], [], []>} : vector<8x8xf32>, vector<8x32xf32>, vector<8x32xf32> -> vector<8x32xf32>
    %47 = arith.addf %42, %46 : vector<8x32xf32>
    %c0_40 = arith.constant 0 : index
    %c0_41 = arith.constant 0 : index
    %48 = vector.load %arg3[%c0_40, %c0_41] : memref<8x1xf32, #tpu.memory_space<vmem>>, vector<8x1xf32>
    %49 = vector.broadcast %48 : vector<8x1xf32> to vector<8x32xf32>
    %50 = arith.addf %47, %49 : vector<8x32xf32>
    %c0_42 = arith.constant 0 : index
    %c0_43 = arith.constant 0 : index
    %51 = vector.load %arg8[%c0_42, %c0_43] : memref<8x1xf32, #tpu.memory_space<vmem>>, vector<8x1xf32>
    %52 = vector.broadcast %51 : vector<8x1xf32> to vector<8x32xf32>
    %53 = arith.mulf %52, %50 : vector<8x32xf32>
    %54 = math.sin %53 : vector<8x32xf32>
    %c0_44 = arith.constant 0 : index
    %c0_45 = arith.constant 0 : index
    %55 = vector.load %arg9[%c0_44, %c0_45] : memref<8x1xf32, #tpu.memory_space<vmem>>, vector<8x1xf32>
    %56 = vector.broadcast %55 : vector<8x1xf32> to vector<8x32xf32>
    %57 = arith.mulf %56, %54 : vector<8x32xf32>
    %58 = arith.mulf %57, %54 : vector<8x32xf32>
    %59 = arith.addf %50, %58 : vector<8x32xf32>
    %c0_46 = arith.constant 0 : index
    %c0_47 = arith.constant 0 : index
    %60 = vector.load %arg6[%c0_46, %c0_47] : memref<8x8xf32, #tpu.memory_space<vmem>>, vector<8x8xf32>
    %cst_48 = arith.constant dense<0.000000e+00> : vector<8x32xf32>
    %61 = tpu.matmul %60, %59, %cst_48 {dimension_numbers = #tpu.dot_dimension_numbers<[1], [0], [0], [1], [0, 0, 1, 1], [], []>} : vector<8x8xf32>, vector<8x32xf32>, vector<8x32xf32> -> vector<8x32xf32>
    %c0_49 = arith.constant 0 : index
    %c0_50 = arith.constant 0 : index
    %62 = vector.load %arg7[%c0_49, %c0_50] : memref<8x1xf32, #tpu.memory_space<vmem>>, vector<8x1xf32>
    %63 = vector.broadcast %62 : vector<8x1xf32> to vector<8x32xf32>
    %64 = arith.addf %61, %63 : vector<8x32xf32>
    %65 = vector.extract_strided_slice %1 {offsets = [0, 9], sizes = [8, 32], strides = [1, 1]} : vector<8x50xf32> to vector<8x32xf32>
    %66 = arith.addf %65, %64 : vector<8x32xf32>
    %c0_51 = arith.constant 0 : index
    %c0_52 = arith.constant 0 : index
    %c0_53 = arith.constant 0 : index
    %67 = vector.load %arg10[%c0_51, %c0_52, %c0_53] : memref<1x8x32xf32, #tpu.memory_space<vmem>>, vector<1x8x32xf32>
    %68 = vector.shape_cast %67 : vector<1x8x32xf32> to vector<8x32xf32>
    %69 = vector.shape_cast %66 : vector<8x32xf32> to vector<1x8x32xf32>
    tpu.vector_store %arg10[%c0_51, %c0_52, %c0_53], %69 {strides = array<i32>} : memref<1x8x32xf32, #tpu.memory_space<vmem>>, vector<1x8x32xf32>,
    return
  }
  func.func @transform_0(%arg0: i32) -> (i32, i32, i32) {
    %c0_i32 = arith.constant 0 : i32
    %c0_i32_0 = arith.constant 0 : i32
    %c0_i32_1 = arith.constant 0 : i32
    return %arg0, %c0_i32, %c0_i32_0 : i32, i32, i32
  }
  func.func @transform_1(%arg0: i32) -> (i32, i32, i32) {
    %c0_i32 = arith.constant 0 : i32
    %c0_i32_0 = arith.constant 0 : i32
    %c0_i32_1 = arith.constant 0 : i32
    %c0_i32_2 = arith.constant 0 : i32
    return %c0_i32, %c0_i32_0, %c0_i32_1 : i32, i32, i32
  }
  func.func @transform_2(%arg0: i32) -> (i32, i32) {
    %c0_i32 = arith.constant 0 : i32
    %c0_i32_0 = arith.constant 0 : i32
    %c0_i32_1 = arith.constant 0 : i32
    return %c0_i32, %c0_i32_0 : i32, i32
  }
  func.func @transform_3(%arg0: i32) -> (i32, i32) {
    %c0_i32 = arith.constant 0 : i32
    %c0_i32_0 = arith.constant 0 : i32
    %c0_i32_1 = arith.constant 0 : i32
    return %c0_i32, %c0_i32_0 : i32, i32
  }
  func.func @transform_4(%arg0: i32) -> (i32, i32) {
    %c0_i32 = arith.constant 0 : i32
    %c0_i32_0 = arith.constant 0 : i32
    %c0_i32_1 = arith.constant 0 : i32
    return %c0_i32, %c0_i32_0 : i32, i32
  }
  func.func @transform_5(%arg0: i32) -> (i32, i32) {
    %c0_i32 = arith.constant 0 : i32
    %c0_i32_0 = arith.constant 0 : i32
    %c0_i32_1 = arith.constant 0 : i32
    return %c0_i32, %c0_i32_0 : i32, i32
  }
  func.func @transform_6(%arg0: i32) -> (i32, i32) {
    %c0_i32 = arith.constant 0 : i32
    %c0_i32_0 = arith.constant 0 : i32
    %c0_i32_1 = arith.constant 0 : i32
    return %c0_i32, %c0_i32_0 : i32, i32
  }
  func.func @transform_7(%arg0: i32) -> (i32, i32) {
    %c0_i32 = arith.constant 0 : i32
    %c0_i32_0 = arith.constant 0 : i32
    %c0_i32_1 = arith.constant 0 : i32
    return %c0_i32, %c0_i32_0 : i32, i32
  }
  func.func @transform_8(%arg0: i32) -> (i32, i32) {
    %c0_i32 = arith.constant 0 : i32
    %c0_i32_0 = arith.constant 0 : i32
    %c0_i32_1 = arith.constant 0 : i32
    return %c0_i32, %c0_i32_0 : i32, i32
  }
  func.func @transform_9(%arg0: i32) -> (i32, i32, i32) {
    %c0_i32 = arith.constant 0 : i32
    %c0_i32_0 = arith.constant 0 : i32
    %c0_i32_1 = arith.constant 0 : i32
    return %arg0, %c0_i32, %c0_i32_0 : i32, i32, i32
  }
}

module attributes {stable_mosaic.version = 11 : i64} {
  func.func @kernel(%arg0: i32, %arg1: memref<1x8x86xf32, #tpu.memory_space<vmem>>, %arg2: memref<7x8x8xf32, #tpu.memory_space<vmem>>, %arg3: memref<8x1xf32, #tpu.memory_space<vmem>>, %arg4: memref<8x1xf32, #tpu.memory_space<vmem>>, %arg5: memref<8x1xf32, #tpu.memory_space<vmem>>, %arg6: memref<8x8xf32, #tpu.memory_space<vmem>>, %arg7: memref<8x1xf32, #tpu.memory_space<vmem>>, %arg8: memref<8x1xf32, #tpu.memory_space<vmem>>, %arg9: memref<8x1xf32, #tpu.memory_space<vmem>>, %arg10: memref<8x1xf32, #tpu.memory_space<vmem>>, %arg11: memref<8x1xf32, #tpu.memory_space<vmem>>, %arg12: memref<1x8x32xf32, #tpu.memory_space<vmem>>, %arg13: memref<8x86xf32, #tpu.memory_space<vmem>>) attributes {dimension_semantics = [#tpu.dimension_semantics<parallel>], iteration_bounds = array<i64: 2>, scalar_prefetch = 0 : i64, scratch_operands = 1 : i64, tpu.core_type = #tpu.core_type<tc>, window_params = [{transform_indices = @transform_0, window_bounds = array<i64: 1, 8, 86>}, {pipeline_mode = #tpu.pipeline_mode<synchronous>, transform_indices = @transform_1, window_bounds = array<i64: 7, 8, 8>}, {pipeline_mode = #tpu.pipeline_mode<synchronous>, transform_indices = @transform_2, window_bounds = array<i64: 8, 1>}, {pipeline_mode = #tpu.pipeline_mode<synchronous>, transform_indices = @transform_3, window_bounds = array<i64: 8, 1>}, {pipeline_mode = #tpu.pipeline_mode<synchronous>, transform_indices = @transform_4, window_bounds = array<i64: 8, 1>}, {pipeline_mode = #tpu.pipeline_mode<synchronous>, transform_indices = @transform_5, window_bounds = array<i64: 8, 8>}, {pipeline_mode = #tpu.pipeline_mode<synchronous>, transform_indices = @transform_6, window_bounds = array<i64: 8, 1>}, {pipeline_mode = #tpu.pipeline_mode<synchronous>, transform_indices = @transform_7, window_bounds = array<i64: 8, 1>}, {pipeline_mode = #tpu.pipeline_mode<synchronous>, transform_indices = @transform_8, window_bounds = array<i64: 8, 1>}, {pipeline_mode = #tpu.pipeline_mode<synchronous>, transform_indices = @transform_9, window_bounds = array<i64: 8, 1>}, {pipeline_mode = #tpu.pipeline_mode<synchronous>, transform_indices = @transform_10, window_bounds = array<i64: 8, 1>}, {transform_indices = @transform_11, window_bounds = array<i64: 1, 8, 32>}]} {
    %c0 = arith.constant 0 : index
    %c0_0 = arith.constant 0 : index
    %c0_1 = arith.constant 0 : index
    %0 = vector.load %arg1[%c0, %c0_0, %c0_1] : memref<1x8x86xf32, #tpu.memory_space<vmem>>, vector<1x8x86xf32>
    %1 = vector.shape_cast %0 : vector<1x8x86xf32> to vector<8x86xf32>
    %c0_2 = arith.constant 0 : index
    %c0_3 = arith.constant 0 : index
    %2 = vector.load %arg4[%c0_2, %c0_3] : memref<8x1xf32, #tpu.memory_space<vmem>>, vector<8x1xf32>
    %c0_4 = arith.constant 0 : index
    %c0_5 = arith.constant 0 : index
    %3 = vector.load %arg5[%c0_4, %c0_5] : memref<8x1xf32, #tpu.memory_space<vmem>>, vector<8x1xf32>
    %4 = vector.broadcast %2 : vector<8x1xf32> to vector<8x86xf32>
    %5 = arith.mulf %4, %1 : vector<8x86xf32>
    %6 = math.sin %5 : vector<8x86xf32>
    %7 = vector.broadcast %3 : vector<8x1xf32> to vector<8x86xf32>
    %8 = arith.mulf %7, %6 : vector<8x86xf32>
    %9 = arith.mulf %8, %6 : vector<8x86xf32>
    %10 = arith.addf %1, %9 : vector<8x86xf32>
    %c0_6 = arith.constant 0 : index
    %c0_7 = arith.constant 0 : index
    %11 = vector.load %arg13[%c0_6, %c0_7] : memref<8x86xf32, #tpu.memory_space<vmem>>, vector<8x86xf32>
    tpu.vector_store %arg13[%c0_6, %c0_7], %10 {strides = array<i32>} : memref<8x86xf32, #tpu.memory_space<vmem>>, vector<8x86xf32>,
    %cst = arith.constant 0.000000e+00 : f32
    %12 = vector.broadcast %cst : f32 to vector<8x32xf32>
    %c0_8 = arith.constant 0 : index
    %c0_9 = arith.constant 0 : index
    %c0_10 = arith.constant 0 : index
    %13 = vector.load %arg2[%c0_8, %c0_9, %c0_10] : memref<7x8x8xf32, #tpu.memory_space<vmem>>, vector<1x8x8xf32>
    %14 = vector.shape_cast %13 : vector<1x8x8xf32> to vector<8x8xf32>
    %c0_11 = arith.constant 0 : index
    %c0_12 = arith.constant 0 : index
    %15 = vector.load %arg13[%c0_11, %c0_12] : memref<8x86xf32, #tpu.memory_space<vmem>>, vector<8x32xf32>
    %cst_13 = arith.constant dense<0.000000e+00> : vector<8x32xf32>
    %16 = tpu.matmul %14, %15, %cst_13 {dimension_numbers = #tpu.dot_dimension_numbers<[1], [0], [0], [1], [0, 0, 1, 1], [], []>} : vector<8x8xf32>, vector<8x32xf32>, vector<8x32xf32> -> vector<8x32xf32>
    %17 = arith.addf %12, %16 : vector<8x32xf32>
    %c1 = arith.constant 1 : index
    %c0_14 = arith.constant 0 : index
    %c0_15 = arith.constant 0 : index
    %18 = vector.load %arg2[%c1, %c0_14, %c0_15] : memref<7x8x8xf32, #tpu.memory_space<vmem>>, vector<1x8x8xf32>
    %19 = vector.shape_cast %18 : vector<1x8x8xf32> to vector<8x8xf32>
    %c0_16 = arith.constant 0 : index
    %c9 = arith.constant 9 : index
    %20 = vector.load %arg13[%c0_16, %c9] : memref<8x86xf32, #tpu.memory_space<vmem>>, vector<8x32xf32>
    %cst_17 = arith.constant dense<0.000000e+00> : vector<8x32xf32>
    %21 = tpu.matmul %19, %20, %cst_17 {dimension_numbers = #tpu.dot_dimension_numbers<[1], [0], [0], [1], [0, 0, 1, 1], [], []>} : vector<8x8xf32>, vector<8x32xf32>, vector<8x32xf32> -> vector<8x32xf32>
    %22 = arith.addf %17, %21 : vector<8x32xf32>
    %c2 = arith.constant 2 : index
    %c0_18 = arith.constant 0 : index
    %c0_19 = arith.constant 0 : index
    %23 = vector.load %arg2[%c2, %c0_18, %c0_19] : memref<7x8x8xf32, #tpu.memory_space<vmem>>, vector<1x8x8xf32>
    %24 = vector.shape_cast %23 : vector<1x8x8xf32> to vector<8x8xf32>
    %c0_20 = arith.constant 0 : index
    %c18 = arith.constant 18 : index
    %25 = vector.load %arg13[%c0_20, %c18] : memref<8x86xf32, #tpu.memory_space<vmem>>, vector<8x32xf32>
    %cst_21 = arith.constant dense<0.000000e+00> : vector<8x32xf32>
    %26 = tpu.matmul %24, %25, %cst_21 {dimension_numbers = #tpu.dot_dimension_numbers<[1], [0], [0], [1], [0, 0, 1, 1], [], []>} : vector<8x8xf32>, vector<8x32xf32>, vector<8x32xf32> -> vector<8x32xf32>
    %27 = arith.addf %22, %26 : vector<8x32xf32>
    %c3 = arith.constant 3 : index
    %c0_22 = arith.constant 0 : index
    %c0_23 = arith.constant 0 : index
    %28 = vector.load %arg2[%c3, %c0_22, %c0_23] : memref<7x8x8xf32, #tpu.memory_space<vmem>>, vector<1x8x8xf32>
    %29 = vector.shape_cast %28 : vector<1x8x8xf32> to vector<8x8xf32>
    %c0_24 = arith.constant 0 : index
    %c27 = arith.constant 27 : index
    %30 = vector.load %arg13[%c0_24, %c27] : memref<8x86xf32, #tpu.memory_space<vmem>>, vector<8x32xf32>
    %cst_25 = arith.constant dense<0.000000e+00> : vector<8x32xf32>
    %31 = tpu.matmul %29, %30, %cst_25 {dimension_numbers = #tpu.dot_dimension_numbers<[1], [0], [0], [1], [0, 0, 1, 1], [], []>} : vector<8x8xf32>, vector<8x32xf32>, vector<8x32xf32> -> vector<8x32xf32>
    %32 = arith.addf %27, %31 : vector<8x32xf32>
    %c4 = arith.constant 4 : index
    %c0_26 = arith.constant 0 : index
    %c0_27 = arith.constant 0 : index
    %33 = vector.load %arg2[%c4, %c0_26, %c0_27] : memref<7x8x8xf32, #tpu.memory_space<vmem>>, vector<1x8x8xf32>
    %34 = vector.shape_cast %33 : vector<1x8x8xf32> to vector<8x8xf32>
    %c0_28 = arith.constant 0 : index
    %c36 = arith.constant 36 : index
    %35 = vector.load %arg13[%c0_28, %c36] : memref<8x86xf32, #tpu.memory_space<vmem>>, vector<8x32xf32>
    %cst_29 = arith.constant dense<0.000000e+00> : vector<8x32xf32>
    %36 = tpu.matmul %34, %35, %cst_29 {dimension_numbers = #tpu.dot_dimension_numbers<[1], [0], [0], [1], [0, 0, 1, 1], [], []>} : vector<8x8xf32>, vector<8x32xf32>, vector<8x32xf32> -> vector<8x32xf32>
    %37 = arith.addf %32, %36 : vector<8x32xf32>
    %c5 = arith.constant 5 : index
    %c0_30 = arith.constant 0 : index
    %c0_31 = arith.constant 0 : index
    %38 = vector.load %arg2[%c5, %c0_30, %c0_31] : memref<7x8x8xf32, #tpu.memory_space<vmem>>, vector<1x8x8xf32>
    %39 = vector.shape_cast %38 : vector<1x8x8xf32> to vector<8x8xf32>
    %c0_32 = arith.constant 0 : index
    %c45 = arith.constant 45 : index
    %40 = vector.load %arg13[%c0_32, %c45] : memref<8x86xf32, #tpu.memory_space<vmem>>, vector<8x32xf32>
    %cst_33 = arith.constant dense<0.000000e+00> : vector<8x32xf32>
    %41 = tpu.matmul %39, %40, %cst_33 {dimension_numbers = #tpu.dot_dimension_numbers<[1], [0], [0], [1], [0, 0, 1, 1], [], []>} : vector<8x8xf32>, vector<8x32xf32>, vector<8x32xf32> -> vector<8x32xf32>
    %42 = arith.addf %37, %41 : vector<8x32xf32>
    %c6 = arith.constant 6 : index
    %c0_34 = arith.constant 0 : index
    %c0_35 = arith.constant 0 : index
    %43 = vector.load %arg2[%c6, %c0_34, %c0_35] : memref<7x8x8xf32, #tpu.memory_space<vmem>>, vector<1x8x8xf32>
    %44 = vector.shape_cast %43 : vector<1x8x8xf32> to vector<8x8xf32>
    %c0_36 = arith.constant 0 : index
    %c54 = arith.constant 54 : index
    %45 = vector.load %arg13[%c0_36, %c54] : memref<8x86xf32, #tpu.memory_space<vmem>>, vector<8x32xf32>
    %cst_37 = arith.constant dense<0.000000e+00> : vector<8x32xf32>
    %46 = tpu.matmul %44, %45, %cst_37 {dimension_numbers = #tpu.dot_dimension_numbers<[1], [0], [0], [1], [0, 0, 1, 1], [], []>} : vector<8x8xf32>, vector<8x32xf32>, vector<8x32xf32> -> vector<8x32xf32>
    %47 = arith.addf %42, %46 : vector<8x32xf32>
    %c0_38 = arith.constant 0 : index
    %c0_39 = arith.constant 0 : index
    %48 = vector.load %arg3[%c0_38, %c0_39] : memref<8x1xf32, #tpu.memory_space<vmem>>, vector<8x1xf32>
    %49 = vector.broadcast %48 : vector<8x1xf32> to vector<8x32xf32>
    %50 = arith.addf %47, %49 : vector<8x32xf32>
    %c0_40 = arith.constant 0 : index
    %c0_41 = arith.constant 0 : index
    %51 = vector.load %arg8[%c0_40, %c0_41] : memref<8x1xf32, #tpu.memory_space<vmem>>, vector<8x1xf32>
    %52 = vector.broadcast %51 : vector<8x1xf32> to vector<8x32xf32>
    %53 = arith.mulf %52, %50 : vector<8x32xf32>
    %54 = math.sin %53 : vector<8x32xf32>
    %c0_42 = arith.constant 0 : index
    %c0_43 = arith.constant 0 : index
    %55 = vector.load %arg9[%c0_42, %c0_43] : memref<8x1xf32, #tpu.memory_space<vmem>>, vector<8x1xf32>
    %56 = vector.broadcast %55 : vector<8x1xf32> to vector<8x32xf32>
    %57 = arith.mulf %56, %54 : vector<8x32xf32>
    %58 = arith.mulf %57, %54 : vector<8x32xf32>
    %59 = arith.addf %50, %58 : vector<8x32xf32>
    %c0_44 = arith.constant 0 : index
    %c0_45 = arith.constant 0 : index
    %60 = vector.load %arg6[%c0_44, %c0_45] : memref<8x8xf32, #tpu.memory_space<vmem>>, vector<8x8xf32>
    %cst_46 = arith.constant dense<0.000000e+00> : vector<8x32xf32>
    %61 = tpu.matmul %60, %59, %cst_46 {dimension_numbers = #tpu.dot_dimension_numbers<[1], [0], [0], [1], [0, 0, 1, 1], [], []>} : vector<8x8xf32>, vector<8x32xf32>, vector<8x32xf32> -> vector<8x32xf32>
    %c0_47 = arith.constant 0 : index
    %c0_48 = arith.constant 0 : index
    %62 = vector.load %arg7[%c0_47, %c0_48] : memref<8x1xf32, #tpu.memory_space<vmem>>, vector<8x1xf32>
    %63 = vector.broadcast %62 : vector<8x1xf32> to vector<8x32xf32>
    %64 = arith.addf %61, %63 : vector<8x32xf32>
    %65 = vector.extract_strided_slice %1 {offsets = [0, 27], sizes = [8, 32], strides = [1, 1]} : vector<8x86xf32> to vector<8x32xf32>
    %66 = arith.addf %65, %64 : vector<8x32xf32>
    %c0_49 = arith.constant 0 : index
    %c0_50 = arith.constant 0 : index
    %67 = vector.load %arg10[%c0_49, %c0_50] : memref<8x1xf32, #tpu.memory_space<vmem>>, vector<8x1xf32>
    %c0_51 = arith.constant 0 : index
    %c0_52 = arith.constant 0 : index
    %68 = vector.load %arg11[%c0_51, %c0_52] : memref<8x1xf32, #tpu.memory_space<vmem>>, vector<8x1xf32>
    %69 = vector.broadcast %67 : vector<8x1xf32> to vector<8x32xf32>
    %70 = arith.mulf %69, %66 : vector<8x32xf32>
    %71 = math.sin %70 : vector<8x32xf32>
    %72 = vector.broadcast %68 : vector<8x1xf32> to vector<8x32xf32>
    %73 = arith.mulf %72, %71 : vector<8x32xf32>
    %74 = arith.mulf %73, %71 : vector<8x32xf32>
    %75 = arith.addf %66, %74 : vector<8x32xf32>
    %c0_53 = arith.constant 0 : index
    %c0_54 = arith.constant 0 : index
    %c0_55 = arith.constant 0 : index
    %76 = vector.load %arg12[%c0_53, %c0_54, %c0_55] : memref<1x8x32xf32, #tpu.memory_space<vmem>>, vector<1x8x32xf32>
    %77 = vector.shape_cast %76 : vector<1x8x32xf32> to vector<8x32xf32>
    %78 = vector.shape_cast %75 : vector<8x32xf32> to vector<1x8x32xf32>
    tpu.vector_store %arg12[%c0_53, %c0_54, %c0_55], %78 {strides = array<i32>} : memref<1x8x32xf32, #tpu.memory_space<vmem>>, vector<1x8x32xf32>,
    return
  }
  func.func @transform_0(%arg0: i32) -> (i32, i32, i32) {
    %c0_i32 = arith.constant 0 : i32
    %c0_i32_0 = arith.constant 0 : i32
    %c0_i32_1 = arith.constant 0 : i32
    return %arg0, %c0_i32, %c0_i32_0 : i32, i32, i32
  }
  func.func @transform_1(%arg0: i32) -> (i32, i32, i32) {
    %c0_i32 = arith.constant 0 : i32
    %c0_i32_0 = arith.constant 0 : i32
    %c0_i32_1 = arith.constant 0 : i32
    %c0_i32_2 = arith.constant 0 : i32
    return %c0_i32, %c0_i32_0, %c0_i32_1 : i32, i32, i32
  }
  func.func @transform_2(%arg0: i32) -> (i32, i32) {
    %c0_i32 = arith.constant 0 : i32
    %c0_i32_0 = arith.constant 0 : i32
    %c0_i32_1 = arith.constant 0 : i32
    return %c0_i32, %c0_i32_0 : i32, i32
  }
  func.func @transform_3(%arg0: i32) -> (i32, i32) {
    %c0_i32 = arith.constant 0 : i32
    %c0_i32_0 = arith.constant 0 : i32
    %c0_i32_1 = arith.constant 0 : i32
    return %c0_i32, %c0_i32_0 : i32, i32
  }
  func.func @transform_4(%arg0: i32) -> (i32, i32) {
    %c0_i32 = arith.constant 0 : i32
    %c0_i32_0 = arith.constant 0 : i32
    %c0_i32_1 = arith.constant 0 : i32
    return %c0_i32, %c0_i32_0 : i32, i32
  }
  func.func @transform_5(%arg0: i32) -> (i32, i32) {
    %c0_i32 = arith.constant 0 : i32
    %c0_i32_0 = arith.constant 0 : i32
    %c0_i32_1 = arith.constant 0 : i32
    return %c0_i32, %c0_i32_0 : i32, i32
  }
  func.func @transform_6(%arg0: i32) -> (i32, i32) {
    %c0_i32 = arith.constant 0 : i32
    %c0_i32_0 = arith.constant 0 : i32
    %c0_i32_1 = arith.constant 0 : i32
    return %c0_i32, %c0_i32_0 : i32, i32
  }
  func.func @transform_7(%arg0: i32) -> (i32, i32) {
    %c0_i32 = arith.constant 0 : i32
    %c0_i32_0 = arith.constant 0 : i32
    %c0_i32_1 = arith.constant 0 : i32
    return %c0_i32, %c0_i32_0 : i32, i32
  }
  func.func @transform_8(%arg0: i32) -> (i32, i32) {
    %c0_i32 = arith.constant 0 : i32
    %c0_i32_0 = arith.constant 0 : i32
    %c0_i32_1 = arith.constant 0 : i32
    return %c0_i32, %c0_i32_0 : i32, i32
  }
  func.func @transform_9(%arg0: i32) -> (i32, i32) {
    %c0_i32 = arith.constant 0 : i32
    %c0_i32_0 = arith.constant 0 : i32
    %c0_i32_1 = arith.constant 0 : i32
    return %c0_i32, %c0_i32_0 : i32, i32
  }
  func.func @transform_10(%arg0: i32) -> (i32, i32) {
    %c0_i32 = arith.constant 0 : i32
    %c0_i32_0 = arith.constant 0 : i32
    %c0_i32_1 = arith.constant 0 : i32
    return %c0_i32, %c0_i32_0 : i32, i32
  }
  func.func @transform_11(%arg0: i32) -> (i32, i32, i32) {
    %c0_i32 = arith.constant 0 : i32
    %c0_i32_0 = arith.constant 0 : i32
    %c0_i32_1 = arith.constant 0 : i32
    return %arg0, %c0_i32, %c0_i32_0 : i32, i32, i32
  }
}

module attributes {stable_mosaic.version = 11 : i64} {
  func.func @kernel(%arg0: i32, %arg1: memref<1x16x10xf32, #tpu.memory_space<vmem>>, %arg2: memref<3x16x16xf32, #tpu.memory_space<vmem>>, %arg3: memref<16x1xf32, #tpu.memory_space<vmem>>, %arg4: memref<1x16x8xf32, #tpu.memory_space<vmem>>) attributes {dimension_semantics = [#tpu.dimension_semantics<parallel>], iteration_bounds = array<i64: 2>, scalar_prefetch = 0 : i64, scratch_operands = 0 : i64, tpu.core_type = #tpu.core_type<tc>, window_params = [{transform_indices = @transform_0, window_bounds = array<i64: 1, 16, 10>}, {pipeline_mode = #tpu.pipeline_mode<synchronous>, transform_indices = @transform_1, window_bounds = array<i64: 3, 16, 16>}, {pipeline_mode = #tpu.pipeline_mode<synchronous>, transform_indices = @transform_2, window_bounds = array<i64: 16, 1>}, {transform_indices = @transform_3, window_bounds = array<i64: 1, 16, 8>}]} {
    %c0 = arith.constant 0 : index
    %c0_0 = arith.constant 0 : index
    %c0_1 = arith.constant 0 : index
    %0 = vector.load %arg1[%c0, %c0_0, %c0_1] : memref<1x16x10xf32, #tpu.memory_space<vmem>>, vector<1x16x10xf32>
    %1 = vector.shape_cast %0 : vector<1x16x10xf32> to vector<16x10xf32>
    %cst = arith.constant 0.000000e+00 : f32
    %2 = vector.broadcast %cst : f32 to vector<16x8xf32>
    %3 = vector.extract_strided_slice %1 {offsets = [0, 0], sizes = [16, 8], strides = [1, 1]} : vector<16x10xf32> to vector<16x8xf32>
    %c0_2 = arith.constant 0 : index
    %c0_3 = arith.constant 0 : index
    %c0_4 = arith.constant 0 : index
    %4 = vector.load %arg2[%c0_2, %c0_3, %c0_4] : memref<3x16x16xf32, #tpu.memory_space<vmem>>, vector<1x16x16xf32>
    %5 = vector.shape_cast %4 : vector<1x16x16xf32> to vector<16x16xf32>
    %cst_5 = arith.constant dense<0.000000e+00> : vector<16x8xf32>
    %6 = tpu.matmul %5, %3, %cst_5 {dimension_numbers = #tpu.dot_dimension_numbers<[1], [0], [0], [1], [0, 0, 1, 1], [], []>} : vector<16x16xf32>, vector<16x8xf32>, vector<16x8xf32> -> vector<16x8xf32>
    %7 = arith.addf %2, %6 : vector<16x8xf32>
    %8 = vector.extract_strided_slice %1 {offsets = [0, 1], sizes = [16, 8], strides = [1, 1]} : vector<16x10xf32> to vector<16x8xf32>
    %c1 = arith.constant 1 : index
    %c0_6 = arith.constant 0 : index
    %c0_7 = arith.constant 0 : index
    %9 = vector.load %arg2[%c1, %c0_6, %c0_7] : memref<3x16x16xf32, #tpu.memory_space<vmem>>, vector<1x16x16xf32>
    %10 = vector.shape_cast %9 : vector<1x16x16xf32> to vector<16x16xf32>
    %cst_8 = arith.constant dense<0.000000e+00> : vector<16x8xf32>
    %11 = tpu.matmul %10, %8, %cst_8 {dimension_numbers = #tpu.dot_dimension_numbers<[1], [0], [0], [1], [0, 0, 1, 1], [], []>} : vector<16x16xf32>, vector<16x8xf32>, vector<16x8xf32> -> vector<16x8xf32>
    %12 = arith.addf %7, %11 : vector<16x8xf32>
    %13 = vector.extract_strided_slice %1 {offsets = [0, 2], sizes = [16, 8], strides = [1, 1]} : vector<16x10xf32> to vector<16x8xf32>
    %c2 = arith.constant 2 : index
    %c0_9 = arith.constant 0 : index
    %c0_10 = arith.constant 0 : index
    %14 = vector.load %arg2[%c2, %c0_9, %c0_10] : memref<3x16x16xf32, #tpu.memory_space<vmem>>, vector<1x16x16xf32>
    %15 = vector.shape_cast %14 : vector<1x16x16xf32> to vector<16x16xf32>
    %cst_11 = arith.constant dense<0.000000e+00> : vector<16x8xf32>
    %16 = tpu.matmul %15, %13, %cst_11 {dimension_numbers = #tpu.dot_dimension_numbers<[1], [0], [0], [1], [0, 0, 1, 1], [], []>} : vector<16x16xf32>, vector<16x8xf32>, vector<16x8xf32> -> vector<16x8xf32>
    %17 = arith.addf %12, %16 : vector<16x8xf32>
    %c0_12 = arith.constant 0 : index
    %c0_13 = arith.constant 0 : index
    %18 = vector.load %arg3[%c0_12, %c0_13] : memref<16x1xf32, #tpu.memory_space<vmem>>, vector<16x1xf32>
    %19 = vector.broadcast %18 : vector<16x1xf32> to vector<16x8xf32>
    %20 = arith.addf %17, %19 : vector<16x8xf32>
    %c0_14 = arith.constant 0 : index
    %c0_15 = arith.constant 0 : index
    %c0_16 = arith.constant 0 : index
    %21 = vector.load %arg4[%c0_14, %c0_15, %c0_16] : memref<1x16x8xf32, #tpu.memory_space<vmem>>, vector<1x16x8xf32>
    %22 = vector.shape_cast %21 : vector<1x16x8xf32> to vector<16x8xf32>
    %23 = vector.shape_cast %20 : vector<16x8xf32> to vector<1x16x8xf32>
    tpu.vector_store %arg4[%c0_14, %c0_15, %c0_16], %23 {strides = array<i32>} : memref<1x16x8xf32, #tpu.memory_space<vmem>>, vector<1x16x8xf32>,
    return
  }
  func.func @transform_0(%arg0: i32) -> (i32, i32, i32) {
    %c0_i32 = arith.constant 0 : i32
    %c0_i32_0 = arith.constant 0 : i32
    %c0_i32_1 = arith.constant 0 : i32
    return %arg0, %c0_i32, %c0_i32_0 : i32, i32, i32
  }
  func.func @transform_1(%arg0: i32) -> (i32, i32, i32) {
    %c0_i32 = arith.constant 0 : i32
    %c0_i32_0 = arith.constant 0 : i32
    %c0_i32_1 = arith.constant 0 : i32
    %c0_i32_2 = arith.constant 0 : i32
    return %c0_i32, %c0_i32_0, %c0_i32_1 : i32, i32, i32
  }
  func.func @transform_2(%arg0: i32) -> (i32, i32) {
    %c0_i32 = arith.constant 0 : i32
    %c0_i32_0 = arith.constant 0 : i32
    %c0_i32_1 = arith.constant 0 : i32
    return %c0_i32, %c0_i32_0 : i32, i32
  }
  func.func @transform_3(%arg0: i32) -> (i32, i32, i32) {
    %c0_i32 = arith.constant 0 : i32
    %c0_i32_0 = arith.constant 0 : i32
    %c0_i32_1 = arith.constant 0 : i32
    return %arg0, %c0_i32, %c0_i32_0 : i32, i32, i32
  }
}

module attributes {stable_mosaic.version = 11 : i64} {
  func.func @kernel(%arg0: i32, %arg1: memref<16x64xf32, #tpu.memory_space<vmem>>, %arg2: memref<16x1xf32, #tpu.memory_space<vmem>>, %arg3: memref<64x128xf32, #tpu.memory_space<vmem>>, %arg4: memref<16x1xf32, #tpu.memory_space<vmem>>, %arg5: memref<16x1xf32, #tpu.memory_space<vmem>>, %arg6: memref<16x128xf32, #tpu.memory_space<vmem>>) attributes {dimension_semantics = [#tpu.dimension_semantics<parallel>], iteration_bounds = array<i64: 1>, scalar_prefetch = 0 : i64, scratch_operands = 0 : i64, tpu.core_type = #tpu.core_type<tc>, window_params = [{pipeline_mode = #tpu.pipeline_mode<synchronous>, transform_indices = @transform_0, window_bounds = array<i64: 16, 64>}, {pipeline_mode = #tpu.pipeline_mode<synchronous>, transform_indices = @transform_1, window_bounds = array<i64: 16, 1>}, {transform_indices = @transform_2, window_bounds = array<i64: 64, 128>}, {pipeline_mode = #tpu.pipeline_mode<synchronous>, transform_indices = @transform_3, window_bounds = array<i64: 16, 1>}, {pipeline_mode = #tpu.pipeline_mode<synchronous>, transform_indices = @transform_4, window_bounds = array<i64: 16, 1>}, {transform_indices = @transform_5, window_bounds = array<i64: 16, 128>}]} {
    %c0 = arith.constant 0 : index
    %c0_0 = arith.constant 0 : index
    %0 = vector.load %arg1[%c0, %c0_0] : memref<16x64xf32, #tpu.memory_space<vmem>>, vector<16x64xf32>
    %c0_1 = arith.constant 0 : index
    %c0_2 = arith.constant 0 : index
    %1 = vector.load %arg3[%c0_1, %c0_2] : memref<64x128xf32, #tpu.memory_space<vmem>>, vector<64x128xf32>
    %cst = arith.constant dense<0.000000e+00> : vector<16x128xf32>
    %2 = tpu.matmul %0, %1, %cst {dimension_numbers = #tpu.dot_dimension_numbers<[1], [0], [0], [1], [0, 0, 1, 1], [], []>} : vector<16x64xf32>, vector<64x128xf32>, vector<16x128xf32> -> vector<16x128xf32>
    %c0_3 = arith.constant 0 : index
    %c0_4 = arith.constant 0 : index
    %3 = vector.load %arg2[%c0_3, %c0_4] : memref<16x1xf32, #tpu.memory_space<vmem>>, vector<16x1xf32>
    %4 = vector.broadcast %3 : vector<16x1xf32> to vector<16x128xf32>
    %5 = arith.addf %2, %4 : vector<16x128xf32>
    %c0_5 = arith.constant 0 : index
    %c0_6 = arith.constant 0 : index
    %6 = vector.load %arg4[%c0_5, %c0_6] : memref<16x1xf32, #tpu.memory_space<vmem>>, vector<16x1xf32>
    %c0_7 = arith.constant 0 : index
    %c0_8 = arith.constant 0 : index
    %7 = vector.load %arg5[%c0_7, %c0_8] : memref<16x1xf32, #tpu.memory_space<vmem>>, vector<16x1xf32>
    %8 = vector.broadcast %6 : vector<16x1xf32> to vector<16x128xf32>
    %9 = arith.mulf %8, %5 : vector<16x128xf32>
    %10 = math.sin %9 : vector<16x128xf32>
    %11 = vector.broadcast %7 : vector<16x1xf32> to vector<16x128xf32>
    %12 = arith.mulf %11, %10 : vector<16x128xf32>
    %13 = arith.mulf %12, %10 : vector<16x128xf32>
    %14 = arith.addf %5, %13 : vector<16x128xf32>
    %c0_9 = arith.constant 0 : index
    %c0_10 = arith.constant 0 : index
    %15 = vector.load %arg6[%c0_9, %c0_10] : memref<16x128xf32, #tpu.memory_space<vmem>>, vector<16x128xf32>
    tpu.vector_store %arg6[%c0_9, %c0_10], %14 {strides = array<i32>} : memref<16x128xf32, #tpu.memory_space<vmem>>, vector<16x128xf32>,
    return
  }
  func.func @transform_0(%arg0: i32) -> (i32, i32) {
    %c0_i32 = arith.constant 0 : i32
    %c0_i32_0 = arith.constant 0 : i32
    %c0_i32_1 = arith.constant 0 : i32
    return %c0_i32, %c0_i32_0 : i32, i32
  }
  func.func @transform_1(%arg0: i32) -> (i32, i32) {
    %c0_i32 = arith.constant 0 : i32
    %c0_i32_0 = arith.constant 0 : i32
    %c0_i32_1 = arith.constant 0 : i32
    return %c0_i32, %c0_i32_0 : i32, i32
  }
  func.func @transform_2(%arg0: i32) -> (i32, i32) {
    %c0_i32 = arith.constant 0 : i32
    %c0_i32_0 = arith.constant 0 : i32
    return %c0_i32, %arg0 : i32, i32
  }
  func.func @transform_3(%arg0: i32) -> (i32, i32) {
    %c0_i32 = arith.constant 0 : i32
    %c0_i32_0 = arith.constant 0 : i32
    %c0_i32_1 = arith.constant 0 : i32
    return %c0_i32, %c0_i32_0 : i32, i32
  }
  func.func @transform_4(%arg0: i32) -> (i32, i32) {
    %c0_i32 = arith.constant 0 : i32
    %c0_i32_0 = arith.constant 0 : i32
    %c0_i32_1 = arith.constant 0 : i32
    return %c0_i32, %c0_i32_0 : i32, i32
  }
  func.func @transform_5(%arg0: i32) -> (i32, i32) {
    %c0_i32 = arith.constant 0 : i32
    %c0_i32_0 = arith.constant 0 : i32
    return %c0_i32, %arg0 : i32, i32
  }
}

module attributes {stable_mosaic.version = 11 : i64} {
  func.func @kernel(%arg0: i32, %arg1: memref<16x128xf32, #tpu.memory_space<vmem>>, %arg2: memref<72x16xf32, #tpu.memory_space<vmem>>, %arg3: memref<72x1xf32, #tpu.memory_space<vmem>>, %arg4: memref<144x8xf32, #tpu.memory_space<vmem>>, %arg5: memref<144x1xf32, #tpu.memory_space<vmem>>, %arg6: memref<288x8xf32, #tpu.memory_space<vmem>>, %arg7: memref<288x8xf32, #tpu.memory_space<vmem>>, %arg8: memref<9x128xi32, #tpu.memory_space<vmem>>, %arg9: memref<72x128xf32, #tpu.memory_space<vmem>>, %arg10: memref<16x128xf32, #tpu.memory_space<vmem>>) attributes {dimension_semantics = [#tpu.dimension_semantics<parallel>], iteration_bounds = array<i64: 1>, scalar_prefetch = 0 : i64, scratch_operands = 0 : i64, tpu.core_type = #tpu.core_type<tc>, window_params = [{transform_indices = @transform_0, window_bounds = array<i64: 16, 128>}, {pipeline_mode = #tpu.pipeline_mode<synchronous>, transform_indices = @transform_1, window_bounds = array<i64: 72, 16>}, {pipeline_mode = #tpu.pipeline_mode<synchronous>, transform_indices = @transform_2, window_bounds = array<i64: 72, 1>}, {pipeline_mode = #tpu.pipeline_mode<synchronous>, transform_indices = @transform_3, window_bounds = array<i64: 144, 8>}, {pipeline_mode = #tpu.pipeline_mode<synchronous>, transform_indices = @transform_4, window_bounds = array<i64: 144, 1>}, {pipeline_mode = #tpu.pipeline_mode<synchronous>, transform_indices = @transform_5, window_bounds = array<i64: 288, 8>}, {pipeline_mode = #tpu.pipeline_mode<synchronous>, transform_indices = @transform_6, window_bounds = array<i64: 288, 8>}, {transform_indices = @transform_7, window_bounds = array<i64: 9, 128>}, {transform_indices = @transform_8, window_bounds = array<i64: 72, 128>}, {transform_indices = @transform_9, window_bounds = array<i64: 16, 128>}]} {
    %c0 = arith.constant 0 : index
    %c0_0 = arith.constant 0 : index
    %0 = vector.load %arg1[%c0, %c0_0] : memref<16x128xf32, #tpu.memory_space<vmem>>, vector<16x128xf32>
    %c0_1 = arith.constant 0 : index
    %c0_2 = arith.constant 0 : index
    %1 = vector.load %arg2[%c0_1, %c0_2] : memref<72x16xf32, #tpu.memory_space<vmem>>, vector<72x16xf32>
    %c0_3 = arith.constant 0 : index
    %c0_4 = arith.constant 0 : index
    %2 = vector.load %arg3[%c0_3, %c0_4] : memref<72x1xf32, #tpu.memory_space<vmem>>, vector<72x1xf32>
    %c0_5 = arith.constant 0 : index
    %c0_6 = arith.constant 0 : index
    %3 = vector.load %arg4[%c0_5, %c0_6] : memref<144x8xf32, #tpu.memory_space<vmem>>, vector<144x8xf32>
    %c0_7 = arith.constant 0 : index
    %c0_8 = arith.constant 0 : index
    %4 = vector.load %arg5[%c0_7, %c0_8] : memref<144x1xf32, #tpu.memory_space<vmem>>, vector<144x1xf32>
    %c0_9 = arith.constant 0 : index
    %c0_10 = arith.constant 0 : index
    %5 = vector.load %arg6[%c0_9, %c0_10] : memref<288x8xf32, #tpu.memory_space<vmem>>, vector<288x8xf32>
    %c0_11 = arith.constant 0 : index
    %c0_12 = arith.constant 0 : index
    %6 = vector.load %arg7[%c0_11, %c0_12] : memref<288x8xf32, #tpu.memory_space<vmem>>, vector<288x8xf32>
    %cst = arith.constant 0.000000e+00 : f32
    %7 = vector.broadcast %cst : f32 to vector<16x128xf32>
    %c0_i32 = arith.constant 0 : i32
    %8 = vector.broadcast %c0_i32 : i32 to vector<9x128xi32>
    %9 = tpu.iota {dimensions = array<i32: 0>} : vector<32x128xi32>
    %10 = tpu.iota {dimensions = array<i32: 0>} : vector<9x128xi32>
    %11 = vector.extract_strided_slice %1 {offsets = [0, 0], sizes = [8, 16], strides = [1, 1]} : vector<72x16xf32> to vector<8x16xf32>
    %12 = vector.extract_strided_slice %2 {offsets = [0, 0], sizes = [8, 1], strides = [1, 1]} : vector<72x1xf32> to vector<8x1xf32>
    %cst_13 = arith.constant dense<0.000000e+00> : vector<8x128xf32>
    %13 = tpu.matmul %11, %0, %cst_13 {dimension_numbers = #tpu.dot_dimension_numbers<[1], [0], [0], [1], [0, 0, 1, 1], [], []>} : vector<8x16xf32>, vector<16x128xf32>, vector<8x128xf32> -> vector<8x128xf32>
    %14 = vector.broadcast %12 : vector<8x1xf32> to vector<8x128xf32>
    %15 = arith.addf %13, %14 : vector<8x128xf32>
    %16 = vector.extract_strided_slice %6 {offsets = [0, 0], sizes = [32, 8], strides = [1, 1]} : vector<288x8xf32> to vector<32x8xf32>
    %cst_14 = arith.constant dense<0.000000e+00> : vector<32x128xf32>
    %17 = tpu.matmul %16, %15, %cst_14 {dimension_numbers = #tpu.dot_dimension_numbers<[1], [0], [0], [1], [0, 0, 1, 1], [], []>} : vector<32x8xf32>, vector<8x128xf32>, vector<32x128xf32> -> vector<32x128xf32>
    %cst_15 = arith.constant dense<0xFF800000> : vector<128xf32>
    %18 = vector.multi_reduction <maximumf>, %17, %cst_15 [0] : vector<32x128xf32> to vector<128xf32>
    %19 = vector.shape_cast %18 : vector<128xf32> to vector<1x128xf32>
    %20 = vector.broadcast %19 : vector<1x128xf32> to vector<32x128xf32>
    %21 = arith.cmpf oge, %17, %20 : vector<32x128xf32>
    %c1073741824_i32 = arith.constant 1073741824 : i32
    %22 = vector.broadcast %c1073741824_i32 : i32 to vector<32x128xi32>
    %23 = arith.select %21, %9, %22 : vector<32x128xi1>, vector<32x128xi32>
    %cst_16 = arith.constant dense<2147483647> : vector<128xi32>
    %24 = vector.multi_reduction <minsi>, %23, %cst_16 [0] : vector<32x128xi32> to vector<128xi32>
    %25 = vector.shape_cast %24 : vector<128xi32> to vector<1x128xi32>
    %c0_i32_17 = arith.constant 0 : i32
    %26 = vector.broadcast %c0_i32_17 : i32 to vector<9x128xi32>
    %27 = arith.cmpi eq, %10, %26 : vector<9x128xi32>
    %28 = vector.shape_cast %25 : vector<1x128xi32> to vector<1x128xi32>
    %29 = vector.broadcast %28 : vector<1x128xi32> to vector<9x128xi32>
    %30 = arith.select %27, %29, %8 : vector<9x128xi1>, vector<9x128xi32>
    %31 = vector.broadcast %25 : vector<1x128xi32> to vector<32x128xi32>
    %32 = arith.cmpi eq, %9, %31 : vector<32x128xi32>
    %33 = arith.extui %32 : vector<32x128xi1> to vector<32x128xi32>
    %34 = arith.sitofp %33 : vector<32x128xi32> to vector<32x128xf32>
    %35 = vector.extract_strided_slice %5 {offsets = [0, 0], sizes = [32, 8], strides = [1, 1]} : vector<288x8xf32> to vector<32x8xf32>
    %cst_18 = arith.constant dense<0.000000e+00> : vector<8x128xf32>
    %36 = tpu.matmul %35, %34, %cst_18 {dimension_numbers = #tpu.dot_dimension_numbers<[0], [0], [1], [1], [0, 1, 1, 1], [], []>} : vector<32x8xf32>, vector<32x128xf32>, vector<8x128xf32> -> vector<8x128xf32>
    %37 = vector.extract_strided_slice %3 {offsets = [0, 0], sizes = [16, 8], strides = [1, 1]} : vector<144x8xf32> to vector<16x8xf32>
    %38 = vector.extract_strided_slice %4 {offsets = [0, 0], sizes = [16, 1], strides = [1, 1]} : vector<144x1xf32> to vector<16x1xf32>
    %cst_19 = arith.constant dense<0.000000e+00> : vector<16x128xf32>
    %39 = tpu.matmul %37, %36, %cst_19 {dimension_numbers = #tpu.dot_dimension_numbers<[1], [0], [0], [1], [0, 0, 1, 1], [], []>} : vector<16x8xf32>, vector<8x128xf32>, vector<16x128xf32> -> vector<16x128xf32>
    %40 = vector.broadcast %38 : vector<16x1xf32> to vector<16x128xf32>
    %41 = arith.addf %39, %40 : vector<16x128xf32>
    %42 = arith.addf %7, %41 : vector<16x128xf32>
    %43 = arith.subf %0, %41 : vector<16x128xf32>
    %c0_20 = arith.constant 0 : index
    %c0_21 = arith.constant 0 : index
    %44 = vector.load %arg9[%c0_20, %c0_21] : memref<72x128xf32, #tpu.memory_space<vmem>>, vector<8x128xf32>
    tpu.vector_store %arg9[%c0_20, %c0_21], %15 {strides = array<i32>} : memref<72x128xf32, #tpu.memory_space<vmem>>, vector<8x128xf32>,
    %45 = vector.extract_strided_slice %1 {offsets = [8, 0], sizes = [8, 16], strides = [1, 1]} : vector<72x16xf32> to vector<8x16xf32>
    %46 = vector.extract_strided_slice %2 {offsets = [8, 0], sizes = [8, 1], strides = [1, 1]} : vector<72x1xf32> to vector<8x1xf32>
    %cst_22 = arith.constant dense<0.000000e+00> : vector<8x128xf32>
    %47 = tpu.matmul %45, %43, %cst_22 {dimension_numbers = #tpu.dot_dimension_numbers<[1], [0], [0], [1], [0, 0, 1, 1], [], []>} : vector<8x16xf32>, vector<16x128xf32>, vector<8x128xf32> -> vector<8x128xf32>
    %48 = vector.broadcast %46 : vector<8x1xf32> to vector<8x128xf32>
    %49 = arith.addf %47, %48 : vector<8x128xf32>
    %50 = vector.extract_strided_slice %6 {offsets = [32, 0], sizes = [32, 8], strides = [1, 1]} : vector<288x8xf32> to vector<32x8xf32>
    %cst_23 = arith.constant dense<0.000000e+00> : vector<32x128xf32>
    %51 = tpu.matmul %50, %49, %cst_23 {dimension_numbers = #tpu.dot_dimension_numbers<[1], [0], [0], [1], [0, 0, 1, 1], [], []>} : vector<32x8xf32>, vector<8x128xf32>, vector<32x128xf32> -> vector<32x128xf32>
    %cst_24 = arith.constant dense<0xFF800000> : vector<128xf32>
    %52 = vector.multi_reduction <maximumf>, %51, %cst_24 [0] : vector<32x128xf32> to vector<128xf32>
    %53 = vector.shape_cast %52 : vector<128xf32> to vector<1x128xf32>
    %54 = vector.broadcast %53 : vector<1x128xf32> to vector<32x128xf32>
    %55 = arith.cmpf oge, %51, %54 : vector<32x128xf32>
    %c1073741824_i32_25 = arith.constant 1073741824 : i32
    %56 = vector.broadcast %c1073741824_i32_25 : i32 to vector<32x128xi32>
    %57 = arith.select %55, %9, %56 : vector<32x128xi1>, vector<32x128xi32>
    %cst_26 = arith.constant dense<2147483647> : vector<128xi32>
    %58 = vector.multi_reduction <minsi>, %57, %cst_26 [0] : vector<32x128xi32> to vector<128xi32>
    %59 = vector.shape_cast %58 : vector<128xi32> to vector<1x128xi32>
    %c1_i32 = arith.constant 1 : i32
    %60 = vector.broadcast %c1_i32 : i32 to vector<9x128xi32>
    %61 = arith.cmpi eq, %10, %60 : vector<9x128xi32>
    %62 = vector.shape_cast %59 : vector<1x128xi32> to vector<1x128xi32>
    %63 = vector.broadcast %62 : vector<1x128xi32> to vector<9x128xi32>
    %64 = arith.select %61, %63, %30 : vector<9x128xi1>, vector<9x128xi32>
    %65 = vector.broadcast %59 : vector<1x128xi32> to vector<32x128xi32>
    %66 = arith.cmpi eq, %9, %65 : vector<32x128xi32>
    %67 = arith.extui %66 : vector<32x128xi1> to vector<32x128xi32>
    %68 = arith.sitofp %67 : vector<32x128xi32> to vector<32x128xf32>
    %69 = vector.extract_strided_slice %5 {offsets = [32, 0], sizes = [32, 8], strides = [1, 1]} : vector<288x8xf32> to vector<32x8xf32>
    %cst_27 = arith.constant dense<0.000000e+00> : vector<8x128xf32>
    %70 = tpu.matmul %69, %68, %cst_27 {dimension_numbers = #tpu.dot_dimension_numbers<[0], [0], [1], [1], [0, 1, 1, 1], [], []>} : vector<32x8xf32>, vector<32x128xf32>, vector<8x128xf32> -> vector<8x128xf32>
    %71 = vector.extract_strided_slice %3 {offsets = [16, 0], sizes = [16, 8], strides = [1, 1]} : vector<144x8xf32> to vector<16x8xf32>
    %72 = vector.extract_strided_slice %4 {offsets = [16, 0], sizes = [16, 1], strides = [1, 1]} : vector<144x1xf32> to vector<16x1xf32>
    %cst_28 = arith.constant dense<0.000000e+00> : vector<16x128xf32>
    %73 = tpu.matmul %71, %70, %cst_28 {dimension_numbers = #tpu.dot_dimension_numbers<[1], [0], [0], [1], [0, 0, 1, 1], [], []>} : vector<16x8xf32>, vector<8x128xf32>, vector<16x128xf32> -> vector<16x128xf32>
    %74 = vector.broadcast %72 : vector<16x1xf32> to vector<16x128xf32>
    %75 = arith.addf %73, %74 : vector<16x128xf32>
    %76 = arith.addf %42, %75 : vector<16x128xf32>
    %77 = arith.subf %43, %75 : vector<16x128xf32>
    %c8 = arith.constant 8 : index
    %c0_29 = arith.constant 0 : index
    %78 = vector.load %arg9[%c8, %c0_29] : memref<72x128xf32, #tpu.memory_space<vmem>>, vector<8x128xf32>
    tpu.vector_store %arg9[%c8, %c0_29], %49 {strides = array<i32>} : memref<72x128xf32, #tpu.memory_space<vmem>>, vector<8x128xf32>,
    %79 = vector.extract_strided_slice %1 {offsets = [16, 0], sizes = [8, 16], strides = [1, 1]} : vector<72x16xf32> to vector<8x16xf32>
    %80 = vector.extract_strided_slice %2 {offsets = [16, 0], sizes = [8, 1], strides = [1, 1]} : vector<72x1xf32> to vector<8x1xf32>
    %cst_30 = arith.constant dense<0.000000e+00> : vector<8x128xf32>
    %81 = tpu.matmul %79, %77, %cst_30 {dimension_numbers = #tpu.dot_dimension_numbers<[1], [0], [0], [1], [0, 0, 1, 1], [], []>} : vector<8x16xf32>, vector<16x128xf32>, vector<8x128xf32> -> vector<8x128xf32>
    %82 = vector.broadcast %80 : vector<8x1xf32> to vector<8x128xf32>
    %83 = arith.addf %81, %82 : vector<8x128xf32>
    %84 = vector.extract_strided_slice %6 {offsets = [64, 0], sizes = [32, 8], strides = [1, 1]} : vector<288x8xf32> to vector<32x8xf32>
    %cst_31 = arith.constant dense<0.000000e+00> : vector<32x128xf32>
    %85 = tpu.matmul %84, %83, %cst_31 {dimension_numbers = #tpu.dot_dimension_numbers<[1], [0], [0], [1], [0, 0, 1, 1], [], []>} : vector<32x8xf32>, vector<8x128xf32>, vector<32x128xf32> -> vector<32x128xf32>
    %cst_32 = arith.constant dense<0xFF800000> : vector<128xf32>
    %86 = vector.multi_reduction <maximumf>, %85, %cst_32 [0] : vector<32x128xf32> to vector<128xf32>
    %87 = vector.shape_cast %86 : vector<128xf32> to vector<1x128xf32>
    %88 = vector.broadcast %87 : vector<1x128xf32> to vector<32x128xf32>
    %89 = arith.cmpf oge, %85, %88 : vector<32x128xf32>
    %c1073741824_i32_33 = arith.constant 1073741824 : i32
    %90 = vector.broadcast %c1073741824_i32_33 : i32 to vector<32x128xi32>
    %91 = arith.select %89, %9, %90 : vector<32x128xi1>, vector<32x128xi32>
    %cst_34 = arith.constant dense<2147483647> : vector<128xi32>
    %92 = vector.multi_reduction <minsi>, %91, %cst_34 [0] : vector<32x128xi32> to vector<128xi32>
    %93 = vector.shape_cast %92 : vector<128xi32> to vector<1x128xi32>
    %c2_i32 = arith.constant 2 : i32
    %94 = vector.broadcast %c2_i32 : i32 to vector<9x128xi32>
    %95 = arith.cmpi eq, %10, %94 : vector<9x128xi32>
    %96 = vector.shape_cast %93 : vector<1x128xi32> to vector<1x128xi32>
    %97 = vector.broadcast %96 : vector<1x128xi32> to vector<9x128xi32>
    %98 = arith.select %95, %97, %64 : vector<9x128xi1>, vector<9x128xi32>
    %99 = vector.broadcast %93 : vector<1x128xi32> to vector<32x128xi32>
    %100 = arith.cmpi eq, %9, %99 : vector<32x128xi32>
    %101 = arith.extui %100 : vector<32x128xi1> to vector<32x128xi32>
    %102 = arith.sitofp %101 : vector<32x128xi32> to vector<32x128xf32>
    %103 = vector.extract_strided_slice %5 {offsets = [64, 0], sizes = [32, 8], strides = [1, 1]} : vector<288x8xf32> to vector<32x8xf32>
    %cst_35 = arith.constant dense<0.000000e+00> : vector<8x128xf32>
    %104 = tpu.matmul %103, %102, %cst_35 {dimension_numbers = #tpu.dot_dimension_numbers<[0], [0], [1], [1], [0, 1, 1, 1], [], []>} : vector<32x8xf32>, vector<32x128xf32>, vector<8x128xf32> -> vector<8x128xf32>
    %105 = vector.extract_strided_slice %3 {offsets = [32, 0], sizes = [16, 8], strides = [1, 1]} : vector<144x8xf32> to vector<16x8xf32>
    %106 = vector.extract_strided_slice %4 {offsets = [32, 0], sizes = [16, 1], strides = [1, 1]} : vector<144x1xf32> to vector<16x1xf32>
    %cst_36 = arith.constant dense<0.000000e+00> : vector<16x128xf32>
    %107 = tpu.matmul %105, %104, %cst_36 {dimension_numbers = #tpu.dot_dimension_numbers<[1], [0], [0], [1], [0, 0, 1, 1], [], []>} : vector<16x8xf32>, vector<8x128xf32>, vector<16x128xf32> -> vector<16x128xf32>
    %108 = vector.broadcast %106 : vector<16x1xf32> to vector<16x128xf32>
    %109 = arith.addf %107, %108 : vector<16x128xf32>
    %110 = arith.addf %76, %109 : vector<16x128xf32>
    %111 = arith.subf %77, %109 : vector<16x128xf32>
    %c16 = arith.constant 16 : index
    %c0_37 = arith.constant 0 : index
    %112 = vector.load %arg9[%c16, %c0_37] : memref<72x128xf32, #tpu.memory_space<vmem>>, vector<8x128xf32>
    tpu.vector_store %arg9[%c16, %c0_37], %83 {strides = array<i32>} : memref<72x128xf32, #tpu.memory_space<vmem>>, vector<8x128xf32>,
    %113 = vector.extract_strided_slice %1 {offsets = [24, 0], sizes = [8, 16], strides = [1, 1]} : vector<72x16xf32> to vector<8x16xf32>
    %114 = vector.extract_strided_slice %2 {offsets = [24, 0], sizes = [8, 1], strides = [1, 1]} : vector<72x1xf32> to vector<8x1xf32>
    %cst_38 = arith.constant dense<0.000000e+00> : vector<8x128xf32>
    %115 = tpu.matmul %113, %111, %cst_38 {dimension_numbers = #tpu.dot_dimension_numbers<[1], [0], [0], [1], [0, 0, 1, 1], [], []>} : vector<8x16xf32>, vector<16x128xf32>, vector<8x128xf32> -> vector<8x128xf32>
    %116 = vector.broadcast %114 : vector<8x1xf32> to vector<8x128xf32>
    %117 = arith.addf %115, %116 : vector<8x128xf32>
    %118 = vector.extract_strided_slice %6 {offsets = [96, 0], sizes = [32, 8], strides = [1, 1]} : vector<288x8xf32> to vector<32x8xf32>
    %cst_39 = arith.constant dense<0.000000e+00> : vector<32x128xf32>
    %119 = tpu.matmul %118, %117, %cst_39 {dimension_numbers = #tpu.dot_dimension_numbers<[1], [0], [0], [1], [0, 0, 1, 1], [], []>} : vector<32x8xf32>, vector<8x128xf32>, vector<32x128xf32> -> vector<32x128xf32>
    %cst_40 = arith.constant dense<0xFF800000> : vector<128xf32>
    %120 = vector.multi_reduction <maximumf>, %119, %cst_40 [0] : vector<32x128xf32> to vector<128xf32>
    %121 = vector.shape_cast %120 : vector<128xf32> to vector<1x128xf32>
    %122 = vector.broadcast %121 : vector<1x128xf32> to vector<32x128xf32>
    %123 = arith.cmpf oge, %119, %122 : vector<32x128xf32>
    %c1073741824_i32_41 = arith.constant 1073741824 : i32
    %124 = vector.broadcast %c1073741824_i32_41 : i32 to vector<32x128xi32>
    %125 = arith.select %123, %9, %124 : vector<32x128xi1>, vector<32x128xi32>
    %cst_42 = arith.constant dense<2147483647> : vector<128xi32>
    %126 = vector.multi_reduction <minsi>, %125, %cst_42 [0] : vector<32x128xi32> to vector<128xi32>
    %127 = vector.shape_cast %126 : vector<128xi32> to vector<1x128xi32>
    %c3_i32 = arith.constant 3 : i32
    %128 = vector.broadcast %c3_i32 : i32 to vector<9x128xi32>
    %129 = arith.cmpi eq, %10, %128 : vector<9x128xi32>
    %130 = vector.shape_cast %127 : vector<1x128xi32> to vector<1x128xi32>
    %131 = vector.broadcast %130 : vector<1x128xi32> to vector<9x128xi32>
    %132 = arith.select %129, %131, %98 : vector<9x128xi1>, vector<9x128xi32>
    %133 = vector.broadcast %127 : vector<1x128xi32> to vector<32x128xi32>
    %134 = arith.cmpi eq, %9, %133 : vector<32x128xi32>
    %135 = arith.extui %134 : vector<32x128xi1> to vector<32x128xi32>
    %136 = arith.sitofp %135 : vector<32x128xi32> to vector<32x128xf32>
    %137 = vector.extract_strided_slice %5 {offsets = [96, 0], sizes = [32, 8], strides = [1, 1]} : vector<288x8xf32> to vector<32x8xf32>
    %cst_43 = arith.constant dense<0.000000e+00> : vector<8x128xf32>
    %138 = tpu.matmul %137, %136, %cst_43 {dimension_numbers = #tpu.dot_dimension_numbers<[0], [0], [1], [1], [0, 1, 1, 1], [], []>} : vector<32x8xf32>, vector<32x128xf32>, vector<8x128xf32> -> vector<8x128xf32>
    %139 = vector.extract_strided_slice %3 {offsets = [48, 0], sizes = [16, 8], strides = [1, 1]} : vector<144x8xf32> to vector<16x8xf32>
    %140 = vector.extract_strided_slice %4 {offsets = [48, 0], sizes = [16, 1], strides = [1, 1]} : vector<144x1xf32> to vector<16x1xf32>
    %cst_44 = arith.constant dense<0.000000e+00> : vector<16x128xf32>
    %141 = tpu.matmul %139, %138, %cst_44 {dimension_numbers = #tpu.dot_dimension_numbers<[1], [0], [0], [1], [0, 0, 1, 1], [], []>} : vector<16x8xf32>, vector<8x128xf32>, vector<16x128xf32> -> vector<16x128xf32>
    %142 = vector.broadcast %140 : vector<16x1xf32> to vector<16x128xf32>
    %143 = arith.addf %141, %142 : vector<16x128xf32>
    %144 = arith.addf %110, %143 : vector<16x128xf32>
    %145 = arith.subf %111, %143 : vector<16x128xf32>
    %c24 = arith.constant 24 : index
    %c0_45 = arith.constant 0 : index
    %146 = vector.load %arg9[%c24, %c0_45] : memref<72x128xf32, #tpu.memory_space<vmem>>, vector<8x128xf32>
    tpu.vector_store %arg9[%c24, %c0_45], %117 {strides = array<i32>} : memref<72x128xf32, #tpu.memory_space<vmem>>, vector<8x128xf32>,
    %147 = vector.extract_strided_slice %1 {offsets = [32, 0], sizes = [8, 16], strides = [1, 1]} : vector<72x16xf32> to vector<8x16xf32>
    %148 = vector.extract_strided_slice %2 {offsets = [32, 0], sizes = [8, 1], strides = [1, 1]} : vector<72x1xf32> to vector<8x1xf32>
    %cst_46 = arith.constant dense<0.000000e+00> : vector<8x128xf32>
    %149 = tpu.matmul %147, %145, %cst_46 {dimension_numbers = #tpu.dot_dimension_numbers<[1], [0], [0], [1], [0, 0, 1, 1], [], []>} : vector<8x16xf32>, vector<16x128xf32>, vector<8x128xf32> -> vector<8x128xf32>
    %150 = vector.broadcast %148 : vector<8x1xf32> to vector<8x128xf32>
    %151 = arith.addf %149, %150 : vector<8x128xf32>
    %152 = vector.extract_strided_slice %6 {offsets = [128, 0], sizes = [32, 8], strides = [1, 1]} : vector<288x8xf32> to vector<32x8xf32>
    %cst_47 = arith.constant dense<0.000000e+00> : vector<32x128xf32>
    %153 = tpu.matmul %152, %151, %cst_47 {dimension_numbers = #tpu.dot_dimension_numbers<[1], [0], [0], [1], [0, 0, 1, 1], [], []>} : vector<32x8xf32>, vector<8x128xf32>, vector<32x128xf32> -> vector<32x128xf32>
    %cst_48 = arith.constant dense<0xFF800000> : vector<128xf32>
    %154 = vector.multi_reduction <maximumf>, %153, %cst_48 [0] : vector<32x128xf32> to vector<128xf32>
    %155 = vector.shape_cast %154 : vector<128xf32> to vector<1x128xf32>
    %156 = vector.broadcast %155 : vector<1x128xf32> to vector<32x128xf32>
    %157 = arith.cmpf oge, %153, %156 : vector<32x128xf32>
    %c1073741824_i32_49 = arith.constant 1073741824 : i32
    %158 = vector.broadcast %c1073741824_i32_49 : i32 to vector<32x128xi32>
    %159 = arith.select %157, %9, %158 : vector<32x128xi1>, vector<32x128xi32>
    %cst_50 = arith.constant dense<2147483647> : vector<128xi32>
    %160 = vector.multi_reduction <minsi>, %159, %cst_50 [0] : vector<32x128xi32> to vector<128xi32>
    %161 = vector.shape_cast %160 : vector<128xi32> to vector<1x128xi32>
    %c4_i32 = arith.constant 4 : i32
    %162 = vector.broadcast %c4_i32 : i32 to vector<9x128xi32>
    %163 = arith.cmpi eq, %10, %162 : vector<9x128xi32>
    %164 = vector.shape_cast %161 : vector<1x128xi32> to vector<1x128xi32>
    %165 = vector.broadcast %164 : vector<1x128xi32> to vector<9x128xi32>
    %166 = arith.select %163, %165, %132 : vector<9x128xi1>, vector<9x128xi32>
    %167 = vector.broadcast %161 : vector<1x128xi32> to vector<32x128xi32>
    %168 = arith.cmpi eq, %9, %167 : vector<32x128xi32>
    %169 = arith.extui %168 : vector<32x128xi1> to vector<32x128xi32>
    %170 = arith.sitofp %169 : vector<32x128xi32> to vector<32x128xf32>
    %171 = vector.extract_strided_slice %5 {offsets = [128, 0], sizes = [32, 8], strides = [1, 1]} : vector<288x8xf32> to vector<32x8xf32>
    %cst_51 = arith.constant dense<0.000000e+00> : vector<8x128xf32>
    %172 = tpu.matmul %171, %170, %cst_51 {dimension_numbers = #tpu.dot_dimension_numbers<[0], [0], [1], [1], [0, 1, 1, 1], [], []>} : vector<32x8xf32>, vector<32x128xf32>, vector<8x128xf32> -> vector<8x128xf32>
    %173 = vector.extract_strided_slice %3 {offsets = [64, 0], sizes = [16, 8], strides = [1, 1]} : vector<144x8xf32> to vector<16x8xf32>
    %174 = vector.extract_strided_slice %4 {offsets = [64, 0], sizes = [16, 1], strides = [1, 1]} : vector<144x1xf32> to vector<16x1xf32>
    %cst_52 = arith.constant dense<0.000000e+00> : vector<16x128xf32>
    %175 = tpu.matmul %173, %172, %cst_52 {dimension_numbers = #tpu.dot_dimension_numbers<[1], [0], [0], [1], [0, 0, 1, 1], [], []>} : vector<16x8xf32>, vector<8x128xf32>, vector<16x128xf32> -> vector<16x128xf32>
    %176 = vector.broadcast %174 : vector<16x1xf32> to vector<16x128xf32>
    %177 = arith.addf %175, %176 : vector<16x128xf32>
    %178 = arith.addf %144, %177 : vector<16x128xf32>
    %179 = arith.subf %145, %177 : vector<16x128xf32>
    %c32 = arith.constant 32 : index
    %c0_53 = arith.constant 0 : index
    %180 = vector.load %arg9[%c32, %c0_53] : memref<72x128xf32, #tpu.memory_space<vmem>>, vector<8x128xf32>
    tpu.vector_store %arg9[%c32, %c0_53], %151 {strides = array<i32>} : memref<72x128xf32, #tpu.memory_space<vmem>>, vector<8x128xf32>,
    %181 = vector.extract_strided_slice %1 {offsets = [40, 0], sizes = [8, 16], strides = [1, 1]} : vector<72x16xf32> to vector<8x16xf32>
    %182 = vector.extract_strided_slice %2 {offsets = [40, 0], sizes = [8, 1], strides = [1, 1]} : vector<72x1xf32> to vector<8x1xf32>
    %cst_54 = arith.constant dense<0.000000e+00> : vector<8x128xf32>
    %183 = tpu.matmul %181, %179, %cst_54 {dimension_numbers = #tpu.dot_dimension_numbers<[1], [0], [0], [1], [0, 0, 1, 1], [], []>} : vector<8x16xf32>, vector<16x128xf32>, vector<8x128xf32> -> vector<8x128xf32>
    %184 = vector.broadcast %182 : vector<8x1xf32> to vector<8x128xf32>
    %185 = arith.addf %183, %184 : vector<8x128xf32>
    %186 = vector.extract_strided_slice %6 {offsets = [160, 0], sizes = [32, 8], strides = [1, 1]} : vector<288x8xf32> to vector<32x8xf32>
    %cst_55 = arith.constant dense<0.000000e+00> : vector<32x128xf32>
    %187 = tpu.matmul %186, %185, %cst_55 {dimension_numbers = #tpu.dot_dimension_numbers<[1], [0], [0], [1], [0, 0, 1, 1], [], []>} : vector<32x8xf32>, vector<8x128xf32>, vector<32x128xf32> -> vector<32x128xf32>
    %cst_56 = arith.constant dense<0xFF800000> : vector<128xf32>
    %188 = vector.multi_reduction <maximumf>, %187, %cst_56 [0] : vector<32x128xf32> to vector<128xf32>
    %189 = vector.shape_cast %188 : vector<128xf32> to vector<1x128xf32>
    %190 = vector.broadcast %189 : vector<1x128xf32> to vector<32x128xf32>
    %191 = arith.cmpf oge, %187, %190 : vector<32x128xf32>
    %c1073741824_i32_57 = arith.constant 1073741824 : i32
    %192 = vector.broadcast %c1073741824_i32_57 : i32 to vector<32x128xi32>
    %193 = arith.select %191, %9, %192 : vector<32x128xi1>, vector<32x128xi32>
    %cst_58 = arith.constant dense<2147483647> : vector<128xi32>
    %194 = vector.multi_reduction <minsi>, %193, %cst_58 [0] : vector<32x128xi32> to vector<128xi32>
    %195 = vector.shape_cast %194 : vector<128xi32> to vector<1x128xi32>
    %c5_i32 = arith.constant 5 : i32
    %196 = vector.broadcast %c5_i32 : i32 to vector<9x128xi32>
    %197 = arith.cmpi eq, %10, %196 : vector<9x128xi32>
    %198 = vector.shape_cast %195 : vector<1x128xi32> to vector<1x128xi32>
    %199 = vector.broadcast %198 : vector<1x128xi32> to vector<9x128xi32>
    %200 = arith.select %197, %199, %166 : vector<9x128xi1>, vector<9x128xi32>
    %201 = vector.broadcast %195 : vector<1x128xi32> to vector<32x128xi32>
    %202 = arith.cmpi eq, %9, %201 : vector<32x128xi32>
    %203 = arith.extui %202 : vector<32x128xi1> to vector<32x128xi32>
    %204 = arith.sitofp %203 : vector<32x128xi32> to vector<32x128xf32>
    %205 = vector.extract_strided_slice %5 {offsets = [160, 0], sizes = [32, 8], strides = [1, 1]} : vector<288x8xf32> to vector<32x8xf32>
    %cst_59 = arith.constant dense<0.000000e+00> : vector<8x128xf32>
    %206 = tpu.matmul %205, %204, %cst_59 {dimension_numbers = #tpu.dot_dimension_numbers<[0], [0], [1], [1], [0, 1, 1, 1], [], []>} : vector<32x8xf32>, vector<32x128xf32>, vector<8x128xf32> -> vector<8x128xf32>
    %207 = vector.extract_strided_slice %3 {offsets = [80, 0], sizes = [16, 8], strides = [1, 1]} : vector<144x8xf32> to vector<16x8xf32>
    %208 = vector.extract_strided_slice %4 {offsets = [80, 0], sizes = [16, 1], strides = [1, 1]} : vector<144x1xf32> to vector<16x1xf32>
    %cst_60 = arith.constant dense<0.000000e+00> : vector<16x128xf32>
    %209 = tpu.matmul %207, %206, %cst_60 {dimension_numbers = #tpu.dot_dimension_numbers<[1], [0], [0], [1], [0, 0, 1, 1], [], []>} : vector<16x8xf32>, vector<8x128xf32>, vector<16x128xf32> -> vector<16x128xf32>
    %210 = vector.broadcast %208 : vector<16x1xf32> to vector<16x128xf32>
    %211 = arith.addf %209, %210 : vector<16x128xf32>
    %212 = arith.addf %178, %211 : vector<16x128xf32>
    %213 = arith.subf %179, %211 : vector<16x128xf32>
    %c40 = arith.constant 40 : index
    %c0_61 = arith.constant 0 : index
    %214 = vector.load %arg9[%c40, %c0_61] : memref<72x128xf32, #tpu.memory_space<vmem>>, vector<8x128xf32>
    tpu.vector_store %arg9[%c40, %c0_61], %185 {strides = array<i32>} : memref<72x128xf32, #tpu.memory_space<vmem>>, vector<8x128xf32>,
    %215 = vector.extract_strided_slice %1 {offsets = [48, 0], sizes = [8, 16], strides = [1, 1]} : vector<72x16xf32> to vector<8x16xf32>
    %216 = vector.extract_strided_slice %2 {offsets = [48, 0], sizes = [8, 1], strides = [1, 1]} : vector<72x1xf32> to vector<8x1xf32>
    %cst_62 = arith.constant dense<0.000000e+00> : vector<8x128xf32>
    %217 = tpu.matmul %215, %213, %cst_62 {dimension_numbers = #tpu.dot_dimension_numbers<[1], [0], [0], [1], [0, 0, 1, 1], [], []>} : vector<8x16xf32>, vector<16x128xf32>, vector<8x128xf32> -> vector<8x128xf32>
    %218 = vector.broadcast %216 : vector<8x1xf32> to vector<8x128xf32>
    %219 = arith.addf %217, %218 : vector<8x128xf32>
    %220 = vector.extract_strided_slice %6 {offsets = [192, 0], sizes = [32, 8], strides = [1, 1]} : vector<288x8xf32> to vector<32x8xf32>
    %cst_63 = arith.constant dense<0.000000e+00> : vector<32x128xf32>
    %221 = tpu.matmul %220, %219, %cst_63 {dimension_numbers = #tpu.dot_dimension_numbers<[1], [0], [0], [1], [0, 0, 1, 1], [], []>} : vector<32x8xf32>, vector<8x128xf32>, vector<32x128xf32> -> vector<32x128xf32>
    %cst_64 = arith.constant dense<0xFF800000> : vector<128xf32>
    %222 = vector.multi_reduction <maximumf>, %221, %cst_64 [0] : vector<32x128xf32> to vector<128xf32>
    %223 = vector.shape_cast %222 : vector<128xf32> to vector<1x128xf32>
    %224 = vector.broadcast %223 : vector<1x128xf32> to vector<32x128xf32>
    %225 = arith.cmpf oge, %221, %224 : vector<32x128xf32>
    %c1073741824_i32_65 = arith.constant 1073741824 : i32
    %226 = vector.broadcast %c1073741824_i32_65 : i32 to vector<32x128xi32>
    %227 = arith.select %225, %9, %226 : vector<32x128xi1>, vector<32x128xi32>
    %cst_66 = arith.constant dense<2147483647> : vector<128xi32>
    %228 = vector.multi_reduction <minsi>, %227, %cst_66 [0] : vector<32x128xi32> to vector<128xi32>
    %229 = vector.shape_cast %228 : vector<128xi32> to vector<1x128xi32>
    %c6_i32 = arith.constant 6 : i32
    %230 = vector.broadcast %c6_i32 : i32 to vector<9x128xi32>
    %231 = arith.cmpi eq, %10, %230 : vector<9x128xi32>
    %232 = vector.shape_cast %229 : vector<1x128xi32> to vector<1x128xi32>
    %233 = vector.broadcast %232 : vector<1x128xi32> to vector<9x128xi32>
    %234 = arith.select %231, %233, %200 : vector<9x128xi1>, vector<9x128xi32>
    %235 = vector.broadcast %229 : vector<1x128xi32> to vector<32x128xi32>
    %236 = arith.cmpi eq, %9, %235 : vector<32x128xi32>
    %237 = arith.extui %236 : vector<32x128xi1> to vector<32x128xi32>
    %238 = arith.sitofp %237 : vector<32x128xi32> to vector<32x128xf32>
    %239 = vector.extract_strided_slice %5 {offsets = [192, 0], sizes = [32, 8], strides = [1, 1]} : vector<288x8xf32> to vector<32x8xf32>
    %cst_67 = arith.constant dense<0.000000e+00> : vector<8x128xf32>
    %240 = tpu.matmul %239, %238, %cst_67 {dimension_numbers = #tpu.dot_dimension_numbers<[0], [0], [1], [1], [0, 1, 1, 1], [], []>} : vector<32x8xf32>, vector<32x128xf32>, vector<8x128xf32> -> vector<8x128xf32>
    %241 = vector.extract_strided_slice %3 {offsets = [96, 0], sizes = [16, 8], strides = [1, 1]} : vector<144x8xf32> to vector<16x8xf32>
    %242 = vector.extract_strided_slice %4 {offsets = [96, 0], sizes = [16, 1], strides = [1, 1]} : vector<144x1xf32> to vector<16x1xf32>
    %cst_68 = arith.constant dense<0.000000e+00> : vector<16x128xf32>
    %243 = tpu.matmul %241, %240, %cst_68 {dimension_numbers = #tpu.dot_dimension_numbers<[1], [0], [0], [1], [0, 0, 1, 1], [], []>} : vector<16x8xf32>, vector<8x128xf32>, vector<16x128xf32> -> vector<16x128xf32>
    %244 = vector.broadcast %242 : vector<16x1xf32> to vector<16x128xf32>
    %245 = arith.addf %243, %244 : vector<16x128xf32>
    %246 = arith.addf %212, %245 : vector<16x128xf32>
    %247 = arith.subf %213, %245 : vector<16x128xf32>
    %c48 = arith.constant 48 : index
    %c0_69 = arith.constant 0 : index
    %248 = vector.load %arg9[%c48, %c0_69] : memref<72x128xf32, #tpu.memory_space<vmem>>, vector<8x128xf32>
    tpu.vector_store %arg9[%c48, %c0_69], %219 {strides = array<i32>} : memref<72x128xf32, #tpu.memory_space<vmem>>, vector<8x128xf32>,
    %249 = vector.extract_strided_slice %1 {offsets = [56, 0], sizes = [8, 16], strides = [1, 1]} : vector<72x16xf32> to vector<8x16xf32>
    %250 = vector.extract_strided_slice %2 {offsets = [56, 0], sizes = [8, 1], strides = [1, 1]} : vector<72x1xf32> to vector<8x1xf32>
    %cst_70 = arith.constant dense<0.000000e+00> : vector<8x128xf32>
    %251 = tpu.matmul %249, %247, %cst_70 {dimension_numbers = #tpu.dot_dimension_numbers<[1], [0], [0], [1], [0, 0, 1, 1], [], []>} : vector<8x16xf32>, vector<16x128xf32>, vector<8x128xf32> -> vector<8x128xf32>
    %252 = vector.broadcast %250 : vector<8x1xf32> to vector<8x128xf32>
    %253 = arith.addf %251, %252 : vector<8x128xf32>
    %254 = vector.extract_strided_slice %6 {offsets = [224, 0], sizes = [32, 8], strides = [1, 1]} : vector<288x8xf32> to vector<32x8xf32>
    %cst_71 = arith.constant dense<0.000000e+00> : vector<32x128xf32>
    %255 = tpu.matmul %254, %253, %cst_71 {dimension_numbers = #tpu.dot_dimension_numbers<[1], [0], [0], [1], [0, 0, 1, 1], [], []>} : vector<32x8xf32>, vector<8x128xf32>, vector<32x128xf32> -> vector<32x128xf32>
    %cst_72 = arith.constant dense<0xFF800000> : vector<128xf32>
    %256 = vector.multi_reduction <maximumf>, %255, %cst_72 [0] : vector<32x128xf32> to vector<128xf32>
    %257 = vector.shape_cast %256 : vector<128xf32> to vector<1x128xf32>
    %258 = vector.broadcast %257 : vector<1x128xf32> to vector<32x128xf32>
    %259 = arith.cmpf oge, %255, %258 : vector<32x128xf32>
    %c1073741824_i32_73 = arith.constant 1073741824 : i32
    %260 = vector.broadcast %c1073741824_i32_73 : i32 to vector<32x128xi32>
    %261 = arith.select %259, %9, %260 : vector<32x128xi1>, vector<32x128xi32>
    %cst_74 = arith.constant dense<2147483647> : vector<128xi32>
    %262 = vector.multi_reduction <minsi>, %261, %cst_74 [0] : vector<32x128xi32> to vector<128xi32>
    %263 = vector.shape_cast %262 : vector<128xi32> to vector<1x128xi32>
    %c7_i32 = arith.constant 7 : i32
    %264 = vector.broadcast %c7_i32 : i32 to vector<9x128xi32>
    %265 = arith.cmpi eq, %10, %264 : vector<9x128xi32>
    %266 = vector.shape_cast %263 : vector<1x128xi32> to vector<1x128xi32>
    %267 = vector.broadcast %266 : vector<1x128xi32> to vector<9x128xi32>
    %268 = arith.select %265, %267, %234 : vector<9x128xi1>, vector<9x128xi32>
    %269 = vector.broadcast %263 : vector<1x128xi32> to vector<32x128xi32>
    %270 = arith.cmpi eq, %9, %269 : vector<32x128xi32>
    %271 = arith.extui %270 : vector<32x128xi1> to vector<32x128xi32>
    %272 = arith.sitofp %271 : vector<32x128xi32> to vector<32x128xf32>
    %273 = vector.extract_strided_slice %5 {offsets = [224, 0], sizes = [32, 8], strides = [1, 1]} : vector<288x8xf32> to vector<32x8xf32>
    %cst_75 = arith.constant dense<0.000000e+00> : vector<8x128xf32>
    %274 = tpu.matmul %273, %272, %cst_75 {dimension_numbers = #tpu.dot_dimension_numbers<[0], [0], [1], [1], [0, 1, 1, 1], [], []>} : vector<32x8xf32>, vector<32x128xf32>, vector<8x128xf32> -> vector<8x128xf32>
    %275 = vector.extract_strided_slice %3 {offsets = [112, 0], sizes = [16, 8], strides = [1, 1]} : vector<144x8xf32> to vector<16x8xf32>
    %276 = vector.extract_strided_slice %4 {offsets = [112, 0], sizes = [16, 1], strides = [1, 1]} : vector<144x1xf32> to vector<16x1xf32>
    %cst_76 = arith.constant dense<0.000000e+00> : vector<16x128xf32>
    %277 = tpu.matmul %275, %274, %cst_76 {dimension_numbers = #tpu.dot_dimension_numbers<[1], [0], [0], [1], [0, 0, 1, 1], [], []>} : vector<16x8xf32>, vector<8x128xf32>, vector<16x128xf32> -> vector<16x128xf32>
    %278 = vector.broadcast %276 : vector<16x1xf32> to vector<16x128xf32>
    %279 = arith.addf %277, %278 : vector<16x128xf32>
    %280 = arith.addf %246, %279 : vector<16x128xf32>
    %281 = arith.subf %247, %279 : vector<16x128xf32>
    %c56 = arith.constant 56 : index
    %c0_77 = arith.constant 0 : index
    %282 = vector.load %arg9[%c56, %c0_77] : memref<72x128xf32, #tpu.memory_space<vmem>>, vector<8x128xf32>
    tpu.vector_store %arg9[%c56, %c0_77], %253 {strides = array<i32>} : memref<72x128xf32, #tpu.memory_space<vmem>>, vector<8x128xf32>,
    %283 = vector.extract_strided_slice %1 {offsets = [64, 0], sizes = [8, 16], strides = [1, 1]} : vector<72x16xf32> to vector<8x16xf32>
    %284 = vector.extract_strided_slice %2 {offsets = [64, 0], sizes = [8, 1], strides = [1, 1]} : vector<72x1xf32> to vector<8x1xf32>
    %cst_78 = arith.constant dense<0.000000e+00> : vector<8x128xf32>
    %285 = tpu.matmul %283, %281, %cst_78 {dimension_numbers = #tpu.dot_dimension_numbers<[1], [0], [0], [1], [0, 0, 1, 1], [], []>} : vector<8x16xf32>, vector<16x128xf32>, vector<8x128xf32> -> vector<8x128xf32>
    %286 = vector.broadcast %284 : vector<8x1xf32> to vector<8x128xf32>
    %287 = arith.addf %285, %286 : vector<8x128xf32>
    %288 = vector.extract_strided_slice %6 {offsets = [256, 0], sizes = [32, 8], strides = [1, 1]} : vector<288x8xf32> to vector<32x8xf32>
    %cst_79 = arith.constant dense<0.000000e+00> : vector<32x128xf32>
    %289 = tpu.matmul %288, %287, %cst_79 {dimension_numbers = #tpu.dot_dimension_numbers<[1], [0], [0], [1], [0, 0, 1, 1], [], []>} : vector<32x8xf32>, vector<8x128xf32>, vector<32x128xf32> -> vector<32x128xf32>
    %cst_80 = arith.constant dense<0xFF800000> : vector<128xf32>
    %290 = vector.multi_reduction <maximumf>, %289, %cst_80 [0] : vector<32x128xf32> to vector<128xf32>
    %291 = vector.shape_cast %290 : vector<128xf32> to vector<1x128xf32>
    %292 = vector.broadcast %291 : vector<1x128xf32> to vector<32x128xf32>
    %293 = arith.cmpf oge, %289, %292 : vector<32x128xf32>
    %c1073741824_i32_81 = arith.constant 1073741824 : i32
    %294 = vector.broadcast %c1073741824_i32_81 : i32 to vector<32x128xi32>
    %295 = arith.select %293, %9, %294 : vector<32x128xi1>, vector<32x128xi32>
    %cst_82 = arith.constant dense<2147483647> : vector<128xi32>
    %296 = vector.multi_reduction <minsi>, %295, %cst_82 [0] : vector<32x128xi32> to vector<128xi32>
    %297 = vector.shape_cast %296 : vector<128xi32> to vector<1x128xi32>
    %c8_i32 = arith.constant 8 : i32
    %298 = vector.broadcast %c8_i32 : i32 to vector<9x128xi32>
    %299 = arith.cmpi eq, %10, %298 : vector<9x128xi32>
    %300 = vector.shape_cast %297 : vector<1x128xi32> to vector<1x128xi32>
    %301 = vector.broadcast %300 : vector<1x128xi32> to vector<9x128xi32>
    %302 = arith.select %299, %301, %268 : vector<9x128xi1>, vector<9x128xi32>
    %303 = vector.broadcast %297 : vector<1x128xi32> to vector<32x128xi32>
    %304 = arith.cmpi eq, %9, %303 : vector<32x128xi32>
    %305 = arith.extui %304 : vector<32x128xi1> to vector<32x128xi32>
    %306 = arith.sitofp %305 : vector<32x128xi32> to vector<32x128xf32>
    %307 = vector.extract_strided_slice %5 {offsets = [256, 0], sizes = [32, 8], strides = [1, 1]} : vector<288x8xf32> to vector<32x8xf32>
    %cst_83 = arith.constant dense<0.000000e+00> : vector<8x128xf32>
    %308 = tpu.matmul %307, %306, %cst_83 {dimension_numbers = #tpu.dot_dimension_numbers<[0], [0], [1], [1], [0, 1, 1, 1], [], []>} : vector<32x8xf32>, vector<32x128xf32>, vector<8x128xf32> -> vector<8x128xf32>
    %309 = vector.extract_strided_slice %3 {offsets = [128, 0], sizes = [16, 8], strides = [1, 1]} : vector<144x8xf32> to vector<16x8xf32>
    %310 = vector.extract_strided_slice %4 {offsets = [128, 0], sizes = [16, 1], strides = [1, 1]} : vector<144x1xf32> to vector<16x1xf32>
    %cst_84 = arith.constant dense<0.000000e+00> : vector<16x128xf32>
    %311 = tpu.matmul %309, %308, %cst_84 {dimension_numbers = #tpu.dot_dimension_numbers<[1], [0], [0], [1], [0, 0, 1, 1], [], []>} : vector<16x8xf32>, vector<8x128xf32>, vector<16x128xf32> -> vector<16x128xf32>
    %312 = vector.broadcast %310 : vector<16x1xf32> to vector<16x128xf32>
    %313 = arith.addf %311, %312 : vector<16x128xf32>
    %314 = arith.addf %280, %313 : vector<16x128xf32>
    %c64 = arith.constant 64 : index
    %c0_85 = arith.constant 0 : index
    %315 = vector.load %arg9[%c64, %c0_85] : memref<72x128xf32, #tpu.memory_space<vmem>>, vector<8x128xf32>
    tpu.vector_store %arg9[%c64, %c0_85], %287 {strides = array<i32>} : memref<72x128xf32, #tpu.memory_space<vmem>>, vector<8x128xf32>,
    %c0_86 = arith.constant 0 : index
    %c0_87 = arith.constant 0 : index
    %316 = vector.load %arg8[%c0_86, %c0_87] : memref<9x128xi32, #tpu.memory_space<vmem>>, vector<9x128xi32>
    tpu.vector_store %arg8[%c0_86, %c0_87], %302 {strides = array<i32>} : memref<9x128xi32, #tpu.memory_space<vmem>>, vector<9x128xi32>,
    %c0_88 = arith.constant 0 : index
    %c0_89 = arith.constant 0 : index
    %317 = vector.load %arg10[%c0_88, %c0_89] : memref<16x128xf32, #tpu.memory_space<vmem>>, vector<16x128xf32>
    tpu.vector_store %arg10[%c0_88, %c0_89], %314 {strides = array<i32>} : memref<16x128xf32, #tpu.memory_space<vmem>>, vector<16x128xf32>,
    return
  }
  func.func @transform_0(%arg0: i32) -> (i32, i32) {
    %c0_i32 = arith.constant 0 : i32
    %c0_i32_0 = arith.constant 0 : i32
    return %c0_i32, %arg0 : i32, i32
  }
  func.func @transform_1(%arg0: i32) -> (i32, i32) {
    %c0_i32 = arith.constant 0 : i32
    %c0_i32_0 = arith.constant 0 : i32
    %c0_i32_1 = arith.constant 0 : i32
    return %c0_i32, %c0_i32_0 : i32, i32
  }
  func.func @transform_2(%arg0: i32) -> (i32, i32) {
    %c0_i32 = arith.constant 0 : i32
    %c0_i32_0 = arith.constant 0 : i32
    %c0_i32_1 = arith.constant 0 : i32
    return %c0_i32, %c0_i32_0 : i32, i32
  }
  func.func @transform_3(%arg0: i32) -> (i32, i32) {
    %c0_i32 = arith.constant 0 : i32
    %c0_i32_0 = arith.constant 0 : i32
    %c0_i32_1 = arith.constant 0 : i32
    return %c0_i32, %c0_i32_0 : i32, i32
  }
  func.func @transform_4(%arg0: i32) -> (i32, i32) {
    %c0_i32 = arith.constant 0 : i32
    %c0_i32_0 = arith.constant 0 : i32
    %c0_i32_1 = arith.constant 0 : i32
    return %c0_i32, %c0_i32_0 : i32, i32
  }
  func.func @transform_5(%arg0: i32) -> (i32, i32) {
    %c0_i32 = arith.constant 0 : i32
    %c0_i32_0 = arith.constant 0 : i32
    %c0_i32_1 = arith.constant 0 : i32
    return %c0_i32, %c0_i32_0 : i32, i32
  }
  func.func @transform_6(%arg0: i32) -> (i32, i32) {
    %c0_i32 = arith.constant 0 : i32
    %c0_i32_0 = arith.constant 0 : i32
    %c0_i32_1 = arith.constant 0 : i32
    return %c0_i32, %c0_i32_0 : i32, i32
  }
  func.func @transform_7(%arg0: i32) -> (i32, i32) {
    %c0_i32 = arith.constant 0 : i32
    %c0_i32_0 = arith.constant 0 : i32
    return %c0_i32, %arg0 : i32, i32
  }
  func.func @transform_8(%arg0: i32) -> (i32, i32) {
    %c0_i32 = arith.constant 0 : i32
    %c0_i32_0 = arith.constant 0 : i32
    return %c0_i32, %arg0 : i32, i32
  }
  func.func @transform_9(%arg0: i32) -> (i32, i32) {
    %c0_i32 = arith.constant 0 : i32
    %c0_i32_0 = arith.constant 0 : i32
    return %c0_i32, %arg0 : i32, i32
  }
}

</mosaic_0001>

<bundles_post_ra>
// kernel: dac_encoder_forward.11
= control target key start
LH: loop header
LB: loop body
LE: loop exit
PB: predicated region body
PF: predicated region fallthrough
CT: control target
= control target key end

     0   :  { %s382_s12 = smov 0   ;;  %s427_s0 = inlined_call_operand.vmem [shape: f32[2,1,70], index: 0, kind: input, shape index: {}]   ;;  %s428_s1 = inlined_call_operand.vmem [shape: f32[7,4,1], index: 1, kind: input, shape index: {}]   ;;  %s429_s2 = inlined_call_operand.vmem [shape: f32[4,1], index: 2, kind: input, shape index: {}]   ;;  %s430_s3 = inlined_call_operand.vmem [shape: f32[2,4,64], index: 3, kind: output, shape index: {}]  }
   0x1 LB: > { %s315_s13 = sadd.s32 4294967295, %s353_s12   ;;  %p319_p0 = scmp.ge.s32.totalorder %s353_s12, 1  ;;  %s353_s12 = sphi %s382_s12, %s13_s12  }
   0x2   : > { %p135_p1 = scmp.lt.s32.totalorder %s353_s12, 3 }
   0x4   : > { %p136_p2 = pnand %p319_p0, %p135_p1 }
   0x5   : > { %v322_v0 = vld [vmem:[%s428_s1 + $0x4] sm:$0xf] (!%p136_p2)  ;;  %v324_v1 = vld [vmem:[%s428_s1 + $0xc] sm:$0xf] (!%p136_p2)  ;;  %v355_v2 = vmov (!%p136_p2), 0   ;;  %p156_p3 = scmp.lt.s32.totalorder (!%p136_p2), %s315_s13, 1 }
   0x6   : > { %139 = sbr.rel (%p136_p2) target bundleno = 284 (0x11c), region = 32  ;;  %345 = vset.pattern.permute.xlu0 (!%p136_p2), %v355_v2  ;;  %346 = vset.pattern.permute.xlu1 (!%p136_p2), %v355_v2  ;;  %v323_v3 = vld [vmem:[%s428_s1 + $0x8] sm:$0xf] (!%p136_p2)  ;;  %v325_v4 = vld [vmem:[%s428_s1 + $0x10] sm:$0xf] (!%p136_p2)  ;;  %s356_s4 = smov (!%p136_p2), 127  }
   0x7   : > { %182 = vperm.xlu0 (!%p136_p2), %345, %v322_v0   ;;  %208 = vperm.xlu1 (!%p136_p2), %346, %v324_v1   ;;  %v326_v5 = vld [vmem:[%s428_s1 + $0x14] sm:$0xf] (!%p136_p2)  ;;  %v327_v6 = vld [vmem:[%s428_s1 + $0x18] sm:$0xf] (!%p136_p2)  ;;  %v164_v7 = vld [vmem:[%s428_s1] sm:$0xf] (!%p136_p2) }
   0x8   : > { %s357_s5 = smov (!%p136_p2), 126   ;;  %s358_s6 = smov (!%p136_p2), 125   ;;  %v256_v17 = vld [vmem:[%s429_s2] sm:$0xf] (!%p136_p2)  ;;  %vm263_vm0 = vcmask (!%p136_p2), 519168  }
   0x9   : > { %s359_s9 = smov (!%p136_p2), 124   ;;  %s360_s10 = smov (!%p136_p2), 123  }
   0xa   : > { %s361_s11 = smov (!%p136_p2), 122  }
   0xb   : > { %195 = vperm.xlu0 (!%p136_p2), %345, %v323_v3   ;;  %221 = vperm.xlu1 (!%p136_p2), %346, %v325_v4  }
   0xd   : > { %s432_s13 = smov (!%p156_p3, %s315_s13), 1 }
   0xe   : > { %s158_s30 = scalar_lea.vmem %s427_s0, %s432_s13  ;;  %s320_s14 = sshll.u32 %s432_s13, 2 }
   0xf   : > { %234 = vperm.xlu0 %345, %v326_v5   ;;  %247 = vperm.xlu1 %346, %v327_v6   ;;  %v321_v8 = vld [vmem:[%s158_s30] ss:$0 sm:$0xff]  ;;  %s162_s17 = scalar_lea.vmem %s430_s3, %s320_s14 }
  0x13   : > { %167 = vperm.xlu0 %345, %v164_v7  }
  0x86   : > { %v183_v9 = vpop.permute.xlu0 %182  ;;  %v209_v10 = vpop.permute.xlu1 %208 }
  0x87   : > { %v185_v11 = vmul.f32 %v321_v8, %v183_v9  ;;  %v211_v12 = vmul.f32 %v321_v8, %v209_v10 }
  0x89   : > { %187 = vrot.lane.b32.xlu1 %v185_v11, %s356_s4 }
  0x8a   : > { %v196_v13 = vpop.permute.xlu0 %195  ;;  %v222_v14 = vpop.permute.xlu1 %221 }
  0x8b   : > { %v198_v15 = vmul.f32 %v321_v8, %v196_v13  ;;  %v224_v16 = vmul.f32 %v321_v8, %v222_v14 }
  0x8d   : > { %200 = vrot.lane.b32.xlu0 %v198_v15, %s357_s5  ;;  %213 = vrot.lane.b32.xlu1 %v211_v12, %s358_s6 }
  0x8e   : > { %v248_v18 = vpop.permute.xlu1 %247  ;;  %v235_v19 = vpop.permute.xlu0 %234 }
  0x8f   : > { %v250_v20 = vmul.f32 %v321_v8, %v248_v18  ;;  %v237_v21 = vmul.f32 %v321_v8, %v235_v19 }
  0x91   : > { %259 = vperm.xlu0 %345, %v256_v17   ;;  %226 = vrot.lane.b32.xlu1 %v224_v16, %s359_s9 }
  0x92   : > { %v168_v22 = vpop.permute.xlu0 %167 }
  0x93   : > { %v176_v24 = vmul.f32 %v321_v8, %v168_v22 }
  0x95   : > { %239 = vrot.lane.b32.xlu0 %v237_v21, %s360_s10  ;;  %252 = vrot.lane.b32.xlu1 %v250_v20, %s361_s11 }
  0xfb   : > { %v188_v23 = vpop.permute.xlu1 %187 }
  0xfc   : > { %v190_v26 = vadd.f32 %v188_v23, %v176_v24 }
  0xff   : > { %v201_v25 = vpop.permute.xlu0 %200  ;;  %v214_v27 = vpop.permute.xlu1 %213 }
 0x100   : > { %v203_v28 = vadd.f32 %v201_v25, %v190_v26 }
 0x102   : > { %v216_v29 = vadd.f32 %v214_v27, %v203_v28 }
 0x103   : > { %v227_v30 = vpop.permute.xlu1 %226 }
 0x104   : > { %v229_v32 = vadd.f32 %v227_v30, %v216_v29 }
 0x107   : > { %v253_v35 = vpop.permute.xlu1 %252 }
 0x110   : > { %v260_v31 = vpop.permute.xlu0 %259 }
 0x114   : > { %v240_v33 = vpop.permute.xlu0 %239 }
 0x115   : > { %v242_v34 = vadd.f32 %v240_v33, %v229_v32 }
 0x117   : > { %v255_v36 = vadd.f32 %v253_v35, %v242_v34 }
 0x119   : > { %v262_v37 = vadd.f32 %v260_v31, %v255_v36 }
 0x11b   : > { %264 = vst.msk [vmem:[%s162_s17] sm:$0xf] %vm263_vm0, %v262_v37 }
 0x11c PF: > { %s13_s12 = sadd.s32 1, %s353_s12  }
 0x11d   : > { %p10_p4 = scmp.ge.s32.totalorder %s13_s12, 4  }
 0x11f   :  { %12 = sbr.rel (!%p10_p4) target bundleno = 1 (0x1), region = 68 }

// kernel: dac_encoder_forward.12
= control target key start
LH: loop header
LB: loop body
LE: loop exit
PB: predicated region body
PF: predicated region fallthrough
CT: control target
= control target key end

     0   :  { %s1475_s30 = smov 0   ;;  %s1648_s0 = inlined_call_operand.vmem [shape: f32[2,8,70], index: 0, kind: input, shape index: {}]   ;;  %s1649_s1 = inlined_call_operand.vmem [shape: f32[7,8,8], index: 1, kind: input, shape index: {}]   ;;  %s1650_s2 = inlined_call_operand.vmem [shape: f32[8,1], index: 2, kind: input, shape index: {}]   ;;  %s1651_s3 = inlined_call_operand.vmem [shape: f32[8,1], index: 3, kind: input, shape index: {}]   ;;  %s1652_s4 = inlined_call_operand.vmem [shape: f32[8,1], index: 4, kind: input, shape index: {}]   ;;  %s1653_s5 = inlined_call_operand.vmem [shape: f32[8,8], index: 5, kind: input, shape index: {}]   ;;  %s1654_s6 = inlined_call_operand.vmem [shape: f32[8,1], index: 6, kind: input, shape index: {}]   ;;  %s1655_s7 = inlined_call_operand.vmem [shape: f32[8,1], index: 7, kind: input, shape index: {}]   ;;  %s1656_s8 = inlined_call_operand.vmem [shape: f32[8,1], index: 8, kind: input, shape index: {}]   ;;  %s1657_s9 = inlined_call_operand.vmem [shape: f32[2,8,64], index: 9, kind: output, shape index: {}]  }
   0x1 LB: > { %s1272_s10 = sadd.s32 4294967295, %s1407_s30   ;;  %p1276_p0 = scmp.ge.s32.totalorder %s1407_s30, 1  ;;  %s1407_s30 = sphi %s1475_s30, %s19_s30  }
   0x2   : > { %p286_p1 = scmp.lt.s32.totalorder %s1407_s30, 3 }
   0x4   : > { %p287_p2 = pnand %p1276_p0, %p286_p1 }
   0x5   : > { %v329_v0 = vld [vmem:[%s1651_s3] sm:$0xff] (!%p287_p2)  ;;  %v1409_v1 = vmov (!%p287_p2), 0   ;;  %v1410_v3 = vmov (!%p287_p2), 0.0   ;;  %vm1411_vm0 = vmmov (!%p287_p2), 0   ;;  %p320_p3 = scmp.lt.s32.totalorder (!%p287_p2), %s1272_s10, 1  ;;  %vm449_vm14 = vcmask (!%p287_p2), 572416  }
   0x6   : > { %290 = sbr.rel (%p287_p2) target bundleno = 1109 (0x455), region = 56  ;;  %1391 = vset.pattern.permute.xlu0 (!%p287_p2), %v1409_v1  ;;  %1392 = vset.pattern.permute.xlu1 (!%p287_p2), %v1409_v1  ;;  %v330_v2 = vld [vmem:[%s1652_s4] sm:$0xff] (!%p287_p2)  ;;  %v1412_v18 = vmov (!%p287_p2), 2102212464   ;;  %v1413_v20 = vmov (!%p287_p2), 920167782  }
   0x7   : > { %333 = vperm.xlu0 (!%p287_p2), %1391, %v329_v0   ;;  %1324 = vmatprep.subr.mxu1 (!%p287_p2), %v1410_v3  ;;  %v1414_v24 = vmov (!%p287_p2), 1326507024   ;;  %v1415_v26 = vmov (!%p287_p2), 683565275   ;;  %v1416_v28 = vmov (!%p287_p2), 2475754826  }
   0x8   : > { %1319 = vmatprep.subr.mxu0 (!%p287_p2), %v1410_v3  ;;  %1326 = vmatprep.mubr.msk.f32.mxu1 (!%p287_p2), %vm1411_vm0, %v1410_v3  ;;  %v1417_v31 = vmov (!%p287_p2), 2131351028   ;;  %vm459_vm15 = vcmask (!%p287_p2), 64512   ;;  %s1418_s21 = smov (!%p287_p2), 125   ;;  %s1419_s22 = smov (!%p287_p2), 127  }
   0x9   : > { %1321 = vmatprep.mubr.msk.f32.mxu0 (!%p287_p2), %vm1411_vm0, %v1410_v3  ;;  %s1420_s23 = smov (!%p287_p2), 123   ;;  %s1421_s24 = smov (!%p287_p2), 126  }
   0xa   : > { %s1422_s27 = smov (!%p287_p2), 124   ;;  %s1423_s11 = smov (!%p287_p2), 122  }
   0xb   : > { %443 = vperm.xlu0 (!%p287_p2), %1391, %v330_v2   ;;  %s1424_s13 = smov (!%p287_p2), 3  }
   0xd   : > { %s1659_s10 = smov (!%p320_p3, %s1272_s10), 1 }
   0xe   : > { %s1277_s15 = sshll.u32 %s1659_s10, 3 }
   0xf   : > { %s323_s18 = scalar_lea.vmem %s1648_s0, %s1277_s15  ;;  %s327_s17 = scalar_lea.vmem %s1657_s9, %s1277_s15 }
  0x10   : > { %v1503_v4 = vld [vmem:[%s323_s18] sm:$0xff] }
  0x86   : > { %v334_v5 = vpop.permute.xlu0 %333 }
  0x87   : > { %v1506_v6 = vmul.f32 %v334_v5, %v1503_v4 }
  0x89   : > { %v340_v7 = vand.u32 2139095040, %v1506_v6  ;;  %v337_v8 = vand.u32 2147483647, %v1506_v6  ;;  %vm339_vm8 = vcmp.lt.s32.totalorder %v1506_v6, 0  ;;  %vm429_vm13 = vweird.f32 %v1506_v6 }
  0x8b   : > { %v341_v9 = vshrl.u32 %v340_v7, 23  ;;  %v344_v11 = vand.u32 8388607, %v337_v8  ;;  %vm338_vm9 = vcmp.le.f32.partialorder %v337_v8, 0.7853982 }
  0x8d   : > { %v1279_v10 = vadd.s32 4294967169, %v341_v9  ;;  %v345_v14 = vor.u32 8388608, %v344_v11 }
  0x8f   : > { %v347_v12 = vadd.s32 1, %v1279_v10  ;;  %v385_v22 = vshll.u32 %v345_v14, 8 }
  0x91   : > { %vm348_vm1 = vcmp.gt.s32.totalorder %v347_v12, 0 }
  0x92   : > { %v349_v13 = vsel %vm348_vm1, %v347_v12, 0 }
  0x93   : > { %v351_v15 = vand.u32 31, %v349_v13  ;;  %v350_v16 = vshrl.u32 %v349_v13, 5 }
  0x95   : > { %v352_v17 = vsub.s32 32, %v351_v15  ;;  %v363_v19 = vshll.u32 %v1412_v18, %v351_v15  ;;  %v366_v21 = vshll.u32 %v1413_v20, %v351_v15  ;;  %v354_v27 = vshll.u32 %v1415_v26, %v351_v15 }
  0x96   : > { %v357_v30 = vshll.u32 %v1416_v28, %v351_v15  ;;  %v360_v33 = vshll.u32 %v1417_v31, %v351_v15  ;;  %vm372_vm2 = vcmp.lt.s32.totalorder %v350_v16, 4  ;;  %vm369_vm3 = vcmp.lt.s32.totalorder %v350_v16, 1 }
  0x97   : > { %v364_v23 = vshrl.u32 %v1413_v20, %v352_v17  ;;  %v367_v25 = vshrl.u32 %v1414_v24, %v352_v17  ;;  %v355_v29 = vshrl.u32 %v1416_v28, %v352_v17  ;;  %v358_v32 = vshrl.u32 %v1417_v31, %v352_v17 }
  0x98   : > { %v361_v34 = vshrl.u32 %v1412_v18, %v352_v17  ;;  %v353_v38 = vshrl.u32 %v1415_v26, %v352_v17  ;;  %vm370_vm4 = vcmp.lt.s32.totalorder %v350_v16, 2  ;;  %vm371_vm5 = vcmp.lt.s32.totalorder %v350_v16, 3 }
  0x99   : > { %v365_v35 = vor.u32 %v364_v23, %v363_v19  ;;  %v368_v36 = vor.u32 %v367_v25, %v366_v21  ;;  %v356_v37 = vor.u32 %v355_v29, %v354_v27  ;;  %v359_v39 = vor.u32 %v358_v32, %v357_v30 }
  0x9a   : > { %v362_v40 = vor.u32 %v361_v34, %v360_v33 }
  0x9b   : > { %v378_v41 = vsel %vm372_vm2, %v365_v35, 920167782  ;;  %v382_v42 = vsel %vm372_vm2, %v368_v36, 1326507024  ;;  %v377_v44 = vsel %vm369_vm3, %v356_v37, %v359_v39  ;;  %v373_v47 = vsel %vm369_vm3, %v353_v38, %v356_v37 }
  0x9c   : > { %v374_v43 = vsel %vm372_vm2, %v362_v40, 2102212464  ;;  %v379_v45 = vsel %vm371_vm5, %v362_v40, %v378_v41  ;;  %v381_v46 = vsel %vm369_vm3, %v359_v39, %v362_v40  ;;  %v383_v50 = vsel %vm371_vm5, %v365_v35, %v382_v42  ;;  %v444_v42 = vpop.permute.xlu0 %443 }
  0x9d   : > { %v375_v48 = vsel %vm371_vm5, %v359_v39, %v374_v43  ;;  %v380_v49 = vsel %vm370_vm4, %v377_v44, %v379_v45  ;;  %v384_v51 = vsel %vm370_vm4, %v381_v46, %v383_v50  ;;  %v1008_v50 = vld [vmem:[%s1655_s7] sm:$0xff] }
  0x9e   : > { %v1523_v52 = vmul.u32.u64.low %v385_v22, %v380_v49  ;;  %v1524_v53 = vmul.u32.u64.high %v385_v22, %v380_v49, %v1523_v52  ;;  %v1526_v54 = vmul.u32.u64.low %v385_v22, %v384_v51  ;;  %v1527_v55 = vmul.u32.u64.high %v385_v22, %v384_v51, %v1526_v54  ;;  %v1119_v49 = vld [vmem:[%s1656_s8] sm:$0xff] }
  0x9f   : > { %v376_v56 = vsel %vm370_vm4, %v373_v47, %v375_v48  ;;  %v451_v48 = vld [vmem:[%s1649_s1] sm:$0xff] }
  0xa0   : > { %v395_v57 = vadd.s32 1, %v1524_v53  ;;  %v392_v58 = vmul.u32 %v385_v22, %v376_v56  ;;  %vm394_vm6 = vc.u32 %v1527_v55, %v1523_v52  ;;  %v393_v10 = vadd.s32 %v1523_v52, %v1527_v55  ;;  %v1129_v51 = vld [vmem:[%s1654_s6] sm:$0xff]  ;;  %v1283_v52 = vld [vmem:[%s1649_s1 + $0x8] sm:$0xff]  ;;  %v1288_v55 = vld [vmem:[%s1649_s1 + $0x18] sm:$0xff] }
  0xa1   : > { %v1286_v56 = vld [vmem:[%s1649_s1 + $0x10] sm:$0xff] }
  0xa2   : > { %v396_v59 = vsel %vm394_vm6, %v395_v57, %v1524_v53 }
  0xa3   : > { %v397_v60 = vadd.s32 %v396_v59, %v392_v58  ;;  %v1292_v59 = vld [vmem:[%s1649_s1 + $0x28] sm:$0xff] }
  0xa5   : > { %v398_v61 = vadd.s32 536870912, %v397_v60 }
  0xa7   : > { %v399_v62 = vshrl.u32 %v398_v61, 30 }
  0xa9   : > { %v400_v63 = vshll.u32 %v399_v62, 30  ;;  %v423_v25 = vsub.s32 4, %v399_v62 }
  0xab   : > { %v401_v0 = vsub.s32 %v397_v60, %v400_v63  ;;  %v424_v30 = vsel %vm339_vm8, %v423_v25, %v399_v62  ;;  %v1290_v60 = vld [vmem:[%s1649_s1 + $0x20] sm:$0xff]  ;;  %v1294_v62 = vld [vmem:[%s1649_s1 + $0x30] sm:$0xff] }
  0xac   : > { %v426_v33 = vsel %vm338_vm9, 0, %v424_v30 }
  0xad   : > { %v403_v1 = vsub.s32 0, %v401_v0  ;;  %v430_v34 = vadd.s32 3, %v426_v33 }
  0xaf   : > { %v1280_v2 = vmin.u32 %v403_v1, %v401_v0  ;;  %v431_v35 = vand.u32 3, %v430_v34 }
  0xb1   : > { %v405_v5 = vclz %v1280_v2  ;;  %vm436_vm10 = vcmp.eq.s32.totalorder %v431_v35, 2  ;;  %vm433_vm11 = vcmp.eq.s32.totalorder %v431_v35, 0  ;;  %vm432_vm12 = vcmp.lt.s32.totalorder %v431_v35, 2 }
  0xb3   : > { %v1281_v7 = vadd.s32 4294967294, %v405_v5 }
  0xb5   : > { %vm1282_vm7 = vcmp.lt.s32.totalorder %v1281_v7, 0 }
  0xb6   : > { %v408_v9 = vsel %vm1282_vm7, 0, %v1281_v7 }
  0xb7   : > { %v409_v11 = vsub.s32 32, %v408_v9  ;;  %v413_v12 = vsub.s32 4294967266, %v408_v9  ;;  %v410_v13 = vshll.u32 %v401_v0, %v408_v9 }
  0xb9   : > { %v411_v14 = vshrl.u32 %v393_v10, %v409_v11  ;;  %v414_v15 = vadd.s32 127, %v413_v12 }
  0xbb   : > { %v412_v16 = vor.u32 %v411_v14, %v410_v13  ;;  %v415_v17 = vshll.u32 %v414_v15, 23 }
  0xbd   : > { %v416_v19 = vor.u32 4788187, %v415_v17  ;;  %v419_v22 = vcvt.s32.f32 %v412_v16 }
  0xbf   : > { %v417_v21 = vand.u32 2147483647, %v416_v19 }
  0xc1   : > { %v420_v23 = vmul.f32 %v419_v22, %v417_v21 }
  0xc3   : > { %v421_v27 = vxor.u32 2147483648, %v420_v23 }
  0xc5   : > { %v422_v29 = vsel %vm339_vm8, %v421_v27, %v420_v23 }
  0xc6   : > { %v425_v32 = vsel %vm338_vm9, %v1506_v6, %v422_v29  ;;  %v1001_v6 = vld [vmem:[%s1650_s2] sm:$0xff] }
  0xc7   : > { %1393 = vcosq.f32 %v425_v32 }
  0xc8   : > { %1395 = vsinq.f32 %v425_v32 }
  0xd1   : > { %v1394_v36 = vpop.eup %1393 }
  0xd2   : > { %v1396_v37 = vpop.eup %1395  ;;  %v437_v38 = vxor.u32 2147483648, %v1394_v36 }
  0xd3   : > { %v434_v39 = vxor.u32 2147483648, %v1396_v37 }
  0xd4   : > { %v438_v40 = vsel %vm436_vm10, %v437_v38, %v1396_v37 }
  0xd5   : > { %v435_v41 = vsel %vm433_vm11, %v1394_v36, %v434_v39 }
  0xd6   : > { %v439_v8 = vsel %vm432_vm12, %v435_v41, %v438_v40 }
  0xd7   : > { %v440_v43 = vsel %vm429_vm13, nan, %v439_v8  ;;  %vm1217_vm13 = vcmask 523264  }
  0xd8   : > { %v446_v44 = vmul.f32 %v444_v42, %v440_v43 }
  0xda   : > { %v447_v45 = vmul.f32 %v446_v44, %v440_v43 }
  0xdc   : > { %v448_v46 = vadd.f32 %v447_v45, %v1503_v4 }
  0xde   : > { %450 = vst.msk [vmem:[#allocation2] sm:$0xff] %vm449_vm14, %v448_v46 }
  0xe5   : > { %v452_v47 = vld [vmem:[#allocation2] sm:$0xff] }
  0xe6   : > { %687 = vrot.lane.b32.xlu0 %v452_v47, %s1418_s21  ;;  %456 = vrot.lane.b32.xlu1 %v452_v47, %s1419_s22 }
  0xe7   : > { %1325 = vmatpush3.msra.mxu1 %v452_v47 }
  0xe8   : > { %1334 = vmatprep.subr.mxu1 %v1410_v3  ;;  %1327 = vmatmul.mubr.msk.f32.vlgmr.msra.gmra.mrb[0].mxu1 %vm459_vm15, %v451_v48 }
  0xe9   : > { %1336 = vmatprep.mubr.msk.f32.mxu1 %vm1411_vm0, %v1410_v3 }
  0xea   : > { %845 = vrot.lane.b32.xlu0 %v452_v47, %s1420_s23  ;;  %608 = vrot.lane.b32.xlu1 %v452_v47, %s1421_s24 }
  0xee   : > { %1004 = vperm.xlu0 %1391, %v1001_v6   ;;  %766 = vrot.lane.b32.xlu1 %v452_v47, %s1422_s27 }
  0xf2   : > { %1122 = vperm.xlu0 %1391, %v1119_v49   ;;  %924 = vrot.lane.b32.xlu1 %v452_v47, %s1423_s11 }
  0xf6   : > { %1011 = vperm.xlu1 %1392, %v1008_v50  }
  0xfa   : > { %1132 = vperm.xlu1 %1392, %v1129_v51  }
 0x158   : > { %v688_v53 = vpop.permute.xlu0 %687  ;;  %v457_v54 = vpop.permute.xlu1 %456 }
 0x159   : > { %1320 = vmatpush3.msra.mxu0 %v457_v54  ;;  %1335 = vmatpush3.msra.mxu1 %v688_v53 }
 0x15a   : > { %1322 = vmatmul.mubr.msk.f32.vlgmr.msra.gmra.mrb[0].mxu0 %vm459_vm15, %v1283_v52  ;;  %1329 = vmatprep.subr.mxu0 %v1410_v3 }
 0x15b   : > { %1344 = vmatprep.subr.mxu1 %v1410_v3  ;;  %1331 = vmatprep.mubr.msk.f32.mxu0 %vm1411_vm0, %v1410_v3 }
 0x15c   : > { %v846_v57 = vpop.permute.xlu0 %845  ;;  %v609_v58 = vpop.permute.xlu1 %608  ;;  %1337 = vmatmul.mubr.msk.f32.vlgmr.msra.gmra.mrb[2].mxu1 %vm459_vm15, %v1288_v55 }
 0x15d   : > { %1330 = vmatpush3.msra.mxu0 %v609_v58  ;;  %1345 = vmatpush3.msra.mxu1 %v846_v57 }
 0x15e   : > { %1332 = vmatmul.mubr.msk.f32.vlgmr.msra.gmra.mrb[2].mxu0 %vm459_vm15, %v1286_v56  ;;  %1339 = vmatprep.subr.mxu0 %v1410_v3 }
 0x15f   : > { %1341 = vmatprep.mubr.msk.f32.mxu0 %vm1411_vm0, %v1410_v3  ;;  %1346 = vmatprep.mubr.msk.f32.mxu1 %vm1411_vm0, %v1410_v3 }
 0x160   : > { %v767_v61 = vpop.permute.xlu1 %766  ;;  %1347 = vmatmul.mubr.msk.f32.vlgmr.msra.gmra.mrb[4].mxu1 %vm459_vm15, %v1292_v59  ;;  %1354 = vmatprep.subr.mxu1 %v1410_v3 }
 0x161   : > { %1340 = vmatpush3.msra.mxu0 %v767_v61  ;;  %1356 = vmatprep.mubr.msk.f32.mxu1 %vm1411_vm0, %v1410_v3 }
 0x162   : > { %1342 = vmatmul.mubr.msk.f32.vlgmr.msra.gmra.mrb[4].mxu0 %vm459_vm15, %v1290_v60  ;;  %1349 = vmatprep.subr.mxu0 %v1410_v3 }
 0x163   : > { %1351 = vmatprep.mubr.msk.f32.mxu0 %vm1411_vm0, %v1410_v3 }
 0x164   : > { %v925_v63 = vpop.permute.xlu1 %924 }
 0x165   : > { %1350 = vmatpush3.msra.mxu0 %v925_v63 }
 0x166   : > { %1352 = vmatmul.mubr.msk.f32.vlgmr.msra.gmra.mrb[6].mxu0 %vm459_vm15, %v1294_v62 }
 0x16d   : > { %v1005_v27 = vpop.permute.xlu0 %1004 }
 0x175   : > { %v1012_v30 = vpop.permute.xlu1 %1011 }
 0x1bb   : > { %v602_v0 = vpop.f32.mrb[0].mxu1 }
 0x1bc   : > { %v1328_v1 = vpop.f32.mrb[1].mxu1 }
 0x22d   : > { %v529_v2 = vpop.f32.mrb[0].mxu0 }
 0x22e   : > { %v603_v5 = vadd.f32 %v602_v0, %v529_v2  ;;  %v1323_v7 = vpop.f32.mrb[1].mxu0 }
 0x22f   : > { %v759_v9 = vpop.f32.mrb[2].mxu1 }
 0x230   : > { %v1338_v10 = vpop.f32.mrb[3].mxu1 }
 0x231   : > { %v680_v11 = vpop.f32.mrb[2].mxu0 }
 0x232   : > { %v684_v12 = vadd.f32 %v680_v11, %v603_v5  ;;  %v1333_v13 = vpop.f32.mrb[3].mxu0 }
 0x233   : > { %v917_v14 = vpop.f32.mrb[4].mxu1 }
 0x234   : > { %v763_v3 = vadd.f32 %v759_v9, %v684_v12  ;;  %v1348_v15 = vpop.f32.mrb[5].mxu1 }
 0x235   : > { %v838_v16 = vpop.f32.mrb[4].mxu0 }
 0x236   : > { %v842_v17 = vadd.f32 %v838_v16, %v763_v3  ;;  %v1343_v19 = vpop.f32.mrb[5].mxu0 }
 0x238   : > { %v921_v21 = vadd.f32 %v917_v14, %v842_v17 }
 0x239   : > { %v996_v22 = vpop.f32.mrb[6].mxu0 }
 0x23a   : > { %v1000_v23 = vadd.f32 %v996_v22, %v921_v21  ;;  %v1353_v25 = vpop.f32.mrb[7].mxu0 }
 0x23c   : > { %v1598_v29 = vadd.f32 %v1005_v27, %v1000_v23 }
 0x23e   : > { %v1601_v32 = vmul.f32 %v1012_v30, %v1598_v29 }
 0x240   : > { %v1018_v33 = vand.u32 2139095040, %v1601_v32  ;;  %v1015_v37 = vand.u32 2147483647, %v1601_v32  ;;  %vm1017_vm7 = vcmp.lt.s32.totalorder %v1601_v32, 0  ;;  %vm1107_vm12 = vweird.f32 %v1601_v32 }
 0x242   : > { %v1019_v34 = vshrl.u32 %v1018_v33, 23  ;;  %v1022_v40 = vand.u32 8388607, %v1015_v37  ;;  %vm1016_vm8 = vcmp.le.f32.partialorder %v1015_v37, 0.7853982 }
 0x244   : > { %v1296_v35 = vadd.s32 4294967169, %v1019_v34  ;;  %v1023_v51 = vor.u32 8388608, %v1022_v40 }
 0x246   : > { %v1025_v36 = vadd.s32 1, %v1296_v35 }
 0x248   : > { %vm1026_vm0 = vcmp.gt.s32.totalorder %v1025_v36, 0 }
 0x249   : > { %v1027_v38 = vsel %vm1026_vm0, %v1025_v36, 0 }
 0x24a   : > { %v1029_v39 = vand.u32 31, %v1027_v38  ;;  %v1028_v8 = vshrl.u32 %v1027_v38, 5 }
 0x24c   : > { %v1030_v41 = vsub.s32 32, %v1029_v39  ;;  %v1032_v42 = vshll.u32 %v1415_v26, %v1029_v39  ;;  %v1035_v43 = vshll.u32 %v1416_v28, %v1029_v39  ;;  %v1038_v46 = vshll.u32 %v1417_v31, %v1029_v39 }
 0x24d   : > { %v1041_v48 = vshll.u32 %v1412_v18, %v1029_v39  ;;  %v1044_v49 = vshll.u32 %v1413_v20, %v1029_v39  ;;  %vm1047_vm1 = vcmp.lt.s32.totalorder %v1028_v8, 1  ;;  %vm1050_vm2 = vcmp.lt.s32.totalorder %v1028_v8, 4 }
 0x24e   : > { %v1033_v44 = vshrl.u32 %v1416_v28, %v1030_v41  ;;  %v1036_v45 = vshrl.u32 %v1417_v31, %v1030_v41  ;;  %v1039_v47 = vshrl.u32 %v1412_v18, %v1030_v41  ;;  %v1042_v6 = vshrl.u32 %v1413_v20, %v1030_v41 }
 0x24f   : > { %v1045_v50 = vshrl.u32 %v1414_v24, %v1030_v41  ;;  %v1031_v58 = vshrl.u32 %v1415_v26, %v1030_v41  ;;  %vm1049_vm3 = vcmp.lt.s32.totalorder %v1028_v8, 3  ;;  %vm1048_vm4 = vcmp.lt.s32.totalorder %v1028_v8, 2 }
 0x250   : > { %v1034_v52 = vor.u32 %v1033_v44, %v1032_v42  ;;  %v1037_v53 = vor.u32 %v1036_v45, %v1035_v43  ;;  %v1040_v54 = vor.u32 %v1039_v47, %v1038_v46  ;;  %v1043_v55 = vor.u32 %v1042_v6, %v1041_v48 }
 0x251   : > { %v1046_v28 = vor.u32 %v1045_v50, %v1044_v49  ;;  %v1063_v24 = vshll.u32 %v1023_v51, 8 }
 0x252   : > { %v1052_v56 = vsel %vm1050_vm2, %v1040_v54, 2102212464  ;;  %v1055_v31 = vsel %vm1047_vm1, %v1034_v52, %v1037_v53  ;;  %v1059_v57 = vsel %vm1047_vm1, %v1037_v53, %v1040_v54  ;;  %v1056_v18 = vsel %vm1050_vm2, %v1043_v55, 920167782 }
 0x253   : > { %v1060_v59 = vsel %vm1050_vm2, %v1046_v28, 1326507024  ;;  %v1057_v20 = vsel %vm1049_vm3, %v1040_v54, %v1056_v18  ;;  %v1051_v61 = vsel %vm1047_vm1, %v1031_v58, %v1034_v52  ;;  %v1053_v62 = vsel %vm1049_vm3, %v1037_v53, %v1052_v56  ;;  %v1123_v54 = vpop.permute.xlu0 %1122  ;;  %v1133_v58 = vpop.permute.xlu1 %1132 }
 0x254   : > { %v1061_v60 = vsel %vm1049_vm3, %v1043_v55, %v1060_v59  ;;  %v1058_v63 = vsel %vm1048_vm4, %v1055_v31, %v1057_v20  ;;  %v1054_v9 = vsel %vm1048_vm4, %v1051_v61, %v1053_v62 }
 0x255   : > { %v1062_v0 = vsel %vm1048_vm4, %v1059_v57, %v1061_v60  ;;  %v1621_v5 = vmul.u32.u64.low %v1063_v24, %v1058_v63  ;;  %v1622_v7 = vmul.u32.u64.high %v1063_v24, %v1058_v63, %v1621_v5  ;;  %v1070_v10 = vmul.u32 %v1063_v24, %v1054_v9  ;;  %v1128_v57 = vld [vmem:[%s1653_s5] sm:$0xff] }
 0x256   : > { %v1618_v1 = vmul.u32.u64.low %v1063_v24, %v1062_v0  ;;  %v1619_v2 = vmul.u32.u64.high %v1063_v24, %v1062_v0, %v1618_v1 }
 0x257   : > { %v1073_v26 = vadd.s32 1, %v1622_v7 }
 0x258   : > { %vm1072_vm5 = vc.u32 %v1619_v2, %v1621_v5  ;;  %v1071_v23 = vadd.s32 %v1621_v5, %v1619_v2 }
 0x259   : > { %v1074_v11 = vsel %vm1072_vm5, %v1073_v26, %v1622_v7 }
 0x25a   : > { %v1075_v12 = vadd.s32 %v1074_v11, %v1070_v10 }
 0x25c   : > { %v1076_v13 = vadd.s32 536870912, %v1075_v12 }
 0x25e   : > { %v1077_v14 = vshrl.u32 %v1076_v13, 30 }
 0x260   : > { %v1078_v3 = vshll.u32 %v1077_v14, 30  ;;  %v1101_v8 = vsub.s32 4, %v1077_v14 }
 0x262   : > { %v1079_v15 = vsub.s32 %v1075_v12, %v1078_v3  ;;  %v1102_v44 = vsel %vm1017_vm7, %v1101_v8, %v1077_v14 }
 0x263   : > { %v1104_v46 = vsel %vm1016_vm8, 0, %v1102_v44 }
 0x264   : > { %v1081_v16 = vsub.s32 0, %v1079_v15  ;;  %v1108_v47 = vadd.s32 3, %v1104_v46 }
 0x266   : > { %v1297_v17 = vmin.u32 %v1081_v16, %v1079_v15  ;;  %v1109_v48 = vand.u32 3, %v1108_v47 }
 0x268   : > { %v1083_v19 = vclz %v1297_v17  ;;  %vm1114_vm9 = vcmp.eq.s32.totalorder %v1109_v48, 2  ;;  %vm1111_vm10 = vcmp.eq.s32.totalorder %v1109_v48, 0  ;;  %vm1110_vm11 = vcmp.lt.s32.totalorder %v1109_v48, 2 }
 0x26a   : > { %v1298_v21 = vadd.s32 4294967294, %v1083_v19 }
 0x26c   : > { %vm1299_vm6 = vcmp.lt.s32.totalorder %v1298_v21, 0 }
 0x26d   : > { %v1086_v22 = vsel %vm1299_vm6, 0, %v1298_v21 }
 0x26e   : > { %v1087_v25 = vsub.s32 32, %v1086_v22  ;;  %v1091_v27 = vsub.s32 4294967266, %v1086_v22  ;;  %v1088_v30 = vshll.u32 %v1079_v15, %v1086_v22 }
 0x270   : > { %v1089_v33 = vshrl.u32 %v1071_v23, %v1087_v25  ;;  %v1092_v34 = vadd.s32 127, %v1091_v27 }
 0x272   : > { %v1090_v35 = vor.u32 %v1089_v33, %v1088_v30  ;;  %v1093_v36 = vshll.u32 %v1092_v34, 23 }
 0x274   : > { %v1094_v38 = vor.u32 4788187, %v1093_v36  ;;  %v1097_v40 = vcvt.s32.f32 %v1090_v35 }
 0x276   : > { %v1095_v39 = vand.u32 2147483647, %v1094_v38 }
 0x278   : > { %v1098_v41 = vmul.f32 %v1097_v40, %v1095_v39 }
 0x27a   : > { %v1099_v42 = vxor.u32 2147483648, %v1098_v41 }
 0x27c   : > { %v1100_v43 = vsel %vm1017_vm7, %v1099_v42, %v1098_v41 }
 0x27d   : > { %v1103_v45 = vsel %vm1016_vm8, %v1601_v32, %v1100_v43 }
 0x27e   : > { %1397 = vcosq.f32 %v1103_v45 }
 0x27f   : > { %1399 = vsinq.f32 %v1103_v45 }
 0x288   : > { %v1398_v6 = vpop.eup %1397 }
 0x289   : > { %v1400_v49 = vpop.eup %1399  ;;  %v1115_v50 = vxor.u32 2147483648, %v1398_v6 }
 0x28a   : > { %v1112_v51 = vxor.u32 2147483648, %v1400_v49 }
 0x28b   : > { %v1116_v52 = vsel %vm1114_vm9, %v1115_v50, %v1400_v49 }
 0x28c   : > { %v1113_v53 = vsel %vm1111_vm10, %v1398_v6, %v1112_v51 }
 0x28d   : > { %v1117_v37 = vsel %vm1110_vm11, %v1113_v53, %v1116_v52 }
 0x28e   : > { %v1118_v55 = vsel %vm1107_vm12, nan, %v1117_v37 }
 0x28f   : > { %v1125_v28 = vmul.f32 %v1123_v54, %v1118_v55 }
 0x291   : > { %v1126_v56 = vmul.f32 %v1125_v28, %v1118_v55 }
 0x293   : > { %v1127_v31 = vadd.f32 %v1126_v56, %v1598_v29 }
 0x295   : > { %1355 = vmatpush3.msra.mxu1 %v1127_v31 }
 0x296   : > { %1357 = vmatmul.mubr.msk.f32.vlgmr.msra.gmra.mrb[6].mxu1 %vm459_vm15, %v1128_v57 }
 0x369   : > { %v1204_v18 = vpop.f32.mrb[6].mxu1 }
 0x36a   : > { %v1205_v59 = vadd.f32 %v1204_v18, %v1133_v58  ;;  %v1358_v20 = vpop.f32.mrb[7].mxu1 }
 0x36c   : > { %1209 = vrot.lane.b32.xlu0 %v1205_v59, %s1424_s13 }
 0x3de   : > { %v1210_v32 = vpop.permute.xlu0 %1209 }
 0x3df   : > { %v1212_v60 = vadd.f32 %v1210_v32, %v1503_v4 }
 0x3e1   : > { %1214 = vrot.lane.b32.xlu1 %v1212_v60, %s1418_s21 }
 0x453   : > { %v1215_v29 = vpop.permute.xlu1 %1214 }
 0x454   : > { %1218 = vst.msk [vmem:[%s327_s17] sm:$0xff] %vm1217_vm13, %v1215_v29 }
 0x455 PF: > { %s19_s30 = sadd.s32 1, %s1407_s30  }
 0x456   : > { %p16_p4 = scmp.ge.s32.totalorder %s19_s30, 4  }
 0x458   :  { %18 = sbr.rel (!%p16_p4) target bundleno = 1 (0x1), region = 92 }

// kernel: dac_encoder_forward.13
= control target key start
LH: loop header
LB: loop body
LE: loop exit
PB: predicated region body
PF: predicated region fallthrough
CT: control target
= control target key end

     0   :  { %s1475_s30 = smov 0   ;;  %s1648_s0 = inlined_call_operand.vmem [shape: f32[2,8,82], index: 0, kind: input, shape index: {}]   ;;  %s1649_s1 = inlined_call_operand.vmem [shape: f32[7,8,8], index: 1, kind: input, shape index: {}]   ;;  %s1650_s2 = inlined_call_operand.vmem [shape: f32[8,1], index: 2, kind: input, shape index: {}]   ;;  %s1651_s3 = inlined_call_operand.vmem [shape: f32[8,1], index: 3, kind: input, shape index: {}]   ;;  %s1652_s4 = inlined_call_operand.vmem [shape: f32[8,1], index: 4, kind: input, shape index: {}]   ;;  %s1653_s5 = inlined_call_operand.vmem [shape: f32[8,8], index: 5, kind: input, shape index: {}]   ;;  %s1654_s6 = inlined_call_operand.vmem [shape: f32[8,1], index: 6, kind: input, shape index: {}]   ;;  %s1655_s7 = inlined_call_operand.vmem [shape: f32[8,1], index: 7, kind: input, shape index: {}]   ;;  %s1656_s8 = inlined_call_operand.vmem [shape: f32[8,1], index: 8, kind: input, shape index: {}]   ;;  %s1657_s9 = inlined_call_operand.vmem [shape: f32[2,8,64], index: 9, kind: output, shape index: {}]  }
   0x1 LB: > { %s1272_s10 = sadd.s32 4294967295, %s1407_s30   ;;  %p1276_p0 = scmp.ge.s32.totalorder %s1407_s30, 1  ;;  %s1407_s30 = sphi %s1475_s30, %s19_s30  }
   0x2   : > { %p286_p1 = scmp.lt.s32.totalorder %s1407_s30, 3 }
   0x4   : > { %p287_p2 = pnand %p1276_p0, %p286_p1 }
   0x5   : > { %v329_v0 = vld [vmem:[%s1651_s3] sm:$0xff] (!%p287_p2)  ;;  %v1409_v1 = vmov (!%p287_p2), 0   ;;  %v1410_v3 = vmov (!%p287_p2), 0.0   ;;  %vm1411_vm0 = vmmov (!%p287_p2), 0   ;;  %p320_p3 = scmp.lt.s32.totalorder (!%p287_p2), %s1272_s10, 1  ;;  %vm449_vm14 = vcmask (!%p287_p2), 670720  }
   0x6   : > { %290 = sbr.rel (%p287_p2) target bundleno = 1109 (0x455), region = 56  ;;  %1391 = vset.pattern.permute.xlu0 (!%p287_p2), %v1409_v1  ;;  %1392 = vset.pattern.permute.xlu1 (!%p287_p2), %v1409_v1  ;;  %v330_v2 = vld [vmem:[%s1652_s4] sm:$0xff] (!%p287_p2)  ;;  %v1412_v18 = vmov (!%p287_p2), 2102212464   ;;  %v1413_v20 = vmov (!%p287_p2), 920167782  }
   0x7   : > { %333 = vperm.xlu0 (!%p287_p2), %1391, %v329_v0   ;;  %1324 = vmatprep.subr.mxu1 (!%p287_p2), %v1410_v3  ;;  %v1414_v24 = vmov (!%p287_p2), 1326507024   ;;  %v1415_v26 = vmov (!%p287_p2), 683565275   ;;  %v1416_v28 = vmov (!%p287_p2), 2475754826  }
   0x8   : > { %1319 = vmatprep.subr.mxu0 (!%p287_p2), %v1410_v3  ;;  %1326 = vmatprep.mubr.msk.f32.mxu1 (!%p287_p2), %vm1411_vm0, %v1410_v3  ;;  %v1417_v31 = vmov (!%p287_p2), 2131351028   ;;  %vm459_vm15 = vcmask (!%p287_p2), 64512   ;;  %s1418_s21 = smov (!%p287_p2), 119   ;;  %s1419_s22 = smov (!%p287_p2), 125  }
   0x9   : > { %1321 = vmatprep.mubr.msk.f32.mxu0 (!%p287_p2), %vm1411_vm0, %v1410_v3  ;;  %s1420_s23 = smov (!%p287_p2), 113   ;;  %s1421_s24 = smov (!%p287_p2), 122  }
   0xa   : > { %s1422_s27 = smov (!%p287_p2), 116   ;;  %s1423_s11 = smov (!%p287_p2), 110  }
   0xb   : > { %443 = vperm.xlu0 (!%p287_p2), %1391, %v330_v2   ;;  %s1424_s13 = smov (!%p287_p2), 9  }
   0xd   : > { %s1659_s10 = smov (!%p320_p3, %s1272_s10), 1 }
   0xe   : > { %s1277_s15 = sshll.u32 %s1659_s10, 3 }
   0xf   : > { %s323_s18 = scalar_lea.vmem %s1648_s0, %s1277_s15  ;;  %s327_s17 = scalar_lea.vmem %s1657_s9, %s1277_s15 }
  0x10   : > { %v1503_v4 = vld [vmem:[%s323_s18] sm:$0xff] }
  0x86   : > { %v334_v5 = vpop.permute.xlu0 %333 }
  0x87   : > { %v1506_v6 = vmul.f32 %v334_v5, %v1503_v4 }
  0x89   : > { %v340_v7 = vand.u32 2139095040, %v1506_v6  ;;  %v337_v8 = vand.u32 2147483647, %v1506_v6  ;;  %vm339_vm8 = vcmp.lt.s32.totalorder %v1506_v6, 0  ;;  %vm429_vm13 = vweird.f32 %v1506_v6 }
  0x8b   : > { %v341_v9 = vshrl.u32 %v340_v7, 23  ;;  %v344_v11 = vand.u32 8388607, %v337_v8  ;;  %vm338_vm9 = vcmp.le.f32.partialorder %v337_v8, 0.7853982 }
  0x8d   : > { %v1279_v10 = vadd.s32 4294967169, %v341_v9  ;;  %v345_v14 = vor.u32 8388608, %v344_v11 }
  0x8f   : > { %v347_v12 = vadd.s32 1, %v1279_v10  ;;  %v385_v22 = vshll.u32 %v345_v14, 8 }
  0x91   : > { %vm348_vm1 = vcmp.gt.s32.totalorder %v347_v12, 0 }
  0x92   : > { %v349_v13 = vsel %vm348_vm1, %v347_v12, 0 }
  0x93   : > { %v351_v15 = vand.u32 31, %v349_v13  ;;  %v350_v16 = vshrl.u32 %v349_v13, 5 }
  0x95   : > { %v352_v17 = vsub.s32 32, %v351_v15  ;;  %v363_v19 = vshll.u32 %v1412_v18, %v351_v15  ;;  %v366_v21 = vshll.u32 %v1413_v20, %v351_v15  ;;  %v354_v27 = vshll.u32 %v1415_v26, %v351_v15 }
  0x96   : > { %v357_v30 = vshll.u32 %v1416_v28, %v351_v15  ;;  %v360_v33 = vshll.u32 %v1417_v31, %v351_v15  ;;  %vm372_vm2 = vcmp.lt.s32.totalorder %v350_v16, 4  ;;  %vm369_vm3 = vcmp.lt.s32.totalorder %v350_v16, 1 }
  0x97   : > { %v364_v23 = vshrl.u32 %v1413_v20, %v352_v17  ;;  %v367_v25 = vshrl.u32 %v1414_v24, %v352_v17  ;;  %v355_v29 = vshrl.u32 %v1416_v28, %v352_v17  ;;  %v358_v32 = vshrl.u32 %v1417_v31, %v352_v17 }
  0x98   : > { %v361_v34 = vshrl.u32 %v1412_v18, %v352_v17  ;;  %v353_v38 = vshrl.u32 %v1415_v26, %v352_v17  ;;  %vm370_vm4 = vcmp.lt.s32.totalorder %v350_v16, 2  ;;  %vm371_vm5 = vcmp.lt.s32.totalorder %v350_v16, 3 }
  0x99   : > { %v365_v35 = vor.u32 %v364_v23, %v363_v19  ;;  %v368_v36 = vor.u32 %v367_v25, %v366_v21  ;;  %v356_v37 = vor.u32 %v355_v29, %v354_v27  ;;  %v359_v39 = vor.u32 %v358_v32, %v357_v30 }
  0x9a   : > { %v362_v40 = vor.u32 %v361_v34, %v360_v33 }
  0x9b   : > { %v378_v41 = vsel %vm372_vm2, %v365_v35, 920167782  ;;  %v382_v42 = vsel %vm372_vm2, %v368_v36, 1326507024  ;;  %v377_v44 = vsel %vm369_vm3, %v356_v37, %v359_v39  ;;  %v373_v47 = vsel %vm369_vm3, %v353_v38, %v356_v37 }
  0x9c   : > { %v374_v43 = vsel %vm372_vm2, %v362_v40, 2102212464  ;;  %v379_v45 = vsel %vm371_vm5, %v362_v40, %v378_v41  ;;  %v381_v46 = vsel %vm369_vm3, %v359_v39, %v362_v40  ;;  %v383_v50 = vsel %vm371_vm5, %v365_v35, %v382_v42  ;;  %v444_v42 = vpop.permute.xlu0 %443 }
  0x9d   : > { %v375_v48 = vsel %vm371_vm5, %v359_v39, %v374_v43  ;;  %v380_v49 = vsel %vm370_vm4, %v377_v44, %v379_v45  ;;  %v384_v51 = vsel %vm370_vm4, %v381_v46, %v383_v50  ;;  %v1008_v50 = vld [vmem:[%s1655_s7] sm:$0xff] }
  0x9e   : > { %v1523_v52 = vmul.u32.u64.low %v385_v22, %v380_v49  ;;  %v1524_v53 = vmul.u32.u64.high %v385_v22, %v380_v49, %v1523_v52  ;;  %v1526_v54 = vmul.u32.u64.low %v385_v22, %v384_v51  ;;  %v1527_v55 = vmul.u32.u64.high %v385_v22, %v384_v51, %v1526_v54  ;;  %v1119_v49 = vld [vmem:[%s1656_s8] sm:$0xff] }
  0x9f   : > { %v376_v56 = vsel %vm370_vm4, %v373_v47, %v375_v48  ;;  %v451_v48 = vld [vmem:[%s1649_s1] sm:$0xff] }
  0xa0   : > { %v395_v57 = vadd.s32 1, %v1524_v53  ;;  %v392_v58 = vmul.u32 %v385_v22, %v376_v56  ;;  %vm394_vm6 = vc.u32 %v1527_v55, %v1523_v52  ;;  %v393_v10 = vadd.s32 %v1523_v52, %v1527_v55  ;;  %v1129_v51 = vld [vmem:[%s1654_s6] sm:$0xff]  ;;  %v1283_v52 = vld [vmem:[%s1649_s1 + $0x8] sm:$0xff]  ;;  %v1288_v55 = vld [vmem:[%s1649_s1 + $0x18] sm:$0xff] }
  0xa1   : > { %v1286_v56 = vld [vmem:[%s1649_s1 + $0x10] sm:$0xff] }
  0xa2   : > { %v396_v59 = vsel %vm394_vm6, %v395_v57, %v1524_v53 }
  0xa3   : > { %v397_v60 = vadd.s32 %v396_v59, %v392_v58  ;;  %v1292_v59 = vld [vmem:[%s1649_s1 + $0x28] sm:$0xff] }
  0xa5   : > { %v398_v61 = vadd.s32 536870912, %v397_v60 }
  0xa7   : > { %v399_v62 = vshrl.u32 %v398_v61, 30 }
  0xa9   : > { %v400_v63 = vshll.u32 %v399_v62, 30  ;;  %v423_v25 = vsub.s32 4, %v399_v62 }
  0xab   : > { %v401_v0 = vsub.s32 %v397_v60, %v400_v63  ;;  %v424_v30 = vsel %vm339_vm8, %v423_v25, %v399_v62  ;;  %v1290_v60 = vld [vmem:[%s1649_s1 + $0x20] sm:$0xff]  ;;  %v1294_v62 = vld [vmem:[%s1649_s1 + $0x30] sm:$0xff] }
  0xac   : > { %v426_v33 = vsel %vm338_vm9, 0, %v424_v30 }
  0xad   : > { %v403_v1 = vsub.s32 0, %v401_v0  ;;  %v430_v34 = vadd.s32 3, %v426_v33 }
  0xaf   : > { %v1280_v2 = vmin.u32 %v403_v1, %v401_v0  ;;  %v431_v35 = vand.u32 3, %v430_v34 }
  0xb1   : > { %v405_v5 = vclz %v1280_v2  ;;  %vm436_vm10 = vcmp.eq.s32.totalorder %v431_v35, 2  ;;  %vm433_vm11 = vcmp.eq.s32.totalorder %v431_v35, 0  ;;  %vm432_vm12 = vcmp.lt.s32.totalorder %v431_v35, 2 }
  0xb3   : > { %v1281_v7 = vadd.s32 4294967294, %v405_v5 }
  0xb5   : > { %vm1282_vm7 = vcmp.lt.s32.totalorder %v1281_v7, 0 }
  0xb6   : > { %v408_v9 = vsel %vm1282_vm7, 0, %v1281_v7 }
  0xb7   : > { %v409_v11 = vsub.s32 32, %v408_v9  ;;  %v413_v12 = vsub.s32 4294967266, %v408_v9  ;;  %v410_v13 = vshll.u32 %v401_v0, %v408_v9 }
  0xb9   : > { %v411_v14 = vshrl.u32 %v393_v10, %v409_v11  ;;  %v414_v15 = vadd.s32 127, %v413_v12 }
  0xbb   : > { %v412_v16 = vor.u32 %v411_v14, %v410_v13  ;;  %v415_v17 = vshll.u32 %v414_v15, 23 }
  0xbd   : > { %v416_v19 = vor.u32 4788187, %v415_v17  ;;  %v419_v22 = vcvt.s32.f32 %v412_v16 }
  0xbf   : > { %v417_v21 = vand.u32 2147483647, %v416_v19 }
  0xc1   : > { %v420_v23 = vmul.f32 %v419_v22, %v417_v21 }
  0xc3   : > { %v421_v27 = vxor.u32 2147483648, %v420_v23 }
  0xc5   : > { %v422_v29 = vsel %vm339_vm8, %v421_v27, %v420_v23 }
  0xc6   : > { %v425_v32 = vsel %vm338_vm9, %v1506_v6, %v422_v29  ;;  %v1001_v6 = vld [vmem:[%s1650_s2] sm:$0xff] }
  0xc7   : > { %1393 = vcosq.f32 %v425_v32 }
  0xc8   : > { %1395 = vsinq.f32 %v425_v32 }
  0xd1   : > { %v1394_v36 = vpop.eup %1393 }
  0xd2   : > { %v1396_v37 = vpop.eup %1395  ;;  %v437_v38 = vxor.u32 2147483648, %v1394_v36 }
  0xd3   : > { %v434_v39 = vxor.u32 2147483648, %v1396_v37 }
  0xd4   : > { %v438_v40 = vsel %vm436_vm10, %v437_v38, %v1396_v37 }
  0xd5   : > { %v435_v41 = vsel %vm433_vm11, %v1394_v36, %v434_v39 }
  0xd6   : > { %v439_v8 = vsel %vm432_vm12, %v435_v41, %v438_v40 }
  0xd7   : > { %v440_v43 = vsel %vm429_vm13, nan, %v439_v8  ;;  %vm1217_vm13 = vcmask 523264  }
  0xd8   : > { %v446_v44 = vmul.f32 %v444_v42, %v440_v43 }
  0xda   : > { %v447_v45 = vmul.f32 %v446_v44, %v440_v43 }
  0xdc   : > { %v448_v46 = vadd.f32 %v447_v45, %v1503_v4 }
  0xde   : > { %450 = vst.msk [vmem:[#allocation2] sm:$0xff] %vm449_vm14, %v448_v46 }
  0xe5   : > { %v452_v47 = vld [vmem:[#allocation2] sm:$0xff] }
  0xe6   : > { %687 = vrot.lane.b32.xlu0 %v452_v47, %s1418_s21  ;;  %456 = vrot.lane.b32.xlu1 %v452_v47, %s1419_s22 }
  0xe7   : > { %1325 = vmatpush3.msra.mxu1 %v452_v47 }
  0xe8   : > { %1334 = vmatprep.subr.mxu1 %v1410_v3  ;;  %1327 = vmatmul.mubr.msk.f32.vlgmr.msra.gmra.mrb[0].mxu1 %vm459_vm15, %v451_v48 }
  0xe9   : > { %1336 = vmatprep.mubr.msk.f32.mxu1 %vm1411_vm0, %v1410_v3 }
  0xea   : > { %845 = vrot.lane.b32.xlu0 %v452_v47, %s1420_s23  ;;  %608 = vrot.lane.b32.xlu1 %v452_v47, %s1421_s24 }
  0xee   : > { %1004 = vperm.xlu0 %1391, %v1001_v6   ;;  %766 = vrot.lane.b32.xlu1 %v452_v47, %s1422_s27 }
  0xf2   : > { %1122 = vperm.xlu0 %1391, %v1119_v49   ;;  %924 = vrot.lane.b32.xlu1 %v452_v47, %s1423_s11 }
  0xf6   : > { %1011 = vperm.xlu1 %1392, %v1008_v50  }
  0xfa   : > { %1132 = vperm.xlu1 %1392, %v1129_v51  }
 0x158   : > { %v688_v53 = vpop.permute.xlu0 %687  ;;  %v457_v54 = vpop.permute.xlu1 %456 }
 0x159   : > { %1320 = vmatpush3.msra.mxu0 %v457_v54  ;;  %1335 = vmatpush3.msra.mxu1 %v688_v53 }
 0x15a   : > { %1322 = vmatmul.mubr.msk.f32.vlgmr.msra.gmra.mrb[0].mxu0 %vm459_vm15, %v1283_v52  ;;  %1329 = vmatprep.subr.mxu0 %v1410_v3 }
 0x15b   : > { %1344 = vmatprep.subr.mxu1 %v1410_v3  ;;  %1331 = vmatprep.mubr.msk.f32.mxu0 %vm1411_vm0, %v1410_v3 }
 0x15c   : > { %v846_v57 = vpop.permute.xlu0 %845  ;;  %v609_v58 = vpop.permute.xlu1 %608  ;;  %1337 = vmatmul.mubr.msk.f32.vlgmr.msra.gmra.mrb[2].mxu1 %vm459_vm15, %v1288_v55 }
 0x15d   : > { %1330 = vmatpush3.msra.mxu0 %v609_v58  ;;  %1345 = vmatpush3.msra.mxu1 %v846_v57 }
 0x15e   : > { %1332 = vmatmul.mubr.msk.f32.vlgmr.msra.gmra.mrb[2].mxu0 %vm459_vm15, %v1286_v56  ;;  %1339 = vmatprep.subr.mxu0 %v1410_v3 }
 0x15f   : > { %1341 = vmatprep.mubr.msk.f32.mxu0 %vm1411_vm0, %v1410_v3  ;;  %1346 = vmatprep.mubr.msk.f32.mxu1 %vm1411_vm0, %v1410_v3 }
 0x160   : > { %v767_v61 = vpop.permute.xlu1 %766  ;;  %1347 = vmatmul.mubr.msk.f32.vlgmr.msra.gmra.mrb[4].mxu1 %vm459_vm15, %v1292_v59  ;;  %1354 = vmatprep.subr.mxu1 %v1410_v3 }
 0x161   : > { %1340 = vmatpush3.msra.mxu0 %v767_v61  ;;  %1356 = vmatprep.mubr.msk.f32.mxu1 %vm1411_vm0, %v1410_v3 }
 0x162   : > { %1342 = vmatmul.mubr.msk.f32.vlgmr.msra.gmra.mrb[4].mxu0 %vm459_vm15, %v1290_v60  ;;  %1349 = vmatprep.subr.mxu0 %v1410_v3 }
 0x163   : > { %1351 = vmatprep.mubr.msk.f32.mxu0 %vm1411_vm0, %v1410_v3 }
 0x164   : > { %v925_v63 = vpop.permute.xlu1 %924 }
 0x165   : > { %1350 = vmatpush3.msra.mxu0 %v925_v63 }
 0x166   : > { %1352 = vmatmul.mubr.msk.f32.vlgmr.msra.gmra.mrb[6].mxu0 %vm459_vm15, %v1294_v62 }
 0x16d   : > { %v1005_v27 = vpop.permute.xlu0 %1004 }
 0x175   : > { %v1012_v30 = vpop.permute.xlu1 %1011 }
 0x1bb   : > { %v602_v0 = vpop.f32.mrb[0].mxu1 }
 0x1bc   : > { %v1328_v1 = vpop.f32.mrb[1].mxu1 }
 0x22d   : > { %v529_v2 = vpop.f32.mrb[0].mxu0 }
 0x22e   : > { %v603_v5 = vadd.f32 %v602_v0, %v529_v2  ;;  %v1323_v7 = vpop.f32.mrb[1].mxu0 }
 0x22f   : > { %v759_v9 = vpop.f32.mrb[2].mxu1 }
 0x230   : > { %v1338_v10 = vpop.f32.mrb[3].mxu1 }
 0x231   : > { %v680_v11 = vpop.f32.mrb[2].mxu0 }
 0x232   : > { %v684_v12 = vadd.f32 %v680_v11, %v603_v5  ;;  %v1333_v13 = vpop.f32.mrb[3].mxu0 }
 0x233   : > { %v917_v14 = vpop.f32.mrb[4].mxu1 }
 0x234   : > { %v763_v3 = vadd.f32 %v759_v9, %v684_v12  ;;  %v1348_v15 = vpop.f32.mrb[5].mxu1 }
 0x235   : > { %v838_v16 = vpop.f32.mrb[4].mxu0 }
 0x236   : > { %v842_v17 = vadd.f32 %v838_v16, %v763_v3  ;;  %v1343_v19 = vpop.f32.mrb[5].mxu0 }
 0x238   : > { %v921_v21 = vadd.f32 %v917_v14, %v842_v17 }
 0x239   : > { %v996_v22 = vpop.f32.mrb[6].mxu0 }
 0x23a   : > { %v1000_v23 = vadd.f32 %v996_v22, %v921_v21  ;;  %v1353_v25 = vpop.f32.mrb[7].mxu0 }
 0x23c   : > { %v1598_v29 = vadd.f32 %v1005_v27, %v1000_v23 }
 0x23e   : > { %v1601_v32 = vmul.f32 %v1012_v30, %v1598_v29 }
 0x240   : > { %v1018_v33 = vand.u32 2139095040, %v1601_v32  ;;  %v1015_v37 = vand.u32 2147483647, %v1601_v32  ;;  %vm1017_vm7 = vcmp.lt.s32.totalorder %v1601_v32, 0  ;;  %vm1107_vm12 = vweird.f32 %v1601_v32 }
 0x242   : > { %v1019_v34 = vshrl.u32 %v1018_v33, 23  ;;  %v1022_v40 = vand.u32 8388607, %v1015_v37  ;;  %vm1016_vm8 = vcmp.le.f32.partialorder %v1015_v37, 0.7853982 }
 0x244   : > { %v1296_v35 = vadd.s32 4294967169, %v1019_v34  ;;  %v1023_v51 = vor.u32 8388608, %v1022_v40 }
 0x246   : > { %v1025_v36 = vadd.s32 1, %v1296_v35 }
 0x248   : > { %vm1026_vm0 = vcmp.gt.s32.totalorder %v1025_v36, 0 }
 0x249   : > { %v1027_v38 = vsel %vm1026_vm0, %v1025_v36, 0 }
 0x24a   : > { %v1029_v39 = vand.u32 31, %v1027_v38  ;;  %v1028_v8 = vshrl.u32 %v1027_v38, 5 }
 0x24c   : > { %v1030_v41 = vsub.s32 32, %v1029_v39  ;;  %v1032_v42 = vshll.u32 %v1415_v26, %v1029_v39  ;;  %v1035_v43 = vshll.u32 %v1416_v28, %v1029_v39  ;;  %v1038_v46 = vshll.u32 %v1417_v31, %v1029_v39 }
 0x24d   : > { %v1041_v48 = vshll.u32 %v1412_v18, %v1029_v39  ;;  %v1044_v49 = vshll.u32 %v1413_v20, %v1029_v39  ;;  %vm1047_vm1 = vcmp.lt.s32.totalorder %v1028_v8, 1  ;;  %vm1050_vm2 = vcmp.lt.s32.totalorder %v1028_v8, 4 }
 0x24e   : > { %v1033_v44 = vshrl.u32 %v1416_v28, %v1030_v41  ;;  %v1036_v45 = vshrl.u32 %v1417_v31, %v1030_v41  ;;  %v1039_v47 = vshrl.u32 %v1412_v18, %v1030_v41  ;;  %v1042_v6 = vshrl.u32 %v1413_v20, %v1030_v41 }
 0x24f   : > { %v1045_v50 = vshrl.u32 %v1414_v24, %v1030_v41  ;;  %v1031_v58 = vshrl.u32 %v1415_v26, %v1030_v41  ;;  %vm1049_vm3 = vcmp.lt.s32.totalorder %v1028_v8, 3  ;;  %vm1048_vm4 = vcmp.lt.s32.totalorder %v1028_v8, 2 }
 0x250   : > { %v1034_v52 = vor.u32 %v1033_v44, %v1032_v42  ;;  %v1037_v53 = vor.u32 %v1036_v45, %v1035_v43  ;;  %v1040_v54 = vor.u32 %v1039_v47, %v1038_v46  ;;  %v1043_v55 = vor.u32 %v1042_v6, %v1041_v48 }
 0x251   : > { %v1046_v28 = vor.u32 %v1045_v50, %v1044_v49  ;;  %v1063_v24 = vshll.u32 %v1023_v51, 8 }
 0x252   : > { %v1052_v56 = vsel %vm1050_vm2, %v1040_v54, 2102212464  ;;  %v1055_v31 = vsel %vm1047_vm1, %v1034_v52, %v1037_v53  ;;  %v1059_v57 = vsel %vm1047_vm1, %v1037_v53, %v1040_v54  ;;  %v1056_v18 = vsel %vm1050_vm2, %v1043_v55, 920167782 }
 0x253   : > { %v1060_v59 = vsel %vm1050_vm2, %v1046_v28, 1326507024  ;;  %v1057_v20 = vsel %vm1049_vm3, %v1040_v54, %v1056_v18  ;;  %v1051_v61 = vsel %vm1047_vm1, %v1031_v58, %v1034_v52  ;;  %v1053_v62 = vsel %vm1049_vm3, %v1037_v53, %v1052_v56  ;;  %v1123_v54 = vpop.permute.xlu0 %1122  ;;  %v1133_v58 = vpop.permute.xlu1 %1132 }
 0x254   : > { %v1061_v60 = vsel %vm1049_vm3, %v1043_v55, %v1060_v59  ;;  %v1058_v63 = vsel %vm1048_vm4, %v1055_v31, %v1057_v20  ;;  %v1054_v9 = vsel %vm1048_vm4, %v1051_v61, %v1053_v62 }
 0x255   : > { %v1062_v0 = vsel %vm1048_vm4, %v1059_v57, %v1061_v60  ;;  %v1621_v5 = vmul.u32.u64.low %v1063_v24, %v1058_v63  ;;  %v1622_v7 = vmul.u32.u64.high %v1063_v24, %v1058_v63, %v1621_v5  ;;  %v1070_v10 = vmul.u32 %v1063_v24, %v1054_v9  ;;  %v1128_v57 = vld [vmem:[%s1653_s5] sm:$0xff] }
 0x256   : > { %v1618_v1 = vmul.u32.u64.low %v1063_v24, %v1062_v0  ;;  %v1619_v2 = vmul.u32.u64.high %v1063_v24, %v1062_v0, %v1618_v1 }
 0x257   : > { %v1073_v26 = vadd.s32 1, %v1622_v7 }
 0x258   : > { %vm1072_vm5 = vc.u32 %v1619_v2, %v1621_v5  ;;  %v1071_v23 = vadd.s32 %v1621_v5, %v1619_v2 }
 0x259   : > { %v1074_v11 = vsel %vm1072_vm5, %v1073_v26, %v1622_v7 }
 0x25a   : > { %v1075_v12 = vadd.s32 %v1074_v11, %v1070_v10 }
 0x25c   : > { %v1076_v13 = vadd.s32 536870912, %v1075_v12 }
 0x25e   : > { %v1077_v14 = vshrl.u32 %v1076_v13, 30 }
 0x260   : > { %v1078_v3 = vshll.u32 %v1077_v14, 30  ;;  %v1101_v8 = vsub.s32 4, %v1077_v14 }
 0x262   : > { %v1079_v15 = vsub.s32 %v1075_v12, %v1078_v3  ;;  %v1102_v44 = vsel %vm1017_vm7, %v1101_v8, %v1077_v14 }
 0x263   : > { %v1104_v46 = vsel %vm1016_vm8, 0, %v1102_v44 }
 0x264   : > { %v1081_v16 = vsub.s32 0, %v1079_v15  ;;  %v1108_v47 = vadd.s32 3, %v1104_v46 }
 0x266   : > { %v1297_v17 = vmin.u32 %v1081_v16, %v1079_v15  ;;  %v1109_v48 = vand.u32 3, %v1108_v47 }
 0x268   : > { %v1083_v19 = vclz %v1297_v17  ;;  %vm1114_vm9 = vcmp.eq.s32.totalorder %v1109_v48, 2  ;;  %vm1111_vm10 = vcmp.eq.s32.totalorder %v1109_v48, 0  ;;  %vm1110_vm11 = vcmp.lt.s32.totalorder %v1109_v48, 2 }
 0x26a   : > { %v1298_v21 = vadd.s32 4294967294, %v1083_v19 }
 0x26c   : > { %vm1299_vm6 = vcmp.lt.s32.totalorder %v1298_v21, 0 }
 0x26d   : > { %v1086_v22 = vsel %vm1299_vm6, 0, %v1298_v21 }
 0x26e   : > { %v1087_v25 = vsub.s32 32, %v1086_v22  ;;  %v1091_v27 = vsub.s32 4294967266, %v1086_v22  ;;  %v1088_v30 = vshll.u32 %v1079_v15, %v1086_v22 }
 0x270   : > { %v1089_v33 = vshrl.u32 %v1071_v23, %v1087_v25  ;;  %v1092_v34 = vadd.s32 127, %v1091_v27 }
 0x272   : > { %v1090_v35 = vor.u32 %v1089_v33, %v1088_v30  ;;  %v1093_v36 = vshll.u32 %v1092_v34, 23 }
 0x274   : > { %v1094_v38 = vor.u32 4788187, %v1093_v36  ;;  %v1097_v40 = vcvt.s32.f32 %v1090_v35 }
 0x276   : > { %v1095_v39 = vand.u32 2147483647, %v1094_v38 }
 0x278   : > { %v1098_v41 = vmul.f32 %v1097_v40, %v1095_v39 }
 0x27a   : > { %v1099_v42 = vxor.u32 2147483648, %v1098_v41 }
 0x27c   : > { %v1100_v43 = vsel %vm1017_vm7, %v1099_v42, %v1098_v41 }
 0x27d   : > { %v1103_v45 = vsel %vm1016_vm8, %v1601_v32, %v1100_v43 }
 0x27e   : > { %1397 = vcosq.f32 %v1103_v45 }
 0x27f   : > { %1399 = vsinq.f32 %v1103_v45 }
 0x288   : > { %v1398_v6 = vpop.eup %1397 }
 0x289   : > { %v1400_v49 = vpop.eup %1399  ;;  %v1115_v50 = vxor.u32 2147483648, %v1398_v6 }
 0x28a   : > { %v1112_v51 = vxor.u32 2147483648, %v1400_v49 }
 0x28b   : > { %v1116_v52 = vsel %vm1114_vm9, %v1115_v50, %v1400_v49 }
 0x28c   : > { %v1113_v53 = vsel %vm1111_vm10, %v1398_v6, %v1112_v51 }
 0x28d   : > { %v1117_v37 = vsel %vm1110_vm11, %v1113_v53, %v1116_v52 }
 0x28e   : > { %v1118_v55 = vsel %vm1107_vm12, nan, %v1117_v37 }
 0x28f   : > { %v1125_v28 = vmul.f32 %v1123_v54, %v1118_v55 }
 0x291   : > { %v1126_v56 = vmul.f32 %v1125_v28, %v1118_v55 }
 0x293   : > { %v1127_v31 = vadd.f32 %v1126_v56, %v1598_v29 }
 0x295   : > { %1355 = vmatpush3.msra.mxu1 %v1127_v31 }
 0x296   : > { %1357 = vmatmul.mubr.msk.f32.vlgmr.msra.gmra.mrb[6].mxu1 %vm459_vm15, %v1128_v57 }
 0x369   : > { %v1204_v18 = vpop.f32.mrb[6].mxu1 }
 0x36a   : > { %v1205_v59 = vadd.f32 %v1204_v18, %v1133_v58  ;;  %v1358_v20 = vpop.f32.mrb[7].mxu1 }
 0x36c   : > { %1209 = vrot.lane.b32.xlu0 %v1205_v59, %s1424_s13 }
 0x3de   : > { %v1210_v32 = vpop.permute.xlu0 %1209 }
 0x3df   : > { %v1212_v60 = vadd.f32 %v1210_v32, %v1503_v4 }
 0x3e1   : > { %1214 = vrot.lane.b32.xlu1 %v1212_v60, %s1418_s21 }
 0x453   : > { %v1215_v29 = vpop.permute.xlu1 %1214 }
 0x454   : > { %1218 = vst.msk [vmem:[%s327_s17] sm:$0xff] %vm1217_vm13, %v1215_v29 }
 0x455 PF: > { %s19_s30 = sadd.s32 1, %s1407_s30  }
 0x456   : > { %p16_p4 = scmp.ge.s32.totalorder %s19_s30, 4  }
 0x458   :  { %18 = sbr.rel (!%p16_p4) target bundleno = 1 (0x1), region = 92 }

// kernel: dac_encoder_forward.14
= control target key start
LH: loop header
LB: loop body
LE: loop exit
PB: predicated region body
PF: predicated region fallthrough
CT: control target
= control target key end

     0   :  { %s1671_s17 = smov 0   ;;  %s1886_s0 = inlined_call_operand.vmem [shape: f32[2,8,118], index: 0, kind: input, shape index: {}]   ;;  %s1887_s1 = inlined_call_operand.vmem [shape: f32[7,8,8], index: 1, kind: input, shape index: {}]   ;;  %s1888_s2 = inlined_call_operand.vmem [shape: f32[8,1], index: 2, kind: input, shape index: {}]   ;;  %s1889_s3 = inlined_call_operand.vmem [shape: f32[8,1], index: 3, kind: input, shape index: {}]   ;;  %s1890_s4 = inlined_call_operand.vmem [shape: f32[8,1], index: 4, kind: input, shape index: {}]   ;;  %s1891_s5 = inlined_call_operand.vmem [shape: f32[8,8], index: 5, kind: input, shape index: {}]   ;;  %s1892_s6 = inlined_call_operand.vmem [shape: f32[8,1], index: 6, kind: input, shape index: {}]   ;;  %s1893_s7 = inlined_call_operand.vmem [shape: f32[8,1], index: 7, kind: input, shape index: {}]   ;;  %s1894_s8 = inlined_call_operand.vmem [shape: f32[8,1], index: 8, kind: input, shape index: {}]   ;;  %s1895_s9 = inlined_call_operand.vmem [shape: f32[8,1], index: 9, kind: input, shape index: {}]   ;;  %s1896_s10 = inlined_call_operand.vmem [shape: f32[8,1], index: 10, kind: input, shape index: {}]   ;;  %s1897_s11 = inlined_call_operand.vmem [shape: f32[2,8,64], index: 11, kind: output, shape index: {}]  }
   0x1 LB: > { %s1446_s18 = sadd.s32 4294967295, %s1593_s17   ;;  %p1450_p0 = scmp.ge.s32.totalorder %s1593_s17, 1  ;;  %s1593_s17 = sphi %s1671_s17, %s21_s17  }
   0x2   : > { %p336_p1 = scmp.lt.s32.totalorder %s1593_s17, 3 }
   0x4   : > { %p337_p2 = pnand %p1450_p0, %p336_p1 }
   0x5   : > { %v383_v0 = vld [vmem:[%s1889_s3] sm:$0xff] (!%p337_p2)  ;;  %v1595_v1 = vmov (!%p337_p2), 0   ;;  %v1596_v3 = vmov (!%p337_p2), 0.0   ;;  %p374_p3 = scmp.lt.s32.totalorder (!%p337_p2), %s1446_s18, 1  ;;  %vm1597_vm0 = vmmov (!%p337_p2), 0   ;;  %vm503_vm14 = vcmask (!%p337_p2), 965632  }
   0x6   : > { %340 = sbr.rel (%p337_p2) target bundleno = 1196 (0x4ac), region = 64  ;;  %1573 = vset.pattern.permute.xlu0 (!%p337_p2), %v1595_v1  ;;  %1574 = vset.pattern.permute.xlu1 (!%p337_p2), %v1595_v1  ;;  %v384_v2 = vld [vmem:[%s1890_s4] sm:$0xff] (!%p337_p2)  ;;  %v1598_v18 = vmov (!%p337_p2), 2102212464   ;;  %v1599_v20 = vmov (!%p337_p2), 920167782  }
   0x7   : > { %387 = vperm.xlu0 (!%p337_p2), %1573, %v383_v0   ;;  %1502 = vmatprep.subr.mxu1 (!%p337_p2), %v1596_v3  ;;  %v1600_v24 = vmov (!%p337_p2), 1326507024   ;;  %v1601_v26 = vmov (!%p337_p2), 683565275   ;;  %v1602_v28 = vmov (!%p337_p2), 2475754826  }
   0x8   : > { %1497 = vmatprep.subr.mxu0 (!%p337_p2), %v1596_v3  ;;  %1504 = vmatprep.mubr.msk.f32.mxu1 (!%p337_p2), %vm1597_vm0, %v1596_v3  ;;  %v1603_v31 = vmov (!%p337_p2), 2131351028   ;;  %vm513_vm15 = vcmask (!%p337_p2), 64512   ;;  %s1604_s29 = smov (!%p337_p2), 101   ;;  %s1605_s30 = smov (!%p337_p2), 119  }
   0x9   : > { %1499 = vmatprep.mubr.msk.f32.mxu0 (!%p337_p2), %vm1597_vm0, %v1596_v3  ;;  %s1606_s12 = smov (!%p337_p2), 83   ;;  %s1607_s13 = smov (!%p337_p2), 110  }
   0xa   : > { %s1608_s16 = smov (!%p337_p2), 92   ;;  %s1609_s21 = smov (!%p337_p2), 74  }
   0xb   : > { %497 = vperm.xlu0 (!%p337_p2), %1573, %v384_v2  }
   0xd   : > { %s1899_s18 = smov (!%p374_p3, %s1446_s18), 1 }
   0xe   : > { %s1451_s23 = sshll.u32 %s1899_s18, 3 }
   0xf   : > { %s377_s26 = scalar_lea.vmem %s1886_s0, %s1451_s23  ;;  %s381_s15 = scalar_lea.vmem %s1897_s11, %s1451_s23 }
  0x10   : > { %v1699_v4 = vld [vmem:[%s377_s26] sm:$0xff] }
  0x86   : > { %v388_v5 = vpop.permute.xlu0 %387 }
  0x87   : > { %v1702_v6 = vmul.f32 %v388_v5, %v1699_v4 }
  0x89   : > { %v394_v7 = vand.u32 2139095040, %v1702_v6  ;;  %v391_v8 = vand.u32 2147483647, %v1702_v6  ;;  %vm393_vm8 = vcmp.lt.s32.totalorder %v1702_v6, 0  ;;  %vm483_vm13 = vweird.f32 %v1702_v6 }
  0x8b   : > { %v395_v9 = vshrl.u32 %v394_v7, 23  ;;  %v398_v11 = vand.u32 8388607, %v391_v8  ;;  %vm392_vm9 = vcmp.le.f32.partialorder %v391_v8, 0.7853982 }
  0x8d   : > { %v1453_v10 = vadd.s32 4294967169, %v395_v9  ;;  %v399_v14 = vor.u32 8388608, %v398_v11 }
  0x8f   : > { %v401_v12 = vadd.s32 1, %v1453_v10  ;;  %v439_v22 = vshll.u32 %v399_v14, 8 }
  0x91   : > { %vm402_vm1 = vcmp.gt.s32.totalorder %v401_v12, 0 }
  0x92   : > { %v403_v13 = vsel %vm402_vm1, %v401_v12, 0 }
  0x93   : > { %v405_v15 = vand.u32 31, %v403_v13  ;;  %v404_v16 = vshrl.u32 %v403_v13, 5 }
  0x95   : > { %v406_v17 = vsub.s32 32, %v405_v15  ;;  %v417_v19 = vshll.u32 %v1598_v18, %v405_v15  ;;  %v420_v21 = vshll.u32 %v1599_v20, %v405_v15  ;;  %v408_v27 = vshll.u32 %v1601_v26, %v405_v15 }
  0x96   : > { %v411_v30 = vshll.u32 %v1602_v28, %v405_v15  ;;  %v414_v33 = vshll.u32 %v1603_v31, %v405_v15  ;;  %vm426_vm2 = vcmp.lt.s32.totalorder %v404_v16, 4  ;;  %vm423_vm3 = vcmp.lt.s32.totalorder %v404_v16, 1 }
  0x97   : > { %v418_v23 = vshrl.u32 %v1599_v20, %v406_v17  ;;  %v421_v25 = vshrl.u32 %v1600_v24, %v406_v17  ;;  %v409_v29 = vshrl.u32 %v1602_v28, %v406_v17  ;;  %v412_v32 = vshrl.u32 %v1603_v31, %v406_v17 }
  0x98   : > { %v415_v34 = vshrl.u32 %v1598_v18, %v406_v17  ;;  %v407_v38 = vshrl.u32 %v1601_v26, %v406_v17  ;;  %vm424_vm4 = vcmp.lt.s32.totalorder %v404_v16, 2  ;;  %vm425_vm5 = vcmp.lt.s32.totalorder %v404_v16, 3 }
  0x99   : > { %v419_v35 = vor.u32 %v418_v23, %v417_v19  ;;  %v422_v36 = vor.u32 %v421_v25, %v420_v21  ;;  %v410_v37 = vor.u32 %v409_v29, %v408_v27  ;;  %v413_v39 = vor.u32 %v412_v32, %v411_v30 }
  0x9a   : > { %v416_v40 = vor.u32 %v415_v34, %v414_v33 }
  0x9b   : > { %v432_v41 = vsel %vm426_vm2, %v419_v35, 920167782  ;;  %v436_v42 = vsel %vm426_vm2, %v422_v36, 1326507024  ;;  %v431_v44 = vsel %vm423_vm3, %v410_v37, %v413_v39  ;;  %v427_v47 = vsel %vm423_vm3, %v407_v38, %v410_v37 }
  0x9c   : > { %v428_v43 = vsel %vm426_vm2, %v416_v40, 2102212464  ;;  %v433_v45 = vsel %vm425_vm5, %v416_v40, %v432_v41  ;;  %v435_v46 = vsel %vm423_vm3, %v413_v39, %v416_v40  ;;  %v437_v50 = vsel %vm425_vm5, %v419_v35, %v436_v42  ;;  %v498_v42 = vpop.permute.xlu0 %497 }
  0x9d   : > { %v429_v48 = vsel %vm425_vm5, %v413_v39, %v428_v43  ;;  %v434_v49 = vsel %vm424_vm4, %v431_v44, %v433_v45  ;;  %v438_v51 = vsel %vm424_vm4, %v435_v46, %v437_v50  ;;  %v1267_v50 = vld [vmem:[%s1895_s9] sm:$0xff] }
  0x9e   : > { %v1719_v52 = vmul.u32.u64.low %v439_v22, %v434_v49  ;;  %v1720_v53 = vmul.u32.u64.high %v439_v22, %v434_v49, %v1719_v52  ;;  %v1722_v54 = vmul.u32.u64.low %v439_v22, %v438_v51  ;;  %v1723_v55 = vmul.u32.u64.high %v439_v22, %v438_v51, %v1722_v54  ;;  %v1173_v49 = vld [vmem:[%s1894_s8] sm:$0xff] }
  0x9f   : > { %v430_v56 = vsel %vm424_vm4, %v427_v47, %v429_v48  ;;  %v505_v48 = vld [vmem:[%s1887_s1] sm:$0xff]  ;;  %v1457_v54 = vld [vmem:[%s1887_s1 + $0x8] sm:$0xff] }
  0xa0   : > { %v449_v57 = vadd.s32 1, %v1720_v53  ;;  %v446_v58 = vmul.u32 %v439_v22, %v430_v56  ;;  %vm448_vm6 = vc.u32 %v1723_v55, %v1719_v52  ;;  %v447_v10 = vadd.s32 %v1719_v52, %v1723_v55  ;;  %v1268_v51 = vld [vmem:[%s1896_s10] sm:$0xff] }
  0xa1   : > { %v1062_v52 = vld [vmem:[%s1893_s7] sm:$0xff] }
  0xa2   : > { %v450_v59 = vsel %vm448_vm6, %v449_v57, %v1720_v53  ;;  %v1183_v53 = vld [vmem:[%s1892_s6] sm:$0xff]  ;;  %v1462_v57 = vld [vmem:[%s1887_s1 + $0x18] sm:$0xff] }
  0xa3   : > { %v451_v60 = vadd.s32 %v450_v59, %v446_v58  ;;  %v1460_v58 = vld [vmem:[%s1887_s1 + $0x10] sm:$0xff] }
  0xa5   : > { %v452_v61 = vadd.s32 536870912, %v451_v60 }
  0xa7   : > { %v453_v62 = vshrl.u32 %v452_v61, 30  ;;  %v1466_v61 = vld [vmem:[%s1887_s1 + $0x28] sm:$0xff] }
  0xa9   : > { %v454_v63 = vshll.u32 %v453_v62, 30  ;;  %v477_v25 = vsub.s32 4, %v453_v62 }
  0xab   : > { %v455_v0 = vsub.s32 %v451_v60, %v454_v63  ;;  %v478_v30 = vsel %vm393_vm8, %v477_v25, %v453_v62  ;;  %v1464_v62 = vld [vmem:[%s1887_s1 + $0x20] sm:$0xff] }
  0xac   : > { %v480_v33 = vsel %vm392_vm9, 0, %v478_v30 }
  0xad   : > { %v457_v1 = vsub.s32 0, %v455_v0  ;;  %v484_v34 = vadd.s32 3, %v480_v33 }
  0xaf   : > { %v1454_v2 = vmin.u32 %v457_v1, %v455_v0  ;;  %v485_v35 = vand.u32 3, %v484_v34 }
  0xb1   : > { %v459_v5 = vclz %v1454_v2  ;;  %vm490_vm10 = vcmp.eq.s32.totalorder %v485_v35, 2  ;;  %vm487_vm11 = vcmp.eq.s32.totalorder %v485_v35, 0  ;;  %vm486_vm12 = vcmp.lt.s32.totalorder %v485_v35, 2 }
  0xb3   : > { %v1455_v7 = vadd.s32 4294967294, %v459_v5 }
  0xb5   : > { %vm1456_vm7 = vcmp.lt.s32.totalorder %v1455_v7, 0 }
  0xb6   : > { %v462_v9 = vsel %vm1456_vm7, 0, %v1455_v7 }
  0xb7   : > { %v463_v11 = vsub.s32 32, %v462_v9  ;;  %v467_v12 = vsub.s32 4294967266, %v462_v9  ;;  %v464_v13 = vshll.u32 %v455_v0, %v462_v9  ;;  %v1468_v0 = vld [vmem:[%s1887_s1 + $0x30] sm:$0xff] }
  0xb9   : > { %v465_v14 = vshrl.u32 %v447_v10, %v463_v11  ;;  %v468_v15 = vadd.s32 127, %v467_v12 }
  0xbb   : > { %v466_v16 = vor.u32 %v465_v14, %v464_v13  ;;  %v469_v17 = vshll.u32 %v468_v15, 23 }
  0xbd   : > { %v470_v19 = vor.u32 4788187, %v469_v17  ;;  %v473_v22 = vcvt.s32.f32 %v466_v16 }
  0xbf   : > { %v471_v21 = vand.u32 2147483647, %v470_v19 }
  0xc1   : > { %v474_v23 = vmul.f32 %v473_v22, %v471_v21 }
  0xc3   : > { %v475_v27 = vxor.u32 2147483648, %v474_v23 }
  0xc5   : > { %v476_v29 = vsel %vm393_vm8, %v475_v27, %v474_v23 }
  0xc6   : > { %v479_v32 = vsel %vm392_vm9, %v1702_v6, %v476_v29  ;;  %v1055_v6 = vld [vmem:[%s1888_s2] sm:$0xff] }
  0xc7   : > { %1575 = vcosq.f32 %v479_v32 }
  0xc8   : > { %1577 = vsinq.f32 %v479_v32 }
  0xd1   : > { %v1576_v36 = vpop.eup %1575 }
  0xd2   : > { %v1578_v37 = vpop.eup %1577  ;;  %v491_v38 = vxor.u32 2147483648, %v1576_v36 }
  0xd3   : > { %v488_v39 = vxor.u32 2147483648, %v1578_v37 }
  0xd4   : > { %v492_v40 = vsel %vm490_vm10, %v491_v38, %v1578_v37 }
  0xd5   : > { %v489_v41 = vsel %vm487_vm11, %v1576_v36, %v488_v39 }
  0xd6   : > { %v493_v8 = vsel %vm486_vm12, %v489_v41, %v492_v40 }
  0xd7   : > { %v494_v43 = vsel %vm483_vm13, nan, %v493_v8 }
  0xd8   : > { %v500_v44 = vmul.f32 %v498_v42, %v494_v43 }
  0xda   : > { %v501_v45 = vmul.f32 %v500_v44, %v494_v43 }
  0xdc   : > { %v502_v46 = vadd.f32 %v501_v45, %v1699_v4 }
  0xde   : > { %504 = vst.msk [vmem:[#allocation2] sm:$0xff] %vm503_vm14, %v502_v46 }
  0xe5   : > { %v506_v47 = vld [vmem:[#allocation2] sm:$0xff] }
  0xe6   : > { %741 = vrot.lane.b32.xlu0 %v506_v47, %s1604_s29  ;;  %510 = vrot.lane.b32.xlu1 %v506_v47, %s1605_s30 }
  0xe7   : > { %1503 = vmatpush3.msra.mxu1 %v506_v47 }
  0xe8   : > { %1512 = vmatprep.subr.mxu1 %v1596_v3  ;;  %1505 = vmatmul.mubr.msk.f32.vlgmr.msra.gmra.mrb[0].mxu1 %vm513_vm15, %v505_v48 }
  0xe9   : > { %1514 = vmatprep.mubr.msk.f32.mxu1 %vm1597_vm0, %v1596_v3 }
  0xea   : > { %899 = vrot.lane.b32.xlu0 %v506_v47, %s1606_s12  ;;  %662 = vrot.lane.b32.xlu1 %v506_v47, %s1607_s13  ;;  %s1610_s12 = smov 27  }
  0xee   : > { %1058 = vperm.xlu0 %1573, %v1055_v6   ;;  %820 = vrot.lane.b32.xlu1 %v506_v47, %s1608_s16 }
  0xf2   : > { %1176 = vperm.xlu0 %1573, %v1173_v49   ;;  %978 = vrot.lane.b32.xlu1 %v506_v47, %s1609_s21 }
  0xf6   : > { %1271 = vperm.xlu0 %1573, %v1267_v50   ;;  %1065 = vperm.xlu1 %1574, %v1062_v52  }
  0xfa   : > { %1381 = vperm.xlu0 %1573, %v1268_v51   ;;  %1186 = vperm.xlu1 %1574, %v1183_v53  }
 0x158   : > { %v742_v55 = vpop.permute.xlu0 %741  ;;  %v511_v56 = vpop.permute.xlu1 %510 }
 0x159   : > { %1498 = vmatpush3.msra.mxu0 %v511_v56  ;;  %1513 = vmatpush3.msra.mxu1 %v742_v55 }
 0x15a   : > { %1500 = vmatmul.mubr.msk.f32.vlgmr.msra.gmra.mrb[0].mxu0 %vm513_vm15, %v1457_v54  ;;  %1507 = vmatprep.subr.mxu0 %v1596_v3 }
 0x15b   : > { %1522 = vmatprep.subr.mxu1 %v1596_v3  ;;  %1509 = vmatprep.mubr.msk.f32.mxu0 %vm1597_vm0, %v1596_v3 }
 0x15c   : > { %v900_v59 = vpop.permute.xlu0 %899  ;;  %v663_v60 = vpop.permute.xlu1 %662  ;;  %1515 = vmatmul.mubr.msk.f32.vlgmr.msra.gmra.mrb[2].mxu1 %vm513_vm15, %v1462_v57 }
 0x15d   : > { %1508 = vmatpush3.msra.mxu0 %v663_v60  ;;  %1523 = vmatpush3.msra.mxu1 %v900_v59 }
 0x15e   : > { %1510 = vmatmul.mubr.msk.f32.vlgmr.msra.gmra.mrb[2].mxu0 %vm513_vm15, %v1460_v58  ;;  %1517 = vmatprep.subr.mxu0 %v1596_v3 }
 0x15f   : > { %1519 = vmatprep.mubr.msk.f32.mxu0 %vm1597_vm0, %v1596_v3  ;;  %1524 = vmatprep.mubr.msk.f32.mxu1 %vm1597_vm0, %v1596_v3 }
 0x160   : > { %v821_v63 = vpop.permute.xlu1 %820  ;;  %1525 = vmatmul.mubr.msk.f32.vlgmr.msra.gmra.mrb[4].mxu1 %vm513_vm15, %v1466_v61  ;;  %1532 = vmatprep.subr.mxu1 %v1596_v3 }
 0x161   : > { %1518 = vmatpush3.msra.mxu0 %v821_v63  ;;  %1534 = vmatprep.mubr.msk.f32.mxu1 %vm1597_vm0, %v1596_v3 }
 0x162   : > { %1520 = vmatmul.mubr.msk.f32.vlgmr.msra.gmra.mrb[4].mxu0 %vm513_vm15, %v1464_v62  ;;  %1527 = vmatprep.subr.mxu0 %v1596_v3 }
 0x163   : > { %1529 = vmatprep.mubr.msk.f32.mxu0 %vm1597_vm0, %v1596_v3 }
 0x164   : > { %v979_v1 = vpop.permute.xlu1 %978 }
 0x165   : > { %1528 = vmatpush3.msra.mxu0 %v979_v1 }
 0x166   : > { %1530 = vmatmul.mubr.msk.f32.vlgmr.msra.gmra.mrb[6].mxu0 %vm513_vm15, %v1468_v0 }
 0x16d   : > { %v1059_v30 = vpop.permute.xlu0 %1058 }
 0x175   : > { %v1066_v33 = vpop.permute.xlu1 %1065 }
 0x1bb   : > { %v656_v2 = vpop.f32.mrb[0].mxu1 }
 0x1bc   : > { %v1506_v5 = vpop.f32.mrb[1].mxu1 }
 0x22d   : > { %v583_v7 = vpop.f32.mrb[0].mxu0 }
 0x22e   : > { %v657_v9 = vadd.f32 %v656_v2, %v583_v7  ;;  %v1501_v10 = vpop.f32.mrb[1].mxu0 }
 0x22f   : > { %v813_v11 = vpop.f32.mrb[2].mxu1 }
 0x230   : > { %v1516_v12 = vpop.f32.mrb[3].mxu1 }
 0x231   : > { %v734_v13 = vpop.f32.mrb[2].mxu0 }
 0x232   : > { %v738_v14 = vadd.f32 %v734_v13, %v657_v9  ;;  %v1511_v15 = vpop.f32.mrb[3].mxu0 }
 0x233   : > { %v971_v16 = vpop.f32.mrb[4].mxu1 }
 0x234   : > { %v817_v3 = vadd.f32 %v813_v11, %v738_v14  ;;  %v1526_v17 = vpop.f32.mrb[5].mxu1 }
 0x235   : > { %v892_v19 = vpop.f32.mrb[4].mxu0 }
 0x236   : > { %v896_v21 = vadd.f32 %v892_v19, %v817_v3  ;;  %v1521_v22 = vpop.f32.mrb[5].mxu0 }
 0x238   : > { %v975_v23 = vadd.f32 %v971_v16, %v896_v21 }
 0x239   : > { %v1050_v25 = vpop.f32.mrb[6].mxu0 }
 0x23a   : > { %v1054_v27 = vadd.f32 %v1050_v25, %v975_v23  ;;  %v1531_v29 = vpop.f32.mrb[7].mxu0 }
 0x23c   : > { %v1800_v32 = vadd.f32 %v1059_v30, %v1054_v27 }
 0x23e   : > { %v1803_v34 = vmul.f32 %v1066_v33, %v1800_v32 }
 0x240   : > { %v1072_v35 = vand.u32 2139095040, %v1803_v34  ;;  %v1069_v39 = vand.u32 2147483647, %v1803_v34  ;;  %vm1071_vm7 = vcmp.lt.s32.totalorder %v1803_v34, 0  ;;  %vm1161_vm12 = vweird.f32 %v1803_v34 }
 0x242   : > { %v1073_v36 = vshrl.u32 %v1072_v35, 23  ;;  %v1076_v8 = vand.u32 8388607, %v1069_v39  ;;  %vm1070_vm8 = vcmp.le.f32.partialorder %v1069_v39, 0.7853982 }
 0x244   : > { %v1470_v37 = vadd.s32 4294967169, %v1073_v36  ;;  %v1077_v53 = vor.u32 8388608, %v1076_v8 }
 0x246   : > { %v1079_v38 = vadd.s32 1, %v1470_v37  ;;  %v1117_v5 = vshll.u32 %v1077_v53, 8 }
 0x248   : > { %vm1080_vm0 = vcmp.gt.s32.totalorder %v1079_v38, 0 }
 0x249   : > { %v1081_v40 = vsel %vm1080_vm0, %v1079_v38, 0 }
 0x24a   : > { %v1083_v41 = vand.u32 31, %v1081_v40  ;;  %v1082_v43 = vshrl.u32 %v1081_v40, 5 }
 0x24c   : > { %v1084_v42 = vsub.s32 32, %v1083_v41  ;;  %v1086_v44 = vshll.u32 %v1601_v26, %v1083_v41  ;;  %v1089_v45 = vshll.u32 %v1602_v28, %v1083_v41  ;;  %v1092_v48 = vshll.u32 %v1603_v31, %v1083_v41 }
 0x24d   : > { %v1095_v49 = vshll.u32 %v1598_v18, %v1083_v41  ;;  %v1098_v51 = vshll.u32 %v1599_v20, %v1083_v41  ;;  %vm1101_vm1 = vcmp.lt.s32.totalorder %v1082_v43, 1  ;;  %vm1104_vm2 = vcmp.lt.s32.totalorder %v1082_v43, 4 }
 0x24e   : > { %v1087_v46 = vshrl.u32 %v1602_v28, %v1084_v42  ;;  %v1090_v47 = vshrl.u32 %v1603_v31, %v1084_v42  ;;  %v1093_v6 = vshrl.u32 %v1598_v18, %v1084_v42  ;;  %v1096_v50 = vshrl.u32 %v1599_v20, %v1084_v42 }
 0x24f   : > { %v1099_v52 = vshrl.u32 %v1600_v24, %v1084_v42  ;;  %v1085_v62 = vshrl.u32 %v1601_v26, %v1084_v42  ;;  %vm1103_vm3 = vcmp.lt.s32.totalorder %v1082_v43, 3  ;;  %vm1102_vm4 = vcmp.lt.s32.totalorder %v1082_v43, 2 }
 0x250   : > { %v1088_v54 = vor.u32 %v1087_v46, %v1086_v44  ;;  %v1091_v55 = vor.u32 %v1090_v47, %v1089_v45  ;;  %v1094_v56 = vor.u32 %v1093_v6, %v1092_v48  ;;  %v1097_v57 = vor.u32 %v1096_v50, %v1095_v49 }
 0x251   : > { %v1100_v58 = vor.u32 %v1099_v52, %v1098_v51 }
 0x252   : > { %v1106_v59 = vsel %vm1104_vm2, %v1094_v56, 2102212464  ;;  %v1109_v60 = vsel %vm1101_vm1, %v1088_v54, %v1091_v55  ;;  %v1113_v61 = vsel %vm1101_vm1, %v1091_v55, %v1094_v56  ;;  %v1110_v63 = vsel %vm1104_vm2, %v1097_v57, 920167782 }
 0x253   : > { %v1114_v0 = vsel %vm1104_vm2, %v1100_v58, 1326507024  ;;  %v1111_v1 = vsel %vm1103_vm3, %v1094_v56, %v1110_v63  ;;  %v1105_v7 = vsel %vm1101_vm1, %v1085_v62, %v1088_v54  ;;  %v1107_v9 = vsel %vm1103_vm3, %v1091_v55, %v1106_v59  ;;  %v1177_v62 = vpop.permute.xlu0 %1176 }
 0x254   : > { %v1115_v2 = vsel %vm1103_vm3, %v1097_v57, %v1114_v0  ;;  %v1112_v10 = vsel %vm1102_vm4, %v1109_v60, %v1111_v1  ;;  %v1108_v16 = vsel %vm1102_vm4, %v1105_v7, %v1107_v9  ;;  %v1187_v7 = vpop.permute.xlu1 %1186 }
 0x255   : > { %v1116_v11 = vsel %vm1102_vm4, %v1113_v61, %v1115_v2  ;;  %v1823_v14 = vmul.u32.u64.low %v1117_v5, %v1112_v10  ;;  %v1824_v15 = vmul.u32.u64.high %v1117_v5, %v1112_v10, %v1823_v14  ;;  %v1124_v17 = vmul.u32 %v1117_v5, %v1108_v16 }
 0x256   : > { %v1820_v12 = vmul.u32.u64.low %v1117_v5, %v1116_v11  ;;  %v1821_v13 = vmul.u32.u64.high %v1117_v5, %v1116_v11, %v1820_v12  ;;  %v1182_v5 = vld [vmem:[%s1891_s5] sm:$0xff] }
 0x257   : > { %v1127_v3 = vadd.s32 1, %v1824_v15 }
 0x258   : > { %vm1126_vm5 = vc.u32 %v1821_v13, %v1823_v14  ;;  %v1125_v37 = vadd.s32 %v1823_v14, %v1821_v13  ;;  %v1272_v13 = vpop.permute.xlu0 %1271 }
 0x259   : > { %v1128_v19 = vsel %vm1126_vm5, %v1127_v3, %v1824_v15 }
 0x25a   : > { %v1129_v21 = vadd.s32 %v1128_v19, %v1124_v17 }
 0x25c   : > { %v1130_v22 = vadd.s32 536870912, %v1129_v21 }
 0x25e   : > { %v1131_v23 = vshrl.u32 %v1130_v22, 30 }
 0x260   : > { %v1132_v25 = vshll.u32 %v1131_v23, 30  ;;  %v1155_v6 = vsub.s32 4, %v1131_v23 }
 0x262   : > { %v1133_v27 = vsub.s32 %v1129_v21, %v1132_v25  ;;  %v1156_v51 = vsel %vm1071_vm7, %v1155_v6, %v1131_v23 }
 0x263   : > { %v1158_v53 = vsel %vm1070_vm8, 0, %v1156_v51 }
 0x264   : > { %v1135_v29 = vsub.s32 0, %v1133_v27  ;;  %v1162_v54 = vadd.s32 3, %v1158_v53 }
 0x266   : > { %v1471_v30 = vmin.u32 %v1135_v29, %v1133_v27  ;;  %v1163_v55 = vand.u32 3, %v1162_v54 }
 0x268   : > { %v1137_v33 = vclz %v1471_v30  ;;  %vm1168_vm9 = vcmp.eq.s32.totalorder %v1163_v55, 2  ;;  %vm1165_vm10 = vcmp.eq.s32.totalorder %v1163_v55, 0  ;;  %vm1164_vm11 = vcmp.lt.s32.totalorder %v1163_v55, 2 }
 0x26a   : > { %v1472_v35 = vadd.s32 4294967294, %v1137_v33 }
 0x26c   : > { %vm1473_vm6 = vcmp.lt.s32.totalorder %v1472_v35, 0 }
 0x26d   : > { %v1140_v36 = vsel %vm1473_vm6, 0, %v1472_v35 }
 0x26e   : > { %v1141_v38 = vsub.s32 32, %v1140_v36  ;;  %v1145_v40 = vsub.s32 4294967266, %v1140_v36  ;;  %v1142_v41 = vshll.u32 %v1133_v27, %v1140_v36 }
 0x270   : > { %v1143_v8 = vshrl.u32 %v1125_v37, %v1141_v38  ;;  %v1146_v42 = vadd.s32 127, %v1145_v40 }
 0x272   : > { %v1144_v43 = vor.u32 %v1143_v8, %v1142_v41  ;;  %v1147_v44 = vshll.u32 %v1146_v42, 23 }
 0x274   : > { %v1148_v45 = vor.u32 4788187, %v1147_v44  ;;  %v1151_v47 = vcvt.s32.f32 %v1144_v43 }
 0x276   : > { %v1149_v46 = vand.u32 2147483647, %v1148_v45 }
 0x278   : > { %v1152_v48 = vmul.f32 %v1151_v47, %v1149_v46 }
 0x27a   : > { %v1153_v49 = vxor.u32 2147483648, %v1152_v48 }
 0x27c   : > { %v1154_v50 = vsel %vm1071_vm7, %v1153_v49, %v1152_v48 }
 0x27d   : > { %v1157_v52 = vsel %vm1070_vm8, %v1803_v34, %v1154_v50 }
 0x27e   : > { %1579 = vcosq.f32 %v1157_v52 }
 0x27f   : > { %1581 = vsinq.f32 %v1157_v52 }
 0x288   : > { %v1580_v56 = vpop.eup %1579 }
 0x289   : > { %v1582_v57 = vpop.eup %1581  ;;  %v1169_v58 = vxor.u32 2147483648, %v1580_v56 }
 0x28a   : > { %v1166_v59 = vxor.u32 2147483648, %v1582_v57 }
 0x28b   : > { %v1170_v60 = vsel %vm1168_vm9, %v1169_v58, %v1582_v57 }
 0x28c   : > { %v1167_v61 = vsel %vm1165_vm10, %v1580_v56, %v1166_v59  ;;  %vm1391_vm10 = vcmask 523264  }
 0x28d   : > { %v1171_v39 = vsel %vm1164_vm11, %v1167_v61, %v1170_v60 }
 0x28e   : > { %v1172_v63 = vsel %vm1161_vm12, nan, %v1171_v39 }
 0x28f   : > { %v1179_v0 = vmul.f32 %v1177_v62, %v1172_v63 }
 0x291   : > { %v1180_v1 = vmul.f32 %v1179_v0, %v1172_v63 }
 0x293   : > { %v1181_v2 = vadd.f32 %v1180_v1, %v1800_v32 }
 0x295   : > { %1533 = vmatpush3.msra.mxu1 %v1181_v2 }
 0x296   : > { %1535 = vmatmul.mubr.msk.f32.vlgmr.msra.gmra.mrb[6].mxu1 %vm513_vm15, %v1182_v5 }
 0x369   : > { %v1258_v9 = vpop.f32.mrb[6].mxu1 }
 0x36a   : > { %v1259_v10 = vadd.f32 %v1258_v9, %v1187_v7  ;;  %v1536_v11 = vpop.f32.mrb[7].mxu1 }
 0x36c   : > { %1263 = vrot.lane.b32.xlu1 %v1259_v10, %s1610_s12 }
 0x3de   : > { %v1264_v34 = vpop.permute.xlu1 %1263 }
 0x3df   : > { %v1841_v12 = vadd.f32 %v1264_v34, %v1699_v4 }
 0x3e1   : > { %v1844_v32 = vmul.f32 %v1272_v13, %v1841_v12 }
 0x3e3   : > { %v1278_v14 = vand.u32 2139095040, %v1844_v32  ;;  %v1275_v17 = vand.u32 2147483647, %v1844_v32  ;;  %vm1277_vm4 = vcmp.lt.s32.totalorder %v1844_v32, 0  ;;  %vm1367_vm9 = vweird.f32 %v1844_v32 }
 0x3e5   : > { %v1279_v15 = vshrl.u32 %v1278_v14, 23  ;;  %v1282_v22 = vand.u32 8388607, %v1275_v17  ;;  %vm1276_vm5 = vcmp.le.f32.partialorder %v1275_v17, 0.7853982 }
 0x3e7   : > { %v1475_v16 = vadd.s32 4294967169, %v1279_v15  ;;  %v1283_v41 = vor.u32 8388608, %v1282_v22 }
 0x3e9   : > { %v1285_v3 = vadd.s32 1, %v1475_v16 }
 0x3eb   : > { %vm1286_vm13 = vcmp.gt.s32.totalorder %v1285_v3, 0 }
 0x3ec   : > { %v1287_v19 = vsel %vm1286_vm13, %v1285_v3, 0 }
 0x3ed   : > { %v1289_v21 = vand.u32 31, %v1287_v19  ;;  %v1288_v4 = vshrl.u32 %v1287_v19, 5 }
 0x3ef   : > { %v1290_v23 = vsub.s32 32, %v1289_v21  ;;  %v1292_v25 = vshll.u32 %v1601_v26, %v1289_v21  ;;  %v1295_v27 = vshll.u32 %v1602_v28, %v1289_v21  ;;  %v1298_v33 = vshll.u32 %v1603_v31, %v1289_v21 }
 0x3f0   : > { %v1301_v36 = vshll.u32 %v1598_v18, %v1289_v21  ;;  %v1304_v38 = vshll.u32 %v1599_v20, %v1289_v21  ;;  %vm1307_vm14 = vcmp.lt.s32.totalorder %v1288_v4, 1  ;;  %vm1310_vm15 = vcmp.lt.s32.totalorder %v1288_v4, 4 }
 0x3f1   : > { %v1293_v29 = vshrl.u32 %v1602_v28, %v1290_v23  ;;  %v1296_v30 = vshrl.u32 %v1603_v31, %v1290_v23  ;;  %v1299_v35 = vshrl.u32 %v1598_v18, %v1290_v23  ;;  %v1302_v37 = vshrl.u32 %v1599_v20, %v1290_v23 }
 0x3f2   : > { %v1305_v40 = vshrl.u32 %v1600_v24, %v1290_v23  ;;  %v1291_v47 = vshrl.u32 %v1601_v26, %v1290_v23  ;;  %vm1309_vm0 = vcmp.lt.s32.totalorder %v1288_v4, 3  ;;  %vm1308_vm1 = vcmp.lt.s32.totalorder %v1288_v4, 2 }
 0x3f3   : > { %v1294_v8 = vor.u32 %v1293_v29, %v1292_v25  ;;  %v1297_v42 = vor.u32 %v1296_v30, %v1295_v27  ;;  %v1300_v43 = vor.u32 %v1299_v35, %v1298_v33  ;;  %v1303_v44 = vor.u32 %v1302_v37, %v1301_v36 }
 0x3f4   : > { %v1306_v28 = vor.u32 %v1305_v40, %v1304_v38  ;;  %v1323_v24 = vshll.u32 %v1283_v41, 8 }
 0x3f5   : > { %v1312_v45 = vsel %vm1310_vm15, %v1300_v43, 2102212464  ;;  %v1315_v31 = vsel %vm1307_vm14, %v1294_v8, %v1297_v42  ;;  %v1319_v46 = vsel %vm1307_vm14, %v1297_v42, %v1300_v43  ;;  %v1316_v18 = vsel %vm1310_vm15, %v1303_v44, 920167782 }
 0x3f6   : > { %v1320_v48 = vsel %vm1310_vm15, %v1306_v28, 1326507024  ;;  %v1317_v20 = vsel %vm1309_vm0, %v1300_v43, %v1316_v18  ;;  %v1311_v49 = vsel %vm1307_vm14, %v1291_v47, %v1294_v8  ;;  %v1313_v50 = vsel %vm1309_vm0, %v1297_v42, %v1312_v45  ;;  %v1382_v42 = vpop.permute.xlu0 %1381 }
 0x3f7   : > { %v1321_v6 = vsel %vm1309_vm0, %v1303_v44, %v1320_v48  ;;  %v1318_v51 = vsel %vm1308_vm1, %v1315_v31, %v1317_v20  ;;  %v1314_v57 = vsel %vm1308_vm1, %v1311_v49, %v1313_v50 }
 0x3f8   : > { %v1322_v52 = vsel %vm1308_vm1, %v1319_v46, %v1321_v6  ;;  %v1864_v55 = vmul.u32.u64.low %v1323_v24, %v1318_v51  ;;  %v1865_v56 = vmul.u32.u64.high %v1323_v24, %v1318_v51, %v1864_v55  ;;  %v1330_v58 = vmul.u32 %v1323_v24, %v1314_v57 }
 0x3f9   : > { %v1861_v53 = vmul.u32.u64.low %v1323_v24, %v1322_v52  ;;  %v1862_v54 = vmul.u32.u64.high %v1323_v24, %v1322_v52, %v1861_v53 }
 0x3fa   : > { %v1333_v26 = vadd.s32 1, %v1865_v56 }
 0x3fb   : > { %vm1332_vm2 = vc.u32 %v1862_v54, %v1864_v55  ;;  %v1331_v9 = vadd.s32 %v1864_v55, %v1862_v54 }
 0x3fc   : > { %v1334_v59 = vsel %vm1332_vm2, %v1333_v26, %v1865_v56 }
 0x3fd   : > { %v1335_v60 = vadd.s32 %v1334_v59, %v1330_v58 }
 0x3ff   : > { %v1336_v61 = vadd.s32 536870912, %v1335_v60 }
 0x401   : > { %v1337_v39 = vshrl.u32 %v1336_v61, 30 }
 0x403   : > { %v1338_v62 = vshll.u32 %v1337_v39, 30  ;;  %v1361_v23 = vsub.s32 4, %v1337_v39 }
 0x405   : > { %v1339_v63 = vsub.s32 %v1335_v60, %v1338_v62  ;;  %v1362_v27 = vsel %vm1277_vm4, %v1361_v23, %v1337_v39 }
 0x406   : > { %v1364_v30 = vsel %vm1276_vm5, 0, %v1362_v27 }
 0x407   : > { %v1341_v0 = vsub.s32 0, %v1339_v63  ;;  %v1368_v33 = vadd.s32 3, %v1364_v30 }
 0x409   : > { %v1476_v1 = vmin.u32 %v1341_v0, %v1339_v63  ;;  %v1369_v35 = vand.u32 3, %v1368_v33 }
 0x40b   : > { %v1343_v2 = vclz %v1476_v1  ;;  %vm1374_vm6 = vcmp.eq.s32.totalorder %v1369_v35, 2  ;;  %vm1371_vm7 = vcmp.eq.s32.totalorder %v1369_v35, 0  ;;  %vm1370_vm8 = vcmp.lt.s32.totalorder %v1369_v35, 2 }
 0x40d   : > { %v1477_v5 = vadd.s32 4294967294, %v1343_v2 }
 0x40f   : > { %vm1478_vm3 = vcmp.lt.s32.totalorder %v1477_v5, 0 }
 0x410   : > { %v1346_v7 = vsel %vm1478_vm3, 0, %v1477_v5 }
 0x411   : > { %v1347_v10 = vsub.s32 32, %v1346_v7  ;;  %v1351_v11 = vsub.s32 4294967266, %v1346_v7  ;;  %v1348_v34 = vshll.u32 %v1339_v63, %v1346_v7 }
 0x413   : > { %v1349_v13 = vshrl.u32 %v1331_v9, %v1347_v10  ;;  %v1352_v14 = vadd.s32 127, %v1351_v11 }
 0x415   : > { %v1350_v15 = vor.u32 %v1349_v13, %v1348_v34  ;;  %v1353_v16 = vshll.u32 %v1352_v14, 23 }
 0x417   : > { %v1354_v3 = vor.u32 4788187, %v1353_v16  ;;  %v1357_v21 = vcvt.s32.f32 %v1350_v15 }
 0x419   : > { %v1355_v19 = vand.u32 2147483647, %v1354_v3 }
 0x41b   : > { %v1358_v22 = vmul.f32 %v1357_v21, %v1355_v19 }
 0x41d   : > { %v1359_v4 = vxor.u32 2147483648, %v1358_v22 }
 0x41f   : > { %v1360_v25 = vsel %vm1277_vm4, %v1359_v4, %v1358_v22 }
 0x420   : > { %v1363_v29 = vsel %vm1276_vm5, %v1844_v32, %v1360_v25 }
 0x421   : > { %1583 = vcosq.f32 %v1363_v29 }
 0x422   : > { %1585 = vsinq.f32 %v1363_v29 }
 0x42b   : > { %v1584_v36 = vpop.eup %1583 }
 0x42c   : > { %v1586_v37 = vpop.eup %1585  ;;  %v1375_v38 = vxor.u32 2147483648, %v1584_v36 }
 0x42d   : > { %v1372_v40 = vxor.u32 2147483648, %v1586_v37 }
 0x42e   : > { %v1376_v41 = vsel %vm1374_vm6, %v1375_v38, %v1586_v37 }
 0x42f   : > { %v1373_v8 = vsel %vm1371_vm7, %v1584_v36, %v1372_v40 }
 0x430   : > { %v1377_v17 = vsel %vm1370_vm8, %v1373_v8, %v1376_v41 }
 0x431   : > { %v1378_v43 = vsel %vm1367_vm9, nan, %v1377_v17 }
 0x432   : > { %v1384_v44 = vmul.f32 %v1382_v42, %v1378_v43 }
 0x434   : > { %v1385_v28 = vmul.f32 %v1384_v44, %v1378_v43 }
 0x436   : > { %v1386_v45 = vadd.f32 %v1385_v28, %v1841_v12 }
 0x438   : > { %1388 = vrot.lane.b32.xlu1 %v1386_v45, %s1604_s29 }
 0x4aa   : > { %v1389_v31 = vpop.permute.xlu1 %1388 }
 0x4ab   : > { %1392 = vst.msk [vmem:[%s381_s15] sm:$0xff] %vm1391_vm10, %v1389_v31 }
 0x4ac PF: > { %s21_s17 = sadd.s32 1, %s1593_s17  }
 0x4ad   : > { %p18_p4 = scmp.ge.s32.totalorder %s21_s17, 4  }
 0x4af   :  { %20 = sbr.rel (!%p18_p4) target bundleno = 1 (0x1), region = 100 }

// kernel: dac_encoder_forward.15
= control target key start
LH: loop header
LB: loop body
LE: loop exit
PB: predicated region body
PF: predicated region fallthrough
CT: control target
= control target key end

     0   :  { %v121_v0 = vmov 0.0|0.0   ;;  %vm122_vm0 = vmmov 0   ;;  %v123_v3 = vmov 0.0   ;;  %v124_v5 = vmov 0   ;;  %s160_s2 = inlined_call_operand.vmem [shape: f32[16,128], index: 2, kind: input, shape index: {}]   ;;  %s161_s1 = inlined_call_operand.vmem [shape: f32[8,1], index: 1, kind: input, shape index: {}]   ;;  %s162_s0 = inlined_call_operand.vmem [shape: f32[8,16], index: 0, kind: input, shape index: {}]   ;;  %s163_s3 = inlined_call_operand.vmem [shape: f32[8,128], index: 3, kind: output, shape index: {}]  }
   0x1   :  { %113 = vmatprep.subr.bf16.mxu0 %v121_v0  ;;  %v15_v1 = vld [vmem:[%s160_s2] sm:$0xff]  ;;  %v16_v2 = vld [vmem:[%s160_s2 + $0x8] sm:$0xff]  ;;  %110 = vmatprep.mubr.msk.f32.mxu0 %vm122_vm0, %v123_v3  ;;  %vm23_vm1 = vcmask 130048  }
   0x2   :  { %v114_v4 = vpack.c.bf16 %v16_v2, %v15_v1  ;;  %120 = vset.pattern.permute.xlu0 %v124_v5  ;;  %v17_v6 = vld [vmem:[%s161_s1] sm:$0xff] }
   0x3   :  { %20 = vperm.xlu0 %120, %v17_v6   ;;  %v14_v7 = vld [vmem:[%s162_s0] sm:$0xff] }
   0x4   :  { %115 = vmatpush3.bf16.msra.mxu0 %v114_v4 }
   0x7   :  { %111 = vmatmul.mubr.msk.f32.vlgmr.msra.gmra.mrb[0].mxu0 %vm23_vm1, %v14_v7 }
  0x82   :  { %v21_v8 = vpop.permute.xlu0 %20 }
  0xda   :  { %v93_v9 = vpop.f32.mrb[0].mxu0 }
  0xdb   :  { %v94_v10 = vadd.f32 %v93_v9, %v21_v8  ;;  %v112_v11 = vpop.f32.mrb[1].mxu0 }
  0xdd   :  { %97 = vst [vmem:[%s163_s3] sm:$0xff] %v94_v10 }

// kernel: dac_encoder_forward.16
= control target key start
LH: loop header
LB: loop body
LE: loop exit
PB: predicated region body
PF: predicated region fallthrough
CT: control target
= control target key end

     0   :  { %s1475_s30 = smov 0   ;;  %s1648_s0 = inlined_call_operand.vmem [shape: f32[2,8,38], index: 0, kind: input, shape index: {}]   ;;  %s1649_s1 = inlined_call_operand.vmem [shape: f32[7,8,8], index: 1, kind: input, shape index: {}]   ;;  %s1650_s2 = inlined_call_operand.vmem [shape: f32[8,1], index: 2, kind: input, shape index: {}]   ;;  %s1651_s3 = inlined_call_operand.vmem [shape: f32[8,1], index: 3, kind: input, shape index: {}]   ;;  %s1652_s4 = inlined_call_operand.vmem [shape: f32[8,1], index: 4, kind: input, shape index: {}]   ;;  %s1653_s5 = inlined_call_operand.vmem [shape: f32[8,8], index: 5, kind: input, shape index: {}]   ;;  %s1654_s6 = inlined_call_operand.vmem [shape: f32[8,1], index: 6, kind: input, shape index: {}]   ;;  %s1655_s7 = inlined_call_operand.vmem [shape: f32[8,1], index: 7, kind: input, shape index: {}]   ;;  %s1656_s8 = inlined_call_operand.vmem [shape: f32[8,1], index: 8, kind: input, shape index: {}]   ;;  %s1657_s9 = inlined_call_operand.vmem [shape: f32[2,8,32], index: 9, kind: output, shape index: {}]  }
   0x1 LB: > { %s1272_s10 = sadd.s32 4294967295, %s1407_s30   ;;  %p1276_p0 = scmp.ge.s32.totalorder %s1407_s30, 1  ;;  %s1407_s30 = sphi %s1475_s30, %s19_s30  }
   0x2   : > { %p286_p1 = scmp.lt.s32.totalorder %s1407_s30, 3 }
   0x4   : > { %p287_p2 = pnand %p1276_p0, %p286_p1 }
   0x5   : > { %v329_v0 = vld [vmem:[%s1651_s3] sm:$0xff] (!%p287_p2)  ;;  %v1409_v1 = vmov (!%p287_p2), 0   ;;  %v1410_v3 = vmov (!%p287_p2), 0.0   ;;  %vm1411_vm0 = vmmov (!%p287_p2), 0   ;;  %p320_p3 = scmp.lt.s32.totalorder (!%p287_p2), %s1272_s10, 1  ;;  %vm449_vm14 = vcmask (!%p287_p2), 310272  }
   0x6   : > { %290 = sbr.rel (%p287_p2) target bundleno = 1109 (0x455), region = 56  ;;  %1391 = vset.pattern.permute.xlu0 (!%p287_p2), %v1409_v1  ;;  %1392 = vset.pattern.permute.xlu1 (!%p287_p2), %v1409_v1  ;;  %v330_v2 = vld [vmem:[%s1652_s4] sm:$0xff] (!%p287_p2)  ;;  %v1412_v18 = vmov (!%p287_p2), 2102212464   ;;  %v1413_v20 = vmov (!%p287_p2), 920167782  }
   0x7   : > { %333 = vperm.xlu0 (!%p287_p2), %1391, %v329_v0   ;;  %1324 = vmatprep.subr.mxu1 (!%p287_p2), %v1410_v3  ;;  %v1414_v24 = vmov (!%p287_p2), 1326507024   ;;  %v1415_v26 = vmov (!%p287_p2), 683565275   ;;  %v1416_v28 = vmov (!%p287_p2), 2475754826  }
   0x8   : > { %1319 = vmatprep.subr.mxu0 (!%p287_p2), %v1410_v3  ;;  %1326 = vmatprep.mubr.msk.f32.mxu1 (!%p287_p2), %vm1411_vm0, %v1410_v3  ;;  %v1417_v31 = vmov (!%p287_p2), 2131351028   ;;  %vm459_vm15 = vcmask (!%p287_p2), 64512   ;;  %s1418_s21 = smov (!%p287_p2), 125   ;;  %s1419_s22 = smov (!%p287_p2), 127  }
   0x9   : > { %1321 = vmatprep.mubr.msk.f32.mxu0 (!%p287_p2), %vm1411_vm0, %v1410_v3  ;;  %s1420_s23 = smov (!%p287_p2), 123   ;;  %s1421_s24 = smov (!%p287_p2), 126  }
   0xa   : > { %s1422_s27 = smov (!%p287_p2), 124   ;;  %s1423_s11 = smov (!%p287_p2), 122  }
   0xb   : > { %443 = vperm.xlu0 (!%p287_p2), %1391, %v330_v2   ;;  %s1424_s13 = smov (!%p287_p2), 3  }
   0xd   : > { %s1659_s10 = smov (!%p320_p3, %s1272_s10), 1 }
   0xe   : > { %s1277_s15 = sshll.u32 %s1659_s10, 3 }
   0xf   : > { %s323_s18 = scalar_lea.vmem %s1648_s0, %s1277_s15  ;;  %s327_s17 = scalar_lea.vmem %s1657_s9, %s1277_s15 }
  0x10   : > { %v1503_v4 = vld [vmem:[%s323_s18] sm:$0xff] }
  0x86   : > { %v334_v5 = vpop.permute.xlu0 %333 }
  0x87   : > { %v1506_v6 = vmul.f32 %v334_v5, %v1503_v4 }
  0x89   : > { %v340_v7 = vand.u32 2139095040, %v1506_v6  ;;  %v337_v8 = vand.u32 2147483647, %v1506_v6  ;;  %vm339_vm8 = vcmp.lt.s32.totalorder %v1506_v6, 0  ;;  %vm429_vm13 = vweird.f32 %v1506_v6 }
  0x8b   : > { %v341_v9 = vshrl.u32 %v340_v7, 23  ;;  %v344_v11 = vand.u32 8388607, %v337_v8  ;;  %vm338_vm9 = vcmp.le.f32.partialorder %v337_v8, 0.7853982 }
  0x8d   : > { %v1279_v10 = vadd.s32 4294967169, %v341_v9  ;;  %v345_v14 = vor.u32 8388608, %v344_v11 }
  0x8f   : > { %v347_v12 = vadd.s32 1, %v1279_v10  ;;  %v385_v22 = vshll.u32 %v345_v14, 8 }
  0x91   : > { %vm348_vm1 = vcmp.gt.s32.totalorder %v347_v12, 0 }
  0x92   : > { %v349_v13 = vsel %vm348_vm1, %v347_v12, 0 }
  0x93   : > { %v351_v15 = vand.u32 31, %v349_v13  ;;  %v350_v16 = vshrl.u32 %v349_v13, 5 }
  0x95   : > { %v352_v17 = vsub.s32 32, %v351_v15  ;;  %v363_v19 = vshll.u32 %v1412_v18, %v351_v15  ;;  %v366_v21 = vshll.u32 %v1413_v20, %v351_v15  ;;  %v354_v27 = vshll.u32 %v1415_v26, %v351_v15 }
  0x96   : > { %v357_v30 = vshll.u32 %v1416_v28, %v351_v15  ;;  %v360_v33 = vshll.u32 %v1417_v31, %v351_v15  ;;  %vm372_vm2 = vcmp.lt.s32.totalorder %v350_v16, 4  ;;  %vm369_vm3 = vcmp.lt.s32.totalorder %v350_v16, 1 }
  0x97   : > { %v364_v23 = vshrl.u32 %v1413_v20, %v352_v17  ;;  %v367_v25 = vshrl.u32 %v1414_v24, %v352_v17  ;;  %v355_v29 = vshrl.u32 %v1416_v28, %v352_v17  ;;  %v358_v32 = vshrl.u32 %v1417_v31, %v352_v17 }
  0x98   : > { %v361_v34 = vshrl.u32 %v1412_v18, %v352_v17  ;;  %v353_v38 = vshrl.u32 %v1415_v26, %v352_v17  ;;  %vm370_vm4 = vcmp.lt.s32.totalorder %v350_v16, 2  ;;  %vm371_vm5 = vcmp.lt.s32.totalorder %v350_v16, 3 }
  0x99   : > { %v365_v35 = vor.u32 %v364_v23, %v363_v19  ;;  %v368_v36 = vor.u32 %v367_v25, %v366_v21  ;;  %v356_v37 = vor.u32 %v355_v29, %v354_v27  ;;  %v359_v39 = vor.u32 %v358_v32, %v357_v30 }
  0x9a   : > { %v362_v40 = vor.u32 %v361_v34, %v360_v33 }
  0x9b   : > { %v378_v41 = vsel %vm372_vm2, %v365_v35, 920167782  ;;  %v382_v42 = vsel %vm372_vm2, %v368_v36, 1326507024  ;;  %v377_v44 = vsel %vm369_vm3, %v356_v37, %v359_v39  ;;  %v373_v47 = vsel %vm369_vm3, %v353_v38, %v356_v37 }
  0x9c   : > { %v374_v43 = vsel %vm372_vm2, %v362_v40, 2102212464  ;;  %v379_v45 = vsel %vm371_vm5, %v362_v40, %v378_v41  ;;  %v381_v46 = vsel %vm369_vm3, %v359_v39, %v362_v40  ;;  %v383_v50 = vsel %vm371_vm5, %v365_v35, %v382_v42  ;;  %v444_v42 = vpop.permute.xlu0 %443 }
  0x9d   : > { %v375_v48 = vsel %vm371_vm5, %v359_v39, %v374_v43  ;;  %v380_v49 = vsel %vm370_vm4, %v377_v44, %v379_v45  ;;  %v384_v51 = vsel %vm370_vm4, %v381_v46, %v383_v50  ;;  %v1008_v50 = vld [vmem:[%s1655_s7] sm:$0xff] }
  0x9e   : > { %v1523_v52 = vmul.u32.u64.low %v385_v22, %v380_v49  ;;  %v1524_v53 = vmul.u32.u64.high %v385_v22, %v380_v49, %v1523_v52  ;;  %v1526_v54 = vmul.u32.u64.low %v385_v22, %v384_v51  ;;  %v1527_v55 = vmul.u32.u64.high %v385_v22, %v384_v51, %v1526_v54  ;;  %v1119_v49 = vld [vmem:[%s1656_s8] sm:$0xff] }
  0x9f   : > { %v376_v56 = vsel %vm370_vm4, %v373_v47, %v375_v48  ;;  %v451_v48 = vld [vmem:[%s1649_s1] sm:$0xff] }
  0xa0   : > { %v395_v57 = vadd.s32 1, %v1524_v53  ;;  %v392_v58 = vmul.u32 %v385_v22, %v376_v56  ;;  %vm394_vm6 = vc.u32 %v1527_v55, %v1523_v52  ;;  %v393_v10 = vadd.s32 %v1523_v52, %v1527_v55  ;;  %v1129_v51 = vld [vmem:[%s1654_s6] sm:$0xff]  ;;  %v1283_v52 = vld [vmem:[%s1649_s1 + $0x8] sm:$0xff]  ;;  %v1288_v55 = vld [vmem:[%s1649_s1 + $0x18] sm:$0xff] }
  0xa1   : > { %v1286_v56 = vld [vmem:[%s1649_s1 + $0x10] sm:$0xff] }
  0xa2   : > { %v396_v59 = vsel %vm394_vm6, %v395_v57, %v1524_v53 }
  0xa3   : > { %v397_v60 = vadd.s32 %v396_v59, %v392_v58  ;;  %v1292_v59 = vld [vmem:[%s1649_s1 + $0x28] sm:$0xff] }
  0xa5   : > { %v398_v61 = vadd.s32 536870912, %v397_v60 }
  0xa7   : > { %v399_v62 = vshrl.u32 %v398_v61, 30 }
  0xa9   : > { %v400_v63 = vshll.u32 %v399_v62, 30  ;;  %v423_v25 = vsub.s32 4, %v399_v62 }
  0xab   : > { %v401_v0 = vsub.s32 %v397_v60, %v400_v63  ;;  %v424_v30 = vsel %vm339_vm8, %v423_v25, %v399_v62  ;;  %v1290_v60 = vld [vmem:[%s1649_s1 + $0x20] sm:$0xff]  ;;  %v1294_v62 = vld [vmem:[%s1649_s1 + $0x30] sm:$0xff] }
  0xac   : > { %v426_v33 = vsel %vm338_vm9, 0, %v424_v30 }
  0xad   : > { %v403_v1 = vsub.s32 0, %v401_v0  ;;  %v430_v34 = vadd.s32 3, %v426_v33 }
  0xaf   : > { %v1280_v2 = vmin.u32 %v403_v1, %v401_v0  ;;  %v431_v35 = vand.u32 3, %v430_v34 }
  0xb1   : > { %v405_v5 = vclz %v1280_v2  ;;  %vm436_vm10 = vcmp.eq.s32.totalorder %v431_v35, 2  ;;  %vm433_vm11 = vcmp.eq.s32.totalorder %v431_v35, 0  ;;  %vm432_vm12 = vcmp.lt.s32.totalorder %v431_v35, 2 }
  0xb3   : > { %v1281_v7 = vadd.s32 4294967294, %v405_v5 }
  0xb5   : > { %vm1282_vm7 = vcmp.lt.s32.totalorder %v1281_v7, 0 }
  0xb6   : > { %v408_v9 = vsel %vm1282_vm7, 0, %v1281_v7 }
  0xb7   : > { %v409_v11 = vsub.s32 32, %v408_v9  ;;  %v413_v12 = vsub.s32 4294967266, %v408_v9  ;;  %v410_v13 = vshll.u32 %v401_v0, %v408_v9 }
  0xb9   : > { %v411_v14 = vshrl.u32 %v393_v10, %v409_v11  ;;  %v414_v15 = vadd.s32 127, %v413_v12 }
  0xbb   : > { %v412_v16 = vor.u32 %v411_v14, %v410_v13  ;;  %v415_v17 = vshll.u32 %v414_v15, 23 }
  0xbd   : > { %v416_v19 = vor.u32 4788187, %v415_v17  ;;  %v419_v22 = vcvt.s32.f32 %v412_v16 }
  0xbf   : > { %v417_v21 = vand.u32 2147483647, %v416_v19 }
  0xc1   : > { %v420_v23 = vmul.f32 %v419_v22, %v417_v21 }
  0xc3   : > { %v421_v27 = vxor.u32 2147483648, %v420_v23 }
  0xc5   : > { %v422_v29 = vsel %vm339_vm8, %v421_v27, %v420_v23 }
  0xc6   : > { %v425_v32 = vsel %vm338_vm9, %v1506_v6, %v422_v29  ;;  %v1001_v6 = vld [vmem:[%s1650_s2] sm:$0xff] }
  0xc7   : > { %1393 = vcosq.f32 %v425_v32 }
  0xc8   : > { %1395 = vsinq.f32 %v425_v32 }
  0xd1   : > { %v1394_v36 = vpop.eup %1393 }
  0xd2   : > { %v1396_v37 = vpop.eup %1395  ;;  %v437_v38 = vxor.u32 2147483648, %v1394_v36 }
  0xd3   : > { %v434_v39 = vxor.u32 2147483648, %v1396_v37 }
  0xd4   : > { %v438_v40 = vsel %vm436_vm10, %v437_v38, %v1396_v37 }
  0xd5   : > { %v435_v41 = vsel %vm433_vm11, %v1394_v36, %v434_v39 }
  0xd6   : > { %v439_v8 = vsel %vm432_vm12, %v435_v41, %v438_v40 }
  0xd7   : > { %v440_v43 = vsel %vm429_vm13, nan, %v439_v8  ;;  %vm1217_vm13 = vcmask 261120  }
  0xd8   : > { %v446_v44 = vmul.f32 %v444_v42, %v440_v43 }
  0xda   : > { %v447_v45 = vmul.f32 %v446_v44, %v440_v43 }
  0xdc   : > { %v448_v46 = vadd.f32 %v447_v45, %v1503_v4 }
  0xde   : > { %450 = vst.msk [vmem:[#allocation2] sm:$0xff] %vm449_vm14, %v448_v46 }
  0xe5   : > { %v452_v47 = vld [vmem:[#allocation2] sm:$0xff] }
  0xe6   : > { %687 = vrot.lane.b32.xlu0 %v452_v47, %s1418_s21  ;;  %456 = vrot.lane.b32.xlu1 %v452_v47, %s1419_s22 }
  0xe7   : > { %1325 = vmatpush3.msra.mxu1 %v452_v47 }
  0xe8   : > { %1334 = vmatprep.subr.mxu1 %v1410_v3  ;;  %1327 = vmatmul.mubr.msk.f32.vlgmr.msra.gmra.mrb[0].mxu1 %vm459_vm15, %v451_v48 }
  0xe9   : > { %1336 = vmatprep.mubr.msk.f32.mxu1 %vm1411_vm0, %v1410_v3 }
  0xea   : > { %845 = vrot.lane.b32.xlu0 %v452_v47, %s1420_s23  ;;  %608 = vrot.lane.b32.xlu1 %v452_v47, %s1421_s24 }
  0xee   : > { %1004 = vperm.xlu0 %1391, %v1001_v6   ;;  %766 = vrot.lane.b32.xlu1 %v452_v47, %s1422_s27 }
  0xf2   : > { %1122 = vperm.xlu0 %1391, %v1119_v49   ;;  %924 = vrot.lane.b32.xlu1 %v452_v47, %s1423_s11 }
  0xf6   : > { %1011 = vperm.xlu1 %1392, %v1008_v50  }
  0xfa   : > { %1132 = vperm.xlu1 %1392, %v1129_v51  }
 0x158   : > { %v688_v53 = vpop.permute.xlu0 %687  ;;  %v457_v54 = vpop.permute.xlu1 %456 }
 0x159   : > { %1320 = vmatpush3.msra.mxu0 %v457_v54  ;;  %1335 = vmatpush3.msra.mxu1 %v688_v53 }
 0x15a   : > { %1322 = vmatmul.mubr.msk.f32.vlgmr.msra.gmra.mrb[0].mxu0 %vm459_vm15, %v1283_v52  ;;  %1329 = vmatprep.subr.mxu0 %v1410_v3 }
 0x15b   : > { %1344 = vmatprep.subr.mxu1 %v1410_v3  ;;  %1331 = vmatprep.mubr.msk.f32.mxu0 %vm1411_vm0, %v1410_v3 }
 0x15c   : > { %v846_v57 = vpop.permute.xlu0 %845  ;;  %v609_v58 = vpop.permute.xlu1 %608  ;;  %1337 = vmatmul.mubr.msk.f32.vlgmr.msra.gmra.mrb[2].mxu1 %vm459_vm15, %v1288_v55 }
 0x15d   : > { %1330 = vmatpush3.msra.mxu0 %v609_v58  ;;  %1345 = vmatpush3.msra.mxu1 %v846_v57 }
 0x15e   : > { %1332 = vmatmul.mubr.msk.f32.vlgmr.msra.gmra.mrb[2].mxu0 %vm459_vm15, %v1286_v56  ;;  %1339 = vmatprep.subr.mxu0 %v1410_v3 }
 0x15f   : > { %1341 = vmatprep.mubr.msk.f32.mxu0 %vm1411_vm0, %v1410_v3  ;;  %1346 = vmatprep.mubr.msk.f32.mxu1 %vm1411_vm0, %v1410_v3 }
 0x160   : > { %v767_v61 = vpop.permute.xlu1 %766  ;;  %1347 = vmatmul.mubr.msk.f32.vlgmr.msra.gmra.mrb[4].mxu1 %vm459_vm15, %v1292_v59  ;;  %1354 = vmatprep.subr.mxu1 %v1410_v3 }
 0x161   : > { %1340 = vmatpush3.msra.mxu0 %v767_v61  ;;  %1356 = vmatprep.mubr.msk.f32.mxu1 %vm1411_vm0, %v1410_v3 }
 0x162   : > { %1342 = vmatmul.mubr.msk.f32.vlgmr.msra.gmra.mrb[4].mxu0 %vm459_vm15, %v1290_v60  ;;  %1349 = vmatprep.subr.mxu0 %v1410_v3 }
 0x163   : > { %1351 = vmatprep.mubr.msk.f32.mxu0 %vm1411_vm0, %v1410_v3 }
 0x164   : > { %v925_v63 = vpop.permute.xlu1 %924 }
 0x165   : > { %1350 = vmatpush3.msra.mxu0 %v925_v63 }
 0x166   : > { %1352 = vmatmul.mubr.msk.f32.vlgmr.msra.gmra.mrb[6].mxu0 %vm459_vm15, %v1294_v62 }
 0x16d   : > { %v1005_v27 = vpop.permute.xlu0 %1004 }
 0x175   : > { %v1012_v30 = vpop.permute.xlu1 %1011 }
 0x1bb   : > { %v602_v0 = vpop.f32.mrb[0].mxu1 }
 0x1bc   : > { %v1328_v1 = vpop.f32.mrb[1].mxu1 }
 0x22d   : > { %v529_v2 = vpop.f32.mrb[0].mxu0 }
 0x22e   : > { %v603_v5 = vadd.f32 %v602_v0, %v529_v2  ;;  %v1323_v7 = vpop.f32.mrb[1].mxu0 }
 0x22f   : > { %v759_v9 = vpop.f32.mrb[2].mxu1 }
 0x230   : > { %v1338_v10 = vpop.f32.mrb[3].mxu1 }
 0x231   : > { %v680_v11 = vpop.f32.mrb[2].mxu0 }
 0x232   : > { %v684_v12 = vadd.f32 %v680_v11, %v603_v5  ;;  %v1333_v13 = vpop.f32.mrb[3].mxu0 }
 0x233   : > { %v917_v14 = vpop.f32.mrb[4].mxu1 }
 0x234   : > { %v763_v3 = vadd.f32 %v759_v9, %v684_v12  ;;  %v1348_v15 = vpop.f32.mrb[5].mxu1 }
 0x235   : > { %v838_v16 = vpop.f32.mrb[4].mxu0 }
 0x236   : > { %v842_v17 = vadd.f32 %v838_v16, %v763_v3  ;;  %v1343_v19 = vpop.f32.mrb[5].mxu0 }
 0x238   : > { %v921_v21 = vadd.f32 %v917_v14, %v842_v17 }
 0x239   : > { %v996_v22 = vpop.f32.mrb[6].mxu0 }
 0x23a   : > { %v1000_v23 = vadd.f32 %v996_v22, %v921_v21  ;;  %v1353_v25 = vpop.f32.mrb[7].mxu0 }
 0x23c   : > { %v1598_v29 = vadd.f32 %v1005_v27, %v1000_v23 }
 0x23e   : > { %v1601_v32 = vmul.f32 %v1012_v30, %v1598_v29 }
 0x240   : > { %v1018_v33 = vand.u32 2139095040, %v1601_v32  ;;  %v1015_v37 = vand.u32 2147483647, %v1601_v32  ;;  %vm1017_vm7 = vcmp.lt.s32.totalorder %v1601_v32, 0  ;;  %vm1107_vm12 = vweird.f32 %v1601_v32 }
 0x242   : > { %v1019_v34 = vshrl.u32 %v1018_v33, 23  ;;  %v1022_v40 = vand.u32 8388607, %v1015_v37  ;;  %vm1016_vm8 = vcmp.le.f32.partialorder %v1015_v37, 0.7853982 }
 0x244   : > { %v1296_v35 = vadd.s32 4294967169, %v1019_v34  ;;  %v1023_v51 = vor.u32 8388608, %v1022_v40 }
 0x246   : > { %v1025_v36 = vadd.s32 1, %v1296_v35 }
 0x248   : > { %vm1026_vm0 = vcmp.gt.s32.totalorder %v1025_v36, 0 }
 0x249   : > { %v1027_v38 = vsel %vm1026_vm0, %v1025_v36, 0 }
 0x24a   : > { %v1029_v39 = vand.u32 31, %v1027_v38  ;;  %v1028_v8 = vshrl.u32 %v1027_v38, 5 }
 0x24c   : > { %v1030_v41 = vsub.s32 32, %v1029_v39  ;;  %v1032_v42 = vshll.u32 %v1415_v26, %v1029_v39  ;;  %v1035_v43 = vshll.u32 %v1416_v28, %v1029_v39  ;;  %v1038_v46 = vshll.u32 %v1417_v31, %v1029_v39 }
 0x24d   : > { %v1041_v48 = vshll.u32 %v1412_v18, %v1029_v39  ;;  %v1044_v49 = vshll.u32 %v1413_v20, %v1029_v39  ;;  %vm1047_vm1 = vcmp.lt.s32.totalorder %v1028_v8, 1  ;;  %vm1050_vm2 = vcmp.lt.s32.totalorder %v1028_v8, 4 }
 0x24e   : > { %v1033_v44 = vshrl.u32 %v1416_v28, %v1030_v41  ;;  %v1036_v45 = vshrl.u32 %v1417_v31, %v1030_v41  ;;  %v1039_v47 = vshrl.u32 %v1412_v18, %v1030_v41  ;;  %v1042_v6 = vshrl.u32 %v1413_v20, %v1030_v41 }
 0x24f   : > { %v1045_v50 = vshrl.u32 %v1414_v24, %v1030_v41  ;;  %v1031_v58 = vshrl.u32 %v1415_v26, %v1030_v41  ;;  %vm1049_vm3 = vcmp.lt.s32.totalorder %v1028_v8, 3  ;;  %vm1048_vm4 = vcmp.lt.s32.totalorder %v1028_v8, 2 }
 0x250   : > { %v1034_v52 = vor.u32 %v1033_v44, %v1032_v42  ;;  %v1037_v53 = vor.u32 %v1036_v45, %v1035_v43  ;;  %v1040_v54 = vor.u32 %v1039_v47, %v1038_v46  ;;  %v1043_v55 = vor.u32 %v1042_v6, %v1041_v48 }
 0x251   : > { %v1046_v28 = vor.u32 %v1045_v50, %v1044_v49  ;;  %v1063_v24 = vshll.u32 %v1023_v51, 8 }
 0x252   : > { %v1052_v56 = vsel %vm1050_vm2, %v1040_v54, 2102212464  ;;  %v1055_v31 = vsel %vm1047_vm1, %v1034_v52, %v1037_v53  ;;  %v1059_v57 = vsel %vm1047_vm1, %v1037_v53, %v1040_v54  ;;  %v1056_v18 = vsel %vm1050_vm2, %v1043_v55, 920167782 }
 0x253   : > { %v1060_v59 = vsel %vm1050_vm2, %v1046_v28, 1326507024  ;;  %v1057_v20 = vsel %vm1049_vm3, %v1040_v54, %v1056_v18  ;;  %v1051_v61 = vsel %vm1047_vm1, %v1031_v58, %v1034_v52  ;;  %v1053_v62 = vsel %vm1049_vm3, %v1037_v53, %v1052_v56  ;;  %v1123_v54 = vpop.permute.xlu0 %1122  ;;  %v1133_v58 = vpop.permute.xlu1 %1132 }
 0x254   : > { %v1061_v60 = vsel %vm1049_vm3, %v1043_v55, %v1060_v59  ;;  %v1058_v63 = vsel %vm1048_vm4, %v1055_v31, %v1057_v20  ;;  %v1054_v9 = vsel %vm1048_vm4, %v1051_v61, %v1053_v62 }
 0x255   : > { %v1062_v0 = vsel %vm1048_vm4, %v1059_v57, %v1061_v60  ;;  %v1621_v5 = vmul.u32.u64.low %v1063_v24, %v1058_v63  ;;  %v1622_v7 = vmul.u32.u64.high %v1063_v24, %v1058_v63, %v1621_v5  ;;  %v1070_v10 = vmul.u32 %v1063_v24, %v1054_v9  ;;  %v1128_v57 = vld [vmem:[%s1653_s5] sm:$0xff] }
 0x256   : > { %v1618_v1 = vmul.u32.u64.low %v1063_v24, %v1062_v0  ;;  %v1619_v2 = vmul.u32.u64.high %v1063_v24, %v1062_v0, %v1618_v1 }
 0x257   : > { %v1073_v26 = vadd.s32 1, %v1622_v7 }
 0x258   : > { %vm1072_vm5 = vc.u32 %v1619_v2, %v1621_v5  ;;  %v1071_v23 = vadd.s32 %v1621_v5, %v1619_v2 }
 0x259   : > { %v1074_v11 = vsel %vm1072_vm5, %v1073_v26, %v1622_v7 }
 0x25a   : > { %v1075_v12 = vadd.s32 %v1074_v11, %v1070_v10 }
 0x25c   : > { %v1076_v13 = vadd.s32 536870912, %v1075_v12 }
 0x25e   : > { %v1077_v14 = vshrl.u32 %v1076_v13, 30 }
 0x260   : > { %v1078_v3 = vshll.u32 %v1077_v14, 30  ;;  %v1101_v8 = vsub.s32 4, %v1077_v14 }
 0x262   : > { %v1079_v15 = vsub.s32 %v1075_v12, %v1078_v3  ;;  %v1102_v44 = vsel %vm1017_vm7, %v1101_v8, %v1077_v14 }
 0x263   : > { %v1104_v46 = vsel %vm1016_vm8, 0, %v1102_v44 }
 0x264   : > { %v1081_v16 = vsub.s32 0, %v1079_v15  ;;  %v1108_v47 = vadd.s32 3, %v1104_v46 }
 0x266   : > { %v1297_v17 = vmin.u32 %v1081_v16, %v1079_v15  ;;  %v1109_v48 = vand.u32 3, %v1108_v47 }
 0x268   : > { %v1083_v19 = vclz %v1297_v17  ;;  %vm1114_vm9 = vcmp.eq.s32.totalorder %v1109_v48, 2  ;;  %vm1111_vm10 = vcmp.eq.s32.totalorder %v1109_v48, 0  ;;  %vm1110_vm11 = vcmp.lt.s32.totalorder %v1109_v48, 2 }
 0x26a   : > { %v1298_v21 = vadd.s32 4294967294, %v1083_v19 }
 0x26c   : > { %vm1299_vm6 = vcmp.lt.s32.totalorder %v1298_v21, 0 }
 0x26d   : > { %v1086_v22 = vsel %vm1299_vm6, 0, %v1298_v21 }
 0x26e   : > { %v1087_v25 = vsub.s32 32, %v1086_v22  ;;  %v1091_v27 = vsub.s32 4294967266, %v1086_v22  ;;  %v1088_v30 = vshll.u32 %v1079_v15, %v1086_v22 }
 0x270   : > { %v1089_v33 = vshrl.u32 %v1071_v23, %v1087_v25  ;;  %v1092_v34 = vadd.s32 127, %v1091_v27 }
 0x272   : > { %v1090_v35 = vor.u32 %v1089_v33, %v1088_v30  ;;  %v1093_v36 = vshll.u32 %v1092_v34, 23 }
 0x274   : > { %v1094_v38 = vor.u32 4788187, %v1093_v36  ;;  %v1097_v40 = vcvt.s32.f32 %v1090_v35 }
 0x276   : > { %v1095_v39 = vand.u32 2147483647, %v1094_v38 }
 0x278   : > { %v1098_v41 = vmul.f32 %v1097_v40, %v1095_v39 }
 0x27a   : > { %v1099_v42 = vxor.u32 2147483648, %v1098_v41 }
 0x27c   : > { %v1100_v43 = vsel %vm1017_vm7, %v1099_v42, %v1098_v41 }
 0x27d   : > { %v1103_v45 = vsel %vm1016_vm8, %v1601_v32, %v1100_v43 }
 0x27e   : > { %1397 = vcosq.f32 %v1103_v45 }
 0x27f   : > { %1399 = vsinq.f32 %v1103_v45 }
 0x288   : > { %v1398_v6 = vpop.eup %1397 }
 0x289   : > { %v1400_v49 = vpop.eup %1399  ;;  %v1115_v50 = vxor.u32 2147483648, %v1398_v6 }
 0x28a   : > { %v1112_v51 = vxor.u32 2147483648, %v1400_v49 }
 0x28b   : > { %v1116_v52 = vsel %vm1114_vm9, %v1115_v50, %v1400_v49 }
 0x28c   : > { %v1113_v53 = vsel %vm1111_vm10, %v1398_v6, %v1112_v51 }
 0x28d   : > { %v1117_v37 = vsel %vm1110_vm11, %v1113_v53, %v1116_v52 }
 0x28e   : > { %v1118_v55 = vsel %vm1107_vm12, nan, %v1117_v37 }
 0x28f   : > { %v1125_v28 = vmul.f32 %v1123_v54, %v1118_v55 }
 0x291   : > { %v1126_v56 = vmul.f32 %v1125_v28, %v1118_v55 }
 0x293   : > { %v1127_v31 = vadd.f32 %v1126_v56, %v1598_v29 }
 0x295   : > { %1355 = vmatpush3.msra.mxu1 %v1127_v31 }
 0x296   : > { %1357 = vmatmul.mubr.msk.f32.vlgmr.msra.gmra.mrb[6].mxu1 %vm459_vm15, %v1128_v57 }
 0x369   : > { %v1204_v18 = vpop.f32.mrb[6].mxu1 }
 0x36a   : > { %v1205_v59 = vadd.f32 %v1204_v18, %v1133_v58  ;;  %v1358_v20 = vpop.f32.mrb[7].mxu1 }
 0x36c   : > { %1209 = vrot.lane.b32.xlu0 %v1205_v59, %s1424_s13 }
 0x3de   : > { %v1210_v32 = vpop.permute.xlu0 %1209 }
 0x3df   : > { %v1212_v60 = vadd.f32 %v1210_v32, %v1503_v4 }
 0x3e1   : > { %1214 = vrot.lane.b32.xlu1 %v1212_v60, %s1418_s21 }
 0x453   : > { %v1215_v29 = vpop.permute.xlu1 %1214 }
 0x454   : > { %1218 = vst.msk [vmem:[%s327_s17] sm:$0xff] %vm1217_vm13, %v1215_v29 }
 0x455 PF: > { %s19_s30 = sadd.s32 1, %s1407_s30  }
 0x456   : > { %p16_p4 = scmp.ge.s32.totalorder %s19_s30, 4  }
 0x458   :  { %18 = sbr.rel (!%p16_p4) target bundleno = 1 (0x1), region = 92 }

// kernel: dac_encoder_forward.17
= control target key start
LH: loop header
LB: loop body
LE: loop exit
PB: predicated region body
PF: predicated region fallthrough
CT: control target
= control target key end

     0   :  { %s1475_s30 = smov 0   ;;  %s1648_s0 = inlined_call_operand.vmem [shape: f32[2,8,50], index: 0, kind: input, shape index: {}]   ;;  %s1649_s1 = inlined_call_operand.vmem [shape: f32[7,8,8], index: 1, kind: input, shape index: {}]   ;;  %s1650_s2 = inlined_call_operand.vmem [shape: f32[8,1], index: 2, kind: input, shape index: {}]   ;;  %s1651_s3 = inlined_call_operand.vmem [shape: f32[8,1], index: 3, kind: input, shape index: {}]   ;;  %s1652_s4 = inlined_call_operand.vmem [shape: f32[8,1], index: 4, kind: input, shape index: {}]   ;;  %s1653_s5 = inlined_call_operand.vmem [shape: f32[8,8], index: 5, kind: input, shape index: {}]   ;;  %s1654_s6 = inlined_call_operand.vmem [shape: f32[8,1], index: 6, kind: input, shape index: {}]   ;;  %s1655_s7 = inlined_call_operand.vmem [shape: f32[8,1], index: 7, kind: input, shape index: {}]   ;;  %s1656_s8 = inlined_call_operand.vmem [shape: f32[8,1], index: 8, kind: input, shape index: {}]   ;;  %s1657_s9 = inlined_call_operand.vmem [shape: f32[2,8,32], index: 9, kind: output, shape index: {}]  }
   0x1 LB: > { %s1272_s10 = sadd.s32 4294967295, %s1407_s30   ;;  %p1276_p0 = scmp.ge.s32.totalorder %s1407_s30, 1  ;;  %s1407_s30 = sphi %s1475_s30, %s19_s30  }
   0x2   : > { %p286_p1 = scmp.lt.s32.totalorder %s1407_s30, 3 }
   0x4   : > { %p287_p2 = pnand %p1276_p0, %p286_p1 }
   0x5   : > { %v329_v0 = vld [vmem:[%s1651_s3] sm:$0xff] (!%p287_p2)  ;;  %v1409_v1 = vmov (!%p287_p2), 0   ;;  %v1410_v3 = vmov (!%p287_p2), 0.0   ;;  %vm1411_vm0 = vmmov (!%p287_p2), 0   ;;  %p320_p3 = scmp.lt.s32.totalorder (!%p287_p2), %s1272_s10, 1  ;;  %vm449_vm14 = vcmask (!%p287_p2), 408576  }
   0x6   : > { %290 = sbr.rel (%p287_p2) target bundleno = 1109 (0x455), region = 56  ;;  %1391 = vset.pattern.permute.xlu0 (!%p287_p2), %v1409_v1  ;;  %1392 = vset.pattern.permute.xlu1 (!%p287_p2), %v1409_v1  ;;  %v330_v2 = vld [vmem:[%s1652_s4] sm:$0xff] (!%p287_p2)  ;;  %v1412_v18 = vmov (!%p287_p2), 2102212464   ;;  %v1413_v20 = vmov (!%p287_p2), 920167782  }
   0x7   : > { %333 = vperm.xlu0 (!%p287_p2), %1391, %v329_v0   ;;  %1324 = vmatprep.subr.mxu1 (!%p287_p2), %v1410_v3  ;;  %v1414_v24 = vmov (!%p287_p2), 1326507024   ;;  %v1415_v26 = vmov (!%p287_p2), 683565275   ;;  %v1416_v28 = vmov (!%p287_p2), 2475754826  }
   0x8   : > { %1319 = vmatprep.subr.mxu0 (!%p287_p2), %v1410_v3  ;;  %1326 = vmatprep.mubr.msk.f32.mxu1 (!%p287_p2), %vm1411_vm0, %v1410_v3  ;;  %v1417_v31 = vmov (!%p287_p2), 2131351028   ;;  %vm459_vm15 = vcmask (!%p287_p2), 64512   ;;  %s1418_s21 = smov (!%p287_p2), 119   ;;  %s1419_s22 = smov (!%p287_p2), 125  }
   0x9   : > { %1321 = vmatprep.mubr.msk.f32.mxu0 (!%p287_p2), %vm1411_vm0, %v1410_v3  ;;  %s1420_s23 = smov (!%p287_p2), 113   ;;  %s1421_s24 = smov (!%p287_p2), 122  }
   0xa   : > { %s1422_s27 = smov (!%p287_p2), 116   ;;  %s1423_s11 = smov (!%p287_p2), 110  }
   0xb   : > { %443 = vperm.xlu0 (!%p287_p2), %1391, %v330_v2   ;;  %s1424_s13 = smov (!%p287_p2), 9  }
   0xd   : > { %s1659_s10 = smov (!%p320_p3, %s1272_s10), 1 }
   0xe   : > { %s1277_s15 = sshll.u32 %s1659_s10, 3 }
   0xf   : > { %s323_s18 = scalar_lea.vmem %s1648_s0, %s1277_s15  ;;  %s327_s17 = scalar_lea.vmem %s1657_s9, %s1277_s15 }
  0x10   : > { %v1503_v4 = vld [vmem:[%s323_s18] sm:$0xff] }
  0x86   : > { %v334_v5 = vpop.permute.xlu0 %333 }
  0x87   : > { %v1506_v6 = vmul.f32 %v334_v5, %v1503_v4 }
  0x89   : > { %v340_v7 = vand.u32 2139095040, %v1506_v6  ;;  %v337_v8 = vand.u32 2147483647, %v1506_v6  ;;  %vm339_vm8 = vcmp.lt.s32.totalorder %v1506_v6, 0  ;;  %vm429_vm13 = vweird.f32 %v1506_v6 }
  0x8b   : > { %v341_v9 = vshrl.u32 %v340_v7, 23  ;;  %v344_v11 = vand.u32 8388607, %v337_v8  ;;  %vm338_vm9 = vcmp.le.f32.partialorder %v337_v8, 0.7853982 }
  0x8d   : > { %v1279_v10 = vadd.s32 4294967169, %v341_v9  ;;  %v345_v14 = vor.u32 8388608, %v344_v11 }
  0x8f   : > { %v347_v12 = vadd.s32 1, %v1279_v10  ;;  %v385_v22 = vshll.u32 %v345_v14, 8 }
  0x91   : > { %vm348_vm1 = vcmp.gt.s32.totalorder %v347_v12, 0 }
  0x92   : > { %v349_v13 = vsel %vm348_vm1, %v347_v12, 0 }
  0x93   : > { %v351_v15 = vand.u32 31, %v349_v13  ;;  %v350_v16 = vshrl.u32 %v349_v13, 5 }
  0x95   : > { %v352_v17 = vsub.s32 32, %v351_v15  ;;  %v363_v19 = vshll.u32 %v1412_v18, %v351_v15  ;;  %v366_v21 = vshll.u32 %v1413_v20, %v351_v15  ;;  %v354_v27 = vshll.u32 %v1415_v26, %v351_v15 }
  0x96   : > { %v357_v30 = vshll.u32 %v1416_v28, %v351_v15  ;;  %v360_v33 = vshll.u32 %v1417_v31, %v351_v15  ;;  %vm372_vm2 = vcmp.lt.s32.totalorder %v350_v16, 4  ;;  %vm369_vm3 = vcmp.lt.s32.totalorder %v350_v16, 1 }
  0x97   : > { %v364_v23 = vshrl.u32 %v1413_v20, %v352_v17  ;;  %v367_v25 = vshrl.u32 %v1414_v24, %v352_v17  ;;  %v355_v29 = vshrl.u32 %v1416_v28, %v352_v17  ;;  %v358_v32 = vshrl.u32 %v1417_v31, %v352_v17 }
  0x98   : > { %v361_v34 = vshrl.u32 %v1412_v18, %v352_v17  ;;  %v353_v38 = vshrl.u32 %v1415_v26, %v352_v17  ;;  %vm370_vm4 = vcmp.lt.s32.totalorder %v350_v16, 2  ;;  %vm371_vm5 = vcmp.lt.s32.totalorder %v350_v16, 3 }
  0x99   : > { %v365_v35 = vor.u32 %v364_v23, %v363_v19  ;;  %v368_v36 = vor.u32 %v367_v25, %v366_v21  ;;  %v356_v37 = vor.u32 %v355_v29, %v354_v27  ;;  %v359_v39 = vor.u32 %v358_v32, %v357_v30 }
  0x9a   : > { %v362_v40 = vor.u32 %v361_v34, %v360_v33 }
  0x9b   : > { %v378_v41 = vsel %vm372_vm2, %v365_v35, 920167782  ;;  %v382_v42 = vsel %vm372_vm2, %v368_v36, 1326507024  ;;  %v377_v44 = vsel %vm369_vm3, %v356_v37, %v359_v39  ;;  %v373_v47 = vsel %vm369_vm3, %v353_v38, %v356_v37 }
  0x9c   : > { %v374_v43 = vsel %vm372_vm2, %v362_v40, 2102212464  ;;  %v379_v45 = vsel %vm371_vm5, %v362_v40, %v378_v41  ;;  %v381_v46 = vsel %vm369_vm3, %v359_v39, %v362_v40  ;;  %v383_v50 = vsel %vm371_vm5, %v365_v35, %v382_v42  ;;  %v444_v42 = vpop.permute.xlu0 %443 }
  0x9d   : > { %v375_v48 = vsel %vm371_vm5, %v359_v39, %v374_v43  ;;  %v380_v49 = vsel %vm370_vm4, %v377_v44, %v379_v45  ;;  %v384_v51 = vsel %vm370_vm4, %v381_v46, %v383_v50  ;;  %v1008_v50 = vld [vmem:[%s1655_s7] sm:$0xff] }
  0x9e   : > { %v1523_v52 = vmul.u32.u64.low %v385_v22, %v380_v49  ;;  %v1524_v53 = vmul.u32.u64.high %v385_v22, %v380_v49, %v1523_v52  ;;  %v1526_v54 = vmul.u32.u64.low %v385_v22, %v384_v51  ;;  %v1527_v55 = vmul.u32.u64.high %v385_v22, %v384_v51, %v1526_v54  ;;  %v1119_v49 = vld [vmem:[%s1656_s8] sm:$0xff] }
  0x9f   : > { %v376_v56 = vsel %vm370_vm4, %v373_v47, %v375_v48  ;;  %v451_v48 = vld [vmem:[%s1649_s1] sm:$0xff] }
  0xa0   : > { %v395_v57 = vadd.s32 1, %v1524_v53  ;;  %v392_v58 = vmul.u32 %v385_v22, %v376_v56  ;;  %vm394_vm6 = vc.u32 %v1527_v55, %v1523_v52  ;;  %v393_v10 = vadd.s32 %v1523_v52, %v1527_v55  ;;  %v1129_v51 = vld [vmem:[%s1654_s6] sm:$0xff]  ;;  %v1283_v52 = vld [vmem:[%s1649_s1 + $0x8] sm:$0xff]  ;;  %v1288_v55 = vld [vmem:[%s1649_s1 + $0x18] sm:$0xff] }
  0xa1   : > { %v1286_v56 = vld [vmem:[%s1649_s1 + $0x10] sm:$0xff] }
  0xa2   : > { %v396_v59 = vsel %vm394_vm6, %v395_v57, %v1524_v53 }
  0xa3   : > { %v397_v60 = vadd.s32 %v396_v59, %v392_v58  ;;  %v1292_v59 = vld [vmem:[%s1649_s1 + $0x28] sm:$0xff] }
  0xa5   : > { %v398_v61 = vadd.s32 536870912, %v397_v60 }
  0xa7   : > { %v399_v62 = vshrl.u32 %v398_v61, 30 }
  0xa9   : > { %v400_v63 = vshll.u32 %v399_v62, 30  ;;  %v423_v25 = vsub.s32 4, %v399_v62 }
  0xab   : > { %v401_v0 = vsub.s32 %v397_v60, %v400_v63  ;;  %v424_v30 = vsel %vm339_vm8, %v423_v25, %v399_v62  ;;  %v1290_v60 = vld [vmem:[%s1649_s1 + $0x20] sm:$0xff]  ;;  %v1294_v62 = vld [vmem:[%s1649_s1 + $0x30] sm:$0xff] }
  0xac   : > { %v426_v33 = vsel %vm338_vm9, 0, %v424_v30 }
  0xad   : > { %v403_v1 = vsub.s32 0, %v401_v0  ;;  %v430_v34 = vadd.s32 3, %v426_v33 }
  0xaf   : > { %v1280_v2 = vmin.u32 %v403_v1, %v401_v0  ;;  %v431_v35 = vand.u32 3, %v430_v34 }
  0xb1   : > { %v405_v5 = vclz %v1280_v2  ;;  %vm436_vm10 = vcmp.eq.s32.totalorder %v431_v35, 2  ;;  %vm433_vm11 = vcmp.eq.s32.totalorder %v431_v35, 0  ;;  %vm432_vm12 = vcmp.lt.s32.totalorder %v431_v35, 2 }
  0xb3   : > { %v1281_v7 = vadd.s32 4294967294, %v405_v5 }
  0xb5   : > { %vm1282_vm7 = vcmp.lt.s32.totalorder %v1281_v7, 0 }
  0xb6   : > { %v408_v9 = vsel %vm1282_vm7, 0, %v1281_v7 }
  0xb7   : > { %v409_v11 = vsub.s32 32, %v408_v9  ;;  %v413_v12 = vsub.s32 4294967266, %v408_v9  ;;  %v410_v13 = vshll.u32 %v401_v0, %v408_v9 }
  0xb9   : > { %v411_v14 = vshrl.u32 %v393_v10, %v409_v11  ;;  %v414_v15 = vadd.s32 127, %v413_v12 }
  0xbb   : > { %v412_v16 = vor.u32 %v411_v14, %v410_v13  ;;  %v415_v17 = vshll.u32 %v414_v15, 23 }
  0xbd   : > { %v416_v19 = vor.u32 4788187, %v415_v17  ;;  %v419_v22 = vcvt.s32.f32 %v412_v16 }
  0xbf   : > { %v417_v21 = vand.u32 2147483647, %v416_v19 }
  0xc1   : > { %v420_v23 = vmul.f32 %v419_v22, %v417_v21 }
  0xc3   : > { %v421_v27 = vxor.u32 2147483648, %v420_v23 }
  0xc5   : > { %v422_v29 = vsel %vm339_vm8, %v421_v27, %v420_v23 }
  0xc6   : > { %v425_v32 = vsel %vm338_vm9, %v1506_v6, %v422_v29  ;;  %v1001_v6 = vld [vmem:[%s1650_s2] sm:$0xff] }
  0xc7   : > { %1393 = vcosq.f32 %v425_v32 }
  0xc8   : > { %1395 = vsinq.f32 %v425_v32 }
  0xd1   : > { %v1394_v36 = vpop.eup %1393 }
  0xd2   : > { %v1396_v37 = vpop.eup %1395  ;;  %v437_v38 = vxor.u32 2147483648, %v1394_v36 }
  0xd3   : > { %v434_v39 = vxor.u32 2147483648, %v1396_v37 }
  0xd4   : > { %v438_v40 = vsel %vm436_vm10, %v437_v38, %v1396_v37 }
  0xd5   : > { %v435_v41 = vsel %vm433_vm11, %v1394_v36, %v434_v39 }
  0xd6   : > { %v439_v8 = vsel %vm432_vm12, %v435_v41, %v438_v40 }
  0xd7   : > { %v440_v43 = vsel %vm429_vm13, nan, %v439_v8  ;;  %vm1217_vm13 = vcmask 261120  }
  0xd8   : > { %v446_v44 = vmul.f32 %v444_v42, %v440_v43 }
  0xda   : > { %v447_v45 = vmul.f32 %v446_v44, %v440_v43 }
  0xdc   : > { %v448_v46 = vadd.f32 %v447_v45, %v1503_v4 }
  0xde   : > { %450 = vst.msk [vmem:[#allocation2] sm:$0xff] %vm449_vm14, %v448_v46 }
  0xe5   : > { %v452_v47 = vld [vmem:[#allocation2] sm:$0xff] }
  0xe6   : > { %687 = vrot.lane.b32.xlu0 %v452_v47, %s1418_s21  ;;  %456 = vrot.lane.b32.xlu1 %v452_v47, %s1419_s22 }
  0xe7   : > { %1325 = vmatpush3.msra.mxu1 %v452_v47 }
  0xe8   : > { %1334 = vmatprep.subr.mxu1 %v1410_v3  ;;  %1327 = vmatmul.mubr.msk.f32.vlgmr.msra.gmra.mrb[0].mxu1 %vm459_vm15, %v451_v48 }
  0xe9   : > { %1336 = vmatprep.mubr.msk.f32.mxu1 %vm1411_vm0, %v1410_v3 }
  0xea   : > { %845 = vrot.lane.b32.xlu0 %v452_v47, %s1420_s23  ;;  %608 = vrot.lane.b32.xlu1 %v452_v47, %s1421_s24 }
  0xee   : > { %1004 = vperm.xlu0 %1391, %v1001_v6   ;;  %766 = vrot.lane.b32.xlu1 %v452_v47, %s1422_s27 }
  0xf2   : > { %1122 = vperm.xlu0 %1391, %v1119_v49   ;;  %924 = vrot.lane.b32.xlu1 %v452_v47, %s1423_s11 }
  0xf6   : > { %1011 = vperm.xlu1 %1392, %v1008_v50  }
  0xfa   : > { %1132 = vperm.xlu1 %1392, %v1129_v51  }
 0x158   : > { %v688_v53 = vpop.permute.xlu0 %687  ;;  %v457_v54 = vpop.permute.xlu1 %456 }
 0x159   : > { %1320 = vmatpush3.msra.mxu0 %v457_v54  ;;  %1335 = vmatpush3.msra.mxu1 %v688_v53 }
 0x15a   : > { %1322 = vmatmul.mubr.msk.f32.vlgmr.msra.gmra.mrb[0].mxu0 %vm459_vm15, %v1283_v52  ;;  %1329 = vmatprep.subr.mxu0 %v1410_v3 }
 0x15b   : > { %1344 = vmatprep.subr.mxu1 %v1410_v3  ;;  %1331 = vmatprep.mubr.msk.f32.mxu0 %vm1411_vm0, %v1410_v3 }
 0x15c   : > { %v846_v57 = vpop.permute.xlu0 %845  ;;  %v609_v58 = vpop.permute.xlu1 %608  ;;  %1337 = vmatmul.mubr.msk.f32.vlgmr.msra.gmra.mrb[2].mxu1 %vm459_vm15, %v1288_v55 }
 0x15d   : > { %1330 = vmatpush3.msra.mxu0 %v609_v58  ;;  %1345 = vmatpush3.msra.mxu1 %v846_v57 }
 0x15e   : > { %1332 = vmatmul.mubr.msk.f32.vlgmr.msra.gmra.mrb[2].mxu0 %vm459_vm15, %v1286_v56  ;;  %1339 = vmatprep.subr.mxu0 %v1410_v3 }
 0x15f   : > { %1341 = vmatprep.mubr.msk.f32.mxu0 %vm1411_vm0, %v1410_v3  ;;  %1346 = vmatprep.mubr.msk.f32.mxu1 %vm1411_vm0, %v1410_v3 }
 0x160   : > { %v767_v61 = vpop.permute.xlu1 %766  ;;  %1347 = vmatmul.mubr.msk.f32.vlgmr.msra.gmra.mrb[4].mxu1 %vm459_vm15, %v1292_v59  ;;  %1354 = vmatprep.subr.mxu1 %v1410_v3 }
 0x161   : > { %1340 = vmatpush3.msra.mxu0 %v767_v61  ;;  %1356 = vmatprep.mubr.msk.f32.mxu1 %vm1411_vm0, %v1410_v3 }
 0x162   : > { %1342 = vmatmul.mubr.msk.f32.vlgmr.msra.gmra.mrb[4].mxu0 %vm459_vm15, %v1290_v60  ;;  %1349 = vmatprep.subr.mxu0 %v1410_v3 }
 0x163   : > { %1351 = vmatprep.mubr.msk.f32.mxu0 %vm1411_vm0, %v1410_v3 }
 0x164   : > { %v925_v63 = vpop.permute.xlu1 %924 }
 0x165   : > { %1350 = vmatpush3.msra.mxu0 %v925_v63 }
 0x166   : > { %1352 = vmatmul.mubr.msk.f32.vlgmr.msra.gmra.mrb[6].mxu0 %vm459_vm15, %v1294_v62 }
 0x16d   : > { %v1005_v27 = vpop.permute.xlu0 %1004 }
 0x175   : > { %v1012_v30 = vpop.permute.xlu1 %1011 }
 0x1bb   : > { %v602_v0 = vpop.f32.mrb[0].mxu1 }
 0x1bc   : > { %v1328_v1 = vpop.f32.mrb[1].mxu1 }
 0x22d   : > { %v529_v2 = vpop.f32.mrb[0].mxu0 }
 0x22e   : > { %v603_v5 = vadd.f32 %v602_v0, %v529_v2  ;;  %v1323_v7 = vpop.f32.mrb[1].mxu0 }
 0x22f   : > { %v759_v9 = vpop.f32.mrb[2].mxu1 }
 0x230   : > { %v1338_v10 = vpop.f32.mrb[3].mxu1 }
 0x231   : > { %v680_v11 = vpop.f32.mrb[2].mxu0 }
 0x232   : > { %v684_v12 = vadd.f32 %v680_v11, %v603_v5  ;;  %v1333_v13 = vpop.f32.mrb[3].mxu0 }
 0x233   : > { %v917_v14 = vpop.f32.mrb[4].mxu1 }
 0x234   : > { %v763_v3 = vadd.f32 %v759_v9, %v684_v12  ;;  %v1348_v15 = vpop.f32.mrb[5].mxu1 }
 0x235   : > { %v838_v16 = vpop.f32.mrb[4].mxu0 }
 0x236   : > { %v842_v17 = vadd.f32 %v838_v16, %v763_v3  ;;  %v1343_v19 = vpop.f32.mrb[5].mxu0 }
 0x238   : > { %v921_v21 = vadd.f32 %v917_v14, %v842_v17 }
 0x239   : > { %v996_v22 = vpop.f32.mrb[6].mxu0 }
 0x23a   : > { %v1000_v23 = vadd.f32 %v996_v22, %v921_v21  ;;  %v1353_v25 = vpop.f32.mrb[7].mxu0 }
 0x23c   : > { %v1598_v29 = vadd.f32 %v1005_v27, %v1000_v23 }
 0x23e   : > { %v1601_v32 = vmul.f32 %v1012_v30, %v1598_v29 }
 0x240   : > { %v1018_v33 = vand.u32 2139095040, %v1601_v32  ;;  %v1015_v37 = vand.u32 2147483647, %v1601_v32  ;;  %vm1017_vm7 = vcmp.lt.s32.totalorder %v1601_v32, 0  ;;  %vm1107_vm12 = vweird.f32 %v1601_v32 }
 0x242   : > { %v1019_v34 = vshrl.u32 %v1018_v33, 23  ;;  %v1022_v40 = vand.u32 8388607, %v1015_v37  ;;  %vm1016_vm8 = vcmp.le.f32.partialorder %v1015_v37, 0.7853982 }
 0x244   : > { %v1296_v35 = vadd.s32 4294967169, %v1019_v34  ;;  %v1023_v51 = vor.u32 8388608, %v1022_v40 }
 0x246   : > { %v1025_v36 = vadd.s32 1, %v1296_v35 }
 0x248   : > { %vm1026_vm0 = vcmp.gt.s32.totalorder %v1025_v36, 0 }
 0x249   : > { %v1027_v38 = vsel %vm1026_vm0, %v1025_v36, 0 }
 0x24a   : > { %v1029_v39 = vand.u32 31, %v1027_v38  ;;  %v1028_v8 = vshrl.u32 %v1027_v38, 5 }
 0x24c   : > { %v1030_v41 = vsub.s32 32, %v1029_v39  ;;  %v1032_v42 = vshll.u32 %v1415_v26, %v1029_v39  ;;  %v1035_v43 = vshll.u32 %v1416_v28, %v1029_v39  ;;  %v1038_v46 = vshll.u32 %v1417_v31, %v1029_v39 }
 0x24d   : > { %v1041_v48 = vshll.u32 %v1412_v18, %v1029_v39  ;;  %v1044_v49 = vshll.u32 %v1413_v20, %v1029_v39  ;;  %vm1047_vm1 = vcmp.lt.s32.totalorder %v1028_v8, 1  ;;  %vm1050_vm2 = vcmp.lt.s32.totalorder %v1028_v8, 4 }
 0x24e   : > { %v1033_v44 = vshrl.u32 %v1416_v28, %v1030_v41  ;;  %v1036_v45 = vshrl.u32 %v1417_v31, %v1030_v41  ;;  %v1039_v47 = vshrl.u32 %v1412_v18, %v1030_v41  ;;  %v1042_v6 = vshrl.u32 %v1413_v20, %v1030_v41 }
 0x24f   : > { %v1045_v50 = vshrl.u32 %v1414_v24, %v1030_v41  ;;  %v1031_v58 = vshrl.u32 %v1415_v26, %v1030_v41  ;;  %vm1049_vm3 = vcmp.lt.s32.totalorder %v1028_v8, 3  ;;  %vm1048_vm4 = vcmp.lt.s32.totalorder %v1028_v8, 2 }
 0x250   : > { %v1034_v52 = vor.u32 %v1033_v44, %v1032_v42  ;;  %v1037_v53 = vor.u32 %v1036_v45, %v1035_v43  ;;  %v1040_v54 = vor.u32 %v1039_v47, %v1038_v46  ;;  %v1043_v55 = vor.u32 %v1042_v6, %v1041_v48 }
 0x251   : > { %v1046_v28 = vor.u32 %v1045_v50, %v1044_v49  ;;  %v1063_v24 = vshll.u32 %v1023_v51, 8 }
 0x252   : > { %v1052_v56 = vsel %vm1050_vm2, %v1040_v54, 2102212464  ;;  %v1055_v31 = vsel %vm1047_vm1, %v1034_v52, %v1037_v53  ;;  %v1059_v57 = vsel %vm1047_vm1, %v1037_v53, %v1040_v54  ;;  %v1056_v18 = vsel %vm1050_vm2, %v1043_v55, 920167782 }
 0x253   : > { %v1060_v59 = vsel %vm1050_vm2, %v1046_v28, 1326507024  ;;  %v1057_v20 = vsel %vm1049_vm3, %v1040_v54, %v1056_v18  ;;  %v1051_v61 = vsel %vm1047_vm1, %v1031_v58, %v1034_v52  ;;  %v1053_v62 = vsel %vm1049_vm3, %v1037_v53, %v1052_v56  ;;  %v1123_v54 = vpop.permute.xlu0 %1122  ;;  %v1133_v58 = vpop.permute.xlu1 %1132 }
 0x254   : > { %v1061_v60 = vsel %vm1049_vm3, %v1043_v55, %v1060_v59  ;;  %v1058_v63 = vsel %vm1048_vm4, %v1055_v31, %v1057_v20  ;;  %v1054_v9 = vsel %vm1048_vm4, %v1051_v61, %v1053_v62 }
 0x255   : > { %v1062_v0 = vsel %vm1048_vm4, %v1059_v57, %v1061_v60  ;;  %v1621_v5 = vmul.u32.u64.low %v1063_v24, %v1058_v63  ;;  %v1622_v7 = vmul.u32.u64.high %v1063_v24, %v1058_v63, %v1621_v5  ;;  %v1070_v10 = vmul.u32 %v1063_v24, %v1054_v9  ;;  %v1128_v57 = vld [vmem:[%s1653_s5] sm:$0xff] }
 0x256   : > { %v1618_v1 = vmul.u32.u64.low %v1063_v24, %v1062_v0  ;;  %v1619_v2 = vmul.u32.u64.high %v1063_v24, %v1062_v0, %v1618_v1 }
 0x257   : > { %v1073_v26 = vadd.s32 1, %v1622_v7 }
 0x258   : > { %vm1072_vm5 = vc.u32 %v1619_v2, %v1621_v5  ;;  %v1071_v23 = vadd.s32 %v1621_v5, %v1619_v2 }
 0x259   : > { %v1074_v11 = vsel %vm1072_vm5, %v1073_v26, %v1622_v7 }
 0x25a   : > { %v1075_v12 = vadd.s32 %v1074_v11, %v1070_v10 }
 0x25c   : > { %v1076_v13 = vadd.s32 536870912, %v1075_v12 }
 0x25e   : > { %v1077_v14 = vshrl.u32 %v1076_v13, 30 }
 0x260   : > { %v1078_v3 = vshll.u32 %v1077_v14, 30  ;;  %v1101_v8 = vsub.s32 4, %v1077_v14 }
 0x262   : > { %v1079_v15 = vsub.s32 %v1075_v12, %v1078_v3  ;;  %v1102_v44 = vsel %vm1017_vm7, %v1101_v8, %v1077_v14 }
 0x263   : > { %v1104_v46 = vsel %vm1016_vm8, 0, %v1102_v44 }
 0x264   : > { %v1081_v16 = vsub.s32 0, %v1079_v15  ;;  %v1108_v47 = vadd.s32 3, %v1104_v46 }
 0x266   : > { %v1297_v17 = vmin.u32 %v1081_v16, %v1079_v15  ;;  %v1109_v48 = vand.u32 3, %v1108_v47 }
 0x268   : > { %v1083_v19 = vclz %v1297_v17  ;;  %vm1114_vm9 = vcmp.eq.s32.totalorder %v1109_v48, 2  ;;  %vm1111_vm10 = vcmp.eq.s32.totalorder %v1109_v48, 0  ;;  %vm1110_vm11 = vcmp.lt.s32.totalorder %v1109_v48, 2 }
 0x26a   : > { %v1298_v21 = vadd.s32 4294967294, %v1083_v19 }
 0x26c   : > { %vm1299_vm6 = vcmp.lt.s32.totalorder %v1298_v21, 0 }
 0x26d   : > { %v1086_v22 = vsel %vm1299_vm6, 0, %v1298_v21 }
 0x26e   : > { %v1087_v25 = vsub.s32 32, %v1086_v22  ;;  %v1091_v27 = vsub.s32 4294967266, %v1086_v22  ;;  %v1088_v30 = vshll.u32 %v1079_v15, %v1086_v22 }
 0x270   : > { %v1089_v33 = vshrl.u32 %v1071_v23, %v1087_v25  ;;  %v1092_v34 = vadd.s32 127, %v1091_v27 }
 0x272   : > { %v1090_v35 = vor.u32 %v1089_v33, %v1088_v30  ;;  %v1093_v36 = vshll.u32 %v1092_v34, 23 }
 0x274   : > { %v1094_v38 = vor.u32 4788187, %v1093_v36  ;;  %v1097_v40 = vcvt.s32.f32 %v1090_v35 }
 0x276   : > { %v1095_v39 = vand.u32 2147483647, %v1094_v38 }
 0x278   : > { %v1098_v41 = vmul.f32 %v1097_v40, %v1095_v39 }
 0x27a   : > { %v1099_v42 = vxor.u32 2147483648, %v1098_v41 }
 0x27c   : > { %v1100_v43 = vsel %vm1017_vm7, %v1099_v42, %v1098_v41 }
 0x27d   : > { %v1103_v45 = vsel %vm1016_vm8, %v1601_v32, %v1100_v43 }
 0x27e   : > { %1397 = vcosq.f32 %v1103_v45 }
 0x27f   : > { %1399 = vsinq.f32 %v1103_v45 }
 0x288   : > { %v1398_v6 = vpop.eup %1397 }
 0x289   : > { %v1400_v49 = vpop.eup %1399  ;;  %v1115_v50 = vxor.u32 2147483648, %v1398_v6 }
 0x28a   : > { %v1112_v51 = vxor.u32 2147483648, %v1400_v49 }
 0x28b   : > { %v1116_v52 = vsel %vm1114_vm9, %v1115_v50, %v1400_v49 }
 0x28c   : > { %v1113_v53 = vsel %vm1111_vm10, %v1398_v6, %v1112_v51 }
 0x28d   : > { %v1117_v37 = vsel %vm1110_vm11, %v1113_v53, %v1116_v52 }
 0x28e   : > { %v1118_v55 = vsel %vm1107_vm12, nan, %v1117_v37 }
 0x28f   : > { %v1125_v28 = vmul.f32 %v1123_v54, %v1118_v55 }
 0x291   : > { %v1126_v56 = vmul.f32 %v1125_v28, %v1118_v55 }
 0x293   : > { %v1127_v31 = vadd.f32 %v1126_v56, %v1598_v29 }
 0x295   : > { %1355 = vmatpush3.msra.mxu1 %v1127_v31 }
 0x296   : > { %1357 = vmatmul.mubr.msk.f32.vlgmr.msra.gmra.mrb[6].mxu1 %vm459_vm15, %v1128_v57 }
 0x369   : > { %v1204_v18 = vpop.f32.mrb[6].mxu1 }
 0x36a   : > { %v1205_v59 = vadd.f32 %v1204_v18, %v1133_v58  ;;  %v1358_v20 = vpop.f32.mrb[7].mxu1 }
 0x36c   : > { %1209 = vrot.lane.b32.xlu0 %v1205_v59, %s1424_s13 }
 0x3de   : > { %v1210_v32 = vpop.permute.xlu0 %1209 }
 0x3df   : > { %v1212_v60 = vadd.f32 %v1210_v32, %v1503_v4 }
 0x3e1   : > { %1214 = vrot.lane.b32.xlu1 %v1212_v60, %s1418_s21 }
 0x453   : > { %v1215_v29 = vpop.permute.xlu1 %1214 }
 0x454   : > { %1218 = vst.msk [vmem:[%s327_s17] sm:$0xff] %vm1217_vm13, %v1215_v29 }
 0x455 PF: > { %s19_s30 = sadd.s32 1, %s1407_s30  }
 0x456   : > { %p16_p4 = scmp.ge.s32.totalorder %s19_s30, 4  }
 0x458   :  { %18 = sbr.rel (!%p16_p4) target bundleno = 1 (0x1), region = 92 }

// kernel: dac_encoder_forward.18
= control target key start
LH: loop header
LB: loop body
LE: loop exit
PB: predicated region body
PF: predicated region fallthrough
CT: control target
= control target key end

     0   :  { %s1671_s17 = smov 0   ;;  %s1886_s0 = inlined_call_operand.vmem [shape: f32[2,8,86], index: 0, kind: input, shape index: {}]   ;;  %s1887_s1 = inlined_call_operand.vmem [shape: f32[7,8,8], index: 1, kind: input, shape index: {}]   ;;  %s1888_s2 = inlined_call_operand.vmem [shape: f32[8,1], index: 2, kind: input, shape index: {}]   ;;  %s1889_s3 = inlined_call_operand.vmem [shape: f32[8,1], index: 3, kind: input, shape index: {}]   ;;  %s1890_s4 = inlined_call_operand.vmem [shape: f32[8,1], index: 4, kind: input, shape index: {}]   ;;  %s1891_s5 = inlined_call_operand.vmem [shape: f32[8,8], index: 5, kind: input, shape index: {}]   ;;  %s1892_s6 = inlined_call_operand.vmem [shape: f32[8,1], index: 6, kind: input, shape index: {}]   ;;  %s1893_s7 = inlined_call_operand.vmem [shape: f32[8,1], index: 7, kind: input, shape index: {}]   ;;  %s1894_s8 = inlined_call_operand.vmem [shape: f32[8,1], index: 8, kind: input, shape index: {}]   ;;  %s1895_s9 = inlined_call_operand.vmem [shape: f32[8,1], index: 9, kind: input, shape index: {}]   ;;  %s1896_s10 = inlined_call_operand.vmem [shape: f32[8,1], index: 10, kind: input, shape index: {}]   ;;  %s1897_s11 = inlined_call_operand.vmem [shape: f32[2,8,32], index: 11, kind: output, shape index: {}]  }
   0x1 LB: > { %s1446_s18 = sadd.s32 4294967295, %s1593_s17   ;;  %p1450_p0 = scmp.ge.s32.totalorder %s1593_s17, 1  ;;  %s1593_s17 = sphi %s1671_s17, %s21_s17  }
   0x2   : > { %p336_p1 = scmp.lt.s32.totalorder %s1593_s17, 3 }
   0x4   : > { %p337_p2 = pnand %p1450_p0, %p336_p1 }
   0x5   : > { %v383_v0 = vld [vmem:[%s1889_s3] sm:$0xff] (!%p337_p2)  ;;  %v1595_v1 = vmov (!%p337_p2), 0   ;;  %v1596_v3 = vmov (!%p337_p2), 0.0   ;;  %p374_p3 = scmp.lt.s32.totalorder (!%p337_p2), %s1446_s18, 1  ;;  %vm1597_vm0 = vmmov (!%p337_p2), 0   ;;  %vm503_vm14 = vcmask (!%p337_p2), 703488  }
   0x6   : > { %340 = sbr.rel (%p337_p2) target bundleno = 1196 (0x4ac), region = 64  ;;  %1573 = vset.pattern.permute.xlu0 (!%p337_p2), %v1595_v1  ;;  %1574 = vset.pattern.permute.xlu1 (!%p337_p2), %v1595_v1  ;;  %v384_v2 = vld [vmem:[%s1890_s4] sm:$0xff] (!%p337_p2)  ;;  %v1598_v18 = vmov (!%p337_p2), 2102212464   ;;  %v1599_v20 = vmov (!%p337_p2), 920167782  }
   0x7   : > { %387 = vperm.xlu0 (!%p337_p2), %1573, %v383_v0   ;;  %1502 = vmatprep.subr.mxu1 (!%p337_p2), %v1596_v3  ;;  %v1600_v24 = vmov (!%p337_p2), 1326507024   ;;  %v1601_v26 = vmov (!%p337_p2), 683565275   ;;  %v1602_v28 = vmov (!%p337_p2), 2475754826  }
   0x8   : > { %1497 = vmatprep.subr.mxu0 (!%p337_p2), %v1596_v3  ;;  %1504 = vmatprep.mubr.msk.f32.mxu1 (!%p337_p2), %vm1597_vm0, %v1596_v3  ;;  %v1603_v31 = vmov (!%p337_p2), 2131351028   ;;  %vm513_vm15 = vcmask (!%p337_p2), 64512   ;;  %s1604_s29 = smov (!%p337_p2), 101   ;;  %s1605_s30 = smov (!%p337_p2), 119  }
   0x9   : > { %1499 = vmatprep.mubr.msk.f32.mxu0 (!%p337_p2), %vm1597_vm0, %v1596_v3  ;;  %s1606_s12 = smov (!%p337_p2), 83   ;;  %s1607_s13 = smov (!%p337_p2), 110  }
   0xa   : > { %s1608_s16 = smov (!%p337_p2), 92   ;;  %s1609_s21 = smov (!%p337_p2), 74  }
   0xb   : > { %497 = vperm.xlu0 (!%p337_p2), %1573, %v384_v2  }
   0xd   : > { %s1899_s18 = smov (!%p374_p3, %s1446_s18), 1 }
   0xe   : > { %s1451_s23 = sshll.u32 %s1899_s18, 3 }
   0xf   : > { %s377_s26 = scalar_lea.vmem %s1886_s0, %s1451_s23  ;;  %s381_s15 = scalar_lea.vmem %s1897_s11, %s1451_s23 }
  0x10   : > { %v1699_v4 = vld [vmem:[%s377_s26] sm:$0xff] }
  0x86   : > { %v388_v5 = vpop.permute.xlu0 %387 }
  0x87   : > { %v1702_v6 = vmul.f32 %v388_v5, %v1699_v4 }
  0x89   : > { %v394_v7 = vand.u32 2139095040, %v1702_v6  ;;  %v391_v8 = vand.u32 2147483647, %v1702_v6  ;;  %vm393_vm8 = vcmp.lt.s32.totalorder %v1702_v6, 0  ;;  %vm483_vm13 = vweird.f32 %v1702_v6 }
  0x8b   : > { %v395_v9 = vshrl.u32 %v394_v7, 23  ;;  %v398_v11 = vand.u32 8388607, %v391_v8  ;;  %vm392_vm9 = vcmp.le.f32.partialorder %v391_v8, 0.7853982 }
  0x8d   : > { %v1453_v10 = vadd.s32 4294967169, %v395_v9  ;;  %v399_v14 = vor.u32 8388608, %v398_v11 }
  0x8f   : > { %v401_v12 = vadd.s32 1, %v1453_v10  ;;  %v439_v22 = vshll.u32 %v399_v14, 8 }
  0x91   : > { %vm402_vm1 = vcmp.gt.s32.totalorder %v401_v12, 0 }
  0x92   : > { %v403_v13 = vsel %vm402_vm1, %v401_v12, 0 }
  0x93   : > { %v405_v15 = vand.u32 31, %v403_v13  ;;  %v404_v16 = vshrl.u32 %v403_v13, 5 }
  0x95   : > { %v406_v17 = vsub.s32 32, %v405_v15  ;;  %v417_v19 = vshll.u32 %v1598_v18, %v405_v15  ;;  %v420_v21 = vshll.u32 %v1599_v20, %v405_v15  ;;  %v408_v27 = vshll.u32 %v1601_v26, %v405_v15 }
  0x96   : > { %v411_v30 = vshll.u32 %v1602_v28, %v405_v15  ;;  %v414_v33 = vshll.u32 %v1603_v31, %v405_v15  ;;  %vm426_vm2 = vcmp.lt.s32.totalorder %v404_v16, 4  ;;  %vm423_vm3 = vcmp.lt.s32.totalorder %v404_v16, 1 }
  0x97   : > { %v418_v23 = vshrl.u32 %v1599_v20, %v406_v17  ;;  %v421_v25 = vshrl.u32 %v1600_v24, %v406_v17  ;;  %v409_v29 = vshrl.u32 %v1602_v28, %v406_v17  ;;  %v412_v32 = vshrl.u32 %v1603_v31, %v406_v17 }
  0x98   : > { %v415_v34 = vshrl.u32 %v1598_v18, %v406_v17  ;;  %v407_v38 = vshrl.u32 %v1601_v26, %v406_v17  ;;  %vm424_vm4 = vcmp.lt.s32.totalorder %v404_v16, 2  ;;  %vm425_vm5 = vcmp.lt.s32.totalorder %v404_v16, 3 }
  0x99   : > { %v419_v35 = vor.u32 %v418_v23, %v417_v19  ;;  %v422_v36 = vor.u32 %v421_v25, %v420_v21  ;;  %v410_v37 = vor.u32 %v409_v29, %v408_v27  ;;  %v413_v39 = vor.u32 %v412_v32, %v411_v30 }
  0x9a   : > { %v416_v40 = vor.u32 %v415_v34, %v414_v33 }
  0x9b   : > { %v432_v41 = vsel %vm426_vm2, %v419_v35, 920167782  ;;  %v436_v42 = vsel %vm426_vm2, %v422_v36, 1326507024  ;;  %v431_v44 = vsel %vm423_vm3, %v410_v37, %v413_v39  ;;  %v427_v47 = vsel %vm423_vm3, %v407_v38, %v410_v37 }
  0x9c   : > { %v428_v43 = vsel %vm426_vm2, %v416_v40, 2102212464  ;;  %v433_v45 = vsel %vm425_vm5, %v416_v40, %v432_v41  ;;  %v435_v46 = vsel %vm423_vm3, %v413_v39, %v416_v40  ;;  %v437_v50 = vsel %vm425_vm5, %v419_v35, %v436_v42  ;;  %v498_v42 = vpop.permute.xlu0 %497 }
  0x9d   : > { %v429_v48 = vsel %vm425_vm5, %v413_v39, %v428_v43  ;;  %v434_v49 = vsel %vm424_vm4, %v431_v44, %v433_v45  ;;  %v438_v51 = vsel %vm424_vm4, %v435_v46, %v437_v50  ;;  %v1267_v50 = vld [vmem:[%s1895_s9] sm:$0xff] }
  0x9e   : > { %v1719_v52 = vmul.u32.u64.low %v439_v22, %v434_v49  ;;  %v1720_v53 = vmul.u32.u64.high %v439_v22, %v434_v49, %v1719_v52  ;;  %v1722_v54 = vmul.u32.u64.low %v439_v22, %v438_v51  ;;  %v1723_v55 = vmul.u32.u64.high %v439_v22, %v438_v51, %v1722_v54  ;;  %v1173_v49 = vld [vmem:[%s1894_s8] sm:$0xff] }
  0x9f   : > { %v430_v56 = vsel %vm424_vm4, %v427_v47, %v429_v48  ;;  %v505_v48 = vld [vmem:[%s1887_s1] sm:$0xff]  ;;  %v1457_v54 = vld [vmem:[%s1887_s1 + $0x8] sm:$0xff] }
  0xa0   : > { %v449_v57 = vadd.s32 1, %v1720_v53  ;;  %v446_v58 = vmul.u32 %v439_v22, %v430_v56  ;;  %vm448_vm6 = vc.u32 %v1723_v55, %v1719_v52  ;;  %v447_v10 = vadd.s32 %v1719_v52, %v1723_v55  ;;  %v1268_v51 = vld [vmem:[%s1896_s10] sm:$0xff] }
  0xa1   : > { %v1062_v52 = vld [vmem:[%s1893_s7] sm:$0xff] }
  0xa2   : > { %v450_v59 = vsel %vm448_vm6, %v449_v57, %v1720_v53  ;;  %v1183_v53 = vld [vmem:[%s1892_s6] sm:$0xff]  ;;  %v1462_v57 = vld [vmem:[%s1887_s1 + $0x18] sm:$0xff] }
  0xa3   : > { %v451_v60 = vadd.s32 %v450_v59, %v446_v58  ;;  %v1460_v58 = vld [vmem:[%s1887_s1 + $0x10] sm:$0xff] }
  0xa5   : > { %v452_v61 = vadd.s32 536870912, %v451_v60 }
  0xa7   : > { %v453_v62 = vshrl.u32 %v452_v61, 30  ;;  %v1466_v61 = vld [vmem:[%s1887_s1 + $0x28] sm:$0xff] }
  0xa9   : > { %v454_v63 = vshll.u32 %v453_v62, 30  ;;  %v477_v25 = vsub.s32 4, %v453_v62 }
  0xab   : > { %v455_v0 = vsub.s32 %v451_v60, %v454_v63  ;;  %v478_v30 = vsel %vm393_vm8, %v477_v25, %v453_v62  ;;  %v1464_v62 = vld [vmem:[%s1887_s1 + $0x20] sm:$0xff] }
  0xac   : > { %v480_v33 = vsel %vm392_vm9, 0, %v478_v30 }
  0xad   : > { %v457_v1 = vsub.s32 0, %v455_v0  ;;  %v484_v34 = vadd.s32 3, %v480_v33 }
  0xaf   : > { %v1454_v2 = vmin.u32 %v457_v1, %v455_v0  ;;  %v485_v35 = vand.u32 3, %v484_v34 }
  0xb1   : > { %v459_v5 = vclz %v1454_v2  ;;  %vm490_vm10 = vcmp.eq.s32.totalorder %v485_v35, 2  ;;  %vm487_vm11 = vcmp.eq.s32.totalorder %v485_v35, 0  ;;  %vm486_vm12 = vcmp.lt.s32.totalorder %v485_v35, 2 }
  0xb3   : > { %v1455_v7 = vadd.s32 4294967294, %v459_v5 }
  0xb5   : > { %vm1456_vm7 = vcmp.lt.s32.totalorder %v1455_v7, 0 }
  0xb6   : > { %v462_v9 = vsel %vm1456_vm7, 0, %v1455_v7 }
  0xb7   : > { %v463_v11 = vsub.s32 32, %v462_v9  ;;  %v467_v12 = vsub.s32 4294967266, %v462_v9  ;;  %v464_v13 = vshll.u32 %v455_v0, %v462_v9  ;;  %v1468_v0 = vld [vmem:[%s1887_s1 + $0x30] sm:$0xff] }
  0xb9   : > { %v465_v14 = vshrl.u32 %v447_v10, %v463_v11  ;;  %v468_v15 = vadd.s32 127, %v467_v12 }
  0xbb   : > { %v466_v16 = vor.u32 %v465_v14, %v464_v13  ;;  %v469_v17 = vshll.u32 %v468_v15, 23 }
  0xbd   : > { %v470_v19 = vor.u32 4788187, %v469_v17  ;;  %v473_v22 = vcvt.s32.f32 %v466_v16 }
  0xbf   : > { %v471_v21 = vand.u32 2147483647, %v470_v19 }
  0xc1   : > { %v474_v23 = vmul.f32 %v473_v22, %v471_v21 }
  0xc3   : > { %v475_v27 = vxor.u32 2147483648, %v474_v23 }
  0xc5   : > { %v476_v29 = vsel %vm393_vm8, %v475_v27, %v474_v23 }
  0xc6   : > { %v479_v32 = vsel %vm392_vm9, %v1702_v6, %v476_v29  ;;  %v1055_v6 = vld [vmem:[%s1888_s2] sm:$0xff] }
  0xc7   : > { %1575 = vcosq.f32 %v479_v32 }
  0xc8   : > { %1577 = vsinq.f32 %v479_v32 }
  0xd1   : > { %v1576_v36 = vpop.eup %1575 }
  0xd2   : > { %v1578_v37 = vpop.eup %1577  ;;  %v491_v38 = vxor.u32 2147483648, %v1576_v36 }
  0xd3   : > { %v488_v39 = vxor.u32 2147483648, %v1578_v37 }
  0xd4   : > { %v492_v40 = vsel %vm490_vm10, %v491_v38, %v1578_v37 }
  0xd5   : > { %v489_v41 = vsel %vm487_vm11, %v1576_v36, %v488_v39 }
  0xd6   : > { %v493_v8 = vsel %vm486_vm12, %v489_v41, %v492_v40 }
  0xd7   : > { %v494_v43 = vsel %vm483_vm13, nan, %v493_v8 }
  0xd8   : > { %v500_v44 = vmul.f32 %v498_v42, %v494_v43 }
  0xda   : > { %v501_v45 = vmul.f32 %v500_v44, %v494_v43 }
  0xdc   : > { %v502_v46 = vadd.f32 %v501_v45, %v1699_v4 }
  0xde   : > { %504 = vst.msk [vmem:[#allocation2] sm:$0xff] %vm503_vm14, %v502_v46 }
  0xe5   : > { %v506_v47 = vld [vmem:[#allocation2] sm:$0xff] }
  0xe6   : > { %741 = vrot.lane.b32.xlu0 %v506_v47, %s1604_s29  ;;  %510 = vrot.lane.b32.xlu1 %v506_v47, %s1605_s30 }
  0xe7   : > { %1503 = vmatpush3.msra.mxu1 %v506_v47 }
  0xe8   : > { %1512 = vmatprep.subr.mxu1 %v1596_v3  ;;  %1505 = vmatmul.mubr.msk.f32.vlgmr.msra.gmra.mrb[0].mxu1 %vm513_vm15, %v505_v48 }
  0xe9   : > { %1514 = vmatprep.mubr.msk.f32.mxu1 %vm1597_vm0, %v1596_v3 }
  0xea   : > { %899 = vrot.lane.b32.xlu0 %v506_v47, %s1606_s12  ;;  %662 = vrot.lane.b32.xlu1 %v506_v47, %s1607_s13  ;;  %s1610_s12 = smov 27  }
  0xee   : > { %1058 = vperm.xlu0 %1573, %v1055_v6   ;;  %820 = vrot.lane.b32.xlu1 %v506_v47, %s1608_s16 }
  0xf2   : > { %1176 = vperm.xlu0 %1573, %v1173_v49   ;;  %978 = vrot.lane.b32.xlu1 %v506_v47, %s1609_s21 }
  0xf6   : > { %1271 = vperm.xlu0 %1573, %v1267_v50   ;;  %1065 = vperm.xlu1 %1574, %v1062_v52  }
  0xfa   : > { %1381 = vperm.xlu0 %1573, %v1268_v51   ;;  %1186 = vperm.xlu1 %1574, %v1183_v53  }
 0x158   : > { %v742_v55 = vpop.permute.xlu0 %741  ;;  %v511_v56 = vpop.permute.xlu1 %510 }
 0x159   : > { %1498 = vmatpush3.msra.mxu0 %v511_v56  ;;  %1513 = vmatpush3.msra.mxu1 %v742_v55 }
 0x15a   : > { %1500 = vmatmul.mubr.msk.f32.vlgmr.msra.gmra.mrb[0].mxu0 %vm513_vm15, %v1457_v54  ;;  %1507 = vmatprep.subr.mxu0 %v1596_v3 }
 0x15b   : > { %1522 = vmatprep.subr.mxu1 %v1596_v3  ;;  %1509 = vmatprep.mubr.msk.f32.mxu0 %vm1597_vm0, %v1596_v3 }
 0x15c   : > { %v900_v59 = vpop.permute.xlu0 %899  ;;  %v663_v60 = vpop.permute.xlu1 %662  ;;  %1515 = vmatmul.mubr.msk.f32.vlgmr.msra.gmra.mrb[2].mxu1 %vm513_vm15, %v1462_v57 }
 0x15d   : > { %1508 = vmatpush3.msra.mxu0 %v663_v60  ;;  %1523 = vmatpush3.msra.mxu1 %v900_v59 }
 0x15e   : > { %1510 = vmatmul.mubr.msk.f32.vlgmr.msra.gmra.mrb[2].mxu0 %vm513_vm15, %v1460_v58  ;;  %1517 = vmatprep.subr.mxu0 %v1596_v3 }
 0x15f   : > { %1519 = vmatprep.mubr.msk.f32.mxu0 %vm1597_vm0, %v1596_v3  ;;  %1524 = vmatprep.mubr.msk.f32.mxu1 %vm1597_vm0, %v1596_v3 }
 0x160   : > { %v821_v63 = vpop.permute.xlu1 %820  ;;  %1525 = vmatmul.mubr.msk.f32.vlgmr.msra.gmra.mrb[4].mxu1 %vm513_vm15, %v1466_v61  ;;  %1532 = vmatprep.subr.mxu1 %v1596_v3 }
 0x161   : > { %1518 = vmatpush3.msra.mxu0 %v821_v63  ;;  %1534 = vmatprep.mubr.msk.f32.mxu1 %vm1597_vm0, %v1596_v3 }
 0x162   : > { %1520 = vmatmul.mubr.msk.f32.vlgmr.msra.gmra.mrb[4].mxu0 %vm513_vm15, %v1464_v62  ;;  %1527 = vmatprep.subr.mxu0 %v1596_v3 }
 0x163   : > { %1529 = vmatprep.mubr.msk.f32.mxu0 %vm1597_vm0, %v1596_v3 }
 0x164   : > { %v979_v1 = vpop.permute.xlu1 %978 }
 0x165   : > { %1528 = vmatpush3.msra.mxu0 %v979_v1 }
 0x166   : > { %1530 = vmatmul.mubr.msk.f32.vlgmr.msra.gmra.mrb[6].mxu0 %vm513_vm15, %v1468_v0 }
 0x16d   : > { %v1059_v30 = vpop.permute.xlu0 %1058 }
 0x175   : > { %v1066_v33 = vpop.permute.xlu1 %1065 }
 0x1bb   : > { %v656_v2 = vpop.f32.mrb[0].mxu1 }
 0x1bc   : > { %v1506_v5 = vpop.f32.mrb[1].mxu1 }
 0x22d   : > { %v583_v7 = vpop.f32.mrb[0].mxu0 }
 0x22e   : > { %v657_v9 = vadd.f32 %v656_v2, %v583_v7  ;;  %v1501_v10 = vpop.f32.mrb[1].mxu0 }
 0x22f   : > { %v813_v11 = vpop.f32.mrb[2].mxu1 }
 0x230   : > { %v1516_v12 = vpop.f32.mrb[3].mxu1 }
 0x231   : > { %v734_v13 = vpop.f32.mrb[2].mxu0 }
 0x232   : > { %v738_v14 = vadd.f32 %v734_v13, %v657_v9  ;;  %v1511_v15 = vpop.f32.mrb[3].mxu0 }
 0x233   : > { %v971_v16 = vpop.f32.mrb[4].mxu1 }
 0x234   : > { %v817_v3 = vadd.f32 %v813_v11, %v738_v14  ;;  %v1526_v17 = vpop.f32.mrb[5].mxu1 }
 0x235   : > { %v892_v19 = vpop.f32.mrb[4].mxu0 }
 0x236   : > { %v896_v21 = vadd.f32 %v892_v19, %v817_v3  ;;  %v1521_v22 = vpop.f32.mrb[5].mxu0 }
 0x238   : > { %v975_v23 = vadd.f32 %v971_v16, %v896_v21 }
 0x239   : > { %v1050_v25 = vpop.f32.mrb[6].mxu0 }
 0x23a   : > { %v1054_v27 = vadd.f32 %v1050_v25, %v975_v23  ;;  %v1531_v29 = vpop.f32.mrb[7].mxu0 }
 0x23c   : > { %v1800_v32 = vadd.f32 %v1059_v30, %v1054_v27 }
 0x23e   : > { %v1803_v34 = vmul.f32 %v1066_v33, %v1800_v32 }
 0x240   : > { %v1072_v35 = vand.u32 2139095040, %v1803_v34  ;;  %v1069_v39 = vand.u32 2147483647, %v1803_v34  ;;  %vm1071_vm7 = vcmp.lt.s32.totalorder %v1803_v34, 0  ;;  %vm1161_vm12 = vweird.f32 %v1803_v34 }
 0x242   : > { %v1073_v36 = vshrl.u32 %v1072_v35, 23  ;;  %v1076_v8 = vand.u32 8388607, %v1069_v39  ;;  %vm1070_vm8 = vcmp.le.f32.partialorder %v1069_v39, 0.7853982 }
 0x244   : > { %v1470_v37 = vadd.s32 4294967169, %v1073_v36  ;;  %v1077_v53 = vor.u32 8388608, %v1076_v8 }
 0x246   : > { %v1079_v38 = vadd.s32 1, %v1470_v37  ;;  %v1117_v5 = vshll.u32 %v1077_v53, 8 }
 0x248   : > { %vm1080_vm0 = vcmp.gt.s32.totalorder %v1079_v38, 0 }
 0x249   : > { %v1081_v40 = vsel %vm1080_vm0, %v1079_v38, 0 }
 0x24a   : > { %v1083_v41 = vand.u32 31, %v1081_v40  ;;  %v1082_v43 = vshrl.u32 %v1081_v40, 5 }
 0x24c   : > { %v1084_v42 = vsub.s32 32, %v1083_v41  ;;  %v1086_v44 = vshll.u32 %v1601_v26, %v1083_v41  ;;  %v1089_v45 = vshll.u32 %v1602_v28, %v1083_v41  ;;  %v1092_v48 = vshll.u32 %v1603_v31, %v1083_v41 }
 0x24d   : > { %v1095_v49 = vshll.u32 %v1598_v18, %v1083_v41  ;;  %v1098_v51 = vshll.u32 %v1599_v20, %v1083_v41  ;;  %vm1101_vm1 = vcmp.lt.s32.totalorder %v1082_v43, 1  ;;  %vm1104_vm2 = vcmp.lt.s32.totalorder %v1082_v43, 4 }
 0x24e   : > { %v1087_v46 = vshrl.u32 %v1602_v28, %v1084_v42  ;;  %v1090_v47 = vshrl.u32 %v1603_v31, %v1084_v42  ;;  %v1093_v6 = vshrl.u32 %v1598_v18, %v1084_v42  ;;  %v1096_v50 = vshrl.u32 %v1599_v20, %v1084_v42 }
 0x24f   : > { %v1099_v52 = vshrl.u32 %v1600_v24, %v1084_v42  ;;  %v1085_v62 = vshrl.u32 %v1601_v26, %v1084_v42  ;;  %vm1103_vm3 = vcmp.lt.s32.totalorder %v1082_v43, 3  ;;  %vm1102_vm4 = vcmp.lt.s32.totalorder %v1082_v43, 2 }
 0x250   : > { %v1088_v54 = vor.u32 %v1087_v46, %v1086_v44  ;;  %v1091_v55 = vor.u32 %v1090_v47, %v1089_v45  ;;  %v1094_v56 = vor.u32 %v1093_v6, %v1092_v48  ;;  %v1097_v57 = vor.u32 %v1096_v50, %v1095_v49 }
 0x251   : > { %v1100_v58 = vor.u32 %v1099_v52, %v1098_v51 }
 0x252   : > { %v1106_v59 = vsel %vm1104_vm2, %v1094_v56, 2102212464  ;;  %v1109_v60 = vsel %vm1101_vm1, %v1088_v54, %v1091_v55  ;;  %v1113_v61 = vsel %vm1101_vm1, %v1091_v55, %v1094_v56  ;;  %v1110_v63 = vsel %vm1104_vm2, %v1097_v57, 920167782 }
 0x253   : > { %v1114_v0 = vsel %vm1104_vm2, %v1100_v58, 1326507024  ;;  %v1111_v1 = vsel %vm1103_vm3, %v1094_v56, %v1110_v63  ;;  %v1105_v7 = vsel %vm1101_vm1, %v1085_v62, %v1088_v54  ;;  %v1107_v9 = vsel %vm1103_vm3, %v1091_v55, %v1106_v59  ;;  %v1177_v62 = vpop.permute.xlu0 %1176 }
 0x254   : > { %v1115_v2 = vsel %vm1103_vm3, %v1097_v57, %v1114_v0  ;;  %v1112_v10 = vsel %vm1102_vm4, %v1109_v60, %v1111_v1  ;;  %v1108_v16 = vsel %vm1102_vm4, %v1105_v7, %v1107_v9  ;;  %v1187_v7 = vpop.permute.xlu1 %1186 }
 0x255   : > { %v1116_v11 = vsel %vm1102_vm4, %v1113_v61, %v1115_v2  ;;  %v1823_v14 = vmul.u32.u64.low %v1117_v5, %v1112_v10  ;;  %v1824_v15 = vmul.u32.u64.high %v1117_v5, %v1112_v10, %v1823_v14  ;;  %v1124_v17 = vmul.u32 %v1117_v5, %v1108_v16 }
 0x256   : > { %v1820_v12 = vmul.u32.u64.low %v1117_v5, %v1116_v11  ;;  %v1821_v13 = vmul.u32.u64.high %v1117_v5, %v1116_v11, %v1820_v12  ;;  %v1182_v5 = vld [vmem:[%s1891_s5] sm:$0xff] }
 0x257   : > { %v1127_v3 = vadd.s32 1, %v1824_v15 }
 0x258   : > { %vm1126_vm5 = vc.u32 %v1821_v13, %v1823_v14  ;;  %v1125_v37 = vadd.s32 %v1823_v14, %v1821_v13  ;;  %v1272_v13 = vpop.permute.xlu0 %1271 }
 0x259   : > { %v1128_v19 = vsel %vm1126_vm5, %v1127_v3, %v1824_v15 }
 0x25a   : > { %v1129_v21 = vadd.s32 %v1128_v19, %v1124_v17 }
 0x25c   : > { %v1130_v22 = vadd.s32 536870912, %v1129_v21 }
 0x25e   : > { %v1131_v23 = vshrl.u32 %v1130_v22, 30 }
 0x260   : > { %v1132_v25 = vshll.u32 %v1131_v23, 30  ;;  %v1155_v6 = vsub.s32 4, %v1131_v23 }
 0x262   : > { %v1133_v27 = vsub.s32 %v1129_v21, %v1132_v25  ;;  %v1156_v51 = vsel %vm1071_vm7, %v1155_v6, %v1131_v23 }
 0x263   : > { %v1158_v53 = vsel %vm1070_vm8, 0, %v1156_v51 }
 0x264   : > { %v1135_v29 = vsub.s32 0, %v1133_v27  ;;  %v1162_v54 = vadd.s32 3, %v1158_v53 }
 0x266   : > { %v1471_v30 = vmin.u32 %v1135_v29, %v1133_v27  ;;  %v1163_v55 = vand.u32 3, %v1162_v54 }
 0x268   : > { %v1137_v33 = vclz %v1471_v30  ;;  %vm1168_vm9 = vcmp.eq.s32.totalorder %v1163_v55, 2  ;;  %vm1165_vm10 = vcmp.eq.s32.totalorder %v1163_v55, 0  ;;  %vm1164_vm11 = vcmp.lt.s32.totalorder %v1163_v55, 2 }
 0x26a   : > { %v1472_v35 = vadd.s32 4294967294, %v1137_v33 }
 0x26c   : > { %vm1473_vm6 = vcmp.lt.s32.totalorder %v1472_v35, 0 }
 0x26d   : > { %v1140_v36 = vsel %vm1473_vm6, 0, %v1472_v35 }
 0x26e   : > { %v1141_v38 = vsub.s32 32, %v1140_v36  ;;  %v1145_v40 = vsub.s32 4294967266, %v1140_v36  ;;  %v1142_v41 = vshll.u32 %v1133_v27, %v1140_v36 }
 0x270   : > { %v1143_v8 = vshrl.u32 %v1125_v37, %v1141_v38  ;;  %v1146_v42 = vadd.s32 127, %v1145_v40 }
 0x272   : > { %v1144_v43 = vor.u32 %v1143_v8, %v1142_v41  ;;  %v1147_v44 = vshll.u32 %v1146_v42, 23 }
 0x274   : > { %v1148_v45 = vor.u32 4788187, %v1147_v44  ;;  %v1151_v47 = vcvt.s32.f32 %v1144_v43 }
 0x276   : > { %v1149_v46 = vand.u32 2147483647, %v1148_v45 }
 0x278   : > { %v1152_v48 = vmul.f32 %v1151_v47, %v1149_v46 }
 0x27a   : > { %v1153_v49 = vxor.u32 2147483648, %v1152_v48 }
 0x27c   : > { %v1154_v50 = vsel %vm1071_vm7, %v1153_v49, %v1152_v48 }
 0x27d   : > { %v1157_v52 = vsel %vm1070_vm8, %v1803_v34, %v1154_v50 }
 0x27e   : > { %1579 = vcosq.f32 %v1157_v52 }
 0x27f   : > { %1581 = vsinq.f32 %v1157_v52 }
 0x288   : > { %v1580_v56 = vpop.eup %1579 }
 0x289   : > { %v1582_v57 = vpop.eup %1581  ;;  %v1169_v58 = vxor.u32 2147483648, %v1580_v56 }
 0x28a   : > { %v1166_v59 = vxor.u32 2147483648, %v1582_v57 }
 0x28b   : > { %v1170_v60 = vsel %vm1168_vm9, %v1169_v58, %v1582_v57 }
 0x28c   : > { %v1167_v61 = vsel %vm1165_vm10, %v1580_v56, %v1166_v59  ;;  %vm1391_vm10 = vcmask 261120  }
 0x28d   : > { %v1171_v39 = vsel %vm1164_vm11, %v1167_v61, %v1170_v60 }
 0x28e   : > { %v1172_v63 = vsel %vm1161_vm12, nan, %v1171_v39 }
 0x28f   : > { %v1179_v0 = vmul.f32 %v1177_v62, %v1172_v63 }
 0x291   : > { %v1180_v1 = vmul.f32 %v1179_v0, %v1172_v63 }
 0x293   : > { %v1181_v2 = vadd.f32 %v1180_v1, %v1800_v32 }
 0x295   : > { %1533 = vmatpush3.msra.mxu1 %v1181_v2 }
 0x296   : > { %1535 = vmatmul.mubr.msk.f32.vlgmr.msra.gmra.mrb[6].mxu1 %vm513_vm15, %v1182_v5 }
 0x369   : > { %v1258_v9 = vpop.f32.mrb[6].mxu1 }
 0x36a   : > { %v1259_v10 = vadd.f32 %v1258_v9, %v1187_v7  ;;  %v1536_v11 = vpop.f32.mrb[7].mxu1 }
 0x36c   : > { %1263 = vrot.lane.b32.xlu1 %v1259_v10, %s1610_s12 }
 0x3de   : > { %v1264_v34 = vpop.permute.xlu1 %1263 }
 0x3df   : > { %v1841_v12 = vadd.f32 %v1264_v34, %v1699_v4 }
 0x3e1   : > { %v1844_v32 = vmul.f32 %v1272_v13, %v1841_v12 }
 0x3e3   : > { %v1278_v14 = vand.u32 2139095040, %v1844_v32  ;;  %v1275_v17 = vand.u32 2147483647, %v1844_v32  ;;  %vm1277_vm4 = vcmp.lt.s32.totalorder %v1844_v32, 0  ;;  %vm1367_vm9 = vweird.f32 %v1844_v32 }
 0x3e5   : > { %v1279_v15 = vshrl.u32 %v1278_v14, 23  ;;  %v1282_v22 = vand.u32 8388607, %v1275_v17  ;;  %vm1276_vm5 = vcmp.le.f32.partialorder %v1275_v17, 0.7853982 }
 0x3e7   : > { %v1475_v16 = vadd.s32 4294967169, %v1279_v15  ;;  %v1283_v41 = vor.u32 8388608, %v1282_v22 }
 0x3e9   : > { %v1285_v3 = vadd.s32 1, %v1475_v16 }
 0x3eb   : > { %vm1286_vm13 = vcmp.gt.s32.totalorder %v1285_v3, 0 }
 0x3ec   : > { %v1287_v19 = vsel %vm1286_vm13, %v1285_v3, 0 }
 0x3ed   : > { %v1289_v21 = vand.u32 31, %v1287_v19  ;;  %v1288_v4 = vshrl.u32 %v1287_v19, 5 }
 0x3ef   : > { %v1290_v23 = vsub.s32 32, %v1289_v21  ;;  %v1292_v25 = vshll.u32 %v1601_v26, %v1289_v21  ;;  %v1295_v27 = vshll.u32 %v1602_v28, %v1289_v21  ;;  %v1298_v33 = vshll.u32 %v1603_v31, %v1289_v21 }
 0x3f0   : > { %v1301_v36 = vshll.u32 %v1598_v18, %v1289_v21  ;;  %v1304_v38 = vshll.u32 %v1599_v20, %v1289_v21  ;;  %vm1307_vm14 = vcmp.lt.s32.totalorder %v1288_v4, 1  ;;  %vm1310_vm15 = vcmp.lt.s32.totalorder %v1288_v4, 4 }
 0x3f1   : > { %v1293_v29 = vshrl.u32 %v1602_v28, %v1290_v23  ;;  %v1296_v30 = vshrl.u32 %v1603_v31, %v1290_v23  ;;  %v1299_v35 = vshrl.u32 %v1598_v18, %v1290_v23  ;;  %v1302_v37 = vshrl.u32 %v1599_v20, %v1290_v23 }
 0x3f2   : > { %v1305_v40 = vshrl.u32 %v1600_v24, %v1290_v23  ;;  %v1291_v47 = vshrl.u32 %v1601_v26, %v1290_v23  ;;  %vm1309_vm0 = vcmp.lt.s32.totalorder %v1288_v4, 3  ;;  %vm1308_vm1 = vcmp.lt.s32.totalorder %v1288_v4, 2 }
 0x3f3   : > { %v1294_v8 = vor.u32 %v1293_v29, %v1292_v25  ;;  %v1297_v42 = vor.u32 %v1296_v30, %v1295_v27  ;;  %v1300_v43 = vor.u32 %v1299_v35, %v1298_v33  ;;  %v1303_v44 = vor.u32 %v1302_v37, %v1301_v36 }
 0x3f4   : > { %v1306_v28 = vor.u32 %v1305_v40, %v1304_v38  ;;  %v1323_v24 = vshll.u32 %v1283_v41, 8 }
 0x3f5   : > { %v1312_v45 = vsel %vm1310_vm15, %v1300_v43, 2102212464  ;;  %v1315_v31 = vsel %vm1307_vm14, %v1294_v8, %v1297_v42  ;;  %v1319_v46 = vsel %vm1307_vm14, %v1297_v42, %v1300_v43  ;;  %v1316_v18 = vsel %vm1310_vm15, %v1303_v44, 920167782 }
 0x3f6   : > { %v1320_v48 = vsel %vm1310_vm15, %v1306_v28, 1326507024  ;;  %v1317_v20 = vsel %vm1309_vm0, %v1300_v43, %v1316_v18  ;;  %v1311_v49 = vsel %vm1307_vm14, %v1291_v47, %v1294_v8  ;;  %v1313_v50 = vsel %vm1309_vm0, %v1297_v42, %v1312_v45  ;;  %v1382_v42 = vpop.permute.xlu0 %1381 }
 0x3f7   : > { %v1321_v6 = vsel %vm1309_vm0, %v1303_v44, %v1320_v48  ;;  %v1318_v51 = vsel %vm1308_vm1, %v1315_v31, %v1317_v20  ;;  %v1314_v57 = vsel %vm1308_vm1, %v1311_v49, %v1313_v50 }
 0x3f8   : > { %v1322_v52 = vsel %vm1308_vm1, %v1319_v46, %v1321_v6  ;;  %v1864_v55 = vmul.u32.u64.low %v1323_v24, %v1318_v51  ;;  %v1865_v56 = vmul.u32.u64.high %v1323_v24, %v1318_v51, %v1864_v55  ;;  %v1330_v58 = vmul.u32 %v1323_v24, %v1314_v57 }
 0x3f9   : > { %v1861_v53 = vmul.u32.u64.low %v1323_v24, %v1322_v52  ;;  %v1862_v54 = vmul.u32.u64.high %v1323_v24, %v1322_v52, %v1861_v53 }
 0x3fa   : > { %v1333_v26 = vadd.s32 1, %v1865_v56 }
 0x3fb   : > { %vm1332_vm2 = vc.u32 %v1862_v54, %v1864_v55  ;;  %v1331_v9 = vadd.s32 %v1864_v55, %v1862_v54 }
 0x3fc   : > { %v1334_v59 = vsel %vm1332_vm2, %v1333_v26, %v1865_v56 }
 0x3fd   : > { %v1335_v60 = vadd.s32 %v1334_v59, %v1330_v58 }
 0x3ff   : > { %v1336_v61 = vadd.s32 536870912, %v1335_v60 }
 0x401   : > { %v1337_v39 = vshrl.u32 %v1336_v61, 30 }
 0x403   : > { %v1338_v62 = vshll.u32 %v1337_v39, 30  ;;  %v1361_v23 = vsub.s32 4, %v1337_v39 }
 0x405   : > { %v1339_v63 = vsub.s32 %v1335_v60, %v1338_v62  ;;  %v1362_v27 = vsel %vm1277_vm4, %v1361_v23, %v1337_v39 }
 0x406   : > { %v1364_v30 = vsel %vm1276_vm5, 0, %v1362_v27 }
 0x407   : > { %v1341_v0 = vsub.s32 0, %v1339_v63  ;;  %v1368_v33 = vadd.s32 3, %v1364_v30 }
 0x409   : > { %v1476_v1 = vmin.u32 %v1341_v0, %v1339_v63  ;;  %v1369_v35 = vand.u32 3, %v1368_v33 }
 0x40b   : > { %v1343_v2 = vclz %v1476_v1  ;;  %vm1374_vm6 = vcmp.eq.s32.totalorder %v1369_v35, 2  ;;  %vm1371_vm7 = vcmp.eq.s32.totalorder %v1369_v35, 0  ;;  %vm1370_vm8 = vcmp.lt.s32.totalorder %v1369_v35, 2 }
 0x40d   : > { %v1477_v5 = vadd.s32 4294967294, %v1343_v2 }
 0x40f   : > { %vm1478_vm3 = vcmp.lt.s32.totalorder %v1477_v5, 0 }
 0x410   : > { %v1346_v7 = vsel %vm1478_vm3, 0, %v1477_v5 }
 0x411   : > { %v1347_v10 = vsub.s32 32, %v1346_v7  ;;  %v1351_v11 = vsub.s32 4294967266, %v1346_v7  ;;  %v1348_v34 = vshll.u32 %v1339_v63, %v1346_v7 }
 0x413   : > { %v1349_v13 = vshrl.u32 %v1331_v9, %v1347_v10  ;;  %v1352_v14 = vadd.s32 127, %v1351_v11 }
 0x415   : > { %v1350_v15 = vor.u32 %v1349_v13, %v1348_v34  ;;  %v1353_v16 = vshll.u32 %v1352_v14, 23 }
 0x417   : > { %v1354_v3 = vor.u32 4788187, %v1353_v16  ;;  %v1357_v21 = vcvt.s32.f32 %v1350_v15 }
 0x419   : > { %v1355_v19 = vand.u32 2147483647, %v1354_v3 }
 0x41b   : > { %v1358_v22 = vmul.f32 %v1357_v21, %v1355_v19 }
 0x41d   : > { %v1359_v4 = vxor.u32 2147483648, %v1358_v22 }
 0x41f   : > { %v1360_v25 = vsel %vm1277_vm4, %v1359_v4, %v1358_v22 }
 0x420   : > { %v1363_v29 = vsel %vm1276_vm5, %v1844_v32, %v1360_v25 }
 0x421   : > { %1583 = vcosq.f32 %v1363_v29 }
 0x422   : > { %1585 = vsinq.f32 %v1363_v29 }
 0x42b   : > { %v1584_v36 = vpop.eup %1583 }
 0x42c   : > { %v1586_v37 = vpop.eup %1585  ;;  %v1375_v38 = vxor.u32 2147483648, %v1584_v36 }
 0x42d   : > { %v1372_v40 = vxor.u32 2147483648, %v1586_v37 }
 0x42e   : > { %v1376_v41 = vsel %vm1374_vm6, %v1375_v38, %v1586_v37 }
 0x42f   : > { %v1373_v8 = vsel %vm1371_vm7, %v1584_v36, %v1372_v40 }
 0x430   : > { %v1377_v17 = vsel %vm1370_vm8, %v1373_v8, %v1376_v41 }
 0x431   : > { %v1378_v43 = vsel %vm1367_vm9, nan, %v1377_v17 }
 0x432   : > { %v1384_v44 = vmul.f32 %v1382_v42, %v1378_v43 }
 0x434   : > { %v1385_v28 = vmul.f32 %v1384_v44, %v1378_v43 }
 0x436   : > { %v1386_v45 = vadd.f32 %v1385_v28, %v1841_v12 }
 0x438   : > { %1388 = vrot.lane.b32.xlu1 %v1386_v45, %s1604_s29 }
 0x4aa   : > { %v1389_v31 = vpop.permute.xlu1 %1388 }
 0x4ab   : > { %1392 = vst.msk [vmem:[%s381_s15] sm:$0xff] %vm1391_vm10, %v1389_v31 }
 0x4ac PF: > { %s21_s17 = sadd.s32 1, %s1593_s17  }
 0x4ad   : > { %p18_p4 = scmp.ge.s32.totalorder %s21_s17, 4  }
 0x4af   :  { %20 = sbr.rel (!%p18_p4) target bundleno = 1 (0x1), region = 100 }

// kernel: dac_encoder_forward.19
= control target key start
LH: loop header
LB: loop body
LE: loop exit
PB: predicated region body
PF: predicated region fallthrough
CT: control target
= control target key end

     0   :  { %vm42_vm0 = vcmask 523264   ;;  %v450_v3 = vmov 0   ;;  %v451_v51 = vmov 683565275   ;;  %v452_v55 = vmov 2475754826   ;;  %s613_s2 = inlined_call_operand.vmem [shape: f32[64,128], index: 2, kind: input, shape index: {}]   ;;  %s614_s0 = inlined_call_operand.vmem [shape: f32[16,64], index: 0, kind: input, shape index: {}]   ;;  %s615_s1 = inlined_call_operand.vmem [shape: f32[16,1], index: 1, kind: input, shape index: {}]   ;;  %s616_s3 = inlined_call_operand.vmem [shape: f32[16,1], index: 3, kind: input, shape index: {}]   ;;  %s617_s4 = inlined_call_operand.vmem [shape: f32[16,1], index: 4, kind: input, shape index: {}]   ;;  %s618_s5 = inlined_call_operand.vmem [shape: f32[16,128], index: 5, kind: output, shape index: {}]  }
   0x1   :  { %v22_v0 = vld [vmem:[%s613_s2] sm:$0xff]  ;;  %v23_v1 = vld [vmem:[%s613_s2 + $0x8] sm:$0xff]  ;;  %v24_v2 = vld [vmem:[%s613_s2 + $0x10] sm:$0xff]  ;;  %440 = vset.pattern.permute.xlu0 %v450_v3  ;;  %441 = vset.pattern.permute.xlu1 %v450_v3  ;;  %v453_v57 = vmov 2131351028  }
   0x2   :  { %v409_v4 = vpack.c.bf16 %v23_v1, %v22_v0  ;;  %v25_v5 = vld [vmem:[%s613_s2 + $0x18] sm:$0xff]  ;;  %v26_v7 = vld [vmem:[%s613_s2 + $0x20] sm:$0xff]  ;;  %v27_v8 = vld [vmem:[%s613_s2 + $0x28] sm:$0xff]  ;;  %v454_v59 = vmov 2102212464  }
   0x3   :  { %v413_v6 = vpack.c.bf16 %v25_v5, %v24_v2  ;;  %v20_v9 = vld [vmem:[%s614_s0] sm:$0xff]  ;;  %v417_v12 = vpack.c.bf16 %v27_v8, %v26_v7  ;;  %v31_v13 = vld [vmem:[%s615_s1 + $0x8] sm:$0xff]  ;;  %v28_v14 = vld [vmem:[%s613_s2 + $0x30] sm:$0xff]  ;;  %v455_v61 = vmov 920167782  }
   0x4   :  { %410 = vmatprep.subr.bf16.mxu0 %v409_v4  ;;  %406 = vmatprep.mubr.msk.f32.mxu0 %vm42_vm0, %v20_v9  ;;  %v30_v10 = vld [vmem:[%s615_s1] sm:$0xff]  ;;  %v29_v15 = vld [vmem:[%s613_s2 + $0x38] sm:$0xff]  ;;  %v125_v16 = vld [vmem:[%s616_s3 + $0x8] sm:$0xff] }
   0x5   :  { %v124_v11 = vld [vmem:[%s616_s3] sm:$0xff]  ;;  %412 = vmatpush3.bf16.msra.mxu0 %v409_v4  ;;  %34 = vperm.xlu0 %440, %v30_v10   ;;  %v421_v17 = vpack.c.bf16 %v29_v15, %v28_v14  ;;  %v127_v19 = vld [vmem:[%s617_s4 + $0x8] sm:$0xff]  ;;  %v456_v4 = vmov 1326507024  }
   0x6   :  { %414 = vmatprep.subr.bf16.mxu0 %v413_v6  ;;  %130 = vperm.xlu1 %441, %v124_v11   ;;  %v126_v18 = vld [vmem:[%s617_s4] sm:$0xff]  ;;  %v21_v20 = vld [vmem:[%s614_s0 + $0x8] sm:$0xff] }
   0x9   :  { %416 = vmatpush3.bf16.msra.mxu0 %v413_v6  ;;  %39 = vperm.xlu0 %440, %v31_v13  }
   0xa   :  { %418 = vmatprep.subr.bf16.mxu0 %v417_v12  ;;  %135 = vperm.xlu1 %441, %v125_v16  }
   0xd   :  { %420 = vmatpush3.bf16.msra.mxu0 %v417_v12  ;;  %350 = vperm.xlu0 %440, %v126_v18  }
   0xe   :  { %422 = vmatprep.subr.bf16.mxu0 %v421_v17  ;;  %355 = vperm.xlu1 %441, %v127_v19  }
  0x11   :  { %424 = vmatpush3.bf16.msra.mxu0 %v421_v17 }
  0x14   :  { %407 = vmatmul.mubr.msk.f32.vlgmr.msra.gmra.mrb[0].mxu0 %vm42_vm0, %v21_v20 }
  0x84   :  { %v35_v21 = vpop.permute.xlu0 %34 }
  0x85   :  { %v131_v22 = vpop.permute.xlu1 %130 }
  0x88   :  { %v40_v23 = vpop.permute.xlu0 %39 }
  0x89   :  { %v136_v27 = vpop.permute.xlu1 %135 }
  0xe7   :  { %v408_v24 = vpop.f32.mrb[0].mxu0 }
  0xe8   :  { %v537_v25 = vadd.f32 %v408_v24, %v40_v23  ;;  %v115_v26 = vpop.f32.mrb[1].mxu0 }
  0xe9   :  { %v539_v28 = vadd.f32 %v115_v26, %v35_v21 }
  0xea   :  { %v542_v29 = vmul.f32 %v136_v27, %v537_v25 }
  0xeb   :  { %v545_v30 = vmul.f32 %v131_v22, %v539_v28 }
  0xec   :  { %v244_v31 = vand.u32 2147483647, %v542_v29  ;;  %v247_v32 = vand.u32 2139095040, %v542_v29  ;;  %vm246_vm15 = vcmp.lt.s32.totalorder %v542_v29, 0 }
  0xed   :  { %v143_v33 = vand.u32 2139095040, %v545_v30  ;;  %v140_v36 = vand.u32 2147483647, %v545_v30 }
  0xee   :  { %v248_v34 = vshrl.u32 %v247_v32, 23  ;;  %v251_v35 = vand.u32 8388607, %v244_v31  ;;  %vm245_vm0 = vcmp.le.f32.partialorder %v244_v31, 0.7853982 }
  0xef   :  { %v144_v37 = vshrl.u32 %v143_v33, 23  ;;  %v555_v42 = vand.u32 8388607, %v140_v36 }
  0xf0   :  { %v376_v38 = vadd.s32 4294967169, %v248_v34  ;;  %v252_v41 = vor.u32 8388608, %v251_v35 }
  0xf1   :  { %v372_v39 = vadd.s32 4294967169, %v144_v37  ;;  %v148_v49 = vor.u32 8388608, %v555_v42 }
  0xf2   :  { %v254_v40 = vadd.s32 1, %v376_v38  ;;  %v557_v48 = vshll.u32 %v252_v41, 8 }
  0xf3   :  { %v150_v43 = vadd.s32 1, %v372_v39 }
  0xf4   :  { %vm255_vm1 = vcmp.gt.s32.totalorder %v254_v40, 0 }
  0xf5   :  { %v256_v44 = vsel %vm255_vm1, %v254_v40, 0  ;;  %vm151_vm2 = vcmp.gt.s32.totalorder %v150_v43, 0  ;;  %vm142_vm1 = vcmp.lt.s32.totalorder %v545_v30, 0 }
  0xf6   :  { %v257_v45 = vshrl.u32 %v256_v44, 5  ;;  %v258_v46 = vand.u32 31, %v256_v44  ;;  %v152_v47 = vsel %vm151_vm2, %v150_v43, 0  ;;  %vm141_vm2 = vcmp.le.f32.partialorder %v140_v36, 0.7853982 }
  0xf7   :  { %v560_v53 = vshrl.u32 %v152_v47, 5  ;;  %v154_v54 = vand.u32 31, %v152_v47 }
  0xf8   :  { %v259_v50 = vsub.s32 32, %v258_v46  ;;  %v261_v52 = vshll.u32 %v451_v51, %v258_v46  ;;  %v264_v56 = vshll.u32 %v452_v55, %v258_v46  ;;  %v267_v58 = vshll.u32 %v453_v57, %v258_v46 }
  0xf9   :  { %v270_v60 = vshll.u32 %v454_v59, %v258_v46  ;;  %v273_v62 = vshll.u32 %v455_v61, %v258_v46  ;;  %vm276_vm3 = vcmp.lt.s32.totalorder %v257_v45, 1  ;;  %vm277_vm4 = vcmp.lt.s32.totalorder %v257_v45, 2 }
  0xfa   :  { %v262_v63 = vshrl.u32 %v452_v55, %v259_v50  ;;  %v265_v0 = vshrl.u32 %v453_v57, %v259_v50  ;;  %v268_v1 = vshrl.u32 %v454_v59, %v259_v50  ;;  %v260_v2 = vshrl.u32 %v451_v51, %v259_v50 }
  0xfb   :  { %v271_v3 = vshrl.u32 %v455_v61, %v259_v50  ;;  %v274_v5 = vshrl.u32 %v456_v4, %v259_v50  ;;  %v155_v9 = vsub.s32 32, %v154_v54  ;;  %vm278_vm5 = vcmp.lt.s32.totalorder %v257_v45, 3 }
  0xfc   :  { %v263_v6 = vor.u32 %v262_v63, %v261_v52  ;;  %v266_v7 = vor.u32 %v265_v0, %v264_v56  ;;  %v269_v8 = vor.u32 %v268_v1, %v267_v58  ;;  %vm279_vm6 = vcmp.lt.s32.totalorder %v257_v45, 4 }
  0xfd   :  { %v272_v10 = vor.u32 %v271_v3, %v270_v60  ;;  %v275_v11 = vor.u32 %v274_v5, %v273_v62  ;;  %v157_v19 = vshll.u32 %v451_v51, %v154_v54  ;;  %v158_v22 = vshrl.u32 %v452_v55, %v155_v9 }
  0xfe   :  { %v280_v12 = vsel %vm276_vm3, %v260_v2, %v263_v6  ;;  %v281_v13 = vsel %vm279_vm6, %v269_v8, 2102212464  ;;  %v284_v14 = vsel %vm276_vm3, %v263_v6, %v266_v7  ;;  %v288_v15 = vsel %vm276_vm3, %v266_v7, %v269_v8 }
  0xff   :  { %v282_v16 = vsel %vm278_vm5, %v266_v7, %v281_v13  ;;  %v285_v17 = vsel %vm279_vm6, %v272_v10, 920167782  ;;  %v289_v18 = vsel %vm279_vm6, %v275_v11, 1326507024  ;;  %v160_v23 = vshll.u32 %v452_v55, %v154_v54 }
 0x100   :  { %v286_v20 = vsel %vm278_vm5, %v269_v8, %v285_v17  ;;  %v290_v21 = vsel %vm278_vm5, %v272_v10, %v289_v18  ;;  %v283_v24 = vsel %vm277_vm4, %v280_v12, %v282_v16  ;;  %v161_v32 = vshrl.u32 %v453_v57, %v155_v9 }
 0x101   :  { %v287_v26 = vsel %vm277_vm4, %v284_v14, %v286_v20  ;;  %v291_v27 = vsel %vm277_vm4, %v288_v15, %v290_v21  ;;  %v159_v38 = vor.u32 %v158_v22, %v157_v19  ;;  %v163_v40 = vshll.u32 %v453_v57, %v154_v54 }
 0x102   :  { %v569_v33 = vmul.u32.u64.low %v557_v48, %v291_v27  ;;  %v570_v34 = vmul.u32.u64.high %v557_v48, %v291_v27, %v569_v33  ;;  %v573_v35 = vmul.u32.u64.low %v557_v48, %v287_v26  ;;  %v574_v37 = vmul.u32.u64.high %v557_v48, %v287_v26, %v573_v35 }
 0x103   :  { %v162_v39 = vor.u32 %v161_v32, %v160_v23  ;;  %v164_v41 = vshrl.u32 %v454_v59, %v155_v9  ;;  %v166_v42 = vshll.u32 %v454_v59, %v154_v54  ;;  %v167_v43 = vshrl.u32 %v455_v61, %v155_v9 }
 0x104   :  { %v170_v44 = vshrl.u32 %v456_v4, %v155_v9  ;;  %v188_v46 = vshll.u32 %v148_v49, 8  ;;  %v299_v45 = vmul.u32 %v557_v48, %v283_v24  ;;  %v156_v47 = vshrl.u32 %v451_v51, %v155_v9 }
 0x105   :  { %v165_v50 = vor.u32 %v164_v41, %v163_v40  ;;  %v169_v52 = vshll.u32 %v455_v61, %v154_v54  ;;  %vm301_vm7 = vc.u32 %v570_v34, %v573_v35  ;;  %v302_v55 = vadd.s32 1, %v574_v37 }
 0x106   :  { %v168_v56 = vor.u32 %v167_v43, %v166_v42  ;;  %vm172_vm8 = vcmp.lt.s32.totalorder %v560_v53, 1  ;;  %vm174_vm9 = vcmp.lt.s32.totalorder %v560_v53, 3  ;;  %vm175_vm10 = vcmp.lt.s32.totalorder %v560_v53, 4 }
 0x107   :  { %v171_v58 = vor.u32 %v170_v44, %v169_v52  ;;  %v180_v57 = vsel %vm172_vm8, %v159_v38, %v162_v39  ;;  %v303_v49 = vsel %vm301_vm7, %v302_v55, %v574_v37  ;;  %v177_v59 = vsel %vm175_vm10, %v165_v50, 2102212464 }
 0x108   :  { %v181_v48 = vsel %vm175_vm10, %v168_v56, 920167782  ;;  %v184_v51 = vsel %vm172_vm8, %v162_v39, %v165_v50  ;;  %v304_v60 = vadd.s32 %v303_v49, %v299_v45  ;;  %vm173_vm11 = vcmp.lt.s32.totalorder %v560_v53, 2 }
 0x109   :  { %v182_v54 = vsel %vm174_vm9, %v165_v50, %v181_v48  ;;  %v185_v61 = vsel %vm175_vm10, %v171_v58, 1326507024  ;;  %v176_v62 = vsel %vm172_vm8, %v156_v47, %v159_v38  ;;  %v178_v63 = vsel %vm174_vm9, %v162_v39, %v177_v59 }
 0x10a   :  { %v183_v0 = vsel %vm173_vm11, %v180_v57, %v182_v54  ;;  %v186_v1 = vsel %vm174_vm9, %v168_v56, %v185_v61  ;;  %v305_v2 = vadd.s32 536870912, %v304_v60  ;;  %v179_v9 = vsel %vm173_vm11, %v176_v62, %v178_v63 }
 0x10b   :  { %v187_v3 = vsel %vm173_vm11, %v184_v51, %v186_v1  ;;  %v584_v4 = vmul.u32.u64.low %v188_v46, %v183_v0  ;;  %v585_v5 = vmul.u32.u64.high %v188_v46, %v183_v0, %v584_v4  ;;  %v195_v53 = vmul.u32 %v188_v46, %v179_v9 }
 0x10c   :  { %v587_v6 = vmul.u32.u64.low %v188_v46, %v187_v3  ;;  %v588_v7 = vmul.u32.u64.high %v188_v46, %v187_v3, %v587_v6  ;;  %v306_v8 = vshrl.u32 %v305_v2, 30  ;;  %v300_v26 = vadd.s32 %v573_v35, %v570_v34 }
 0x10d   :  { %v198_v11 = vadd.s32 1, %v585_v5  ;;  %vm336_vm6 = vweird.f32 %v542_v29  ;;  %vm232_vm10 = vweird.f32 %v545_v30 }
 0x10e   :  { %v307_v10 = vshll.u32 %v306_v8, 30  ;;  %vm197_vm12 = vc.u32 %v588_v7, %v584_v4  ;;  %v196_v50 = vadd.s32 %v584_v4, %v588_v7  ;;  %v330_v35 = vsub.s32 4, %v306_v8 }
 0x10f   :  { %v199_v13 = vsel %vm197_vm12, %v198_v11, %v585_v5 }
 0x110   :  { %v308_v12 = vsub.s32 %v304_v60, %v307_v10  ;;  %v200_v14 = vadd.s32 %v199_v13, %v195_v53  ;;  %v331_v60 = vsel %vm246_vm15, %v330_v35, %v306_v8 }
 0x111   :  { %v333_v62 = vsel %vm245_vm0, 0, %v331_v60 }
 0x112   :  { %v310_v15 = vsub.s32 0, %v308_v12  ;;  %v201_v16 = vadd.s32 536870912, %v200_v14  ;;  %v337_v3 = vadd.s32 3, %v333_v62 }
 0x114   :  { %v377_v17 = vmin.u32 %v310_v15, %v308_v12  ;;  %v202_v18 = vshrl.u32 %v201_v16, 30  ;;  %v338_v6 = vand.u32 3, %v337_v3  ;;  %v356_v15 = vpop.permute.xlu1 %355 }
 0x116   :  { %v312_v19 = vclz %v377_v17  ;;  %v203_v20 = vshll.u32 %v202_v18, 30  ;;  %v226_v2 = vsub.s32 4, %v202_v18  ;;  %vm343_vm3 = vcmp.eq.s32.totalorder %v338_v6, 2 }
 0x117   :  { %vm340_vm4 = vcmp.eq.s32.totalorder %v338_v6, 0  ;;  %vm339_vm5 = vcmp.lt.s32.totalorder %v338_v6, 2 }
 0x118   :  { %v378_v21 = vadd.s32 4294967294, %v312_v19  ;;  %v204_v22 = vsub.s32 %v200_v14, %v203_v20  ;;  %v227_v5 = vsel %vm142_vm1, %v226_v2, %v202_v18 }
 0x119   :  { %v229_v9 = vsel %vm141_vm2, 0, %v227_v5 }
 0x11a   :  { %vm379_vm13 = vcmp.lt.s32.totalorder %v378_v21, 0  ;;  %v206_v24 = vsub.s32 0, %v204_v22  ;;  %v233_v13 = vadd.s32 3, %v229_v9 }
 0x11b   :  { %v315_v23 = vsel %vm379_vm13, 0, %v378_v21 }
 0x11c   :  { %v316_v27 = vsub.s32 32, %v315_v23  ;;  %v320_v32 = vsub.s32 4294967266, %v315_v23  ;;  %v373_v33 = vmin.u32 %v206_v24, %v204_v22  ;;  %v317_v37 = vshll.u32 %v308_v12, %v315_v23 }
 0x11d   :  { %v234_v18 = vand.u32 3, %v233_v13 }
 0x11e   :  { %v318_v38 = vshrl.u32 %v300_v26, %v316_v27  ;;  %v321_v39 = vadd.s32 127, %v320_v32  ;;  %v208_v40 = vclz %v373_v33  ;;  %v351_v32 = vpop.permute.xlu0 %350 }
 0x11f   :  { %vm239_vm7 = vcmp.eq.s32.totalorder %v234_v18, 2  ;;  %vm236_vm8 = vcmp.eq.s32.totalorder %v234_v18, 0  ;;  %vm235_vm9 = vcmp.lt.s32.totalorder %v234_v18, 2 }
 0x120   :  { %v319_v41 = vor.u32 %v318_v38, %v317_v37  ;;  %v322_v42 = vshll.u32 %v321_v39, 23  ;;  %v374_v43 = vadd.s32 4294967294, %v208_v40 }
 0x122   :  { %v323_v44 = vor.u32 4788187, %v322_v42  ;;  %vm375_vm14 = vcmp.lt.s32.totalorder %v374_v43, 0  ;;  %v326_v45 = vcvt.s32.f32 %v319_v41 }
 0x123   :  { %v211_v47 = vsel %vm375_vm14, 0, %v374_v43 }
 0x124   :  { %v324_v46 = vand.u32 2147483647, %v323_v44  ;;  %v212_v52 = vsub.s32 32, %v211_v47  ;;  %v216_v55 = vsub.s32 4294967266, %v211_v47  ;;  %v213_v56 = vshll.u32 %v204_v22, %v211_v47 }
 0x126   :  { %v327_v34 = vmul.f32 %v326_v45, %v324_v46  ;;  %v214_v58 = vshrl.u32 %v196_v50, %v212_v52  ;;  %v217_v57 = vadd.s32 127, %v216_v55 }
 0x128   :  { %v328_v49 = vxor.u32 2147483648, %v327_v34  ;;  %v215_v59 = vor.u32 %v214_v58, %v213_v56  ;;  %v218_v48 = vshll.u32 %v217_v57, 23 }
 0x12a   :  { %v329_v51 = vsel %vm246_vm15, %v328_v49, %v327_v34  ;;  %v219_v61 = vor.u32 4788187, %v218_v48  ;;  %v222_v0 = vcvt.s32.f32 %v215_v59 }
 0x12b   :  { %v332_v54 = vsel %vm245_vm0, %v542_v29, %v329_v51 }
 0x12c   :  { %442 = vcosq.f32 %v332_v54  ;;  %v220_v63 = vand.u32 2147483647, %v219_v61 }
 0x12d   :  { %444 = vsinq.f32 %v332_v54 }
 0x12e   :  { %v223_v1 = vmul.f32 %v222_v0, %v220_v63 }
 0x130   :  { %v224_v4 = vxor.u32 2147483648, %v223_v1 }
 0x132   :  { %v225_v31 = vsel %vm142_vm1, %v224_v4, %v223_v1 }
 0x133   :  { %v228_v7 = vsel %vm141_vm2, %v545_v30, %v225_v31 }
 0x134   :  { %446 = vcosq.f32 %v228_v7 }
 0x135   :  { %448 = vsinq.f32 %v228_v7 }
 0x136   :  { %v443_v8 = vpop.eup %442 }
 0x137   :  { %v445_v10 = vpop.eup %444  ;;  %v344_v11 = vxor.u32 2147483648, %v443_v8 }
 0x138   :  { %v341_v53 = vxor.u32 2147483648, %v445_v10 }
 0x139   :  { %v345_v12 = vsel %vm343_vm3, %v344_v11, %v445_v10 }
 0x13a   :  { %v342_v14 = vsel %vm340_vm4, %v443_v8, %v341_v53 }
 0x13b   :  { %v346_v36 = vsel %vm339_vm5, %v342_v14, %v345_v12 }
 0x13c   :  { %v347_v16 = vsel %vm336_vm6, nan, %v346_v36 }
 0x13d   :  { %v359_v17 = vmul.f32 %v356_v15, %v347_v16 }
 0x13e   :  { %v447_v19 = vpop.eup %446 }
 0x13f   :  { %v361_v20 = vmul.f32 %v359_v17, %v347_v16  ;;  %v449_v21 = vpop.eup %448  ;;  %v240_v22 = vxor.u32 2147483648, %v447_v19 }
 0x140   :  { %v237_v24 = vxor.u32 2147483648, %v449_v21 }
 0x141   :  { %v363_v23 = vadd.f32 %v361_v20, %v537_v25  ;;  %v241_v26 = vsel %vm239_vm7, %v240_v22, %v449_v21 }
 0x142   :  { %v238_v29 = vsel %vm236_vm8, %v447_v19, %v237_v24 }
 0x143   :  { %365 = vst [vmem:[%s618_s5 + $0x8] sm:$0xff] %v363_v23  ;;  %v242_v27 = vsel %vm235_vm9, %v238_v29, %v241_v26 }
 0x144   :  { %v243_v33 = vsel %vm232_vm10, nan, %v242_v27 }
 0x145   :  { %v358_v37 = vmul.f32 %v351_v32, %v243_v33 }
 0x147   :  { %v360_v38 = vmul.f32 %v358_v37, %v243_v33 }
 0x149   :  { %v362_v39 = vadd.f32 %v360_v38, %v539_v28 }
 0x14b   :  { %364 = vst [vmem:[%s618_s5] sm:$0xff] %v362_v39 }

// kernel: dac_encoder_forward.20
= control target key start
LH: loop header
LB: loop body
LE: loop exit
PB: predicated region body
PF: predicated region fallthrough
CT: control target
= control target key end

     0   :  { %s639_s12 = smov 0   ;;  %s693_s0 = inlined_call_operand.vmem [shape: f32[2,16,10], index: 0, kind: input, shape index: {}]   ;;  %s694_s1 = inlined_call_operand.vmem [shape: f32[3,16,16], index: 1, kind: input, shape index: {}]   ;;  %s695_s2 = inlined_call_operand.vmem [shape: f32[16,1], index: 2, kind: input, shape index: {}]   ;;  %s696_s3 = inlined_call_operand.vmem [shape: f32[2,16,8], index: 3, kind: output, shape index: {}]  }
   0x1 LB: > { %s513_s13 = sadd.s32 4294967295, %s614_s12   ;;  %p517_p0 = scmp.ge.s32.totalorder %s614_s12, 1  ;;  %s614_s12 = sphi %s639_s12, %s13_s12  }
   0x2   : > { %p137_p1 = scmp.lt.s32.totalorder %s614_s12, 3 }
   0x4   : > { %p138_p2 = pnand %p517_p0, %p137_p1 }
   0x5   : > { %p161_p3 = scmp.lt.s32.totalorder (!%p138_p2), %s513_s13, 1  ;;  %v173_v0 = vld [vmem:[%s694_s1] sm:$0xff] (!%p138_p2)  ;;  %vm186_vm0 = vcmask (!%p138_p2), 130048   ;;  %v522_v1 = vld [vmem:[%s694_s1 + $0x10] sm:$0xff] (!%p138_p2)  ;;  %s616_s24 = smov (!%p138_p2), 127   ;;  %v174_v7 = vld [vmem:[%s694_s1 + $0x8] sm:$0xff] (!%p138_p2) }
   0x6   : > { %141 = sbr.rel (%p138_p2) target bundleno = 364 (0x16c), region = 32  ;;  %559 = vmatprep.mubr.msk.f32.mxu0 (!%p138_p2), %vm186_vm0, %v173_v0  ;;  %552 = vmatprep.mubr.msk.f32.mxu1 (!%p138_p2), %vm186_vm0, %v522_v1  ;;  %v441_v6 = vld [vmem:[%s695_s2] sm:$0xff] (!%p138_p2)  ;;  %v617_v8 = vmov (!%p138_p2), 0   ;;  %v442_v10 = vld [vmem:[%s695_s2 + $0x8] sm:$0xff] (!%p138_p2)  ;;  %s618_s4 = smov (!%p138_p2), 126   ;;  %v523_v18 = vld [vmem:[%s694_s1 + $0x18] sm:$0xff] (!%p138_p2) }
   0x7   : > { %606 = vset.pattern.permute.xlu1 (!%p138_p2), %v617_v8  ;;  %v528_v9 = vld [vmem:[%s694_s1 + $0x20] sm:$0xff] (!%p138_p2)  ;;  %607 = vset.pattern.permute.xlu0 (!%p138_p2), %v617_v8  ;;  %v529_v20 = vld [vmem:[%s694_s1 + $0x28] sm:$0xff] (!%p138_p2)  ;;  %vm455_vm1 = vcmask (!%p138_p2), 64512  }
   0x8   : > { %445 = vperm.xlu1 (!%p138_p2), %606, %v441_v6  }
   0xc   : > { %450 = vperm.xlu1 (!%p138_p2), %606, %v442_v10  }
   0xd   : > { %s698_s13 = smov (!%p161_p3, %s513_s13), 1 }
   0xe   : > { %s534_s16 = sshll.u32 %s698_s13, 4 }
   0xf   : > { %s165_s19 = scalar_lea.vmem %s693_s0, %s534_s16  ;;  %s170_s11 = scalar_lea.vmem %s696_s3, %s534_s16 }
  0x10   : > { %v171_v2 = vld [vmem:[%s165_s19] sm:$0xff]  ;;  %v172_v3 = vld [vmem:[%s165_s19 + $0x8] sm:$0xff] }
  0x11   : > { %v596_v4 = vpack.i.bf16 %v172_v3, %v171_v2  ;;  %v573_v5 = vpack.c.bf16 %v172_v3, %v171_v2 }
  0x13   : > { %597 = vrot.lane.b32.xlu0 %v596_v4, %s616_s24  ;;  %574 = vmatprep.subr.bf16.mxu0 %v573_v5 }
  0x14   : > { %576 = vmatpush3.bf16.msra.mxu0 %v573_v5 }
  0x17   : > { %602 = vrot.lane.b32.xlu0 %v596_v4, %s618_s4  ;;  %560 = vmatmul.mubr.msk.f32.vlgmr.msra.gmra.mrb[0].mxu0 %vm186_vm0, %v174_v7 }
  0x18   : > { %566 = vmatprep.mubr.msk.f32.mxu0 %vm186_vm0, %v528_v9 }
  0x85   : > { %v598_v11 = vpop.permute.xlu0 %597 }
  0x86   : > { %v600_v12 = vunpack.i.h.bf16 %v598_v11  ;;  %v599_v13 = vunpack.i.l.bf16 %v598_v11 }
  0x87   : > { %v446_v21 = vpop.permute.xlu1 %445 }
  0x88   : > { %v569_v14 = vpack.c.bf16 %v600_v12, %v599_v13 }
  0x89   : > { %v603_v15 = vpop.permute.xlu0 %602 }
  0x8a   : > { %v605_v16 = vunpack.i.h.bf16 %v603_v15  ;;  %v604_v17 = vunpack.i.l.bf16 %v603_v15  ;;  %570 = vmatprep.subr.bf16.mxu1 %v569_v14 }
  0x8b   : > { %572 = vmatpush3.bf16.msra.mxu1 %v569_v14  ;;  %v451_v28 = vpop.permute.xlu1 %450 }
  0x8c   : > { %v577_v19 = vpack.c.bf16 %v605_v16, %v604_v17 }
  0x8e   : > { %578 = vmatprep.subr.bf16.mxu0 %v577_v19  ;;  %553 = vmatmul.mubr.msk.f32.vlgmr.msra.gmra.mrb[0].mxu1 %vm186_vm0, %v523_v18 }
  0x8f   : > { %580 = vmatpush3.bf16.msra.mxu0 %v577_v19 }
  0x92   : > { %567 = vmatmul.mubr.msk.f32.vlgmr.msra.gmra.mrb[0].mxu0 %vm186_vm0, %v529_v20 }
 0x161   : > { %v554_v22 = vpop.f32.mrb[0].mxu1 }
 0x162   : > { %v259_v23 = vpop.f32.mrb[1].mxu1 }
 0x165   : > { %v568_v24 = vpop.f32.mrb[0].mxu0 }
 0x166   : > { %v581_v25 = vadd.f32 %v568_v24, %v554_v22  ;;  %v430_v26 = vpop.f32.mrb[1].mxu0 }
 0x167   : > { %v582_v27 = vadd.f32 %v430_v26, %v259_v23 }
 0x168   : > { %v454_v29 = vadd.f32 %v581_v25, %v451_v28 }
 0x169   : > { %v453_v30 = vadd.f32 %v582_v27, %v446_v21 }
 0x16a   : > { %457 = vst.msk [vmem:[%s170_s11 + $0x8] sm:$0xff] %vm455_vm1, %v454_v29 }
 0x16b   : > { %456 = vst.msk [vmem:[%s170_s11] sm:$0xff] %vm455_vm1, %v453_v30 }
 0x16c PF: > { %s13_s12 = sadd.s32 1, %s614_s12  }
 0x16d   : > { %p10_p4 = scmp.ge.s32.totalorder %s13_s12, 4  }
 0x16f   :  { %12 = sbr.rel (!%p10_p4) target bundleno = 1 (0x1), region = 64 }

// kernel: dac_encoder_forward.21
= control target key start
LH: loop header
LB: loop body
LE: loop exit
PB: predicated region body
PF: predicated region fallthrough
CT: control target
= control target key end

     0   :  { %v4650_v0 = vmov 0   ;;  %v4651_v2 = vmov 0.0|0.0   ;;  %vm4652_vm0 = vmmov 0   ;;  %v4653_v6 = vmov 0.0   ;;  %s5514_s2 = inlined_call_operand.vmem [shape: f32[72,1], index: 2, kind: input, shape index: {}]   ;;  %s5515_s0 = inlined_call_operand.vmem [shape: f32[16,128], index: 0, kind: input, shape index: {}]   ;;  %s5516_s1 = inlined_call_operand.vmem [shape: f32[72,16], index: 1, kind: input, shape index: {}]   ;;  %s5517_s5 = inlined_call_operand.vmem [shape: f32[288,8], index: 5, kind: input, shape index: {}]   ;;  %s5518_s4 = inlined_call_operand.vmem [shape: f32[144,1], index: 4, kind: input, shape index: {}]   ;;  %s5519_s6 = inlined_call_operand.vmem [shape: f32[288,8], index: 6, kind: input, shape index: {}]   ;;  %s5520_s8 = inlined_call_operand.vmem [shape: f32[72,128], index: 8, kind: output, shape index: {1}]   ;;  %s5521_s3 = inlined_call_operand.vmem [shape: f32[144,8], index: 3, kind: input, shape index: {}]   ;;  %s5522_s7 = inlined_call_operand.vmem [shape: s32[9,128], index: 7, kind: output, shape index: {0}]   ;;  %s5523_s9 = inlined_call_operand.vmem [shape: f32[16,128], index: 9, kind: output, shape index: {2}]  }
   0x1   :  { %4648 = vset.pattern.permute.xlu0 %v4650_v0  ;;  %v40_v1 = vld [vmem:[%s5514_s2] sm:$0xff]  ;;  %4562 = vmatprep.subr.bf16.mxu0 %v4651_v2  ;;  %v4717_v4 = vld [vmem:[%s5515_s0 + $0x8] sm:$0xff]  ;;  %vm167_vm1 = vcmask 130048   ;;  %v87_v10 = vld [vmem:[%s5517_s5 + $0x10] sm:$0xff]  ;;  %vm241_vm2 = vcmask 64512   ;;  %v157_v63 = vlaneseq }
   0x2   :  { %v4712_v3 = vld [vmem:[%s5515_s0] sm:$0xff]  ;;  %164 = vperm.xlu0 %4648, %v40_v1   ;;  %4287 = vmatprep.mubr.msk.f32.mxu0 %vm4652_vm0, %v4653_v6  ;;  %v86_v9 = vld [vmem:[%s5517_s5 + $0x8] sm:$0xff]  ;;  %v88_v11 = vld [vmem:[%s5517_s5 + $0x18] sm:$0xff] }
   0x3   :  { %v4563_v5 = vpack.c.bf16 %v4717_v4, %v4712_v3  ;;  %4649 = vset.pattern.permute.xlu1 %v4650_v0  ;;  %v31_v7 = vld [vmem:[%s5516_s1] sm:$0xff]  ;;  %v69_v12 = vld [vmem:[%s5518_s4 + $0x10] sm:$0xff]  ;;  %v94_v16 = vld [vmem:[%s5517_s5 + $0x48] sm:$0xff] }
   0x4   :  { %v85_v8 = vld [vmem:[%s5517_s5] sm:$0xff]  ;;  %v42_v13 = vld [vmem:[%s5514_s2 + $0x10] sm:$0xff]  ;;  %v96_v18 = vld [vmem:[%s5517_s5 + $0x58] sm:$0xff] }
   0x5   :  { %4564 = vmatpush3.bf16.msra.mxu0 %v4563_v5  ;;  %v121_v14 = vld [vmem:[%s5519_s6] sm:$0xff]  ;;  %v95_v17 = vld [vmem:[%s5517_s5 + $0x50] sm:$0xff]  ;;  %v102_v22 = vld [vmem:[%s5517_s5 + $0x88] sm:$0xff]  ;;  %v4866_v5 = vshrl.u32 %v157_v63, 7 }
   0x6   :  { %4292 = vmatprep.mubr.msk.f32.mxu1 %vm241_vm2, %v121_v14  ;;  %v93_v15 = vld [vmem:[%s5517_s5 + $0x40] sm:$0xff]  ;;  %v73_v19 = vld [vmem:[%s5518_s4 + $0x30] sm:$0xff]  ;;  %v104_v24 = vld [vmem:[%s5517_s5 + $0x98] sm:$0xff] }
   0x7   :  { %v44_v20 = vld [vmem:[%s5514_s2 + $0x20] sm:$0xff]  ;;  %v103_v23 = vld [vmem:[%s5517_s5 + $0x90] sm:$0xff]  ;;  %v122_v29 = vld [vmem:[%s5519_s6 + $0x8] sm:$0xff] }
   0x8   :  { %4288 = vmatmul.mubr.msk.f32.vlgmr.msra.gmra.mrb[0].mxu0 %vm167_vm1, %v31_v7  ;;  %v101_v21 = vld [vmem:[%s5517_s5 + $0x80] sm:$0xff]  ;;  %v123_v30 = vld [vmem:[%s5519_s6 + $0x10] sm:$0xff]  ;;  %v124_v31 = vld [vmem:[%s5519_s6 + $0x18] sm:$0xff] }
   0x9   :  { %v77_v32 = vld [vmem:[%s5518_s4 + $0x50] sm:$0xff]  ;;  %v67_v34 = vld [vmem:[%s5518_s4] sm:$0xff]  ;;  %v68_v35 = vld [vmem:[%s5518_s4 + $0x8] sm:$0xff] }
   0xa   :  { %v46_v33 = vld [vmem:[%s5514_s2 + $0x30] sm:$0xff]  ;;  %495 = vperm.xlu1 %4649, %v67_v34   ;;  %v41_v36 = vld [vmem:[%s5514_s2 + $0x8] sm:$0xff]  ;;  %v109_v37 = vld [vmem:[%s5517_s5 + $0xc0] sm:$0xff] }
   0xb   :  { %v110_v38 = vld [vmem:[%s5517_s5 + $0xc8] sm:$0xff]  ;;  %v111_v39 = vld [vmem:[%s5517_s5 + $0xd0] sm:$0xff]  ;;  %v112_v40 = vld [vmem:[%s5517_s5 + $0xd8] sm:$0xff] }
   0xc   :  { %v89_v41 = vld [vmem:[%s5517_s5 + $0x20] sm:$0xff]  ;;  %v90_v42 = vld [vmem:[%s5517_s5 + $0x28] sm:$0xff]  ;;  %v91_v43 = vld [vmem:[%s5517_s5 + $0x30] sm:$0xff] }
   0xd   :  { %v92_v44 = vld [vmem:[%s5517_s5 + $0x38] sm:$0xff]  ;;  %v81_v45 = vld [vmem:[%s5518_s4 + $0x70] sm:$0xff]  ;;  %v71_v48 = vld [vmem:[%s5518_s4 + $0x20] sm:$0xff] }
   0xe   :  { %500 = vperm.xlu1 %4649, %v68_v35   ;;  %v82_v46 = vld [vmem:[%s5518_s4 + $0x78] sm:$0xff]  ;;  %v72_v49 = vld [vmem:[%s5518_s4 + $0x28] sm:$0xff]  ;;  %v97_v51 = vld [vmem:[%s5517_s5 + $0x60] sm:$0xff] }
   0xf   :  { %v70_v47 = vld [vmem:[%s5518_s4 + $0x18] sm:$0xff]  ;;  %v98_v52 = vld [vmem:[%s5517_s5 + $0x68] sm:$0xff]  ;;  %v99_v53 = vld [vmem:[%s5517_s5 + $0x70] sm:$0xff] }
  0x10   :  { %v43_v50 = vld [vmem:[%s5514_s2 + $0x18] sm:$0xff]  ;;  %v107_v34 = vld [vmem:[%s5517_s5 + $0xb0] sm:$0xff] }
  0x11   :  { %v100_v54 = vld [vmem:[%s5517_s5 + $0x78] sm:$0xff] }
  0x12   :  { %591 = vperm.xlu1 %4649, %v41_v36   ;;  %v74_v7 = vld [vmem:[%s5518_s4 + $0x38] sm:$0xff] }
  0x13   :  { %v108_v35 = vld [vmem:[%s5517_s5 + $0xb8] sm:$0xff] }
  0x14   :  { %v78_v36 = vld [vmem:[%s5518_s4 + $0x58] sm:$0xff] }
  0x20   :  { %387 = vxpose.xlu0.b32.start [1/4] (short) (narrow) %v85_v8, 8 }
  0x24   :  { %388 = vxpose.xlu0.b32.cont [2/4] (short) (narrow) %v86_v9, 8 }
  0x28   :  { %389 = vxpose.xlu0.b32.cont [3/4] (short) (narrow) %v87_v10, 8  ;;  %v4872_v10 = vadd.s32 8, %v4866_v5 }
  0x2c   :  { %390 = vxpose.xlu0.b32.end [4/4] (short) (narrow) %v88_v11, 8  ;;  %v4875_v11 = vadd.s32 16, %v4866_v5 }
  0x3b   :  { %812 = vxpose.xlu1.b32.start [1/4] (short) (narrow) %v89_v41, 8  ;;  %v113_v41 = vld [vmem:[%s5517_s5 + $0xe0] sm:$0xff] }
  0x3f   :  { %813 = vxpose.xlu1.b32.cont [2/4] (short) (narrow) %v90_v42, 8  ;;  %v114_v42 = vld [vmem:[%s5517_s5 + $0xe8] sm:$0xff] }
  0x43   :  { %814 = vxpose.xlu1.b32.cont [3/4] (short) (narrow) %v91_v43, 8  ;;  %v115_v43 = vld [vmem:[%s5517_s5 + $0xf0] sm:$0xff] }
  0x47   :  { %815 = vxpose.xlu1.b32.end [4/4] (short) (narrow) %v92_v44, 8  ;;  %v116_v44 = vld [vmem:[%s5517_s5 + $0xf8] sm:$0xff] }
  0x55   :  { %919 = vperm.xlu0 %4648, %v69_v12   ;;  %v4878_v12 = vadd.s32 24, %v4866_v5 }
  0x59   :  { %1015 = vperm.xlu0 %4648, %v42_v13   ;;  %v75_v13 = vld [vmem:[%s5518_s4 + $0x40] sm:$0xff] }
  0x65   :  { %924 = vperm.xlu1 %4649, %v70_v47   ;;  %v84_v47 = vld [vmem:[%s5518_s4 + $0x88] sm:$0xff] }
  0x69   :  { %1343 = vperm.xlu1 %4649, %v71_v48  }
  0x6d   :  { %1348 = vperm.xlu1 %4649, %v72_v49   ;;  %v50_v49 = vld [vmem:[%s5521_s3 + $0x8] sm:$0xff] }
  0x71   :  { %1439 = vperm.xlu1 %4649, %v43_v50  }
  0x77   :  { %1236 = vxpose.xlu0.b32.start [1/4] (short) (narrow) %v93_v15, 8 }
  0x7b   :  { %1237 = vxpose.xlu0.b32.cont [2/4] (short) (narrow) %v94_v16, 8 }
  0x7f   :  { %1238 = vxpose.xlu0.b32.cont [3/4] (short) (narrow) %v95_v17, 8 }
  0x81   :  { %v165_v25 = vpop.permute.xlu0 %164 }
  0x83   :  { %1239 = vxpose.xlu0.b32.end [4/4] (short) (narrow) %v96_v18, 8 }
  0x9a   :  { %1660 = vxpose.xlu1.b32.start [1/4] (short) (narrow) %v97_v51, 8  ;;  %v496_v51 = vpop.permute.xlu1 %495 }
  0x9e   :  { %1661 = vxpose.xlu1.b32.cont [2/4] (short) (narrow) %v98_v52, 8  ;;  %v501_v52 = vpop.permute.xlu1 %500 }
  0xa2   :  { %1662 = vxpose.xlu1.b32.cont [3/4] (short) (narrow) %v99_v53, 8 }
  0xa6   :  { %1663 = vxpose.xlu1.b32.end [4/4] (short) (narrow) %v100_v54, 8 }
  0xac   :  { %1767 = vperm.xlu0 %4648, %v73_v19   ;;  %v76_v19 = vld [vmem:[%s5518_s4 + $0x48] sm:$0xff] }
  0xb0   :  { %1863 = vperm.xlu0 %4648, %v44_v20  }
  0xc4   :  { %1772 = vperm.xlu1 %4649, %v74_v7   ;;  %v128_v7 = vld [vmem:[%s5519_s6 + $0x38] sm:$0xff] }
  0xc8   :  { %2191 = vperm.xlu1 %4649, %v75_v13  }
  0xcc   :  { %2196 = vperm.xlu1 %4649, %v76_v19  }
  0xce   :  { %2084 = vxpose.xlu0.b32.start [1/4] (short) (narrow) %v101_v21, 8 }
  0xd2   :  { %2085 = vxpose.xlu0.b32.cont [2/4] (short) (narrow) %v102_v22, 8 }
  0xd6   :  { %2086 = vxpose.xlu0.b32.cont [3/4] (short) (narrow) %v103_v23, 8  ;;  %v45_v23 = vld [vmem:[%s5514_s2 + $0x28] sm:$0xff] }
  0xd7   :  { %2287 = vperm.xlu1 %4649, %v45_v23  }
  0xda   :  { %2087 = vxpose.xlu0.b32.end [4/4] (short) (narrow) %v104_v24, 8 }
  0xdb   :  { %v237_v26 = vpop.f32.mrb[0].mxu0 }
  0xdc   :  { %v238_v27 = vadd.f32 %v237_v26, %v165_v25  ;;  %v4289_v28 = vpop.f32.mrb[1].mxu0 }
  0xde   :  { %588 = vst [vmem:[%s5520_s8] sm:$0xff] %v238_v27  ;;  %4290 = vmatprep.subr.mxu1 %v238_v27 }
  0xdf   :  { %4291 = vmatpush3.msra.mxu1 %v238_v27 }
  0xe0   :  { %4293 = vmatmul.mubr.msk.f32.vlgmr.msra.gmra.mrb[0].mxu1 %vm241_vm2, %v122_v29  ;;  %4565 = vmatprep.subr.bf16.mxu1 %v4651_v2 }
  0xe1   :  { %4295 = vmatprep.mubr.msk.f32.mxu1 %vm241_vm2, %v123_v30  ;;  %v4654_v30 = vmov 1.0|1.0  }
  0xe4   :  { %4296 = vmatmul.mubr.msk.f32.gmra.mrb[2].mxu1 %vm241_vm2, %v124_v31  ;;  %v403_v31 = vpop.trf.xlu0 }
  0xe5   :  { %4306 = vmatprep.mubr.msk.f32.mxu1 %vm4652_vm0, %v4653_v6 }
 0x103   :  { %2615 = vperm.xlu0 %4648, %v77_v32   ;;  %v105_v32 = vld [vmem:[%s5517_s5 + $0xa0] sm:$0xff] }
 0x104   :  { %2508 = vxpose.xlu1.b32.start [1/4] (short) (narrow) %v105_v32, 8 }
 0x107   :  { %2711 = vperm.xlu0 %4648, %v46_v33   ;;  %v106_v33 = vld [vmem:[%s5517_s5 + $0xa8] sm:$0xff] }
 0x108   :  { %2509 = vxpose.xlu1.b32.cont [2/4] (short) (narrow) %v106_v33, 8 }
 0x10c   :  { %2510 = vxpose.xlu1.b32.cont [3/4] (short) (narrow) %v107_v34, 8 }
 0x110   :  { %2511 = vxpose.xlu1.b32.end [4/4] (short) (narrow) %v108_v35, 8 }
 0x125   :  { %2932 = vxpose.xlu0.b32.start [1/4] (short) (narrow) %v109_v37, 8  ;;  %v79_v37 = vld [vmem:[%s5518_s4 + $0x60] sm:$0xff] }
 0x129   :  { %2933 = vxpose.xlu0.b32.cont [2/4] (short) (narrow) %v110_v38, 8  ;;  %v80_v38 = vld [vmem:[%s5518_s4 + $0x68] sm:$0xff] }
 0x12d   :  { %2934 = vxpose.xlu0.b32.cont [3/4] (short) (narrow) %v111_v39, 8  ;;  %v47_v39 = vld [vmem:[%s5514_s2 + $0x38] sm:$0xff] }
 0x12e   :  { %2620 = vperm.xlu1 %4649, %v78_v36  }
 0x131   :  { %2935 = vxpose.xlu0.b32.end [4/4] (short) (narrow) %v112_v40, 8  ;;  %v49_v40 = vld [vmem:[%s5521_s3] sm:$0xff] }
 0x132   :  { %3039 = vperm.xlu1 %4649, %v79_v37   ;;  %4311 = vmatprep.mubr.msk.f32.mxu0 %vm241_vm2, %v49_v40 }
 0x136   :  { %3044 = vperm.xlu1 %4649, %v80_v38  }
 0x13a   :  { %3135 = vperm.xlu1 %4649, %v47_v39  }
 0x15a   :  { %3463 = vperm.xlu0 %4648, %v81_v45   ;;  %v48_v45 = vld [vmem:[%s5514_s2 + $0x40] sm:$0xff] }
 0x15e   :  { %3468 = vperm.xlu0 %4648, %v82_v46   ;;  %v83_v46 = vld [vmem:[%s5518_s4 + $0x80] sm:$0xff] }
 0x163   :  { %3356 = vxpose.xlu1.b32.start [1/4] (short) (narrow) %v113_v41, 8  ;;  %v51_v41 = vld [vmem:[%s5521_s3 + $0x10] sm:$0xff] }
 0x167   :  { %3357 = vxpose.xlu1.b32.cont [2/4] (short) (narrow) %v114_v42, 8 }
 0x16b   :  { %3358 = vxpose.xlu1.b32.cont [3/4] (short) (narrow) %v115_v43, 8  ;;  %v52_v43 = vld [vmem:[%s5521_s3 + $0x18] sm:$0xff] }
 0x16f   :  { %3359 = vxpose.xlu1.b32.end [4/4] (short) (narrow) %v116_v44, 8 }
 0x18d   :  { %3559 = vperm.xlu1 %4649, %v48_v45  }
 0x191   :  { %3887 = vperm.xlu1 %4649, %v83_v46  }
 0x195   :  { %3892 = vperm.xlu1 %4649, %v84_v47   ;;  %v920_v47 = vpop.permute.xlu0 %919 }
 0x1b3   :  { %v4294_v55 = vpop.f32.mrb[0].mxu1 }
 0x1b4   :  { %v320_v56 = vpop.f32.mrb[1].mxu1 }
 0x1b5   :  { %v339_v57 = vmax.f32 %v320_v56, %v4294_v55 }
 0x1b7   :  { %v4297_v58 = vpop.f32.mrb[2].mxu1 }
 0x1b8   :  { %v330_v59 = vpop.f32.mrb[3].mxu1 }
 0x1b9   :  { %v340_v60 = vmax.f32 %v330_v59, %v4297_v58 }
 0x1bb   :  { %v341_v61 = vmax.f32 %v339_v57, %v340_v60  ;;  %v32_v60 = vld [vmem:[%s5516_s1 + $0x8] sm:$0xff] }
 0x1bd   :  { %v342_v62 = vrot.slane %v341_v61, 4 }
 0x1bf   :  { %v343_v0 = vmax.f32 %v341_v61, %v342_v62 }
 0x1c1   :  { %v344_v1 = vrot.slane %v343_v0, 2 }
 0x1c3   :  { %v345_v8 = vmax.f32 %v343_v0, %v344_v1  ;;  %v126_v0 = vld [vmem:[%s5519_s6 + $0x28] sm:$0xff]  ;;  %v127_v1 = vld [vmem:[%s5519_s6 + $0x30] sm:$0xff] }
 0x1c5   :  { %v346_v9 = vrot.slane %v345_v8, 1 }
 0x1c7   :  { %v347_v14 = vmax.f32 %v345_v8, %v346_v9 }
 0x1c9   :  { %vm348_vm3 = vcmp.ge.f32.partialorder %v320_v56, %v347_v14  ;;  %vm349_vm4 = vcmp.ge.f32.partialorder %v4294_v55, %v347_v14  ;;  %vm350_vm5 = vcmp.ge.f32.partialorder %v330_v59, %v347_v14  ;;  %vm351_vm6 = vcmp.ge.f32.partialorder %v4297_v58, %v347_v14 }
 0x1ca   :  { %v352_v15 = vsel %vm348_vm3, %v4866_v5, 1073741824  ;;  %v353_v16 = vsel %vm349_vm4, %v4872_v10, 1073741824  ;;  %v354_v17 = vsel %vm350_vm5, %v4875_v11, 1073741824  ;;  %v355_v18 = vsel %vm351_vm6, %v4878_v12, 1073741824 }
 0x1cb   :  { %vm356_vm7 = vcmp.lt.s32.totalorder %v352_v15, %v353_v16  ;;  %vm358_vm8 = vcmp.lt.s32.totalorder %v354_v17, %v355_v18  ;;  %vm419_vm6 = vcmask 261120  }
 0x1cc   :  { %v357_v20 = vsel %vm356_vm7, %v352_v15, %v353_v16  ;;  %v359_v21 = vsel %vm358_vm8, %v354_v17, %v355_v18 }
 0x1cd   :  { %vm360_vm9 = vcmp.lt.s32.totalorder %v357_v20, %v359_v21 }
 0x1ce   :  { %v361_v22 = vsel %vm360_vm9, %v357_v20, %v359_v21 }
 0x1cf   :  { %v362_v24 = vrot.slane %v361_v22, 4 }
 0x1d1   :  { %vm363_vm10 = vcmp.lt.s32.totalorder %v361_v22, %v362_v24 }
 0x1d2   :  { %v364_v25 = vsel %vm363_vm10, %v361_v22, %v362_v24 }
 0x1d3   :  { %v365_v26 = vrot.slane %v364_v25, 2 }
 0x1d5   :  { %vm366_vm11 = vcmp.lt.s32.totalorder %v364_v25, %v365_v26 }
 0x1d6   :  { %v367_v27 = vsel %vm366_vm11, %v364_v25, %v365_v26 }
 0x1d7   :  { %v368_v28 = vrot.slane %v367_v27, 1 }
 0x1d9   :  { %vm369_vm12 = vcmp.lt.s32.totalorder %v367_v27, %v368_v28 }
 0x1da   :  { %v4893_v29 = vsel %vm369_vm12, %v367_v27, %v368_v28 }
 0x1db   :  { %vm375_vm13 = vcmp.eq.s32.totalorder %v4866_v5, %v4893_v29  ;;  %vm376_vm14 = vcmp.eq.s32.totalorder %v4872_v10, %v4893_v29  ;;  %vm377_vm3 = vcmp.eq.s32.totalorder %v4875_v11, %v4893_v29  ;;  %vm378_vm4 = vcmp.eq.s32.totalorder %v4878_v12, %v4893_v29 }
 0x1dc   :  { %vm4566_vm15 = vmpackc.low %vm376_vm14, %vm375_vm13 }
 0x1dd   :  { %4567 = vmatpush3.bf16.msk.msra.mxu1 %vm4566_vm15, %v4654_v30  ;;  %vm4569_vm5 = vmpackc.low %vm378_vm4, %vm377_vm3  ;;  %vm371_vm3 = vcmp.eq.s32.totalorder %v4866_v5, 0  ;;  %vm796_vm4 = vcmp.eq.s32.totalorder %v4866_v5, 1 }
 0x1de   :  { %4568 = vmatprep.subr.bf16.mxu1 %v4651_v2  ;;  %v373_v38 = vsel %vm371_vm3, %v4893_v29, 0 }
 0x1e1   :  { %4570 = vmatpush3.bf16.msk.msra.mxu1 %vm4569_vm5, %v4654_v30 }
 0x1e4   :  { %4307 = vmatmul.mubr.msk.f32.vlgmr.msra.gmra.mrb[4].mxu1 %vm419_vm6, %v403_v31 }
 0x2b7   :  { %v489_v48 = vpop.f32.mrb[4].mxu1 }
 0x2b8   :  { %v4308_v50 = vpop.f32.mrb[5].mxu1  ;;  %4309 = vmatprep.subr.mxu0 %v489_v48 }
 0x2b9   :  { %4310 = vmatpush3.msra.mxu0 %v489_v48 }
 0x2ba   :  { %4312 = vmatmul.mubr.msk.f32.vlgmr.msra.gmra.mrb[2].mxu0 %vm241_vm2, %v50_v49  ;;  %4571 = vmatprep.subr.bf16.mxu0 %v4651_v2 }
 0x2bb   :  { %4318 = vmatprep.mubr.msk.f32.mxu0 %vm4652_vm0, %v4653_v6 }
 0x38d   :  { %v4313_v53 = vpop.f32.mrb[2].mxu0 }
 0x38e   :  { %v4963_v54 = vadd.f32 %v4313_v53, %v501_v52  ;;  %v575_v55 = vpop.f32.mrb[3].mxu0 }
 0x38f   :  { %v4965_v56 = vadd.f32 %v575_v55, %v496_v51  ;;  %v33_v55 = vld [vmem:[%s5516_s1 + $0x10] sm:$0xff] }
 0x390   :  { %v4969_v57 = vsub.f32 %v4717_v4, %v4963_v54  ;;  %v592_v4 = vpop.permute.xlu1 %591 }
 0x391   :  { %v4973_v58 = vsub.f32 %v4712_v3, %v4965_v56  ;;  %v125_v3 = vld [vmem:[%s5519_s6 + $0x20] sm:$0xff] }
 0x392   :  { %4323 = vmatprep.mubr.msk.f32.mxu1 %vm241_vm2, %v125_v3 }
 0x393   :  { %v4572_v59 = vpack.c.bf16 %v4969_v57, %v4973_v58 }
 0x394   :  { %v828_v29 = vpop.trf.xlu1 }
 0x395   :  { %4573 = vmatpush3.bf16.msra.mxu0 %v4572_v59 }
 0x396   :  { %4574 = vmatprep.subr.bf16.mxu0 %v4651_v2 }
 0x398   :  { %4319 = vmatmul.mubr.msk.f32.vlgmr.msra.gmra.mrb[4].mxu0 %vm167_vm1, %v32_v60  ;;  %v925_v45 = vpop.permute.xlu1 %924 }
 0x399   :  { %4337 = vmatprep.mubr.msk.f32.mxu0 %vm4652_vm0, %v4653_v6 }
 0x46b   :  { %v663_v61 = vpop.f32.mrb[4].mxu0 }
 0x46c   :  { %v664_v62 = vadd.f32 %v663_v61, %v592_v4  ;;  %v4320_v63 = vpop.f32.mrb[5].mxu0  ;;  %v130_v4 = vld [vmem:[%s5519_s6 + $0x48] sm:$0xff]  ;;  %v131_v61 = vld [vmem:[%s5519_s6 + $0x50] sm:$0xff] }
 0x46e   :  { %1012 = vst [vmem:[%s5520_s8 + $0x8] sm:$0xff] %v664_v62  ;;  %4321 = vmatprep.subr.mxu1 %v664_v62 }
 0x46f   :  { %4322 = vmatpush3.msra.mxu1 %v664_v62  ;;  %v132_v62 = vld [vmem:[%s5519_s6 + $0x58] sm:$0xff] }
 0x470   :  { %4324 = vmatmul.mubr.msk.f32.vlgmr.msra.gmra.mrb[6].mxu1 %vm241_vm2, %v126_v0 }
 0x471   :  { %4326 = vmatprep.mubr.msk.f32.mxu1 %vm241_vm2, %v127_v1 }
 0x474   :  { %4327 = vmatmul.mubr.msk.f32.gmra.mrb[8].mxu1 %vm241_vm2, %v128_v7 }
 0x475   :  { %4342 = vmatprep.mubr.msk.f32.mxu1 %vm241_vm2, %v51_v41 }
 0x543   :  { %v4325_v8 = vpop.f32.mrb[6].mxu1 }
 0x544   :  { %v745_v9 = vpop.f32.mrb[7].mxu1 }
 0x545   :  { %v764_v13 = vmax.f32 %v745_v9, %v4325_v8 }
 0x547   :  { %v4328_v14 = vpop.f32.mrb[8].mxu1 }
 0x548   :  { %v755_v15 = vpop.f32.mrb[9].mxu1 }
 0x549   :  { %v765_v16 = vmax.f32 %v755_v15, %v4328_v14 }
 0x54b   :  { %v766_v17 = vmax.f32 %v764_v13, %v765_v16 }
 0x54d   :  { %v767_v18 = vrot.slane %v766_v17, 4 }
 0x54f   :  { %v768_v19 = vmax.f32 %v766_v17, %v767_v18 }
 0x551   :  { %v769_v20 = vrot.slane %v768_v19, 2 }
 0x553   :  { %v770_v21 = vmax.f32 %v768_v19, %v769_v20 }
 0x555   :  { %v771_v22 = vrot.slane %v770_v21, 1 }
 0x557   :  { %v772_v23 = vmax.f32 %v770_v21, %v771_v22 }
 0x559   :  { %vm773_vm7 = vcmp.ge.f32.partialorder %v745_v9, %v772_v23  ;;  %vm774_vm8 = vcmp.ge.f32.partialorder %v4325_v8, %v772_v23  ;;  %vm775_vm9 = vcmp.ge.f32.partialorder %v755_v15, %v772_v23  ;;  %vm776_vm10 = vcmp.ge.f32.partialorder %v4328_v14, %v772_v23 }
 0x55a   :  { %v777_v24 = vsel %vm773_vm7, %v4866_v5, 1073741824  ;;  %v778_v25 = vsel %vm774_vm8, %v4872_v10, 1073741824  ;;  %v779_v26 = vsel %vm775_vm9, %v4875_v11, 1073741824  ;;  %v780_v27 = vsel %vm776_vm10, %v4878_v12, 1073741824 }
 0x55b   :  { %vm781_vm11 = vcmp.lt.s32.totalorder %v777_v24, %v778_v25  ;;  %vm783_vm12 = vcmp.lt.s32.totalorder %v779_v26, %v780_v27 }
 0x55c   :  { %v782_v28 = vsel %vm781_vm11, %v777_v24, %v778_v25  ;;  %v784_v31 = vsel %vm783_vm12, %v779_v26, %v780_v27 }
 0x55d   :  { %vm785_vm13 = vcmp.lt.s32.totalorder %v782_v28, %v784_v31 }
 0x55e   :  { %v786_v32 = vsel %vm785_vm13, %v782_v28, %v784_v31 }
 0x55f   :  { %v787_v33 = vrot.slane %v786_v32, 4 }
 0x561   :  { %vm788_vm14 = vcmp.lt.s32.totalorder %v786_v32, %v787_v33 }
 0x562   :  { %v789_v34 = vsel %vm788_vm14, %v786_v32, %v787_v33 }
 0x563   :  { %v790_v35 = vrot.slane %v789_v34, 2 }
 0x565   :  { %vm791_vm15 = vcmp.lt.s32.totalorder %v789_v34, %v790_v35 }
 0x566   :  { %v792_v36 = vsel %vm791_vm15, %v789_v34, %v790_v35 }
 0x567   :  { %v793_v37 = vrot.slane %v792_v36, 1 }
 0x569   :  { %vm794_vm5 = vcmp.lt.s32.totalorder %v792_v36, %v793_v37 }
 0x56a   :  { %v795_v39 = vsel %vm794_vm5, %v792_v36, %v793_v37  ;;  %v53_v37 = vld [vmem:[%s5521_s3 + $0x20] sm:$0xff] }
 0x56b   :  { %v5010_v40 = vsel %vm796_vm4, %v795_v39, %v373_v38  ;;  %vm800_vm7 = vcmp.eq.s32.totalorder %v4866_v5, %v795_v39  ;;  %vm801_vm8 = vcmp.eq.s32.totalorder %v4872_v10, %v795_v39  ;;  %vm802_vm10 = vcmp.eq.s32.totalorder %v4875_v11, %v795_v39 }
 0x56c   :  { %vm4575_vm9 = vmpackc.low %vm801_vm8, %vm800_vm7  ;;  %vm803_vm11 = vcmp.eq.s32.totalorder %v4878_v12, %v795_v39  ;;  %v54_v39 = vld [vmem:[%s5521_s3 + $0x28] sm:$0xff] }
 0x56d   :  { %4576 = vmatpush3.bf16.msk.msra.mxu0 %vm4575_vm9, %v4654_v30  ;;  %vm4578_vm12 = vmpackc.low %vm803_vm11, %vm802_vm10  ;;  %vm1220_vm10 = vcmp.eq.s32.totalorder %v4866_v5, 2 }
 0x56e   :  { %4577 = vmatprep.subr.bf16.mxu0 %v4651_v2 }
 0x571   :  { %4579 = vmatpush3.bf16.msk.msra.mxu0 %vm4578_vm12, %v4654_v30 }
 0x572   :  { %4580 = vmatprep.subr.bf16.mxu0 %v4651_v2 }
 0x574   :  { %4338 = vmatmul.mubr.msk.f32.vlgmr.msra.gmra.mrb[6].mxu0 %vm419_vm6, %v828_v29  ;;  %v1344_v29 = vpop.permute.xlu1 %1343 }
 0x575   :  { %4349 = vmatprep.mubr.msk.f32.mxu0 %vm4652_vm0, %v4653_v6 }
 0x578   :  { %v1349_v41 = vpop.permute.xlu1 %1348 }
 0x647   :  { %v913_v42 = vpop.f32.mrb[6].mxu0 }
 0x648   :  { %v4339_v44 = vpop.f32.mrb[7].mxu0  ;;  %4340 = vmatprep.subr.mxu1 %v913_v42 }
 0x649   :  { %4341 = vmatpush3.msra.mxu1 %v913_v42 }
 0x64a   :  { %4343 = vmatmul.mubr.msk.f32.vlgmr.msra.gmra.mrb[10].mxu1 %vm241_vm2, %v52_v43 }
 0x71d   :  { %v4344_v46 = vpop.f32.mrb[10].mxu1 }
 0x71e   :  { %v5031_v48 = vadd.f32 %v4344_v46, %v925_v45  ;;  %v999_v49 = vpop.f32.mrb[11].mxu1 }
 0x71f   :  { %v5033_v50 = vadd.f32 %v999_v49, %v920_v47 }
 0x720   :  { %v5037_v51 = vsub.f32 %v4969_v57, %v5031_v48  ;;  %v129_v57 = vld [vmem:[%s5519_s6 + $0x40] sm:$0xff]  ;;  %v1009_v43 = vadd.f32 %v5031_v48, %v4963_v54  ;;  %v34_v54 = vld [vmem:[%s5516_s1 + $0x18] sm:$0xff]  ;;  %v1440_v48 = vpop.permute.xlu1 %1439 }
 0x721   :  { %v5041_v52 = vsub.f32 %v4973_v58, %v5033_v50  ;;  %4354 = vmatprep.mubr.msk.f32.mxu1 %vm241_vm2, %v129_v57  ;;  %v1016_v58 = vpop.permute.xlu0 %1015  ;;  %v1008_v46 = vadd.f32 %v5033_v50, %v4965_v56  ;;  %v133_v56 = vld [vmem:[%s5519_s6 + $0x60] sm:$0xff] }
 0x723   :  { %v4581_v53 = vpack.c.bf16 %v5037_v51, %v5041_v52 }
 0x725   :  { %4582 = vmatpush3.bf16.msra.mxu0 %v4581_v53  ;;  %v1252_v36 = vpop.trf.xlu0 }
 0x726   :  { %4583 = vmatprep.subr.bf16.mxu0 %v4651_v2 }
 0x728   :  { %4350 = vmatmul.mubr.msk.f32.vlgmr.msra.gmra.mrb[8].mxu0 %vm167_vm1, %v33_v55 }
 0x729   :  { %4368 = vmatprep.mubr.msk.f32.mxu0 %vm4652_vm0, %v4653_v6 }
 0x7fb   :  { %v1087_v59 = vpop.f32.mrb[8].mxu0 }
 0x7fc   :  { %v1088_v60 = vadd.f32 %v1087_v59, %v1016_v58  ;;  %v4351_v3 = vpop.f32.mrb[9].mxu0  ;;  %v134_v59 = vld [vmem:[%s5519_s6 + $0x68] sm:$0xff] }
 0x7fd   :  { %v136_v3 = vld [vmem:[%s5519_s6 + $0x78] sm:$0xff] }
 0x7fe   :  { %1436 = vst [vmem:[%s5520_s8 + $0x10] sm:$0xff] %v1088_v60  ;;  %4352 = vmatprep.subr.mxu1 %v1088_v60 }
 0x7ff   :  { %4353 = vmatpush3.msra.mxu1 %v1088_v60  ;;  %v135_v60 = vld [vmem:[%s5519_s6 + $0x70] sm:$0xff] }
 0x800   :  { %4355 = vmatmul.mubr.msk.f32.vlgmr.msra.gmra.mrb[12].mxu1 %vm241_vm2, %v130_v4 }
 0x801   :  { %4357 = vmatprep.mubr.msk.f32.mxu1 %vm241_vm2, %v131_v61 }
 0x804   :  { %4358 = vmatmul.mubr.msk.f32.gmra.mrb[14].mxu1 %vm241_vm2, %v132_v62 }
 0x805   :  { %4373 = vmatprep.mubr.msk.f32.mxu1 %vm241_vm2, %v53_v37 }
 0x8d3   :  { %v4356_v63 = vpop.f32.mrb[12].mxu1 }
 0x8d4   :  { %v1169_v0 = vpop.f32.mrb[13].mxu1 }
 0x8d5   :  { %v1188_v1 = vmax.f32 %v1169_v0, %v4356_v63 }
 0x8d7   :  { %v4359_v7 = vpop.f32.mrb[14].mxu1 }
 0x8d8   :  { %v1179_v8 = vpop.f32.mrb[15].mxu1 }
 0x8d9   :  { %v1189_v9 = vmax.f32 %v1179_v8, %v4359_v7 }
 0x8db   :  { %v1190_v13 = vmax.f32 %v1188_v1, %v1189_v9 }
 0x8dd   :  { %v1191_v14 = vrot.slane %v1190_v13, 4 }
 0x8df   :  { %v1192_v15 = vmax.f32 %v1190_v13, %v1191_v14 }
 0x8e1   :  { %v1193_v16 = vrot.slane %v1192_v15, 2 }
 0x8e3   :  { %v1194_v17 = vmax.f32 %v1192_v15, %v1193_v16 }
 0x8e5   :  { %v1195_v18 = vrot.slane %v1194_v17, 1 }
 0x8e7   :  { %v1196_v19 = vmax.f32 %v1194_v17, %v1195_v18 }
 0x8e9   :  { %vm1197_vm13 = vcmp.ge.f32.partialorder %v1169_v0, %v1196_v19  ;;  %vm1198_vm14 = vcmp.ge.f32.partialorder %v4356_v63, %v1196_v19  ;;  %vm1199_vm15 = vcmp.ge.f32.partialorder %v1179_v8, %v1196_v19  ;;  %vm1200_vm3 = vcmp.ge.f32.partialorder %v4359_v7, %v1196_v19 }
 0x8ea   :  { %v1201_v20 = vsel %vm1197_vm13, %v4866_v5, 1073741824  ;;  %v1202_v21 = vsel %vm1198_vm14, %v4872_v10, 1073741824  ;;  %v1203_v22 = vsel %vm1199_vm15, %v4875_v11, 1073741824  ;;  %v1204_v23 = vsel %vm1200_vm3, %v4878_v12, 1073741824 }
 0x8eb   :  { %vm1205_vm4 = vcmp.lt.s32.totalorder %v1201_v20, %v1202_v21  ;;  %vm1207_vm5 = vcmp.lt.s32.totalorder %v1203_v22, %v1204_v23 }
 0x8ec   :  { %v1206_v24 = vsel %vm1205_vm4, %v1201_v20, %v1202_v21  ;;  %v1208_v25 = vsel %vm1207_vm5, %v1203_v22, %v1204_v23 }
 0x8ed   :  { %vm1209_vm7 = vcmp.lt.s32.totalorder %v1206_v24, %v1208_v25 }
 0x8ee   :  { %v1210_v26 = vsel %vm1209_vm7, %v1206_v24, %v1208_v25 }
 0x8ef   :  { %v1211_v27 = vrot.slane %v1210_v26, 4 }
 0x8f1   :  { %vm1212_vm8 = vcmp.lt.s32.totalorder %v1210_v26, %v1211_v27 }
 0x8f2   :  { %v1213_v28 = vsel %vm1212_vm8, %v1210_v26, %v1211_v27 }
 0x8f3   :  { %v1214_v31 = vrot.slane %v1213_v28, 2 }
 0x8f5   :  { %vm1215_vm9 = vcmp.lt.s32.totalorder %v1213_v28, %v1214_v31 }
 0x8f6   :  { %v1216_v32 = vsel %vm1215_vm9, %v1213_v28, %v1214_v31 }
 0x8f7   :  { %v1217_v33 = vrot.slane %v1216_v32, 1 }
 0x8f9   :  { %vm1218_vm11 = vcmp.lt.s32.totalorder %v1216_v32, %v1217_v33 }
 0x8fa   :  { %v1219_v34 = vsel %vm1218_vm11, %v1216_v32, %v1217_v33  ;;  %v1676_v33 = vpop.trf.xlu1 }
 0x8fb   :  { %v5077_v35 = vsel %vm1220_vm10, %v1219_v34, %v5010_v40  ;;  %vm1224_vm12 = vcmp.eq.s32.totalorder %v4866_v5, %v1219_v34  ;;  %vm1225_vm13 = vcmp.eq.s32.totalorder %v4872_v10, %v1219_v34  ;;  %vm1226_vm15 = vcmp.eq.s32.totalorder %v4875_v11, %v1219_v34 }
 0x8fc   :  { %vm4584_vm14 = vmpackc.low %vm1225_vm13, %vm1224_vm12  ;;  %vm1227_vm3 = vcmp.eq.s32.totalorder %v4878_v12, %v1219_v34  ;;  %v55_v34 = vld [vmem:[%s5521_s3 + $0x30] sm:$0xff] }
 0x8fd   :  { %4585 = vmatpush3.bf16.msk.msra.mxu0 %vm4584_vm14, %v4654_v30  ;;  %vm4587_vm4 = vmpackc.low %vm1227_vm3, %vm1226_vm15  ;;  %vm1644_vm15 = vcmp.eq.s32.totalorder %v4866_v5, 3 }
 0x8fe   :  { %4586 = vmatprep.subr.bf16.mxu0 %v4651_v2 }
 0x901   :  { %4588 = vmatpush3.bf16.msk.msra.mxu0 %vm4587_vm4, %v4654_v30 }
 0x902   :  { %4589 = vmatprep.subr.bf16.mxu0 %v4651_v2 }
 0x904   :  { %4369 = vmatmul.mubr.msk.f32.vlgmr.msra.gmra.mrb[10].mxu0 %vm419_vm6, %v1252_v36  ;;  %v56_v36 = vld [vmem:[%s5521_s3 + $0x38] sm:$0xff] }
 0x905   :  { %4380 = vmatprep.mubr.msk.f32.mxu0 %vm4652_vm0, %v4653_v6 }
 0x9d7   :  { %v1337_v38 = vpop.f32.mrb[10].mxu0 }
 0x9d8   :  { %v4370_v40 = vpop.f32.mrb[11].mxu0  ;;  %4371 = vmatprep.subr.mxu1 %v1337_v38 }
 0x9d9   :  { %4372 = vmatpush3.msra.mxu1 %v1337_v38  ;;  %v1773_v38 = vpop.permute.xlu1 %1772  ;;  %v1768_v40 = vpop.permute.xlu0 %1767 }
 0x9da   :  { %4374 = vmatmul.mubr.msk.f32.vlgmr.msra.gmra.mrb[16].mxu1 %vm241_vm2, %v54_v39 }
 0x9db   :  { %4385 = vmatprep.mubr.msk.f32.mxu1 %vm241_vm2, %v133_v56  ;;  %v138_v56 = vld [vmem:[%s5519_s6 + $0x88] sm:$0xff] }
 0xaad   :  { %v4375_v42 = vpop.f32.mrb[16].mxu1 }
 0xaae   :  { %v1429_v44 = vadd.f32 %v4375_v42, %v1349_v41  ;;  %v1423_v45 = vpop.f32.mrb[17].mxu1 }
 0xaaf   :  { %v1424_v47 = vadd.f32 %v1423_v45, %v1344_v29 }
 0xab0   :  { %v5102_v49 = vadd.f32 %v1429_v44, %v1009_v43  ;;  %v5105_v53 = vsub.f32 %v5037_v51, %v1429_v44 }
 0xab1   :  { %v5107_v55 = vadd.f32 %v1424_v47, %v1008_v46  ;;  %v5110_v57 = vsub.f32 %v5041_v52, %v1424_v47 }
 0xab3   :  { %v4590_v58 = vpack.c.bf16 %v5105_v53, %v5110_v57 }
 0xab5   :  { %4591 = vmatpush3.bf16.msra.mxu0 %v4590_v58  ;;  %v35_v58 = vld [vmem:[%s5516_s1 + $0x20] sm:$0xff] }
 0xab6   :  { %4592 = vmatprep.subr.bf16.mxu0 %v4651_v2 }
 0xab8   :  { %4381 = vmatmul.mubr.msk.f32.vlgmr.msra.gmra.mrb[12].mxu0 %vm167_vm1, %v34_v54 }
 0xab9   :  { %4399 = vmatprep.mubr.msk.f32.mxu0 %vm4652_vm0, %v4653_v6 }
 0xb8b   :  { %v1511_v50 = vpop.f32.mrb[12].mxu0 }
 0xb8c   :  { %v1512_v51 = vadd.f32 %v1511_v50, %v1440_v48  ;;  %v4382_v52 = vpop.f32.mrb[13].mxu0  ;;  %v139_v48 = vld [vmem:[%s5519_s6 + $0x90] sm:$0xff]  ;;  %v140_v50 = vld [vmem:[%s5519_s6 + $0x98] sm:$0xff] }
 0xb8e   :  { %1860 = vst [vmem:[%s5520_s8 + $0x18] sm:$0xff] %v1512_v51  ;;  %4383 = vmatprep.subr.mxu1 %v1512_v51 }
 0xb8f   :  { %4384 = vmatpush3.msra.mxu1 %v1512_v51 }
 0xb90   :  { %4386 = vmatmul.mubr.msk.f32.vlgmr.msra.gmra.mrb[18].mxu1 %vm241_vm2, %v134_v59 }
 0xb91   :  { %4388 = vmatprep.mubr.msk.f32.mxu1 %vm241_vm2, %v135_v60 }
 0xb94   :  { %4389 = vmatmul.mubr.msk.f32.gmra.mrb[20].mxu1 %vm241_vm2, %v136_v3 }
 0xb95   :  { %4404 = vmatprep.mubr.msk.f32.mxu1 %vm241_vm2, %v55_v34 }
 0xc63   :  { %v4387_v4 = vpop.f32.mrb[18].mxu1 }
 0xc64   :  { %v1593_v61 = vpop.f32.mrb[19].mxu1 }
 0xc65   :  { %v1612_v62 = vmax.f32 %v1593_v61, %v4387_v4 }
 0xc67   :  { %v4390_v63 = vpop.f32.mrb[20].mxu1 }
 0xc68   :  { %v1603_v0 = vpop.f32.mrb[21].mxu1 }
 0xc69   :  { %v1613_v1 = vmax.f32 %v1603_v0, %v4390_v63 }
 0xc6b   :  { %v1614_v7 = vmax.f32 %v1612_v62, %v1613_v1 }
 0xc6d   :  { %v1615_v8 = vrot.slane %v1614_v7, 4 }
 0xc6f   :  { %v1616_v9 = vmax.f32 %v1614_v7, %v1615_v8 }
 0xc71   :  { %v1617_v13 = vrot.slane %v1616_v9, 2 }
 0xc73   :  { %v1618_v14 = vmax.f32 %v1616_v9, %v1617_v13 }
 0xc75   :  { %v1619_v15 = vrot.slane %v1618_v14, 1 }
 0xc77   :  { %v1620_v16 = vmax.f32 %v1618_v14, %v1619_v15 }
 0xc79   :  { %vm1621_vm5 = vcmp.ge.f32.partialorder %v1593_v61, %v1620_v16  ;;  %vm1622_vm7 = vcmp.ge.f32.partialorder %v4387_v4, %v1620_v16  ;;  %vm1623_vm8 = vcmp.ge.f32.partialorder %v1603_v0, %v1620_v16  ;;  %vm1624_vm9 = vcmp.ge.f32.partialorder %v4390_v63, %v1620_v16 }
 0xc7a   :  { %v1625_v17 = vsel %vm1621_vm5, %v4866_v5, 1073741824  ;;  %v1626_v18 = vsel %vm1622_vm7, %v4872_v10, 1073741824  ;;  %v1627_v19 = vsel %vm1623_vm8, %v4875_v11, 1073741824  ;;  %v1628_v20 = vsel %vm1624_vm9, %v4878_v12, 1073741824 }
 0xc7b   :  { %vm1629_vm10 = vcmp.lt.s32.totalorder %v1625_v17, %v1626_v18  ;;  %vm1631_vm11 = vcmp.lt.s32.totalorder %v1627_v19, %v1628_v20 }
 0xc7c   :  { %v1630_v21 = vsel %vm1629_vm10, %v1625_v17, %v1626_v18  ;;  %v1632_v22 = vsel %vm1631_vm11, %v1627_v19, %v1628_v20 }
 0xc7d   :  { %vm1633_vm12 = vcmp.lt.s32.totalorder %v1630_v21, %v1632_v22 }
 0xc7e   :  { %v1634_v23 = vsel %vm1633_vm12, %v1630_v21, %v1632_v22 }
 0xc7f   :  { %v1635_v24 = vrot.slane %v1634_v23, 4 }
 0xc81   :  { %vm1636_vm13 = vcmp.lt.s32.totalorder %v1634_v23, %v1635_v24 }
 0xc82   :  { %v1637_v25 = vsel %vm1636_vm13, %v1634_v23, %v1635_v24 }
 0xc83   :  { %v1638_v26 = vrot.slane %v1637_v25, 2 }
 0xc85   :  { %vm1639_vm14 = vcmp.lt.s32.totalorder %v1637_v25, %v1638_v26 }
 0xc86   :  { %v1640_v27 = vsel %vm1639_vm14, %v1637_v25, %v1638_v26 }
 0xc87   :  { %v1641_v28 = vrot.slane %v1640_v27, 1 }
 0xc89   :  { %vm1642_vm3 = vcmp.lt.s32.totalorder %v1640_v27, %v1641_v28 }
 0xc8a   :  { %v1643_v31 = vsel %vm1642_vm3, %v1640_v27, %v1641_v28  ;;  %v57_v27 = vld [vmem:[%s5521_s3 + $0x40] sm:$0xff] }
 0xc8b   :  { %v5146_v32 = vsel %vm1644_vm15, %v1643_v31, %v5077_v35  ;;  %vm1648_vm4 = vcmp.eq.s32.totalorder %v4866_v5, %v1643_v31  ;;  %vm1649_vm5 = vcmp.eq.s32.totalorder %v4872_v10, %v1643_v31  ;;  %vm1650_vm8 = vcmp.eq.s32.totalorder %v4875_v11, %v1643_v31 }
 0xc8c   :  { %vm4593_vm7 = vmpackc.low %vm1649_vm5, %vm1648_vm4  ;;  %vm1651_vm9 = vcmp.eq.s32.totalorder %v4878_v12, %v1643_v31  ;;  %v58_v31 = vld [vmem:[%s5521_s3 + $0x48] sm:$0xff] }
 0xc8d   :  { %4594 = vmatpush3.bf16.msk.msra.mxu0 %vm4593_vm7, %v4654_v30  ;;  %vm4596_vm10 = vmpackc.low %vm1651_vm9, %vm1650_vm8  ;;  %vm2068_vm8 = vcmp.eq.s32.totalorder %v4866_v5, 4 }
 0xc8e   :  { %4595 = vmatprep.subr.bf16.mxu0 %v4651_v2 }
 0xc91   :  { %4597 = vmatpush3.bf16.msk.msra.mxu0 %vm4596_vm10, %v4654_v30 }
 0xc92   :  { %4598 = vmatprep.subr.bf16.mxu0 %v4651_v2 }
 0xc94   :  { %4400 = vmatmul.mubr.msk.f32.vlgmr.msra.gmra.mrb[14].mxu0 %vm419_vm6, %v1676_v33  ;;  %v2192_v33 = vpop.permute.xlu1 %2191 }
 0xc95   :  { %4411 = vmatprep.mubr.msk.f32.mxu0 %vm4652_vm0, %v4653_v6 }
 0xc98   :  { %v2197_v34 = vpop.permute.xlu1 %2196 }
 0xd67   :  { %v1761_v35 = vpop.f32.mrb[14].mxu0 }
 0xd68   :  { %v4401_v37 = vpop.f32.mrb[15].mxu0  ;;  %4402 = vmatprep.subr.mxu1 %v1761_v35 }
 0xd69   :  { %4403 = vmatpush3.msra.mxu1 %v1761_v35 }
 0xd6a   :  { %4405 = vmatmul.mubr.msk.f32.vlgmr.msra.gmra.mrb[22].mxu1 %vm241_vm2, %v56_v36 }
 0xe3d   :  { %v4406_v39 = vpop.f32.mrb[22].mxu1 }
 0xe3e   :  { %v1853_v29 = vadd.f32 %v4406_v39, %v1773_v38  ;;  %v1847_v41 = vpop.f32.mrb[23].mxu1 }
 0xe3f   :  { %v1848_v42 = vadd.f32 %v1847_v41, %v1768_v40 }
 0xe40   :  { %v5168_v43 = vadd.f32 %v1853_v29, %v5102_v49  ;;  %v5171_v44 = vsub.f32 %v5105_v53, %v1853_v29  ;;  %v137_v49 = vld [vmem:[%s5519_s6 + $0x80] sm:$0xff]  ;;  %v1864_v53 = vpop.permute.xlu0 %1863 }
 0xe41   :  { %v5174_v45 = vadd.f32 %v1848_v42, %v5107_v55  ;;  %v5177_v46 = vsub.f32 %v5110_v57, %v1848_v42  ;;  %4416 = vmatprep.mubr.msk.f32.mxu1 %vm241_vm2, %v137_v49  ;;  %v142_v49 = vld [vmem:[%s5519_s6 + $0xa8] sm:$0xff] }
 0xe43   :  { %v4599_v47 = vpack.c.bf16 %v5171_v44, %v5177_v46 }
 0xe44   :  { %v2100_v26 = vpop.trf.xlu0 }
 0xe45   :  { %4600 = vmatpush3.bf16.msra.mxu0 %v4599_v47  ;;  %v36_v47 = vld [vmem:[%s5516_s1 + $0x28] sm:$0xff] }
 0xe46   :  { %4601 = vmatprep.subr.bf16.mxu0 %v4651_v2 }
 0xe48   :  { %4412 = vmatmul.mubr.msk.f32.vlgmr.msra.gmra.mrb[16].mxu0 %vm167_vm1, %v35_v58 }
 0xe49   :  { %4430 = vmatprep.mubr.msk.f32.mxu0 %vm4652_vm0, %v4653_v6 }
 0xf1b   :  { %v1935_v55 = vpop.f32.mrb[16].mxu0 }
 0xf1c   :  { %v1936_v57 = vadd.f32 %v1935_v55, %v1864_v53  ;;  %v4413_v54 = vpop.f32.mrb[17].mxu0  ;;  %v143_v53 = vld [vmem:[%s5519_s6 + $0xb0] sm:$0xff]  ;;  %v144_v55 = vld [vmem:[%s5519_s6 + $0xb8] sm:$0xff] }
 0xf1e   :  { %2284 = vst [vmem:[%s5520_s8 + $0x20] sm:$0xff] %v1936_v57  ;;  %4414 = vmatprep.subr.mxu1 %v1936_v57 }
 0xf1f   :  { %4415 = vmatpush3.msra.mxu1 %v1936_v57 }
 0xf20   :  { %4417 = vmatmul.mubr.msk.f32.vlgmr.msra.gmra.mrb[24].mxu1 %vm241_vm2, %v138_v56 }
 0xf21   :  { %4419 = vmatprep.mubr.msk.f32.mxu1 %vm241_vm2, %v139_v48 }
 0xf24   :  { %4420 = vmatmul.mubr.msk.f32.gmra.mrb[26].mxu1 %vm241_vm2, %v140_v50 }
 0xf25   :  { %4435 = vmatprep.mubr.msk.f32.mxu1 %vm241_vm2, %v57_v27 }
 0xff3   :  { %v4418_v51 = vpop.f32.mrb[24].mxu1 }
 0xff4   :  { %v2017_v52 = vpop.f32.mrb[25].mxu1 }
 0xff5   :  { %v2036_v59 = vmax.f32 %v2017_v52, %v4418_v51 }
 0xff7   :  { %v4421_v60 = vpop.f32.mrb[26].mxu1 }
 0xff8   :  { %v2027_v3 = vpop.f32.mrb[27].mxu1 }
 0xff9   :  { %v2037_v4 = vmax.f32 %v2027_v3, %v4421_v60 }
 0xffb   :  { %v2038_v61 = vmax.f32 %v2036_v59, %v2037_v4 }
 0xffd   :  { %v2039_v62 = vrot.slane %v2038_v61, 4 }
 0xfff   :  { %v2040_v63 = vmax.f32 %v2038_v61, %v2039_v62 }
0x1001   :  { %v2041_v0 = vrot.slane %v2040_v63, 2 }
0x1003   :  { %v2042_v1 = vmax.f32 %v2040_v63, %v2041_v0 }
0x1005   :  { %v2043_v7 = vrot.slane %v2042_v1, 1 }
0x1007   :  { %v2044_v8 = vmax.f32 %v2042_v1, %v2043_v7 }
0x1009   :  { %vm2045_vm11 = vcmp.ge.f32.partialorder %v2017_v52, %v2044_v8  ;;  %vm2046_vm12 = vcmp.ge.f32.partialorder %v4418_v51, %v2044_v8  ;;  %vm2047_vm13 = vcmp.ge.f32.partialorder %v2027_v3, %v2044_v8  ;;  %vm2048_vm14 = vcmp.ge.f32.partialorder %v4421_v60, %v2044_v8 }
0x100a   :  { %v2049_v9 = vsel %vm2045_vm11, %v4866_v5, 1073741824  ;;  %v2050_v13 = vsel %vm2046_vm12, %v4872_v10, 1073741824  ;;  %v2051_v14 = vsel %vm2047_vm13, %v4875_v11, 1073741824  ;;  %v2052_v15 = vsel %vm2048_vm14, %v4878_v12, 1073741824 }
0x100b   :  { %vm2053_vm15 = vcmp.lt.s32.totalorder %v2049_v9, %v2050_v13  ;;  %vm2055_vm3 = vcmp.lt.s32.totalorder %v2051_v14, %v2052_v15 }
0x100c   :  { %v2054_v16 = vsel %vm2053_vm15, %v2049_v9, %v2050_v13  ;;  %v2056_v17 = vsel %vm2055_vm3, %v2051_v14, %v2052_v15 }
0x100d   :  { %vm2057_vm4 = vcmp.lt.s32.totalorder %v2054_v16, %v2056_v17 }
0x100e   :  { %v2058_v18 = vsel %vm2057_vm4, %v2054_v16, %v2056_v17 }
0x100f   :  { %v2059_v19 = vrot.slane %v2058_v18, 4 }
0x1011   :  { %vm2060_vm5 = vcmp.lt.s32.totalorder %v2058_v18, %v2059_v19 }
0x1012   :  { %v2061_v20 = vsel %vm2060_vm5, %v2058_v18, %v2059_v19 }
0x1013   :  { %v2062_v21 = vrot.slane %v2061_v20, 2 }
0x1015   :  { %vm2063_vm7 = vcmp.lt.s32.totalorder %v2061_v20, %v2062_v21 }
0x1016   :  { %v2064_v22 = vsel %vm2063_vm7, %v2061_v20, %v2062_v21 }
0x1017   :  { %v2065_v23 = vrot.slane %v2064_v22, 1 }
0x1019   :  { %vm2066_vm9 = vcmp.lt.s32.totalorder %v2064_v22, %v2065_v23 }
0x101a   :  { %v2067_v24 = vsel %vm2066_vm9, %v2064_v22, %v2065_v23  ;;  %v59_v22 = vld [vmem:[%s5521_s3 + $0x50] sm:$0xff] }
0x101b   :  { %v5213_v25 = vsel %vm2068_vm8, %v2067_v24, %v5146_v32  ;;  %vm2072_vm10 = vcmp.eq.s32.totalorder %v4866_v5, %v2067_v24  ;;  %vm2073_vm11 = vcmp.eq.s32.totalorder %v4872_v10, %v2067_v24  ;;  %vm2074_vm13 = vcmp.eq.s32.totalorder %v4875_v11, %v2067_v24 }
0x101c   :  { %vm4602_vm12 = vmpackc.low %vm2073_vm11, %vm2072_vm10  ;;  %vm2075_vm14 = vcmp.eq.s32.totalorder %v4878_v12, %v2067_v24  ;;  %v60_v24 = vld [vmem:[%s5521_s3 + $0x58] sm:$0xff] }
0x101d   :  { %4603 = vmatpush3.bf16.msk.msra.mxu0 %vm4602_vm12, %v4654_v30  ;;  %vm4605_vm15 = vmpackc.low %vm2075_vm14, %vm2074_vm13  ;;  %vm2492_vm13 = vcmp.eq.s32.totalorder %v4866_v5, 5 }
0x101e   :  { %4604 = vmatprep.subr.bf16.mxu0 %v4651_v2 }
0x1021   :  { %4606 = vmatpush3.bf16.msk.msra.mxu0 %vm4605_vm15, %v4654_v30 }
0x1022   :  { %4607 = vmatprep.subr.bf16.mxu0 %v4651_v2 }
0x1024   :  { %4431 = vmatmul.mubr.msk.f32.vlgmr.msra.gmra.mrb[18].mxu0 %vm419_vm6, %v2100_v26 }
0x1025   :  { %4442 = vmatprep.mubr.msk.f32.mxu0 %vm4652_vm0, %v4653_v6 }
0x10f7   :  { %v2185_v28 = vpop.f32.mrb[18].mxu0 }
0x10f8   :  { %v4432_v32 = vpop.f32.mrb[19].mxu0  ;;  %4433 = vmatprep.subr.mxu1 %v2185_v28 }
0x10f9   :  { %4434 = vmatpush3.msra.mxu1 %v2185_v28  ;;  %v2616_v28 = vpop.permute.xlu0 %2615 }
0x10fa   :  { %4436 = vmatmul.mubr.msk.f32.vlgmr.msra.gmra.mrb[28].mxu1 %vm241_vm2, %v58_v31 }
0x11cd   :  { %v4437_v35 = vpop.f32.mrb[28].mxu1 }
0x11ce   :  { %v2277_v36 = vadd.f32 %v4437_v35, %v2197_v34  ;;  %v2271_v37 = vpop.f32.mrb[29].mxu1 }
0x11cf   :  { %v2272_v38 = vadd.f32 %v2271_v37, %v2192_v33 }
0x11d0   :  { %v5235_v39 = vadd.f32 %v2277_v36, %v5168_v43  ;;  %v5238_v40 = vsub.f32 %v5171_v44, %v2277_v36  ;;  %v141_v43 = vld [vmem:[%s5519_s6 + $0xa0] sm:$0xff]  ;;  %v2288_v44 = vpop.permute.xlu1 %2287 }
0x11d1   :  { %v5241_v29 = vadd.f32 %v2272_v38, %v5174_v45  ;;  %v5244_v41 = vsub.f32 %v5177_v46, %v2272_v38  ;;  %4447 = vmatprep.mubr.msk.f32.mxu1 %vm241_vm2, %v141_v43  ;;  %v146_v43 = vld [vmem:[%s5519_s6 + $0xc8] sm:$0xff] }
0x11d3   :  { %v4608_v42 = vpack.c.bf16 %v5238_v40, %v5244_v41 }
0x11d4   :  { %v2524_v21 = vpop.trf.xlu1 }
0x11d5   :  { %4609 = vmatpush3.bf16.msra.mxu0 %v4608_v42  ;;  %v37_v42 = vld [vmem:[%s5516_s1 + $0x30] sm:$0xff] }
0x11d6   :  { %4610 = vmatprep.subr.bf16.mxu0 %v4651_v2 }
0x11d8   :  { %4443 = vmatmul.mubr.msk.f32.vlgmr.msra.gmra.mrb[20].mxu0 %vm167_vm1, %v36_v47  ;;  %v2621_v26 = vpop.permute.xlu1 %2620 }
0x11d9   :  { %4461 = vmatprep.mubr.msk.f32.mxu0 %vm4652_vm0, %v4653_v6 }
0x12ab   :  { %v2359_v45 = vpop.f32.mrb[20].mxu0 }
0x12ac   :  { %v2360_v46 = vadd.f32 %v2359_v45, %v2288_v44  ;;  %v4444_v58 = vpop.f32.mrb[21].mxu0  ;;  %v147_v44 = vld [vmem:[%s5519_s6 + $0xd0] sm:$0xff]  ;;  %v148_v45 = vld [vmem:[%s5519_s6 + $0xd8] sm:$0xff] }
0x12ae   :  { %2708 = vst [vmem:[%s5520_s8 + $0x28] sm:$0xff] %v2360_v46  ;;  %4445 = vmatprep.subr.mxu1 %v2360_v46 }
0x12af   :  { %4446 = vmatpush3.msra.mxu1 %v2360_v46 }
0x12b0   :  { %4448 = vmatmul.mubr.msk.f32.vlgmr.msra.gmra.mrb[30].mxu1 %vm241_vm2, %v142_v49 }
0x12b1   :  { %4450 = vmatprep.mubr.msk.f32.mxu1 %vm241_vm2, %v143_v53 }
0x12b4   :  { %4451 = vmatmul.mubr.msk.f32.gmra.mrb[32].mxu1 %vm241_vm2, %v144_v55 }
0x12b5   :  { %4466 = vmatprep.mubr.msk.f32.mxu1 %vm241_vm2, %v59_v22 }
0x1383   :  { %v4449_v57 = vpop.f32.mrb[30].mxu1 }
0x1384   :  { %v2441_v54 = vpop.f32.mrb[31].mxu1 }
0x1385   :  { %v2460_v56 = vmax.f32 %v2441_v54, %v4449_v57 }
0x1387   :  { %v4452_v48 = vpop.f32.mrb[32].mxu1 }
0x1388   :  { %v2451_v50 = vpop.f32.mrb[33].mxu1 }
0x1389   :  { %v2461_v51 = vmax.f32 %v2451_v50, %v4452_v48 }
0x138b   :  { %v2462_v52 = vmax.f32 %v2460_v56, %v2461_v51 }
0x138d   :  { %v2463_v59 = vrot.slane %v2462_v52, 4 }
0x138f   :  { %v2464_v60 = vmax.f32 %v2462_v52, %v2463_v59 }
0x1391   :  { %v2465_v3 = vrot.slane %v2464_v60, 2 }
0x1393   :  { %v2466_v4 = vmax.f32 %v2464_v60, %v2465_v3 }
0x1395   :  { %v2467_v61 = vrot.slane %v2466_v4, 1 }
0x1397   :  { %v2468_v62 = vmax.f32 %v2466_v4, %v2467_v61 }
0x1399   :  { %vm2469_vm3 = vcmp.ge.f32.partialorder %v2441_v54, %v2468_v62  ;;  %vm2470_vm4 = vcmp.ge.f32.partialorder %v4449_v57, %v2468_v62  ;;  %vm2471_vm5 = vcmp.ge.f32.partialorder %v2451_v50, %v2468_v62  ;;  %vm2472_vm7 = vcmp.ge.f32.partialorder %v4452_v48, %v2468_v62 }
0x139a   :  { %v2473_v63 = vsel %vm2469_vm3, %v4866_v5, 1073741824  ;;  %v2474_v0 = vsel %vm2470_vm4, %v4872_v10, 1073741824  ;;  %v2475_v1 = vsel %vm2471_vm5, %v4875_v11, 1073741824  ;;  %v2476_v7 = vsel %vm2472_vm7, %v4878_v12, 1073741824 }
0x139b   :  { %vm2477_vm8 = vcmp.lt.s32.totalorder %v2473_v63, %v2474_v0  ;;  %vm2479_vm9 = vcmp.lt.s32.totalorder %v2475_v1, %v2476_v7 }
0x139c   :  { %v2478_v8 = vsel %vm2477_vm8, %v2473_v63, %v2474_v0  ;;  %v2480_v9 = vsel %vm2479_vm9, %v2475_v1, %v2476_v7 }
0x139d   :  { %vm2481_vm10 = vcmp.lt.s32.totalorder %v2478_v8, %v2480_v9 }
0x139e   :  { %v2482_v13 = vsel %vm2481_vm10, %v2478_v8, %v2480_v9 }
0x139f   :  { %v2483_v14 = vrot.slane %v2482_v13, 4 }
0x13a1   :  { %vm2484_vm11 = vcmp.lt.s32.totalorder %v2482_v13, %v2483_v14 }
0x13a2   :  { %v2485_v15 = vsel %vm2484_vm11, %v2482_v13, %v2483_v14 }
0x13a3   :  { %v2486_v16 = vrot.slane %v2485_v15, 2 }
0x13a5   :  { %vm2487_vm12 = vcmp.lt.s32.totalorder %v2485_v15, %v2486_v16 }
0x13a6   :  { %v2488_v17 = vsel %vm2487_vm12, %v2485_v15, %v2486_v16 }
0x13a7   :  { %v2489_v18 = vrot.slane %v2488_v17, 1 }
0x13a9   :  { %vm2490_vm14 = vcmp.lt.s32.totalorder %v2488_v17, %v2489_v18 }
0x13aa   :  { %v2491_v19 = vsel %vm2490_vm14, %v2488_v17, %v2489_v18  ;;  %v61_v17 = vld [vmem:[%s5521_s3 + $0x60] sm:$0xff] }
0x13ab   :  { %v5280_v20 = vsel %vm2492_vm13, %v2491_v19, %v5213_v25  ;;  %vm2496_vm15 = vcmp.eq.s32.totalorder %v4866_v5, %v2491_v19  ;;  %vm2497_vm3 = vcmp.eq.s32.totalorder %v4872_v10, %v2491_v19  ;;  %vm2498_vm5 = vcmp.eq.s32.totalorder %v4875_v11, %v2491_v19 }
0x13ac   :  { %vm4611_vm4 = vmpackc.low %vm2497_vm3, %vm2496_vm15  ;;  %vm2499_vm7 = vcmp.eq.s32.totalorder %v4878_v12, %v2491_v19  ;;  %v62_v19 = vld [vmem:[%s5521_s3 + $0x68] sm:$0xff] }
0x13ad   :  { %4612 = vmatpush3.bf16.msk.msra.mxu0 %vm4611_vm4, %v4654_v30  ;;  %vm4614_vm8 = vmpackc.low %vm2499_vm7, %vm2498_vm5  ;;  %vm2916_vm5 = vcmp.eq.s32.totalorder %v4866_v5, 6 }
0x13ae   :  { %4613 = vmatprep.subr.bf16.mxu0 %v4651_v2 }
0x13b1   :  { %4615 = vmatpush3.bf16.msk.msra.mxu0 %vm4614_vm8, %v4654_v30 }
0x13b2   :  { %4616 = vmatprep.subr.bf16.mxu0 %v4651_v2 }
0x13b4   :  { %4462 = vmatmul.mubr.msk.f32.vlgmr.msra.gmra.mrb[22].mxu0 %vm419_vm6, %v2524_v21  ;;  %v3040_v21 = vpop.permute.xlu1 %3039 }
0x13b5   :  { %4473 = vmatprep.mubr.msk.f32.mxu0 %vm4652_vm0, %v4653_v6 }
0x13b8   :  { %v3045_v22 = vpop.permute.xlu1 %3044 }
0x1487   :  { %v2609_v23 = vpop.f32.mrb[22].mxu0 }
0x1488   :  { %v4463_v25 = vpop.f32.mrb[23].mxu0  ;;  %4464 = vmatprep.subr.mxu1 %v2609_v23 }
0x1489   :  { %4465 = vmatpush3.msra.mxu1 %v2609_v23 }
0x148a   :  { %4467 = vmatmul.mubr.msk.f32.vlgmr.msra.gmra.mrb[34].mxu1 %vm241_vm2, %v60_v24 }
0x155d   :  { %v4468_v27 = vpop.f32.mrb[34].mxu1 }
0x155e   :  { %v2701_v31 = vadd.f32 %v4468_v27, %v2621_v26  ;;  %v2695_v32 = vpop.f32.mrb[35].mxu1 }
0x155f   :  { %v2696_v33 = vadd.f32 %v2695_v32, %v2616_v28 }
0x1560   :  { %v5302_v34 = vadd.f32 %v2701_v31, %v5235_v39  ;;  %v5305_v35 = vsub.f32 %v5238_v40, %v2701_v31  ;;  %v145_v39 = vld [vmem:[%s5519_s6 + $0xc0] sm:$0xff]  ;;  %v2712_v40 = vpop.permute.xlu0 %2711 }
0x1561   :  { %v5308_v36 = vadd.f32 %v2696_v33, %v5241_v29  ;;  %v5311_v37 = vsub.f32 %v5244_v41, %v2696_v33  ;;  %4478 = vmatprep.mubr.msk.f32.mxu1 %vm241_vm2, %v145_v39  ;;  %v150_v39 = vld [vmem:[%s5519_s6 + $0xe8] sm:$0xff] }
0x1563   :  { %v4617_v38 = vpack.c.bf16 %v5305_v35, %v5311_v37 }
0x1564   :  { %v2948_v16 = vpop.trf.xlu0 }
0x1565   :  { %4618 = vmatpush3.bf16.msra.mxu0 %v4617_v38  ;;  %v38_v38 = vld [vmem:[%s5516_s1 + $0x38] sm:$0xff] }
0x1566   :  { %4619 = vmatprep.subr.bf16.mxu0 %v4651_v2 }
0x1568   :  { %4474 = vmatmul.mubr.msk.f32.vlgmr.msra.gmra.mrb[24].mxu0 %vm167_vm1, %v37_v42 }
0x1569   :  { %4492 = vmatprep.mubr.msk.f32.mxu0 %vm4652_vm0, %v4653_v6 }
0x163b   :  { %v2783_v29 = vpop.f32.mrb[24].mxu0 }
0x163c   :  { %v2784_v41 = vadd.f32 %v2783_v29, %v2712_v40  ;;  %v4475_v47 = vpop.f32.mrb[25].mxu0  ;;  %v151_v40 = vld [vmem:[%s5519_s6 + $0xf0] sm:$0xff]  ;;  %v152_v29 = vld [vmem:[%s5519_s6 + $0xf8] sm:$0xff] }
0x163e   :  { %3132 = vst [vmem:[%s5520_s8 + $0x30] sm:$0xff] %v2784_v41  ;;  %4476 = vmatprep.subr.mxu1 %v2784_v41 }
0x163f   :  { %4477 = vmatpush3.msra.mxu1 %v2784_v41 }
0x1640   :  { %4479 = vmatmul.mubr.msk.f32.vlgmr.msra.gmra.mrb[36].mxu1 %vm241_vm2, %v146_v43 }
0x1641   :  { %4481 = vmatprep.mubr.msk.f32.mxu1 %vm241_vm2, %v147_v44 }
0x1644   :  { %4482 = vmatmul.mubr.msk.f32.gmra.mrb[38].mxu1 %vm241_vm2, %v148_v45 }
0x1645   :  { %4497 = vmatprep.mubr.msk.f32.mxu1 %vm241_vm2, %v61_v17 }
0x1713   :  { %v4480_v46 = vpop.f32.mrb[36].mxu1 }
0x1714   :  { %v2865_v58 = vpop.f32.mrb[37].mxu1 }
0x1715   :  { %v2884_v49 = vmax.f32 %v2865_v58, %v4480_v46 }
0x1717   :  { %v4483_v53 = vpop.f32.mrb[38].mxu1 }
0x1718   :  { %v2875_v55 = vpop.f32.mrb[39].mxu1 }
0x1719   :  { %v2885_v57 = vmax.f32 %v2875_v55, %v4483_v53 }
0x171b   :  { %v2886_v54 = vmax.f32 %v2884_v49, %v2885_v57 }
0x171d   :  { %v2887_v56 = vrot.slane %v2886_v54, 4 }
0x171f   :  { %v2888_v48 = vmax.f32 %v2886_v54, %v2887_v56 }
0x1721   :  { %v2889_v50 = vrot.slane %v2888_v48, 2 }
0x1723   :  { %v2890_v51 = vmax.f32 %v2888_v48, %v2889_v50 }
0x1725   :  { %v2891_v52 = vrot.slane %v2890_v51, 1 }
0x1727   :  { %v2892_v59 = vmax.f32 %v2890_v51, %v2891_v52 }
0x1729   :  { %vm2893_vm9 = vcmp.ge.f32.partialorder %v2865_v58, %v2892_v59  ;;  %vm2894_vm10 = vcmp.ge.f32.partialorder %v4480_v46, %v2892_v59  ;;  %vm2895_vm11 = vcmp.ge.f32.partialorder %v2875_v55, %v2892_v59  ;;  %vm2896_vm12 = vcmp.ge.f32.partialorder %v4483_v53, %v2892_v59 }
0x172a   :  { %v2897_v60 = vsel %vm2893_vm9, %v4866_v5, 1073741824  ;;  %v2898_v3 = vsel %vm2894_vm10, %v4872_v10, 1073741824  ;;  %v2899_v4 = vsel %vm2895_vm11, %v4875_v11, 1073741824  ;;  %v2900_v61 = vsel %vm2896_vm12, %v4878_v12, 1073741824 }
0x172b   :  { %vm2901_vm13 = vcmp.lt.s32.totalorder %v2897_v60, %v2898_v3  ;;  %vm2903_vm14 = vcmp.lt.s32.totalorder %v2899_v4, %v2900_v61 }
0x172c   :  { %v2902_v62 = vsel %vm2901_vm13, %v2897_v60, %v2898_v3  ;;  %v2904_v63 = vsel %vm2903_vm14, %v2899_v4, %v2900_v61 }
0x172d   :  { %vm2905_vm15 = vcmp.lt.s32.totalorder %v2902_v62, %v2904_v63 }
0x172e   :  { %v2906_v0 = vsel %vm2905_vm15, %v2902_v62, %v2904_v63 }
0x172f   :  { %v2907_v1 = vrot.slane %v2906_v0, 4 }
0x1731   :  { %vm2908_vm3 = vcmp.lt.s32.totalorder %v2906_v0, %v2907_v1 }
0x1732   :  { %v2909_v7 = vsel %vm2908_vm3, %v2906_v0, %v2907_v1 }
0x1733   :  { %v2910_v8 = vrot.slane %v2909_v7, 2 }
0x1735   :  { %vm2911_vm4 = vcmp.lt.s32.totalorder %v2909_v7, %v2910_v8 }
0x1736   :  { %v2912_v9 = vsel %vm2911_vm4, %v2909_v7, %v2910_v8 }
0x1737   :  { %v2913_v13 = vrot.slane %v2912_v9, 1 }
0x1739   :  { %vm2914_vm7 = vcmp.lt.s32.totalorder %v2912_v9, %v2913_v13 }
0x173a   :  { %v2915_v14 = vsel %vm2914_vm7, %v2912_v9, %v2913_v13  ;;  %v63_v9 = vld [vmem:[%s5521_s3 + $0x70] sm:$0xff] }
0x173b   :  { %v5347_v15 = vsel %vm2916_vm5, %v2915_v14, %v5280_v20  ;;  %vm2920_vm8 = vcmp.eq.s32.totalorder %v4866_v5, %v2915_v14  ;;  %vm2921_vm9 = vcmp.eq.s32.totalorder %v4872_v10, %v2915_v14  ;;  %vm2922_vm11 = vcmp.eq.s32.totalorder %v4875_v11, %v2915_v14 }
0x173c   :  { %vm4620_vm10 = vmpackc.low %vm2921_vm9, %vm2920_vm8  ;;  %vm2923_vm12 = vcmp.eq.s32.totalorder %v4878_v12, %v2915_v14  ;;  %v64_v14 = vld [vmem:[%s5521_s3 + $0x78] sm:$0xff] }
0x173d   :  { %4621 = vmatpush3.bf16.msk.msra.mxu0 %vm4620_vm10, %v4654_v30  ;;  %vm4623_vm13 = vmpackc.low %vm2923_vm12, %vm2922_vm11  ;;  %vm3340_vm11 = vcmp.eq.s32.totalorder %v4866_v5, 7 }
0x173e   :  { %4622 = vmatprep.subr.bf16.mxu0 %v4651_v2 }
0x1741   :  { %4624 = vmatpush3.bf16.msk.msra.mxu0 %vm4623_vm13, %v4654_v30 }
0x1742   :  { %4625 = vmatprep.subr.bf16.mxu0 %v4651_v2 }
0x1744   :  { %4493 = vmatmul.mubr.msk.f32.vlgmr.msra.gmra.mrb[26].mxu0 %vm419_vm6, %v2948_v16  ;;  %v3464_v16 = vpop.permute.xlu0 %3463 }
0x1745   :  { %4504 = vmatprep.mubr.msk.f32.mxu0 %vm4652_vm0, %v4653_v6 }
0x1748   :  { %v3469_v17 = vpop.permute.xlu0 %3468 }
0x1817   :  { %v3033_v18 = vpop.f32.mrb[26].mxu0 }
0x1818   :  { %v4494_v20 = vpop.f32.mrb[27].mxu0  ;;  %4495 = vmatprep.subr.mxu1 %v3033_v18 }
0x1819   :  { %4496 = vmatpush3.msra.mxu1 %v3033_v18 }
0x181a   :  { %4498 = vmatmul.mubr.msk.f32.vlgmr.msra.gmra.mrb[40].mxu1 %vm241_vm2, %v62_v19 }
0x18ed   :  { %v4499_v23 = vpop.f32.mrb[40].mxu1 }
0x18ee   :  { %v3125_v24 = vadd.f32 %v4499_v23, %v3045_v22  ;;  %v3119_v25 = vpop.f32.mrb[41].mxu1 }
0x18ef   :  { %v3120_v26 = vadd.f32 %v3119_v25, %v3040_v21 }
0x18f0   :  { %v5369_v27 = vadd.f32 %v3125_v24, %v5302_v34  ;;  %v5372_v28 = vsub.f32 %v5305_v35, %v3125_v24  ;;  %v149_v34 = vld [vmem:[%s5519_s6 + $0xe0] sm:$0xff]  ;;  %v3136_v35 = vpop.permute.xlu1 %3135 }
0x18f1   :  { %v5375_v31 = vadd.f32 %v3120_v26, %v5308_v36  ;;  %v5378_v32 = vsub.f32 %v5311_v37, %v3120_v26  ;;  %4509 = vmatprep.mubr.msk.f32.mxu1 %vm241_vm2, %v149_v34 }
0x18f3   :  { %v4626_v33 = vpack.c.bf16 %v5372_v28, %v5378_v32 }
0x18f4   :  { %v3372_v8 = vpop.trf.xlu1 }
0x18f5   :  { %4627 = vmatpush3.bf16.msra.mxu0 %v4626_v33  ;;  %v39_v33 = vld [vmem:[%s5516_s1 + $0x40] sm:$0xff] }
0x18f6   :  { %4628 = vmatprep.subr.bf16.mxu0 %v4651_v2 }
0x18f8   :  { %4505 = vmatmul.mubr.msk.f32.vlgmr.msra.gmra.mrb[28].mxu0 %vm167_vm1, %v38_v38  ;;  %v3560_v38 = vpop.permute.xlu1 %3559 }
0x18f9   :  { %4523 = vmatprep.mubr.msk.f32.mxu0 %vm4652_vm0, %v4653_v6 }
0x19cb   :  { %v3207_v36 = vpop.f32.mrb[28].mxu0 }
0x19cc   :  { %v3208_v37 = vadd.f32 %v3207_v36, %v3136_v35  ;;  %v4506_v42 = vpop.f32.mrb[29].mxu0 }
0x19cd   :  { %v155_v42 = vld [vmem:[%s5519_s6 + $0x110] sm:$0xff] }
0x19ce   :  { %3556 = vst [vmem:[%s5520_s8 + $0x38] sm:$0xff] %v3208_v37  ;;  %4507 = vmatprep.subr.mxu1 %v3208_v37 }
0x19cf   :  { %4508 = vmatpush3.msra.mxu1 %v3208_v37  ;;  %v154_v37 = vld [vmem:[%s5519_s6 + $0x108] sm:$0xff] }
0x19d0   :  { %4510 = vmatmul.mubr.msk.f32.vlgmr.msra.gmra.mrb[42].mxu1 %vm241_vm2, %v150_v39  ;;  %v156_v39 = vld [vmem:[%s5519_s6 + $0x118] sm:$0xff] }
0x19d1   :  { %4512 = vmatprep.mubr.msk.f32.mxu1 %vm241_vm2, %v151_v40 }
0x19d4   :  { %4513 = vmatmul.mubr.msk.f32.gmra.mrb[44].mxu1 %vm241_vm2, %v152_v29 }
0x19d5   :  { %4528 = vmatprep.mubr.msk.f32.mxu1 %vm241_vm2, %v63_v9 }
0x1aa3   :  { %v4511_v41 = vpop.f32.mrb[42].mxu1 }
0x1aa4   :  { %v3289_v47 = vpop.f32.mrb[43].mxu1 }
0x1aa5   :  { %v3308_v43 = vmax.f32 %v3289_v47, %v4511_v41 }
0x1aa7   :  { %v4514_v44 = vpop.f32.mrb[44].mxu1 }
0x1aa8   :  { %v3299_v45 = vpop.f32.mrb[45].mxu1 }
0x1aa9   :  { %v3309_v46 = vmax.f32 %v3299_v45, %v4514_v44 }
0x1aab   :  { %v3310_v58 = vmax.f32 %v3308_v43, %v3309_v46 }
0x1aad   :  { %v3311_v49 = vrot.slane %v3310_v58, 4 }
0x1aaf   :  { %v3312_v53 = vmax.f32 %v3310_v58, %v3311_v49 }
0x1ab1   :  { %v3313_v55 = vrot.slane %v3312_v53, 2 }
0x1ab3   :  { %v3314_v57 = vmax.f32 %v3312_v53, %v3313_v55 }
0x1ab5   :  { %v3315_v54 = vrot.slane %v3314_v57, 1 }
0x1ab7   :  { %v3316_v56 = vmax.f32 %v3314_v57, %v3315_v54 }
0x1ab9   :  { %vm3317_vm14 = vcmp.ge.f32.partialorder %v3289_v47, %v3316_v56  ;;  %vm3318_vm15 = vcmp.ge.f32.partialorder %v4511_v41, %v3316_v56  ;;  %vm3319_vm3 = vcmp.ge.f32.partialorder %v3299_v45, %v3316_v56  ;;  %vm3320_vm4 = vcmp.ge.f32.partialorder %v4514_v44, %v3316_v56 }
0x1aba   :  { %v3321_v48 = vsel %vm3317_vm14, %v4866_v5, 1073741824  ;;  %v3322_v50 = vsel %vm3318_vm15, %v4872_v10, 1073741824  ;;  %v3323_v51 = vsel %vm3319_vm3, %v4875_v11, 1073741824  ;;  %v3324_v52 = vsel %vm3320_vm4, %v4878_v12, 1073741824 }
0x1abb   :  { %vm3325_vm5 = vcmp.lt.s32.totalorder %v3321_v48, %v3322_v50  ;;  %vm3327_vm7 = vcmp.lt.s32.totalorder %v3323_v51, %v3324_v52 }
0x1abc   :  { %v3326_v59 = vsel %vm3325_vm5, %v3321_v48, %v3322_v50  ;;  %v3328_v60 = vsel %vm3327_vm7, %v3323_v51, %v3324_v52 }
0x1abd   :  { %vm3329_vm8 = vcmp.lt.s32.totalorder %v3326_v59, %v3328_v60 }
0x1abe   :  { %v3330_v3 = vsel %vm3329_vm8, %v3326_v59, %v3328_v60 }
0x1abf   :  { %v3331_v4 = vrot.slane %v3330_v3, 4 }
0x1ac1   :  { %vm3332_vm9 = vcmp.lt.s32.totalorder %v3330_v3, %v3331_v4 }
0x1ac2   :  { %v3333_v61 = vsel %vm3332_vm9, %v3330_v3, %v3331_v4 }
0x1ac3   :  { %v3334_v62 = vrot.slane %v3333_v61, 2 }
0x1ac5   :  { %vm3335_vm10 = vcmp.lt.s32.totalorder %v3333_v61, %v3334_v62 }
0x1ac6   :  { %v3336_v63 = vsel %vm3335_vm10, %v3333_v61, %v3334_v62 }
0x1ac7   :  { %v3337_v0 = vrot.slane %v3336_v63, 1 }
0x1ac9   :  { %vm3338_vm12 = vcmp.lt.s32.totalorder %v3336_v63, %v3337_v0 }
0x1aca   :  { %v3339_v1 = vsel %vm3338_vm12, %v3336_v63, %v3337_v0 }
0x1acb   :  { %v3342_v7 = vsel %vm3340_vm11, %v3339_v1, %v5347_v15  ;;  %vm3344_vm13 = vcmp.eq.s32.totalorder %v4866_v5, %v3339_v1  ;;  %vm3345_vm14 = vcmp.eq.s32.totalorder %v4872_v10, %v3339_v1  ;;  %vm3346_vm3 = vcmp.eq.s32.totalorder %v4875_v11, %v3339_v1 }
0x1acc   :  { %vm4629_vm15 = vmpackc.low %vm3345_vm14, %vm3344_vm13  ;;  %3979 = vst [vmem:[%s5522_s7] sm:$0xff] %v3342_v7  ;;  %vm3347_vm4 = vcmp.eq.s32.totalorder %v4878_v12, %v3339_v1  ;;  %vm3765_vm14 = vcmp.eq.s32.totalorder %v4872_v10, 8 }
0x1acd   :  { %4630 = vmatpush3.bf16.msk.msra.mxu0 %vm4629_vm15, %v4654_v30  ;;  %vm4632_vm5 = vmpackc.low %vm3347_vm4, %vm3346_vm3 }
0x1ace   :  { %4631 = vmatprep.subr.bf16.mxu0 %v4651_v2 }
0x1ad1   :  { %4633 = vmatpush3.bf16.msk.msra.mxu0 %vm4632_vm5, %v4654_v30 }
0x1ad2   :  { %4634 = vmatprep.subr.bf16.mxu0 %v4651_v2 }
0x1ad4   :  { %4524 = vmatmul.mubr.msk.f32.vlgmr.msra.gmra.mrb[30].mxu0 %vm419_vm6, %v3372_v8 }
0x1ad5   :  { %4535 = vmatprep.mubr.msk.f32.mxu0 %vm4652_vm0, %v4653_v6 }
0x1ba7   :  { %v3457_v13 = vpop.f32.mrb[30].mxu0 }
0x1ba8   :  { %v4525_v15 = vpop.f32.mrb[31].mxu0  ;;  %4526 = vmatprep.subr.mxu1 %v3457_v13 }
0x1ba9   :  { %4527 = vmatpush3.msra.mxu1 %v3457_v13 }
0x1baa   :  { %4529 = vmatmul.mubr.msk.f32.vlgmr.msra.gmra.mrb[46].mxu1 %vm241_vm2, %v64_v14 }
0x1c7d   :  { %v4530_v18 = vpop.f32.mrb[46].mxu1 }
0x1c7e   :  { %v3549_v19 = vadd.f32 %v4530_v18, %v3469_v17  ;;  %v3543_v20 = vpop.f32.mrb[47].mxu1 }
0x1c7f   :  { %v3544_v21 = vadd.f32 %v3543_v20, %v3464_v16 }
0x1c80   :  { %v5437_v22 = vadd.f32 %v3549_v19, %v5369_v27  ;;  %v3555_v23 = vsub.f32 %v5372_v28, %v3549_v19  ;;  %v153_v27 = vld [vmem:[%s5519_s6 + $0x100] sm:$0xff] }
0x1c81   :  { %v5441_v24 = vadd.f32 %v3544_v21, %v5375_v31  ;;  %v3554_v25 = vsub.f32 %v5378_v32, %v3544_v21  ;;  %4540 = vmatprep.mubr.msk.f32.mxu1 %vm241_vm2, %v153_v27  ;;  %v117_v28 = vld [vmem:[%s5517_s5 + $0x100] sm:$0xff]  ;;  %v118_v31 = vld [vmem:[%s5517_s5 + $0x108] sm:$0xff]  ;;  %v120_v32 = vld [vmem:[%s5517_s5 + $0x118] sm:$0xff] }
0x1c82   :  { %3780 = vxpose.xlu0.b32.start [1/4] (short) (narrow) %v117_v28, 8 }
0x1c83   :  { %v4635_v26 = vpack.c.bf16 %v3555_v23, %v3554_v25 }
0x1c85   :  { %4636 = vmatpush3.bf16.msra.mxu0 %v4635_v26 }
0x1c86   :  { %4637 = vmatprep.subr.bf16.mxu0 %v4651_v2  ;;  %3781 = vxpose.xlu0.b32.cont [2/4] (short) (narrow) %v118_v31, 8 }
0x1c88   :  { %4536 = vmatmul.mubr.msk.f32.vlgmr.msra.gmra.mrb[32].mxu0 %vm167_vm1, %v39_v33 }
0x1c89   :  { %4554 = vmatprep.mubr.msk.f32.mxu0 %vm4652_vm0, %v4653_v6  ;;  %v119_v6 = vld [vmem:[%s5517_s5 + $0x110] sm:$0xff] }
0x1c8a   :  { %3782 = vxpose.xlu0.b32.cont [3/4] (short) (narrow) %v119_v6, 8 }
0x1c8e   :  { %3783 = vxpose.xlu0.b32.end [4/4] (short) (narrow) %v120_v32, 8 }
0x1d02   :  { %v3796_v1 = vpop.trf.xlu0 }
0x1d5b   :  { %v3631_v34 = vpop.f32.mrb[32].mxu0 }
0x1d5c   :  { %v3632_v35 = vadd.f32 %v3631_v34, %v3560_v38  ;;  %v4537_v36 = vpop.f32.mrb[33].mxu0 }
0x1d5e   :  { %3978 = vst [vmem:[%s5520_s8 + $0x40] sm:$0xff] %v3632_v35  ;;  %4538 = vmatprep.subr.mxu1 %v3632_v35 }
0x1d5f   :  { %4539 = vmatpush3.msra.mxu1 %v3632_v35 }
0x1d60   :  { %4541 = vmatmul.mubr.msk.f32.vlgmr.msra.gmra.mrb[48].mxu1 %vm241_vm2, %v154_v37 }
0x1d61   :  { %4543 = vmatprep.mubr.msk.f32.mxu1 %vm241_vm2, %v155_v42 }
0x1d64   :  { %4544 = vmatmul.mubr.msk.f32.gmra.mrb[50].mxu1 %vm241_vm2, %v156_v39 }
0x1e33   :  { %v4542_v40 = vpop.f32.mrb[48].mxu1 }
0x1e34   :  { %v3713_v29 = vpop.f32.mrb[49].mxu1 }
0x1e35   :  { %v3732_v41 = vmax.f32 %v3713_v29, %v4542_v40 }
0x1e37   :  { %v4545_v47 = vpop.f32.mrb[50].mxu1 }
0x1e38   :  { %v3723_v43 = vpop.f32.mrb[51].mxu1 }
0x1e39   :  { %v3733_v44 = vmax.f32 %v3723_v43, %v4545_v47 }
0x1e3b   :  { %v3734_v45 = vmax.f32 %v3732_v41, %v3733_v44 }
0x1e3d   :  { %v3735_v46 = vrot.slane %v3734_v45, 4 }
0x1e3f   :  { %v3736_v58 = vmax.f32 %v3734_v45, %v3735_v46 }
0x1e41   :  { %v3737_v49 = vrot.slane %v3736_v58, 2 }
0x1e43   :  { %v3738_v53 = vmax.f32 %v3736_v58, %v3737_v49 }
0x1e45   :  { %v3739_v55 = vrot.slane %v3738_v53, 1 }
0x1e47   :  { %v3740_v57 = vmax.f32 %v3738_v53, %v3739_v55 }
0x1e49   :  { %vm3741_vm0 = vcmp.ge.f32.partialorder %v3713_v29, %v3740_v57  ;;  %vm3742_vm1 = vcmp.ge.f32.partialorder %v4542_v40, %v3740_v57  ;;  %vm3743_vm7 = vcmp.ge.f32.partialorder %v3723_v43, %v3740_v57  ;;  %vm3744_vm8 = vcmp.ge.f32.partialorder %v4545_v47, %v3740_v57 }
0x1e4a   :  { %v3745_v54 = vsel %vm3741_vm0, %v4866_v5, 1073741824  ;;  %v3746_v56 = vsel %vm3742_vm1, %v4872_v10, 1073741824  ;;  %v3747_v48 = vsel %vm3743_vm7, %v4875_v11, 1073741824  ;;  %v3748_v50 = vsel %vm3744_vm8, %v4878_v12, 1073741824 }
0x1e4b   :  { %vm3749_vm9 = vcmp.lt.s32.totalorder %v3745_v54, %v3746_v56  ;;  %vm3751_vm10 = vcmp.lt.s32.totalorder %v3747_v48, %v3748_v50 }
0x1e4c   :  { %v3750_v51 = vsel %vm3749_vm9, %v3745_v54, %v3746_v56  ;;  %v3752_v52 = vsel %vm3751_vm10, %v3747_v48, %v3748_v50 }
0x1e4d   :  { %vm3753_vm11 = vcmp.lt.s32.totalorder %v3750_v51, %v3752_v52 }
0x1e4e   :  { %v3754_v59 = vsel %vm3753_vm11, %v3750_v51, %v3752_v52 }
0x1e4f   :  { %v3755_v60 = vrot.slane %v3754_v59, 4 }
0x1e51   :  { %vm3756_vm12 = vcmp.lt.s32.totalorder %v3754_v59, %v3755_v60 }
0x1e52   :  { %v3757_v3 = vsel %vm3756_vm12, %v3754_v59, %v3755_v60 }
0x1e53   :  { %v3758_v4 = vrot.slane %v3757_v3, 2 }
0x1e55   :  { %vm3759_vm13 = vcmp.lt.s32.totalorder %v3757_v3, %v3758_v4 }
0x1e56   :  { %v3760_v61 = vsel %vm3759_vm13, %v3757_v3, %v3758_v4 }
0x1e57   :  { %v3761_v62 = vrot.slane %v3760_v61, 1 }
0x1e59   :  { %vm3762_vm15 = vcmp.lt.s32.totalorder %v3760_v61, %v3761_v62 }
0x1e5a   :  { %v3763_v63 = vsel %vm3762_vm15, %v3760_v61, %v3761_v62 }
0x1e5b   :  { %v3767_v0 = vsel %vm3765_vm14, %v3763_v63, 0  ;;  %vm3768_vm3 = vcmp.eq.s32.totalorder %v4866_v5, %v3763_v63  ;;  %vm3769_vm4 = vcmp.eq.s32.totalorder %v4872_v10, %v3763_v63  ;;  %vm3770_vm0 = vcmp.eq.s32.totalorder %v4875_v11, %v3763_v63  ;;  %v65_v5 = vld [vmem:[%s5521_s3 + $0x80] sm:$0xff]  ;;  %v66_v11 = vld [vmem:[%s5521_s3 + $0x88] sm:$0xff] }
0x1e5c   :  { %vm4638_vm5 = vmpackc.low %vm3769_vm4, %vm3768_vm3  ;;  %3980 = vst [vmem:[%s5522_s7 + $0x8] sm:$0x1] %v3767_v0  ;;  %vm3771_vm1 = vcmp.eq.s32.totalorder %v4878_v12, %v3763_v63  ;;  %4559 = vmatprep.mubr.msk.f32.mxu1 %vm241_vm2, %v65_v5 }
0x1e5d   :  { %4639 = vmatpush3.bf16.msk.msra.mxu0 %vm4638_vm5, %v4654_v30  ;;  %vm4641_vm7 = vmpackc.low %vm3771_vm1, %vm3770_vm0 }
0x1e5e   :  { %4640 = vmatprep.subr.bf16.mxu0 %v4651_v2  ;;  %v3888_v2 = vpop.permute.xlu1 %3887 }
0x1e61   :  { %4642 = vmatpush3.bf16.msk.msra.mxu0 %vm4641_vm7, %v4654_v30 }
0x1e62   :  { %v3893_v30 = vpop.permute.xlu1 %3892 }
0x1e64   :  { %4555 = vmatmul.mubr.msk.f32.vlgmr.msra.gmra.mrb[34].mxu0 %vm419_vm6, %v3796_v1 }
0x1f37   :  { %v3881_v10 = vpop.f32.mrb[34].mxu0 }
0x1f38   :  { %v4556_v12 = vpop.f32.mrb[35].mxu0  ;;  %4557 = vmatprep.subr.mxu1 %v3881_v10 }
0x1f39   :  { %4558 = vmatpush3.msra.mxu1 %v3881_v10 }
0x1f3a   :  { %4560 = vmatmul.mubr.msk.f32.vlgmr.msra.gmra.mrb[52].mxu1 %vm241_vm2, %v66_v11 }
0x200d   :  { %v4561_v7 = vpop.f32.mrb[52].mxu1 }
0x200e   :  { %v3973_v8 = vadd.f32 %v4561_v7, %v3893_v30  ;;  %v3967_v9 = vpop.f32.mrb[53].mxu1 }
0x200f   :  { %v3968_v13 = vadd.f32 %v3967_v9, %v3888_v2 }
0x2010   :  { %v3977_v14 = vadd.f32 %v3973_v8, %v5437_v22 }
0x2011   :  { %v3976_v15 = vadd.f32 %v3968_v13, %v5441_v24 }
0x2012   :  { %3982 = vst [vmem:[%s5523_s9 + $0x8] sm:$0xff] %v3977_v14 }
0x2013   :  { %3981 = vst [vmem:[%s5523_s9] sm:$0xff] %v3976_v15 }

</bundles_post_ra>
